<compile_context>
chip_gen: v7x
topology: tpu7x:2x2x1
jax: 0.10.0
libtpu: 0.0.40
codegen_flags: <defaults>
</compile_context>

<pallas_src>
import jax
import jax.numpy as jnp
from jax.experimental import pallas as pl
from jax.experimental.pallas import tpu as pltpu


_TAPS = tuple((dy, dx) for dy in range(3) for dx in range(3))  # matches w.reshape(9*Cin, Cout)


def _bias_relu_bn_pool(acc, b, scale, shift, batch, hp, wp, c):
    """Conv bias -> ReLU -> BatchNorm(affine, folded) -> MaxPool2x2 on a (B*H*W, C) slab."""
    a = jnp.maximum(acc + b, 0.0) * scale + shift
    a = a.reshape(batch * hp, wp // 2, 2, c)
    a = jnp.maximum(a[:, :, 0, :], a[:, :, 1, :])            # pool along W
    a = a.reshape(batch * hp // 2, 2, wp // 2, c)            # hp even -> pairs never cross batch
    a = jnp.maximum(a[:, 0, :, :], a[:, 1, :, :])            # pool along H
    return a.reshape(batch, hp // 2, wp // 2, c)


def _im2col_into(col_ref, pad_ref, batch, hp, wp, cin):
    """Build the (B*H*W, 9*Cin) im2col slab of a padded NHWC activation in VMEM scratch."""
    m = batch * hp * wp
    for t, (dy, dx) in enumerate(_TAPS):
        win = pad_ref[:, dy:dy + hp, dx:dx + wp, :].reshape(m, cin)
        col_ref[:, t * cin:(t + 1) * cin] = win


def fused_cnn_kernel(x_ref,
                     w1_ref, b1_ref, s1_ref, t1_ref,
                     w2_ref, b2_ref, s2_ref, t2_ref,
                     w3_ref, b3_ref, s3_ref, t3_ref,
                     fcw_ref, fcb_ref,
                     o_ref,
                     pad1, pad2, pad3, col2, col3):
    B, H, W, _ = x_ref.shape              # (B, 16, 16, 1)
    C1 = b1_ref.shape[-1]                 # 16
    C2 = b2_ref.shape[-1]                 # 32
    C3 = b3_ref.shape[-1]                 # 64

    # ---------------- Block 1: Conv(1->16) on the VPU (K=1 -> 9 broadcast MACs) ----------------
    pad1[...] = jnp.zeros_like(pad1)
    pad1[:, 1:H + 1, 1:W + 1, :] = x_ref[...]
    acc1 = jnp.zeros((B * H * W, C1), jnp.float32)
    for t, (dy, dx) in enumerate(_TAPS):
        win = pad1[:, dy:dy + H, dx:dx + W, :].reshape(B * H * W, 1)
        acc1 = acc1 + win * w1_ref[t:t + 1, :]               # (M,1)*(1,C1) broadcast MAC
    a1 = _bias_relu_bn_pool(acc1, b1_ref[...], s1_ref[...], t1_ref[...], B, H, W, C1)
    H2, W2 = H // 2, W // 2                                   # 8, 8

    # ---------------- Block 2: Conv(16->32) as one im2col matmul ----------------
    pad2[...] = jnp.zeros_like(pad2)
    pad2[:, 1:H2 + 1, 1:W2 + 1, :] = a1
    _im2col_into(col2, pad2, B, H2, W2, C1)
    acc2 = jnp.dot(col2[...], w2_ref[...], preferred_element_type=jnp.float32)
    a2 = _bias_relu_bn_pool(acc2, b2_ref[...], s2_ref[...], t2_ref[...], B, H2, W2, C2)
    H3, W3 = H2 // 2, W2 // 2                                 # 4, 4

    # ---------------- Block 3: Conv(32->64) as one im2col matmul ----------------
    pad3[...] = jnp.zeros_like(pad3)
    pad3[:, 1:H3 + 1, 1:W3 + 1, :] = a2
    _im2col_into(col3, pad3, B, H3, W3, C2)
    acc3 = jnp.dot(col3[...], w3_ref[...], preferred_element_type=jnp.float32)
    a3 = _bias_relu_bn_pool(acc3, b3_ref[...], s3_ref[...], t3_ref[...], B, H3, W3, C3)
    H4, W4 = H3 // 2, W3 // 2                                 # 2, 2

    # ---------------- Head: global average pool + Linear ----------------
    pooled = jnp.sum(a3.reshape(B, H4 * W4, C3), axis=1) * (1.0 / (H4 * W4))
    logits = jnp.dot(pooled, fcw_ref[...], preferred_element_type=jnp.float32) + fcb_ref[...]
    o_ref[...] = logits.astype(o_ref.dtype)


def cnn_forward_pallas(params, x_nchw):
    # x_nchw: (B, 1, H, W) -> (B, output_size)
    B, _, H, W = x_nchw.shape
    x = x_nchw.reshape(B, H, W, 1).astype(jnp.float32)        # NCHW, C=1 -> NHWC (free reshape)

    chans = [1, 16, 32, 64]
    args = [x]
    for blk, cin, cout in zip(params["blocks"], chans[:-1], chans[1:]):
        args += [blk["w"].reshape(9 * cin, cout),             # im2col weight layout
                 blk["b"].reshape(1, cout),
                 blk["scale"].reshape(1, cout),
                 blk["shift"].reshape(1, cout)]
    out_dim = params["fc_w"].shape[-1]
    args += [params["fc_w"], params["fc_b"].reshape(1, out_dim)]

    H2, W2, H3, W3 = H // 2, W // 2, H // 4, W // 4
    C1, C2, C3 = chans[1], chans[2], chans[3]

    flops = 2 * B * (H * W * 9 * 1 * C1
                     + H2 * W2 * 9 * C1 * C2
                     + H3 * W3 * 9 * C2 * C3
                     + C3 * out_dim)
    bytes_accessed = 4 * (sum(int(a.size) for a in args) + B * out_dim)

    vmem_spec = pl.BlockSpec(memory_space=pltpu.MemorySpace.VMEM)

    return pl.pallas_call(
        fused_cnn_kernel,
        out_shape=jax.ShapeDtypeStruct((B, out_dim), jnp.float32),
        in_specs=[vmem_spec] * len(args),
        out_specs=vmem_spec,
        scratch_shapes=[
            pltpu.VMEM((B, H + 2, W + 2, 1), jnp.float32),        # pad1
            pltpu.VMEM((B, H2 + 2, W2 + 2, C1), jnp.float32),     # pad2
            pltpu.VMEM((B, H3 + 2, W3 + 2, C2), jnp.float32),     # pad3
            pltpu.VMEM((B * H2 * W2, 9 * C1), jnp.float32),       # col2 (im2col slab)
            pltpu.VMEM((B * H3 * W3, 9 * C2), jnp.float32),       # col3 (im2col slab)
        ],
        cost_estimate=pl.CostEstimate(flops=flops, transcendentals=0,
                                      bytes_accessed=bytes_accessed),
    )(*args)


# ---------------------------------------------------------------------------
# Parameter construction (deterministic, synthetic).
# ---------------------------------------------------------------------------
def init_params(key, output_size=3):
    chans = [1, 16, 32, 64]
    params = {"blocks": []}
    for blk in range(3):
        cin, cout = chans[blk], chans[blk + 1]
        key, kw, kb, kg, kbe, km, kv = jax.random.split(key, 7)
        w = 0.1 * jax.random.normal(kw, (3, 3, cin, cout), jnp.float32)
        b = 0.01 * jax.random.normal(kb, (cout,), jnp.float32)
        gamma = 1.0 + 0.1 * jax.random.normal(kg, (cout,), jnp.float32)
        beta = 0.05 * jax.random.normal(kbe, (cout,), jnp.float32)
        running_mean = 0.05 * jax.random.normal(km, (cout,), jnp.float32)
        running_var = 1.0 + 0.1 * jnp.abs(jax.random.normal(kv, (cout,), jnp.float32))
        # Fold BN (eval mode) into per-channel scale/shift.
        scale = gamma / jnp.sqrt(running_var + 1e-5)
        shift = beta - running_mean * scale
        params["blocks"].append(dict(w=w, b=b, scale=scale, shift=shift))
    key, kfw, kfb = jax.random.split(key, 3)
    params["fc_w"] = 0.1 * jax.random.normal(kfw, (chans[-1], output_size), jnp.float32)
    params["fc_b"] = 0.01 * jax.random.normal(kfb, (output_size,), jnp.float32)
    return params


@jax.jit
def cnn_forward(params, x_nchw):
    return cnn_forward_pallas(params, x_nchw)


if __name__ == "__main__":
    key = jax.random.PRNGKey(0)
    kp, kx = jax.random.split(key)
    params = init_params(kp, output_size=3)

    # Small shapes consistent with the module: batch=2, 1 input channel, 16x16 spatial.
    x = jax.random.normal(kx, (2, 1, 16, 16), jnp.float32)

    y = cnn_forward(params, x)
    y = jax.block_until_ready(y)
    assert y.shape == (2, 3), y.shape
    assert jnp.all(jnp.isfinite(y))
    print("KERNEL_OK")
</pallas_src>

<mosaic_0001>
module attributes {stable_mosaic.version = 11 : i64} {
  func.func @fused_cnn_kernel(%arg0: memref<2x16x16x1xf32, #tpu.memory_space<vmem>>, %arg1: memref<9x16xf32, #tpu.memory_space<vmem>>, %arg2: memref<1x16xf32, #tpu.memory_space<vmem>>, %arg3: memref<1x16xf32, #tpu.memory_space<vmem>>, %arg4: memref<1x16xf32, #tpu.memory_space<vmem>>, %arg5: memref<144x32xf32, #tpu.memory_space<vmem>>, %arg6: memref<1x32xf32, #tpu.memory_space<vmem>>, %arg7: memref<1x32xf32, #tpu.memory_space<vmem>>, %arg8: memref<1x32xf32, #tpu.memory_space<vmem>>, %arg9: memref<288x64xf32, #tpu.memory_space<vmem>>, %arg10: memref<1x64xf32, #tpu.memory_space<vmem>>, %arg11: memref<1x64xf32, #tpu.memory_space<vmem>>, %arg12: memref<1x64xf32, #tpu.memory_space<vmem>>, %arg13: memref<64x3xf32, #tpu.memory_space<vmem>>, %arg14: memref<1x3xf32, #tpu.memory_space<vmem>>, %arg15: memref<2x3xf32, #tpu.memory_space<vmem>>, %arg16: memref<2x18x18x1xf32, #tpu.memory_space<vmem>>, %arg17: memref<2x10x10x16xf32, #tpu.memory_space<vmem>>, %arg18: memref<2x6x6x32xf32, #tpu.memory_space<vmem>>, %arg19: memref<128x144xf32, #tpu.memory_space<vmem>>, %arg20: memref<32x288xf32, #tpu.memory_space<vmem>>) attributes {dimension_semantics = [], scalar_prefetch = 0 : i64, scratch_operands = 5 : i64, tpu.core_type = #tpu.core_type<tc>} {
    %cst = arith.constant 0.000000e+00 : f32
    %0 = vector.broadcast %cst : f32 to vector<2x18x18x1xf32>
    %c0 = arith.constant 0 : index
    %c0_0 = arith.constant 0 : index
    %c0_1 = arith.constant 0 : index
    %c0_2 = arith.constant 0 : index
    %1 = vector.load %arg16[%c0, %c0_0, %c0_1, %c0_2] : memref<2x18x18x1xf32, #tpu.memory_space<vmem>>, vector<2x18x18x1xf32>
    tpu.vector_store %arg16[%c0, %c0_0, %c0_1, %c0_2], %0 {strides = array<i32>} : memref<2x18x18x1xf32, #tpu.memory_space<vmem>>, vector<2x18x18x1xf32>,
    %c0_3 = arith.constant 0 : index
    %c0_4 = arith.constant 0 : index
    %c0_5 = arith.constant 0 : index
    %c0_6 = arith.constant 0 : index
    %2 = vector.load %arg0[%c0_3, %c0_4, %c0_5, %c0_6] : memref<2x16x16x1xf32, #tpu.memory_space<vmem>>, vector<2x16x16x1xf32>
    %c0_7 = arith.constant 0 : index
    %c1 = arith.constant 1 : index
    %c1_8 = arith.constant 1 : index
    %c0_9 = arith.constant 0 : index
    %3 = vector.load %arg16[%c0_7, %c1, %c1_8, %c0_9] : memref<2x18x18x1xf32, #tpu.memory_space<vmem>>, vector<2x16x16x1xf32>
    tpu.vector_store %arg16[%c0_7, %c1, %c1_8, %c0_9], %2 {strides = array<i32>} : memref<2x18x18x1xf32, #tpu.memory_space<vmem>>, vector<2x16x16x1xf32>,
    %cst_10 = arith.constant 0.000000e+00 : f32
    %4 = vector.broadcast %cst_10 : f32 to vector<512x16xf32>
    %c0_11 = arith.constant 0 : index
    %c0_12 = arith.constant 0 : index
    %c0_13 = arith.constant 0 : index
    %c0_14 = arith.constant 0 : index
    %5 = vector.load %arg16[%c0_11, %c0_12, %c0_13, %c0_14] : memref<2x18x18x1xf32, #tpu.memory_space<vmem>>, vector<2x16x16x1xf32>
    %6 = vector.shape_cast %5 : vector<2x16x16x1xf32> to vector<512x1xf32>
    %c0_15 = arith.constant 0 : index
    %c0_16 = arith.constant 0 : index
    %7 = vector.load %arg1[%c0_15, %c0_16] : memref<9x16xf32, #tpu.memory_space<vmem>>, vector<1x16xf32>
    %8 = vector.broadcast %6 : vector<512x1xf32> to vector<512x16xf32>
    %9 = vector.broadcast %7 : vector<1x16xf32> to vector<512x16xf32>
    %10 = arith.mulf %8, %9 : vector<512x16xf32>
    %11 = arith.addf %4, %10 : vector<512x16xf32>
    %c0_17 = arith.constant 0 : index
    %c0_18 = arith.constant 0 : index
    %c1_19 = arith.constant 1 : index
    %c0_20 = arith.constant 0 : index
    %12 = vector.load %arg16[%c0_17, %c0_18, %c1_19, %c0_20] : memref<2x18x18x1xf32, #tpu.memory_space<vmem>>, vector<2x16x16x1xf32>
    %13 = vector.shape_cast %12 : vector<2x16x16x1xf32> to vector<512x1xf32>
    %c1_21 = arith.constant 1 : index
    %c0_22 = arith.constant 0 : index
    %14 = vector.load %arg1[%c1_21, %c0_22] : memref<9x16xf32, #tpu.memory_space<vmem>>, vector<1x16xf32>
    %15 = vector.broadcast %13 : vector<512x1xf32> to vector<512x16xf32>
    %16 = vector.broadcast %14 : vector<1x16xf32> to vector<512x16xf32>
    %17 = arith.mulf %15, %16 : vector<512x16xf32>
    %18 = arith.addf %11, %17 : vector<512x16xf32>
    %c0_23 = arith.constant 0 : index
    %c0_24 = arith.constant 0 : index
    %c2 = arith.constant 2 : index
    %c0_25 = arith.constant 0 : index
    %19 = vector.load %arg16[%c0_23, %c0_24, %c2, %c0_25] : memref<2x18x18x1xf32, #tpu.memory_space<vmem>>, vector<2x16x16x1xf32>
    %20 = vector.shape_cast %19 : vector<2x16x16x1xf32> to vector<512x1xf32>
    %c2_26 = arith.constant 2 : index
    %c0_27 = arith.constant 0 : index
    %21 = vector.load %arg1[%c2_26, %c0_27] : memref<9x16xf32, #tpu.memory_space<vmem>>, vector<1x16xf32>
    %22 = vector.broadcast %20 : vector<512x1xf32> to vector<512x16xf32>
    %23 = vector.broadcast %21 : vector<1x16xf32> to vector<512x16xf32>
    %24 = arith.mulf %22, %23 : vector<512x16xf32>
    %25 = arith.addf %18, %24 : vector<512x16xf32>
    %c0_28 = arith.constant 0 : index
    %c1_29 = arith.constant 1 : index
    %c0_30 = arith.constant 0 : index
    %c0_31 = arith.constant 0 : index
    %26 = vector.load %arg16[%c0_28, %c1_29, %c0_30, %c0_31] : memref<2x18x18x1xf32, #tpu.memory_space<vmem>>, vector<2x16x16x1xf32>
    %27 = vector.shape_cast %26 : vector<2x16x16x1xf32> to vector<512x1xf32>
    %c3 = arith.constant 3 : index
    %c0_32 = arith.constant 0 : index
    %28 = vector.load %arg1[%c3, %c0_32] : memref<9x16xf32, #tpu.memory_space<vmem>>, vector<1x16xf32>
    %29 = vector.broadcast %27 : vector<512x1xf32> to vector<512x16xf32>
    %30 = vector.broadcast %28 : vector<1x16xf32> to vector<512x16xf32>
    %31 = arith.mulf %29, %30 : vector<512x16xf32>
    %32 = arith.addf %25, %31 : vector<512x16xf32>
    %c0_33 = arith.constant 0 : index
    %c1_34 = arith.constant 1 : index
    %c1_35 = arith.constant 1 : index
    %c0_36 = arith.constant 0 : index
    %33 = vector.load %arg16[%c0_33, %c1_34, %c1_35, %c0_36] : memref<2x18x18x1xf32, #tpu.memory_space<vmem>>, vector<2x16x16x1xf32>
    %34 = vector.shape_cast %33 : vector<2x16x16x1xf32> to vector<512x1xf32>
    %c4 = arith.constant 4 : index
    %c0_37 = arith.constant 0 : index
    %35 = vector.load %arg1[%c4, %c0_37] : memref<9x16xf32, #tpu.memory_space<vmem>>, vector<1x16xf32>
    %36 = vector.broadcast %34 : vector<512x1xf32> to vector<512x16xf32>
    %37 = vector.broadcast %35 : vector<1x16xf32> to vector<512x16xf32>
    %38 = arith.mulf %36, %37 : vector<512x16xf32>
    %39 = arith.addf %32, %38 : vector<512x16xf32>
    %c0_38 = arith.constant 0 : index
    %c1_39 = arith.constant 1 : index
    %c2_40 = arith.constant 2 : index
    %c0_41 = arith.constant 0 : index
    %40 = vector.load %arg16[%c0_38, %c1_39, %c2_40, %c0_41] : memref<2x18x18x1xf32, #tpu.memory_space<vmem>>, vector<2x16x16x1xf32>
    %41 = vector.shape_cast %40 : vector<2x16x16x1xf32> to vector<512x1xf32>
    %c5 = arith.constant 5 : index
    %c0_42 = arith.constant 0 : index
    %42 = vector.load %arg1[%c5, %c0_42] : memref<9x16xf32, #tpu.memory_space<vmem>>, vector<1x16xf32>
    %43 = vector.broadcast %41 : vector<512x1xf32> to vector<512x16xf32>
    %44 = vector.broadcast %42 : vector<1x16xf32> to vector<512x16xf32>
    %45 = arith.mulf %43, %44 : vector<512x16xf32>
    %46 = arith.addf %39, %45 : vector<512x16xf32>
    %c0_43 = arith.constant 0 : index
    %c2_44 = arith.constant 2 : index
    %c0_45 = arith.constant 0 : index
    %c0_46 = arith.constant 0 : index
    %47 = vector.load %arg16[%c0_43, %c2_44, %c0_45, %c0_46] : memref<2x18x18x1xf32, #tpu.memory_space<vmem>>, vector<2x16x16x1xf32>
    %48 = vector.shape_cast %47 : vector<2x16x16x1xf32> to vector<512x1xf32>
    %c6 = arith.constant 6 : index
    %c0_47 = arith.constant 0 : index
    %49 = vector.load %arg1[%c6, %c0_47] : memref<9x16xf32, #tpu.memory_space<vmem>>, vector<1x16xf32>
    %50 = vector.broadcast %48 : vector<512x1xf32> to vector<512x16xf32>
    %51 = vector.broadcast %49 : vector<1x16xf32> to vector<512x16xf32>
    %52 = arith.mulf %50, %51 : vector<512x16xf32>
    %53 = arith.addf %46, %52 : vector<512x16xf32>
    %c0_48 = arith.constant 0 : index
    %c2_49 = arith.constant 2 : index
    %c1_50 = arith.constant 1 : index
    %c0_51 = arith.constant 0 : index
    %54 = vector.load %arg16[%c0_48, %c2_49, %c1_50, %c0_51] : memref<2x18x18x1xf32, #tpu.memory_space<vmem>>, vector<2x16x16x1xf32>
    %55 = vector.shape_cast %54 : vector<2x16x16x1xf32> to vector<512x1xf32>
    %c7 = arith.constant 7 : index
    %c0_52 = arith.constant 0 : index
    %56 = vector.load %arg1[%c7, %c0_52] : memref<9x16xf32, #tpu.memory_space<vmem>>, vector<1x16xf32>
    %57 = vector.broadcast %55 : vector<512x1xf32> to vector<512x16xf32>
    %58 = vector.broadcast %56 : vector<1x16xf32> to vector<512x16xf32>
    %59 = arith.mulf %57, %58 : vector<512x16xf32>
    %60 = arith.addf %53, %59 : vector<512x16xf32>
    %c0_53 = arith.constant 0 : index
    %c2_54 = arith.constant 2 : index
    %c2_55 = arith.constant 2 : index
    %c0_56 = arith.constant 0 : index
    %61 = vector.load %arg16[%c0_53, %c2_54, %c2_55, %c0_56] : memref<2x18x18x1xf32, #tpu.memory_space<vmem>>, vector<2x16x16x1xf32>
    %62 = vector.shape_cast %61 : vector<2x16x16x1xf32> to vector<512x1xf32>
    %c8 = arith.constant 8 : index
    %c0_57 = arith.constant 0 : index
    %63 = vector.load %arg1[%c8, %c0_57] : memref<9x16xf32, #tpu.memory_space<vmem>>, vector<1x16xf32>
    %64 = vector.broadcast %62 : vector<512x1xf32> to vector<512x16xf32>
    %65 = vector.broadcast %63 : vector<1x16xf32> to vector<512x16xf32>
    %66 = arith.mulf %64, %65 : vector<512x16xf32>
    %67 = arith.addf %60, %66 : vector<512x16xf32>
    %c0_58 = arith.constant 0 : index
    %c0_59 = arith.constant 0 : index
    %68 = vector.load %arg2[%c0_58, %c0_59] : memref<1x16xf32, #tpu.memory_space<vmem>>, vector<1x16xf32>
    %c0_60 = arith.constant 0 : index
    %c0_61 = arith.constant 0 : index
    %69 = vector.load %arg3[%c0_60, %c0_61] : memref<1x16xf32, #tpu.memory_space<vmem>>, vector<1x16xf32>
    %c0_62 = arith.constant 0 : index
    %c0_63 = arith.constant 0 : index
    %70 = vector.load %arg4[%c0_62, %c0_63] : memref<1x16xf32, #tpu.memory_space<vmem>>, vector<1x16xf32>
    %71 = vector.broadcast %68 : vector<1x16xf32> to vector<512x16xf32>
    %72 = arith.addf %67, %71 : vector<512x16xf32>
    %cst_64 = arith.constant 0.000000e+00 : f32
    %73 = vector.broadcast %cst_64 : f32 to vector<512x16xf32>
    %74 = arith.maximumf %72, %73 : vector<512x16xf32>
    %75 = vector.broadcast %69 : vector<1x16xf32> to vector<512x16xf32>
    %76 = arith.mulf %74, %75 : vector<512x16xf32>
    %77 = vector.broadcast %70 : vector<1x16xf32> to vector<512x16xf32>
    %78 = arith.addf %76, %77 : vector<512x16xf32>
    %79 = vector.shape_cast %78 : vector<512x16xf32> to vector<32x8x2x16xf32>
    %80 = vector.extract_strided_slice %79 {offsets = [0, 0, 0, 0], sizes = [32, 8, 1, 16], strides = [1, 1, 1, 1]} : vector<32x8x2x16xf32> to vector<32x8x1x16xf32>
    %81 = vector.shape_cast %80 : vector<32x8x1x16xf32> to vector<32x8x16xf32>
    %82 = vector.extract_strided_slice %79 {offsets = [0, 0, 1, 0], sizes = [32, 8, 1, 16], strides = [1, 1, 1, 1]} : vector<32x8x2x16xf32> to vector<32x8x1x16xf32>
    %83 = vector.shape_cast %82 : vector<32x8x1x16xf32> to vector<32x8x16xf32>
    %84 = arith.maximumf %81, %83 : vector<32x8x16xf32>
    %85 = vector.shape_cast %84 : vector<32x8x16xf32> to vector<16x2x8x16xf32>
    %86 = vector.extract_strided_slice %85 {offsets = [0, 0, 0, 0], sizes = [16, 1, 8, 16], strides = [1, 1, 1, 1]} : vector<16x2x8x16xf32> to vector<16x1x8x16xf32>
    %87 = vector.shape_cast %86 : vector<16x1x8x16xf32> to vector<16x8x16xf32>
    %88 = vector.extract_strided_slice %85 {offsets = [0, 1, 0, 0], sizes = [16, 1, 8, 16], strides = [1, 1, 1, 1]} : vector<16x2x8x16xf32> to vector<16x1x8x16xf32>
    %89 = vector.shape_cast %88 : vector<16x1x8x16xf32> to vector<16x8x16xf32>
    %90 = arith.maximumf %87, %89 : vector<16x8x16xf32>
    %91 = vector.shape_cast %90 : vector<16x8x16xf32> to vector<2x8x8x16xf32>
    %cst_65 = arith.constant 0.000000e+00 : f32
    %92 = vector.broadcast %cst_65 : f32 to vector<2x10x10x16xf32>
    %c0_66 = arith.constant 0 : index
    %c0_67 = arith.constant 0 : index
    %c0_68 = arith.constant 0 : index
    %c0_69 = arith.constant 0 : index
    %93 = vector.load %arg17[%c0_66, %c0_67, %c0_68, %c0_69] : memref<2x10x10x16xf32, #tpu.memory_space<vmem>>, vector<2x10x10x16xf32>
    tpu.vector_store %arg17[%c0_66, %c0_67, %c0_68, %c0_69], %92 {strides = array<i32>} : memref<2x10x10x16xf32, #tpu.memory_space<vmem>>, vector<2x10x10x16xf32>,
    %c0_70 = arith.constant 0 : index
    %c1_71 = arith.constant 1 : index
    %c1_72 = arith.constant 1 : index
    %c0_73 = arith.constant 0 : index
    %94 = vector.load %arg17[%c0_70, %c1_71, %c1_72, %c0_73] : memref<2x10x10x16xf32, #tpu.memory_space<vmem>>, vector<2x8x8x16xf32>
    tpu.vector_store %arg17[%c0_70, %c1_71, %c1_72, %c0_73], %91 {strides = array<i32>} : memref<2x10x10x16xf32, #tpu.memory_space<vmem>>, vector<2x8x8x16xf32>,
    %c0_74 = arith.constant 0 : index
    %c0_75 = arith.constant 0 : index
    %c0_76 = arith.constant 0 : index
    %c0_77 = arith.constant 0 : index
    %95 = vector.load %arg17[%c0_74, %c0_75, %c0_76, %c0_77] : memref<2x10x10x16xf32, #tpu.memory_space<vmem>>, vector<2x8x8x16xf32>
    %96 = vector.shape_cast %95 : vector<2x8x8x16xf32> to vector<128x16xf32>
    %c0_78 = arith.constant 0 : index
    %c0_79 = arith.constant 0 : index
    %97 = vector.load %arg19[%c0_78, %c0_79] : memref<128x144xf32, #tpu.memory_space<vmem>>, vector<128x16xf32>
    tpu.vector_store %arg19[%c0_78, %c0_79], %96 {strides = array<i32>} : memref<128x144xf32, #tpu.memory_space<vmem>>, vector<128x16xf32>,
    %c0_80 = arith.constant 0 : index
    %c0_81 = arith.constant 0 : index
    %c1_82 = arith.constant 1 : index
    %c0_83 = arith.constant 0 : index
    %98 = vector.load %arg17[%c0_80, %c0_81, %c1_82, %c0_83] : memref<2x10x10x16xf32, #tpu.memory_space<vmem>>, vector<2x8x8x16xf32>
    %99 = vector.shape_cast %98 : vector<2x8x8x16xf32> to vector<128x16xf32>
    %c0_84 = arith.constant 0 : index
    %c16 = arith.constant 16 : index
    %100 = vector.load %arg19[%c0_84, %c16] : memref<128x144xf32, #tpu.memory_space<vmem>>, vector<128x16xf32>
    tpu.vector_store %arg19[%c0_84, %c16], %99 {strides = array<i32>} : memref<128x144xf32, #tpu.memory_space<vmem>>, vector<128x16xf32>,
    %c0_85 = arith.constant 0 : index
    %c0_86 = arith.constant 0 : index
    %c2_87 = arith.constant 2 : index
    %c0_88 = arith.constant 0 : index
    %101 = vector.load %arg17[%c0_85, %c0_86, %c2_87, %c0_88] : memref<2x10x10x16xf32, #tpu.memory_space<vmem>>, vector<2x8x8x16xf32>
    %102 = vector.shape_cast %101 : vector<2x8x8x16xf32> to vector<128x16xf32>
    %c0_89 = arith.constant 0 : index
    %c32 = arith.constant 32 : index
    %103 = vector.load %arg19[%c0_89, %c32] : memref<128x144xf32, #tpu.memory_space<vmem>>, vector<128x16xf32>
    tpu.vector_store %arg19[%c0_89, %c32], %102 {strides = array<i32>} : memref<128x144xf32, #tpu.memory_space<vmem>>, vector<128x16xf32>,
    %c0_90 = arith.constant 0 : index
    %c1_91 = arith.constant 1 : index
    %c0_92 = arith.constant 0 : index
    %c0_93 = arith.constant 0 : index
    %104 = vector.load %arg17[%c0_90, %c1_91, %c0_92, %c0_93] : memref<2x10x10x16xf32, #tpu.memory_space<vmem>>, vector<2x8x8x16xf32>
    %105 = vector.shape_cast %104 : vector<2x8x8x16xf32> to vector<128x16xf32>
    %c0_94 = arith.constant 0 : index
    %c48 = arith.constant 48 : index
    %106 = vector.load %arg19[%c0_94, %c48] : memref<128x144xf32, #tpu.memory_space<vmem>>, vector<128x16xf32>
    tpu.vector_store %arg19[%c0_94, %c48], %105 {strides = array<i32>} : memref<128x144xf32, #tpu.memory_space<vmem>>, vector<128x16xf32>,
    %c0_95 = arith.constant 0 : index
    %c1_96 = arith.constant 1 : index
    %c1_97 = arith.constant 1 : index
    %c0_98 = arith.constant 0 : index
    %107 = vector.load %arg17[%c0_95, %c1_96, %c1_97, %c0_98] : memref<2x10x10x16xf32, #tpu.memory_space<vmem>>, vector<2x8x8x16xf32>
    %108 = vector.shape_cast %107 : vector<2x8x8x16xf32> to vector<128x16xf32>
    %c0_99 = arith.constant 0 : index
    %c64 = arith.constant 64 : index
    %109 = vector.load %arg19[%c0_99, %c64] : memref<128x144xf32, #tpu.memory_space<vmem>>, vector<128x16xf32>
    tpu.vector_store %arg19[%c0_99, %c64], %108 {strides = array<i32>} : memref<128x144xf32, #tpu.memory_space<vmem>>, vector<128x16xf32>,
    %c0_100 = arith.constant 0 : index
    %c1_101 = arith.constant 1 : index
    %c2_102 = arith.constant 2 : index
    %c0_103 = arith.constant 0 : index
    %110 = vector.load %arg17[%c0_100, %c1_101, %c2_102, %c0_103] : memref<2x10x10x16xf32, #tpu.memory_space<vmem>>, vector<2x8x8x16xf32>
    %111 = vector.shape_cast %110 : vector<2x8x8x16xf32> to vector<128x16xf32>
    %c0_104 = arith.constant 0 : index
    %c80 = arith.constant 80 : index
    %112 = vector.load %arg19[%c0_104, %c80] : memref<128x144xf32, #tpu.memory_space<vmem>>, vector<128x16xf32>
    tpu.vector_store %arg19[%c0_104, %c80], %111 {strides = array<i32>} : memref<128x144xf32, #tpu.memory_space<vmem>>, vector<128x16xf32>,
    %c0_105 = arith.constant 0 : index
    %c2_106 = arith.constant 2 : index
    %c0_107 = arith.constant 0 : index
    %c0_108 = arith.constant 0 : index
    %113 = vector.load %arg17[%c0_105, %c2_106, %c0_107, %c0_108] : memref<2x10x10x16xf32, #tpu.memory_space<vmem>>, vector<2x8x8x16xf32>
    %114 = vector.shape_cast %113 : vector<2x8x8x16xf32> to vector<128x16xf32>
    %c0_109 = arith.constant 0 : index
    %c96 = arith.constant 96 : index
    %115 = vector.load %arg19[%c0_109, %c96] : memref<128x144xf32, #tpu.memory_space<vmem>>, vector<128x16xf32>
    tpu.vector_store %arg19[%c0_109, %c96], %114 {strides = array<i32>} : memref<128x144xf32, #tpu.memory_space<vmem>>, vector<128x16xf32>,
    %c0_110 = arith.constant 0 : index
    %c2_111 = arith.constant 2 : index
    %c1_112 = arith.constant 1 : index
    %c0_113 = arith.constant 0 : index
    %116 = vector.load %arg17[%c0_110, %c2_111, %c1_112, %c0_113] : memref<2x10x10x16xf32, #tpu.memory_space<vmem>>, vector<2x8x8x16xf32>
    %117 = vector.shape_cast %116 : vector<2x8x8x16xf32> to vector<128x16xf32>
    %c0_114 = arith.constant 0 : index
    %c112 = arith.constant 112 : index
    %118 = vector.load %arg19[%c0_114, %c112] : memref<128x144xf32, #tpu.memory_space<vmem>>, vector<128x16xf32>
    tpu.vector_store %arg19[%c0_114, %c112], %117 {strides = array<i32>} : memref<128x144xf32, #tpu.memory_space<vmem>>, vector<128x16xf32>,
    %c0_115 = arith.constant 0 : index
    %c2_116 = arith.constant 2 : index
    %c2_117 = arith.constant 2 : index
    %c0_118 = arith.constant 0 : index
    %119 = vector.load %arg17[%c0_115, %c2_116, %c2_117, %c0_118] : memref<2x10x10x16xf32, #tpu.memory_space<vmem>>, vector<2x8x8x16xf32>
    %120 = vector.shape_cast %119 : vector<2x8x8x16xf32> to vector<128x16xf32>
    %c0_119 = arith.constant 0 : index
    %c128 = arith.constant 128 : index
    %121 = vector.load %arg19[%c0_119, %c128] : memref<128x144xf32, #tpu.memory_space<vmem>>, vector<128x16xf32>
    tpu.vector_store %arg19[%c0_119, %c128], %120 {strides = array<i32>} : memref<128x144xf32, #tpu.memory_space<vmem>>, vector<128x16xf32>,
    %c0_120 = arith.constant 0 : index
    %c0_121 = arith.constant 0 : index
    %122 = vector.load %arg19[%c0_120, %c0_121] : memref<128x144xf32, #tpu.memory_space<vmem>>, vector<128x144xf32>
    %c0_122 = arith.constant 0 : index
    %c0_123 = arith.constant 0 : index
    %123 = vector.load %arg5[%c0_122, %c0_123] : memref<144x32xf32, #tpu.memory_space<vmem>>, vector<144x32xf32>
    %cst_124 = arith.constant dense<0.000000e+00> : vector<128x32xf32>
    %124 = tpu.matmul %122, %123, %cst_124 {dimension_numbers = #tpu.dot_dimension_numbers<[1], [0], [0], [1], [0, 0, 1, 1], [], []>} : vector<128x144xf32>, vector<144x32xf32>, vector<128x32xf32> -> vector<128x32xf32>
    %c0_125 = arith.constant 0 : index
    %c0_126 = arith.constant 0 : index
    %125 = vector.load %arg6[%c0_125, %c0_126] : memref<1x32xf32, #tpu.memory_space<vmem>>, vector<1x32xf32>
    %c0_127 = arith.constant 0 : index
    %c0_128 = arith.constant 0 : index
    %126 = vector.load %arg7[%c0_127, %c0_128] : memref<1x32xf32, #tpu.memory_space<vmem>>, vector<1x32xf32>
    %c0_129 = arith.constant 0 : index
    %c0_130 = arith.constant 0 : index
    %127 = vector.load %arg8[%c0_129, %c0_130] : memref<1x32xf32, #tpu.memory_space<vmem>>, vector<1x32xf32>
    %128 = vector.broadcast %125 : vector<1x32xf32> to vector<128x32xf32>
    %129 = arith.addf %124, %128 : vector<128x32xf32>
    %cst_131 = arith.constant 0.000000e+00 : f32
    %130 = vector.broadcast %cst_131 : f32 to vector<128x32xf32>
    %131 = arith.maximumf %129, %130 : vector<128x32xf32>
    %132 = vector.broadcast %126 : vector<1x32xf32> to vector<128x32xf32>
    %133 = arith.mulf %131, %132 : vector<128x32xf32>
    %134 = vector.broadcast %127 : vector<1x32xf32> to vector<128x32xf32>
    %135 = arith.addf %133, %134 : vector<128x32xf32>
    %136 = vector.shape_cast %135 : vector<128x32xf32> to vector<16x4x2x32xf32>
    %137 = vector.extract_strided_slice %136 {offsets = [0, 0, 0, 0], sizes = [16, 4, 1, 32], strides = [1, 1, 1, 1]} : vector<16x4x2x32xf32> to vector<16x4x1x32xf32>
    %138 = vector.shape_cast %137 : vector<16x4x1x32xf32> to vector<16x4x32xf32>
    %139 = vector.extract_strided_slice %136 {offsets = [0, 0, 1, 0], sizes = [16, 4, 1, 32], strides = [1, 1, 1, 1]} : vector<16x4x2x32xf32> to vector<16x4x1x32xf32>
    %140 = vector.shape_cast %139 : vector<16x4x1x32xf32> to vector<16x4x32xf32>
    %141 = arith.maximumf %138, %140 : vector<16x4x32xf32>
    %142 = vector.shape_cast %141 : vector<16x4x32xf32> to vector<8x2x4x32xf32>
    %143 = vector.extract_strided_slice %142 {offsets = [0, 0, 0, 0], sizes = [8, 1, 4, 32], strides = [1, 1, 1, 1]} : vector<8x2x4x32xf32> to vector<8x1x4x32xf32>
    %144 = vector.shape_cast %143 : vector<8x1x4x32xf32> to vector<8x4x32xf32>
    %145 = vector.extract_strided_slice %142 {offsets = [0, 1, 0, 0], sizes = [8, 1, 4, 32], strides = [1, 1, 1, 1]} : vector<8x2x4x32xf32> to vector<8x1x4x32xf32>
    %146 = vector.shape_cast %145 : vector<8x1x4x32xf32> to vector<8x4x32xf32>
    %147 = arith.maximumf %144, %146 : vector<8x4x32xf32>
    %148 = vector.shape_cast %147 : vector<8x4x32xf32> to vector<2x4x4x32xf32>
    %cst_132 = arith.constant 0.000000e+00 : f32
    %149 = vector.broadcast %cst_132 : f32 to vector<2x6x6x32xf32>
    %c0_133 = arith.constant 0 : index
    %c0_134 = arith.constant 0 : index
    %c0_135 = arith.constant 0 : index
    %c0_136 = arith.constant 0 : index
    %150 = vector.load %arg18[%c0_133, %c0_134, %c0_135, %c0_136] : memref<2x6x6x32xf32, #tpu.memory_space<vmem>>, vector<2x6x6x32xf32>
    tpu.vector_store %arg18[%c0_133, %c0_134, %c0_135, %c0_136], %149 {strides = array<i32>} : memref<2x6x6x32xf32, #tpu.memory_space<vmem>>, vector<2x6x6x32xf32>,
    %c0_137 = arith.constant 0 : index
    %c1_138 = arith.constant 1 : index
    %c1_139 = arith.constant 1 : index
    %c0_140 = arith.constant 0 : index
    %151 = vector.load %arg18[%c0_137, %c1_138, %c1_139, %c0_140] : memref<2x6x6x32xf32, #tpu.memory_space<vmem>>, vector<2x4x4x32xf32>
    tpu.vector_store %arg18[%c0_137, %c1_138, %c1_139, %c0_140], %148 {strides = array<i32>} : memref<2x6x6x32xf32, #tpu.memory_space<vmem>>, vector<2x4x4x32xf32>,
    %c0_141 = arith.constant 0 : index
    %c0_142 = arith.constant 0 : index
    %c0_143 = arith.constant 0 : index
    %c0_144 = arith.constant 0 : index
    %152 = vector.load %arg18[%c0_141, %c0_142, %c0_143, %c0_144] : memref<2x6x6x32xf32, #tpu.memory_space<vmem>>, vector<2x4x4x32xf32>
    %153 = vector.shape_cast %152 : vector<2x4x4x32xf32> to vector<32x32xf32>
    %c0_145 = arith.constant 0 : index
    %c0_146 = arith.constant 0 : index
    %154 = vector.load %arg20[%c0_145, %c0_146] : memref<32x288xf32, #tpu.memory_space<vmem>>, vector<32x32xf32>
    tpu.vector_store %arg20[%c0_145, %c0_146], %153 {strides = array<i32>} : memref<32x288xf32, #tpu.memory_space<vmem>>, vector<32x32xf32>,
    %c0_147 = arith.constant 0 : index
    %c0_148 = arith.constant 0 : index
    %c1_149 = arith.constant 1 : index
    %c0_150 = arith.constant 0 : index
    %155 = vector.load %arg18[%c0_147, %c0_148, %c1_149, %c0_150] : memref<2x6x6x32xf32, #tpu.memory_space<vmem>>, vector<2x4x4x32xf32>
    %156 = vector.shape_cast %155 : vector<2x4x4x32xf32> to vector<32x32xf32>
    %c0_151 = arith.constant 0 : index
    %c32_152 = arith.constant 32 : index
    %157 = vector.load %arg20[%c0_151, %c32_152] : memref<32x288xf32, #tpu.memory_space<vmem>>, vector<32x32xf32>
    tpu.vector_store %arg20[%c0_151, %c32_152], %156 {strides = array<i32>} : memref<32x288xf32, #tpu.memory_space<vmem>>, vector<32x32xf32>,
    %c0_153 = arith.constant 0 : index
    %c0_154 = arith.constant 0 : index
    %c2_155 = arith.constant 2 : index
    %c0_156 = arith.constant 0 : index
    %158 = vector.load %arg18[%c0_153, %c0_154, %c2_155, %c0_156] : memref<2x6x6x32xf32, #tpu.memory_space<vmem>>, vector<2x4x4x32xf32>
    %159 = vector.shape_cast %158 : vector<2x4x4x32xf32> to vector<32x32xf32>
    %c0_157 = arith.constant 0 : index
    %c64_158 = arith.constant 64 : index
    %160 = vector.load %arg20[%c0_157, %c64_158] : memref<32x288xf32, #tpu.memory_space<vmem>>, vector<32x32xf32>
    tpu.vector_store %arg20[%c0_157, %c64_158], %159 {strides = array<i32>} : memref<32x288xf32, #tpu.memory_space<vmem>>, vector<32x32xf32>,
    %c0_159 = arith.constant 0 : index
    %c1_160 = arith.constant 1 : index
    %c0_161 = arith.constant 0 : index
    %c0_162 = arith.constant 0 : index
    %161 = vector.load %arg18[%c0_159, %c1_160, %c0_161, %c0_162] : memref<2x6x6x32xf32, #tpu.memory_space<vmem>>, vector<2x4x4x32xf32>
    %162 = vector.shape_cast %161 : vector<2x4x4x32xf32> to vector<32x32xf32>
    %c0_163 = arith.constant 0 : index
    %c96_164 = arith.constant 96 : index
    %163 = vector.load %arg20[%c0_163, %c96_164] : memref<32x288xf32, #tpu.memory_space<vmem>>, vector<32x32xf32>
    tpu.vector_store %arg20[%c0_163, %c96_164], %162 {strides = array<i32>} : memref<32x288xf32, #tpu.memory_space<vmem>>, vector<32x32xf32>,
    %c0_165 = arith.constant 0 : index
    %c1_166 = arith.constant 1 : index
    %c1_167 = arith.constant 1 : index
    %c0_168 = arith.constant 0 : index
    %164 = vector.load %arg18[%c0_165, %c1_166, %c1_167, %c0_168] : memref<2x6x6x32xf32, #tpu.memory_space<vmem>>, vector<2x4x4x32xf32>
    %165 = vector.shape_cast %164 : vector<2x4x4x32xf32> to vector<32x32xf32>
    %c0_169 = arith.constant 0 : index
    %c128_170 = arith.constant 128 : index
    %166 = vector.load %arg20[%c0_169, %c128_170] : memref<32x288xf32, #tpu.memory_space<vmem>>, vector<32x32xf32>
    tpu.vector_store %arg20[%c0_169, %c128_170], %165 {strides = array<i32>} : memref<32x288xf32, #tpu.memory_space<vmem>>, vector<32x32xf32>,
    %c0_171 = arith.constant 0 : index
    %c1_172 = arith.constant 1 : index
    %c2_173 = arith.constant 2 : index
    %c0_174 = arith.constant 0 : index
    %167 = vector.load %arg18[%c0_171, %c1_172, %c2_173, %c0_174] : memref<2x6x6x32xf32, #tpu.memory_space<vmem>>, vector<2x4x4x32xf32>
    %168 = vector.shape_cast %167 : vector<2x4x4x32xf32> to vector<32x32xf32>
    %c0_175 = arith.constant 0 : index
    %c160 = arith.constant 160 : index
    %169 = vector.load %arg20[%c0_175, %c160] : memref<32x288xf32, #tpu.memory_space<vmem>>, vector<32x32xf32>
    tpu.vector_store %arg20[%c0_175, %c160], %168 {strides = array<i32>} : memref<32x288xf32, #tpu.memory_space<vmem>>, vector<32x32xf32>,
    %c0_176 = arith.constant 0 : index
    %c2_177 = arith.constant 2 : index
    %c0_178 = arith.constant 0 : index
    %c0_179 = arith.constant 0 : index
    %170 = vector.load %arg18[%c0_176, %c2_177, %c0_178, %c0_179] : memref<2x6x6x32xf32, #tpu.memory_space<vmem>>, vector<2x4x4x32xf32>
    %171 = vector.shape_cast %170 : vector<2x4x4x32xf32> to vector<32x32xf32>
    %c0_180 = arith.constant 0 : index
    %c192 = arith.constant 192 : index
    %172 = vector.load %arg20[%c0_180, %c192] : memref<32x288xf32, #tpu.memory_space<vmem>>, vector<32x32xf32>
    tpu.vector_store %arg20[%c0_180, %c192], %171 {strides = array<i32>} : memref<32x288xf32, #tpu.memory_space<vmem>>, vector<32x32xf32>,
    %c0_181 = arith.constant 0 : index
    %c2_182 = arith.constant 2 : index
    %c1_183 = arith.constant 1 : index
    %c0_184 = arith.constant 0 : index
    %173 = vector.load %arg18[%c0_181, %c2_182, %c1_183, %c0_184] : memref<2x6x6x32xf32, #tpu.memory_space<vmem>>, vector<2x4x4x32xf32>
    %174 = vector.shape_cast %173 : vector<2x4x4x32xf32> to vector<32x32xf32>
    %c0_185 = arith.constant 0 : index
    %c224 = arith.constant 224 : index
    %175 = vector.load %arg20[%c0_185, %c224] : memref<32x288xf32, #tpu.memory_space<vmem>>, vector<32x32xf32>
    tpu.vector_store %arg20[%c0_185, %c224], %174 {strides = array<i32>} : memref<32x288xf32, #tpu.memory_space<vmem>>, vector<32x32xf32>,
    %c0_186 = arith.constant 0 : index
    %c2_187 = arith.constant 2 : index
    %c2_188 = arith.constant 2 : index
    %c0_189 = arith.constant 0 : index
    %176 = vector.load %arg18[%c0_186, %c2_187, %c2_188, %c0_189] : memref<2x6x6x32xf32, #tpu.memory_space<vmem>>, vector<2x4x4x32xf32>
    %177 = vector.shape_cast %176 : vector<2x4x4x32xf32> to vector<32x32xf32>
    %c0_190 = arith.constant 0 : index
    %c256 = arith.constant 256 : index
    %178 = vector.load %arg20[%c0_190, %c256] : memref<32x288xf32, #tpu.memory_space<vmem>>, vector<32x32xf32>
    tpu.vector_store %arg20[%c0_190, %c256], %177 {strides = array<i32>} : memref<32x288xf32, #tpu.memory_space<vmem>>, vector<32x32xf32>,
    %c0_191 = arith.constant 0 : index
    %c0_192 = arith.constant 0 : index
    %179 = vector.load %arg20[%c0_191, %c0_192] : memref<32x288xf32, #tpu.memory_space<vmem>>, vector<32x288xf32>
    %c0_193 = arith.constant 0 : index
    %c0_194 = arith.constant 0 : index
    %180 = vector.load %arg9[%c0_193, %c0_194] : memref<288x64xf32, #tpu.memory_space<vmem>>, vector<288x64xf32>
    %cst_195 = arith.constant dense<0.000000e+00> : vector<32x64xf32>
    %181 = tpu.matmul %179, %180, %cst_195 {dimension_numbers = #tpu.dot_dimension_numbers<[1], [0], [0], [1], [0, 0, 1, 1], [], []>} : vector<32x288xf32>, vector<288x64xf32>, vector<32x64xf32> -> vector<32x64xf32>
    %c0_196 = arith.constant 0 : index
    %c0_197 = arith.constant 0 : index
    %182 = vector.load %arg10[%c0_196, %c0_197] : memref<1x64xf32, #tpu.memory_space<vmem>>, vector<1x64xf32>
    %c0_198 = arith.constant 0 : index
    %c0_199 = arith.constant 0 : index
    %183 = vector.load %arg11[%c0_198, %c0_199] : memref<1x64xf32, #tpu.memory_space<vmem>>, vector<1x64xf32>
    %c0_200 = arith.constant 0 : index
    %c0_201 = arith.constant 0 : index
    %184 = vector.load %arg12[%c0_200, %c0_201] : memref<1x64xf32, #tpu.memory_space<vmem>>, vector<1x64xf32>
    %185 = vector.broadcast %182 : vector<1x64xf32> to vector<32x64xf32>
    %186 = arith.addf %181, %185 : vector<32x64xf32>
    %cst_202 = arith.constant 0.000000e+00 : f32
    %187 = vector.broadcast %cst_202 : f32 to vector<32x64xf32>
    %188 = arith.maximumf %186, %187 : vector<32x64xf32>
    %189 = vector.broadcast %183 : vector<1x64xf32> to vector<32x64xf32>
    %190 = arith.mulf %188, %189 : vector<32x64xf32>
    %191 = vector.broadcast %184 : vector<1x64xf32> to vector<32x64xf32>
    %192 = arith.addf %190, %191 : vector<32x64xf32>
    %193 = vector.shape_cast %192 : vector<32x64xf32> to vector<8x2x2x64xf32>
    %194 = vector.extract_strided_slice %193 {offsets = [0, 0, 0, 0], sizes = [8, 2, 1, 64], strides = [1, 1, 1, 1]} : vector<8x2x2x64xf32> to vector<8x2x1x64xf32>
    %195 = vector.shape_cast %194 : vector<8x2x1x64xf32> to vector<8x2x64xf32>
    %196 = vector.extract_strided_slice %193 {offsets = [0, 0, 1, 0], sizes = [8, 2, 1, 64], strides = [1, 1, 1, 1]} : vector<8x2x2x64xf32> to vector<8x2x1x64xf32>
    %197 = vector.shape_cast %196 : vector<8x2x1x64xf32> to vector<8x2x64xf32>
    %198 = arith.maximumf %195, %197 : vector<8x2x64xf32>
    %199 = vector.shape_cast %198 : vector<8x2x64xf32> to vector<4x2x2x64xf32>
    %200 = vector.extract_strided_slice %199 {offsets = [0, 0, 0, 0], sizes = [4, 1, 2, 64], strides = [1, 1, 1, 1]} : vector<4x2x2x64xf32> to vector<4x1x2x64xf32>
    %201 = vector.shape_cast %200 : vector<4x1x2x64xf32> to vector<4x2x64xf32>
    %202 = vector.extract_strided_slice %199 {offsets = [0, 1, 0, 0], sizes = [4, 1, 2, 64], strides = [1, 1, 1, 1]} : vector<4x2x2x64xf32> to vector<4x1x2x64xf32>
    %203 = vector.shape_cast %202 : vector<4x1x2x64xf32> to vector<4x2x64xf32>
    %204 = arith.maximumf %201, %203 : vector<4x2x64xf32>
    %205 = vector.shape_cast %204 : vector<4x2x64xf32> to vector<2x2x2x64xf32>
    %206 = vector.shape_cast %205 : vector<2x2x2x64xf32> to vector<2x4x64xf32>
    %cst_203 = arith.constant dense<0.000000e+00> : vector<2x64xf32>
    %207 = vector.multi_reduction <add>, %206, %cst_203 [1] : vector<2x4x64xf32> to vector<2x64xf32>
    %cst_204 = arith.constant 2.500000e-01 : f32
    %208 = vector.broadcast %cst_204 : f32 to vector<2x64xf32>
    %209 = arith.mulf %207, %208 : vector<2x64xf32>
    %c0_205 = arith.constant 0 : index
    %c0_206 = arith.constant 0 : index
    %210 = vector.load %arg13[%c0_205, %c0_206] : memref<64x3xf32, #tpu.memory_space<vmem>>, vector<64x3xf32>
    %cst_207 = arith.constant dense<0.000000e+00> : vector<2x3xf32>
    %211 = tpu.matmul %209, %210, %cst_207 {dimension_numbers = #tpu.dot_dimension_numbers<[1], [0], [0], [1], [0, 0, 1, 1], [], []>} : vector<2x64xf32>, vector<64x3xf32>, vector<2x3xf32> -> vector<2x3xf32>
    %c0_208 = arith.constant 0 : index
    %c0_209 = arith.constant 0 : index
    %212 = vector.load %arg14[%c0_208, %c0_209] : memref<1x3xf32, #tpu.memory_space<vmem>>, vector<1x3xf32>
    %213 = vector.broadcast %212 : vector<1x3xf32> to vector<2x3xf32>
    %214 = arith.addf %211, %213 : vector<2x3xf32>
    %c0_210 = arith.constant 0 : index
    %c0_211 = arith.constant 0 : index
    %215 = vector.load %arg15[%c0_210, %c0_211] : memref<2x3xf32, #tpu.memory_space<vmem>>, vector<2x3xf32>
    tpu.vector_store %arg15[%c0_210, %c0_211], %214 {strides = array<i32>} : memref<2x3xf32, #tpu.memory_space<vmem>>, vector<2x3xf32>,
    return
  }
}

</mosaic_0001>

<bundles_post_ra>
// kernel: cnn_forward.1
= control target key start
LH: loop header
LB: loop body
LE: loop exit
PB: predicated region body
PF: predicated region fallthrough
CT: control target
= control target key end

     0   :  { %vm51_vm0 = vcmask 7168   ;;  %vm54_vm1 = vcmask 1024   ;;  %v12091_v2 = vmov 0   ;;  %v18237_v3 = vmov 0.0   ;;  %s18221_s0 = inlined_call_operand.vmem [shape: f32[2,16,16,1], index: 0, kind: input, shape index: {}]   ;;  %s18222_s1 = inlined_call_operand.vmem [shape: f32[9,16], index: 1, kind: input, shape index: {}]   ;;  %s18223_s2 = inlined_call_operand.vmem [shape: f32[1,16], index: 2, kind: input, shape index: {}]   ;;  %s18224_s3 = inlined_call_operand.vmem [shape: f32[1,16], index: 3, kind: input, shape index: {}]   ;;  %s18225_s4 = inlined_call_operand.vmem [shape: f32[1,16], index: 4, kind: input, shape index: {}]   ;;  %s18226_s5 = inlined_call_operand.vmem [shape: f32[144,32], index: 5, kind: input, shape index: {}]   ;;  %s18227_s6 = inlined_call_operand.vmem [shape: f32[1,32], index: 6, kind: input, shape index: {}]   ;;  %s18228_s7 = inlined_call_operand.vmem [shape: f32[1,32], index: 7, kind: input, shape index: {}]   ;;  %s18229_s8 = inlined_call_operand.vmem [shape: f32[1,32], index: 8, kind: input, shape index: {}]   ;;  %s18230_s9 = inlined_call_operand.vmem [shape: f32[288,64], index: 9, kind: input, shape index: {}]   ;;  %s18231_s10 = inlined_call_operand.vmem [shape: f32[1,64], index: 10, kind: input, shape index: {}]   ;;  %s18232_s11 = inlined_call_operand.vmem [shape: f32[1,64], index: 11, kind: input, shape index: {}]   ;;  %s18233_s12 = inlined_call_operand.vmem [shape: f32[1,64], index: 12, kind: input, shape index: {}]   ;;  %s18234_s13 = inlined_call_operand.vmem [shape: f32[64,3], index: 13, kind: input, shape index: {}]   ;;  %s18235_s14 = inlined_call_operand.vmem [shape: f32[1,3], index: 14, kind: input, shape index: {}]   ;;  %s18236_s15 = inlined_call_operand.hbm [shape: f32[2,3], index: 15, kind: output, shape index: {}]  }
   0x1   :  { %v12187_v0 = vld [vmem:[%s18221_s0] sm:$0xff]  ;;  %v12192_v1 = vld [vmem:[%s18221_s0 + $0x8] sm:$0xff]  ;;  %11989 = vset.pattern.permute.xlu0 %v12091_v2  ;;  %11990 = vset.pattern.permute.xlu1 %v12091_v2  ;;  %52 = vst.msk [vmem:[#allocation2] sm:$0xff] %vm51_vm0, %v18237_v3  ;;  %53 = vst.msk [vmem:[#allocation2 + $0x8] sm:$0xff] %vm51_vm0, %v18237_v3 }
   0x2   :  { %56 = vst.msk [vmem:[#allocation2 + $0x18] sm:$0xff] %vm51_vm0, %v18237_v3  ;;  %57 = vst.msk [vmem:[#allocation2 + $0x20] sm:$0xff] %vm51_vm0, %v18237_v3  ;;  %v163_v4 = vld [vmem:[%s18221_s0 + $0x10] sm:$0xff]  ;;  %v164_v5 = vld [vmem:[%s18221_s0 + $0x18] sm:$0xff] }
   0x3   :  { %59 = vst.msk [vmem:[#allocation2 + $0x30] sm:$0xff] %vm51_vm0, %v18237_v3  ;;  %60 = vst.msk [vmem:[#allocation2 + $0x38] sm:$0xff] %vm51_vm0, %v18237_v3  ;;  %v165_v6 = vld [vmem:[%s18221_s0 + $0x20] sm:$0xff]  ;;  %v166_v7 = vld [vmem:[%s18221_s0 + $0x28] sm:$0xff] }
   0x4   :  { %62 = vst.msk [vmem:[#allocation2 + $0x48] sm:$0xff] %vm51_vm0, %v18237_v3  ;;  %63 = vst.msk [vmem:[#allocation2 + $0x50] sm:$0xff] %vm51_vm0, %v18237_v3  ;;  %v167_v8 = vld [vmem:[%s18221_s0 + $0x30] sm:$0xff]  ;;  %v168_v9 = vld [vmem:[%s18221_s0 + $0x38] sm:$0xff] }
   0x5   :  { %65 = vst.msk [vmem:[#allocation2 + $0x60] sm:$0xff] %vm51_vm0, %v18237_v3  ;;  %66 = vst.msk [vmem:[#allocation2 + $0x68] sm:$0xff] %vm51_vm0, %v18237_v3  ;;  %v169_v10 = vld [vmem:[%s18221_s0 + $0x40] sm:$0xff]  ;;  %v170_v11 = vld [vmem:[%s18221_s0 + $0x48] sm:$0xff] }
   0x6   :  { %68 = vst.msk [vmem:[#allocation2 + $0x78] sm:$0xff] %vm51_vm0, %v18237_v3  ;;  %69 = vst.msk [vmem:[#allocation2 + $0x80] sm:$0xff] %vm51_vm0, %v18237_v3  ;;  %v171_v12 = vld [vmem:[%s18221_s0 + $0x50] sm:$0xff]  ;;  %v172_v13 = vld [vmem:[%s18221_s0 + $0x58] sm:$0xff] }
   0x7   :  { %71 = vst.msk [vmem:[#allocation2 + $0x90] sm:$0xff] %vm51_vm0, %v18237_v3  ;;  %72 = vst.msk [vmem:[#allocation2 + $0x98] sm:$0xff] %vm51_vm0, %v18237_v3  ;;  %v173_v14 = vld [vmem:[%s18221_s0 + $0x60] sm:$0xff]  ;;  %v174_v15 = vld [vmem:[%s18221_s0 + $0x68] sm:$0xff] }
   0x8   :  { %74 = vst.msk [vmem:[#allocation2 + $0xa8] sm:$0xff] %vm51_vm0, %v18237_v3  ;;  %75 = vst.msk [vmem:[#allocation2 + $0xb0] sm:$0xff] %vm51_vm0, %v18237_v3  ;;  %v175_v16 = vld [vmem:[%s18221_s0 + $0x70] sm:$0xff]  ;;  %v176_v17 = vld [vmem:[%s18221_s0 + $0x78] sm:$0xff] }
   0x9   :  { %77 = vst.msk [vmem:[#allocation2 + $0xc0] sm:$0xff] %vm51_vm0, %v18237_v3  ;;  %78 = vst.msk [vmem:[#allocation2 + $0xc8] sm:$0xff] %vm51_vm0, %v18237_v3  ;;  %v177_v18 = vld [vmem:[%s18221_s0 + $0x80] sm:$0xff]  ;;  %v178_v19 = vld [vmem:[%s18221_s0 + $0x88] sm:$0xff] }
   0xa   :  { %80 = vst.msk [vmem:[#allocation2 + $0xd8] sm:$0xff] %vm51_vm0, %v18237_v3  ;;  %81 = vst.msk [vmem:[#allocation2 + $0xe0] sm:$0xff] %vm51_vm0, %v18237_v3  ;;  %v179_v20 = vld [vmem:[%s18221_s0 + $0x90] sm:$0xff]  ;;  %v180_v21 = vld [vmem:[%s18221_s0 + $0x98] sm:$0xff] }
   0xb   :  { %83 = vst.msk [vmem:[#allocation2 + $0xf0] sm:$0xff] %vm51_vm0, %v18237_v3  ;;  %84 = vst.msk [vmem:[#allocation2 + $0xf8] sm:$0xff] %vm51_vm0, %v18237_v3  ;;  %v181_v22 = vld [vmem:[%s18221_s0 + $0xa0] sm:$0xff]  ;;  %v182_v23 = vld [vmem:[%s18221_s0 + $0xa8] sm:$0xff] }
   0xc   :  { %86 = vst.msk [vmem:[#allocation2 + $0x108] sm:$0xff] %vm51_vm0, %v18237_v3  ;;  %87 = vst.msk [vmem:[#allocation2 + $0x110] sm:$0xff] %vm51_vm0, %v18237_v3  ;;  %v183_v24 = vld [vmem:[%s18221_s0 + $0xb0] sm:$0xff]  ;;  %v290_v25 = vld [vmem:[#allocation2] sm:$0xff] }
   0xd   :  { %89 = vst.msk [vmem:[#allocation2 + $0x120] sm:$0xff] %vm51_vm0, %v18237_v3  ;;  %90 = vst.msk [vmem:[#allocation2 + $0x128] sm:$0xff] %vm51_vm0, %v18237_v3  ;;  %v184_v26 = vld [vmem:[%s18221_s0 + $0xb8] sm:$0xff]  ;;  %357 = vperm.xlu0 %11989, %v290_v25   ;;  %v291_v28 = vld [vmem:[#allocation2 + $0x8] sm:$0xff] }
   0xe   :  { %92 = vst.msk [vmem:[#allocation2 + $0x138] sm:$0xff] %vm51_vm0, %v18237_v3  ;;  %93 = vst.msk [vmem:[#allocation2 + $0x140] sm:$0xff] %vm51_vm0, %v18237_v3  ;;  %v185_v33 = vld [vmem:[%s18221_s0 + $0xc0] sm:$0xff]  ;;  %v186_v34 = vld [vmem:[%s18221_s0 + $0xc8] sm:$0xff] }
   0xf   :  { %95 = vst.msk [vmem:[#allocation2 + $0x150] sm:$0xff] %vm51_vm0, %v18237_v3  ;;  %96 = vst.msk [vmem:[#allocation2 + $0x158] sm:$0xff] %vm51_vm0, %v18237_v3  ;;  %v187_v35 = vld [vmem:[%s18221_s0 + $0xd0] sm:$0xff]  ;;  %v188_v36 = vld [vmem:[%s18221_s0 + $0xd8] sm:$0xff] }
  0x10   :  { %98 = vst.msk [vmem:[#allocation2 + $0x168] sm:$0xff] %vm51_vm0, %v18237_v3  ;;  %99 = vst.msk [vmem:[#allocation2 + $0x170] sm:$0xff] %vm51_vm0, %v18237_v3  ;;  %v189_v37 = vld [vmem:[%s18221_s0 + $0xe0] sm:$0xff]  ;;  %v190_v38 = vld [vmem:[%s18221_s0 + $0xe8] sm:$0xff] }
  0x11   :  { %101 = vst.msk [vmem:[#allocation2 + $0x180] sm:$0xff] %vm51_vm0, %v18237_v3  ;;  %102 = vst.msk [vmem:[#allocation2 + $0x188] sm:$0xff] %vm51_vm0, %v18237_v3  ;;  %362 = vperm.xlu0 %11989, %v291_v28   ;;  %v193_v40 = vld [vmem:[%s18221_s0 + $0x100] sm:$0xff]  ;;  %v194_v42 = vld [vmem:[%s18221_s0 + $0x108] sm:$0xff] }
  0x12   :  { %104 = vst.msk [vmem:[#allocation2 + $0x198] sm:$0xff] %vm51_vm0, %v18237_v3  ;;  %105 = vst.msk [vmem:[#allocation2 + $0x1a0] sm:$0xff] %vm51_vm0, %v18237_v3  ;;  %v195_v43 = vld [vmem:[%s18221_s0 + $0x110] sm:$0xff]  ;;  %v196_v44 = vld [vmem:[%s18221_s0 + $0x118] sm:$0xff] }
  0x13   :  { %107 = vst.msk [vmem:[#allocation2 + $0x1b0] sm:$0xff] %vm51_vm0, %v18237_v3  ;;  %108 = vst.msk [vmem:[#allocation2 + $0x1b8] sm:$0xff] %vm51_vm0, %v18237_v3  ;;  %v197_v46 = vld [vmem:[%s18221_s0 + $0x120] sm:$0xff]  ;;  %v198_v47 = vld [vmem:[%s18221_s0 + $0x128] sm:$0xff] }
  0x14   :  { %110 = vst.msk [vmem:[#allocation2 + $0x1c8] sm:$0xff] %vm51_vm0, %v18237_v3  ;;  %111 = vst.msk [vmem:[#allocation2 + $0x1d0] sm:$0xff] %vm51_vm0, %v18237_v3  ;;  %v199_v48 = vld [vmem:[%s18221_s0 + $0x130] sm:$0xff]  ;;  %v200_v49 = vld [vmem:[%s18221_s0 + $0x138] sm:$0xff] }
  0x15   :  { %113 = vst.msk [vmem:[#allocation2 + $0x1e0] sm:$0xff] %vm51_vm0, %v18237_v3  ;;  %114 = vst.msk [vmem:[#allocation2 + $0x1e8] sm:$0xff] %vm51_vm0, %v18237_v3  ;;  %v201_v50 = vld [vmem:[%s18221_s0 + $0x140] sm:$0xff]  ;;  %v202_v51 = vld [vmem:[%s18221_s0 + $0x148] sm:$0xff] }
  0x16   :  { %116 = vst.msk [vmem:[#allocation2 + $0x1f8] sm:$0xff] %vm51_vm0, %v18237_v3  ;;  %117 = vst.msk [vmem:[#allocation2 + $0x200] sm:$0xff] %vm51_vm0, %v18237_v3  ;;  %v203_v52 = vld [vmem:[%s18221_s0 + $0x150] sm:$0xff]  ;;  %v204_v53 = vld [vmem:[%s18221_s0 + $0x158] sm:$0xff] }
  0x17   :  { %119 = vst.msk [vmem:[#allocation2 + $0x210] sm:$0xff] %vm51_vm0, %v18237_v3  ;;  %120 = vst.msk [vmem:[#allocation2 + $0x218] sm:$0xff] %vm51_vm0, %v18237_v3  ;;  %v205_v54 = vld [vmem:[%s18221_s0 + $0x160] sm:$0xff]  ;;  %v206_v55 = vld [vmem:[%s18221_s0 + $0x168] sm:$0xff] }
  0x18   :  { %122 = vst.msk [vmem:[#allocation2 + $0x228] sm:$0xff] %vm51_vm0, %v18237_v3  ;;  %123 = vst.msk [vmem:[#allocation2 + $0x230] sm:$0xff] %vm51_vm0, %v18237_v3  ;;  %v207_v56 = vld [vmem:[%s18221_s0 + $0x170] sm:$0xff]  ;;  %v208_v57 = vld [vmem:[%s18221_s0 + $0x178] sm:$0xff] }
  0x19   :  { %125 = vst.msk [vmem:[#allocation2 + $0x240] sm:$0xff] %vm51_vm0, %v18237_v3  ;;  %126 = vst.msk [vmem:[#allocation2 + $0x248] sm:$0xff] %vm51_vm0, %v18237_v3  ;;  %v209_v60 = vld [vmem:[%s18221_s0 + $0x180] sm:$0xff]  ;;  %v210_v61 = vld [vmem:[%s18221_s0 + $0x188] sm:$0xff] }
  0x1a   :  { %128 = vst.msk [vmem:[#allocation2 + $0x258] sm:$0xff] %vm51_vm0, %v18237_v3  ;;  %129 = vst.msk [vmem:[#allocation2 + $0x260] sm:$0xff] %vm51_vm0, %v18237_v3  ;;  %v212_v2 = vld [vmem:[%s18221_s0 + $0x198] sm:$0xff] }
  0x1b   :  { %131 = vst.msk [vmem:[#allocation2 + $0x270] sm:$0xff] %vm51_vm0, %v18237_v3  ;;  %132 = vst.msk [vmem:[#allocation2 + $0x278] sm:$0xff] %vm51_vm0, %v18237_v3 }
  0x1c   :  { %134 = vst.msk [vmem:[#allocation2 + $0x288] sm:$0xff] %vm51_vm0, %v18237_v3  ;;  %135 = vst.msk [vmem:[#allocation2 + $0x290] sm:$0xff] %vm51_vm0, %v18237_v3 }
  0x1d   :  { %137 = vst.msk [vmem:[#allocation2 + $0x2a0] sm:$0xff] %vm51_vm0, %v18237_v3  ;;  %138 = vst.msk [vmem:[#allocation2 + $0x2a8] sm:$0xff] %vm51_vm0, %v18237_v3 }
  0x1e   :  { %140 = vst.msk [vmem:[#allocation2 + $0x2b8] sm:$0xff] %vm51_vm0, %v18237_v3  ;;  %141 = vst.msk [vmem:[#allocation2 + $0x2c0] sm:$0xff] %vm51_vm0, %v18237_v3 }
  0x1f   :  { %143 = vst.msk [vmem:[#allocation2 + $0x2d0] sm:$0xff] %vm51_vm0, %v18237_v3  ;;  %144 = vst.msk [vmem:[#allocation2 + $0x2d8] sm:$0xff] %vm51_vm0, %v18237_v3 }
  0x20   :  { %146 = vst.msk [vmem:[#allocation2 + $0x2e8] sm:$0xff] %vm51_vm0, %v18237_v3  ;;  %147 = vst.msk [vmem:[#allocation2 + $0x2f0] sm:$0xff] %vm51_vm0, %v18237_v3 }
  0x21   :  { %149 = vst.msk [vmem:[#allocation2 + $0x300] sm:$0xff] %vm51_vm0, %v18237_v3  ;;  %150 = vst.msk [vmem:[#allocation2 + $0x308] sm:$0xff] %vm51_vm0, %v18237_v3 }
  0x22   :  { %152 = vst.msk [vmem:[#allocation2 + $0x318] sm:$0xff] %vm51_vm0, %v18237_v3  ;;  %153 = vst.msk [vmem:[#allocation2 + $0x320] sm:$0xff] %vm51_vm0, %v18237_v3 }
  0x23   :  { %155 = vst.msk [vmem:[#allocation2 + $0x330] sm:$0xff] %vm51_vm0, %v18237_v3  ;;  %156 = vst.msk [vmem:[#allocation2 + $0x338] sm:$0xff] %vm51_vm0, %v18237_v3 }
  0x24   :  { %158 = vst.msk [vmem:[#allocation2 + $0x348] sm:$0xff] %vm51_vm0, %v18237_v3  ;;  %159 = vst.msk [vmem:[#allocation2 + $0x350] sm:$0xff] %vm51_vm0, %v18237_v3 }
  0x25   :  { %58 = vst.msk [vmem:[#allocation2 + $0x28] sm:$0x3] %vm54_vm1, %v18237_v3  ;;  %55 = vst.msk [vmem:[#allocation2 + $0x10] sm:$0x3] %vm54_vm1, %v18237_v3 }
  0x26   :  { %61 = vst.msk [vmem:[#allocation2 + $0x40] sm:$0x3] %vm54_vm1, %v18237_v3  ;;  %64 = vst.msk [vmem:[#allocation2 + $0x58] sm:$0x3] %vm54_vm1, %v18237_v3 }
  0x27   :  { %67 = vst.msk [vmem:[#allocation2 + $0x70] sm:$0x3] %vm54_vm1, %v18237_v3  ;;  %70 = vst.msk [vmem:[#allocation2 + $0x88] sm:$0x3] %vm54_vm1, %v18237_v3 }
  0x28   :  { %73 = vst.msk [vmem:[#allocation2 + $0xa0] sm:$0x3] %vm54_vm1, %v18237_v3  ;;  %76 = vst.msk [vmem:[#allocation2 + $0xb8] sm:$0x3] %vm54_vm1, %v18237_v3 }
  0x29   :  { %79 = vst.msk [vmem:[#allocation2 + $0xd0] sm:$0x3] %vm54_vm1, %v18237_v3  ;;  %82 = vst.msk [vmem:[#allocation2 + $0xe8] sm:$0x3] %vm54_vm1, %v18237_v3 }
  0x2a   :  { %85 = vst.msk [vmem:[#allocation2 + $0x100] sm:$0x3] %vm54_vm1, %v18237_v3  ;;  %88 = vst.msk [vmem:[#allocation2 + $0x118] sm:$0x3] %vm54_vm1, %v18237_v3 }
  0x2b   :  { %91 = vst.msk [vmem:[#allocation2 + $0x130] sm:$0x3] %vm54_vm1, %v18237_v3  ;;  %94 = vst.msk [vmem:[#allocation2 + $0x148] sm:$0x3] %vm54_vm1, %v18237_v3 }
  0x2c   :  { %97 = vst.msk [vmem:[#allocation2 + $0x160] sm:$0x3] %vm54_vm1, %v18237_v3  ;;  %100 = vst.msk [vmem:[#allocation2 + $0x178] sm:$0x3] %vm54_vm1, %v18237_v3 }
  0x2d   :  { %103 = vst.msk [vmem:[#allocation2 + $0x190] sm:$0x3] %vm54_vm1, %v18237_v3  ;;  %106 = vst.msk [vmem:[#allocation2 + $0x1a8] sm:$0x3] %vm54_vm1, %v18237_v3 }
  0x2e   :  { %109 = vst.msk [vmem:[#allocation2 + $0x1c0] sm:$0x3] %vm54_vm1, %v18237_v3  ;;  %112 = vst.msk [vmem:[#allocation2 + $0x1d8] sm:$0x3] %vm54_vm1, %v18237_v3 }
  0x2f   :  { %115 = vst.msk [vmem:[#allocation2 + $0x1f0] sm:$0x3] %vm54_vm1, %v18237_v3  ;;  %118 = vst.msk [vmem:[#allocation2 + $0x208] sm:$0x3] %vm54_vm1, %v18237_v3 }
  0x30   :  { %121 = vst.msk [vmem:[#allocation2 + $0x220] sm:$0x3] %vm54_vm1, %v18237_v3  ;;  %124 = vst.msk [vmem:[#allocation2 + $0x238] sm:$0x3] %vm54_vm1, %v18237_v3 }
  0x31   :  { %127 = vst.msk [vmem:[#allocation2 + $0x250] sm:$0x3] %vm54_vm1, %v18237_v3  ;;  %130 = vst.msk [vmem:[#allocation2 + $0x268] sm:$0x3] %vm54_vm1, %v18237_v3 }
  0x32   :  { %133 = vst.msk [vmem:[#allocation2 + $0x280] sm:$0x3] %vm54_vm1, %v18237_v3  ;;  %136 = vst.msk [vmem:[#allocation2 + $0x298] sm:$0x3] %vm54_vm1, %v18237_v3 }
  0x33   :  { %139 = vst.msk [vmem:[#allocation2 + $0x2b0] sm:$0x3] %vm54_vm1, %v18237_v3  ;;  %142 = vst.msk [vmem:[#allocation2 + $0x2c8] sm:$0x3] %vm54_vm1, %v18237_v3 }
  0x34   :  { %145 = vst.msk [vmem:[#allocation2 + $0x2e0] sm:$0x3] %vm54_vm1, %v18237_v3  ;;  %148 = vst.msk [vmem:[#allocation2 + $0x2f8] sm:$0x3] %vm54_vm1, %v18237_v3 }
  0x35   :  { %151 = vst.msk [vmem:[#allocation2 + $0x310] sm:$0x3] %vm54_vm1, %v18237_v3  ;;  %154 = vst.msk [vmem:[#allocation2 + $0x328] sm:$0x3] %vm54_vm1, %v18237_v3 }
  0x36   :  { %157 = vst.msk [vmem:[#allocation2 + $0x340] sm:$0x3] %vm54_vm1, %v18237_v3  ;;  %160 = vst.msk [vmem:[#allocation2 + $0x358] sm:$0x3] %vm54_vm1, %v18237_v3 }
  0x37   :  { %226 = vst.msk [vmem:[#allocation2 + $0x19] sm:$0xff] %vm51_vm0, %v12187_v0  ;;  %227 = vst.msk [vmem:[#allocation2 + $0x21] sm:$0xff] %vm51_vm0, %v12192_v1  ;;  %v211_v1 = vld [vmem:[%s18221_s0 + $0x190] sm:$0xff] }
  0x38   :  { %228 = vst.msk [vmem:[#allocation2 + $0x31] sm:$0xff] %vm51_vm0, %v163_v4  ;;  %229 = vst.msk [vmem:[#allocation2 + $0x39] sm:$0xff] %vm51_vm0, %v164_v5  ;;  %v213_v4 = vld [vmem:[%s18221_s0 + $0x1a0] sm:$0xff]  ;;  %v214_v5 = vld [vmem:[%s18221_s0 + $0x1a8] sm:$0xff] }
  0x39   :  { %230 = vst.msk [vmem:[#allocation2 + $0x49] sm:$0xff] %vm51_vm0, %v165_v6  ;;  %231 = vst.msk [vmem:[#allocation2 + $0x51] sm:$0xff] %vm51_vm0, %v166_v7  ;;  %v215_v6 = vld [vmem:[%s18221_s0 + $0x1b0] sm:$0xff]  ;;  %v216_v7 = vld [vmem:[%s18221_s0 + $0x1b8] sm:$0xff] }
  0x3a   :  { %232 = vst.msk [vmem:[#allocation2 + $0x61] sm:$0xff] %vm51_vm0, %v167_v8  ;;  %233 = vst.msk [vmem:[#allocation2 + $0x69] sm:$0xff] %vm51_vm0, %v168_v9  ;;  %v217_v9 = vld [vmem:[%s18221_s0 + $0x1c0] sm:$0xff] }
  0x3b   :  { %234 = vst.msk [vmem:[#allocation2 + $0x79] sm:$0xff] %vm51_vm0, %v169_v10  ;;  %235 = vst.msk [vmem:[#allocation2 + $0x81] sm:$0xff] %vm51_vm0, %v170_v11  ;;  %v218_v10 = vld [vmem:[%s18221_s0 + $0x1c8] sm:$0xff]  ;;  %v219_v11 = vld [vmem:[%s18221_s0 + $0x1d0] sm:$0xff] }
  0x3c   :  { %236 = vst.msk [vmem:[#allocation2 + $0x91] sm:$0xff] %vm51_vm0, %v171_v12  ;;  %237 = vst.msk [vmem:[#allocation2 + $0x99] sm:$0xff] %vm51_vm0, %v172_v13  ;;  %v220_v12 = vld [vmem:[%s18221_s0 + $0x1d8] sm:$0xff]  ;;  %v221_v13 = vld [vmem:[%s18221_s0 + $0x1e0] sm:$0xff] }
  0x3d   :  { %238 = vst.msk [vmem:[#allocation2 + $0xa9] sm:$0xff] %vm51_vm0, %v173_v14  ;;  %239 = vst.msk [vmem:[#allocation2 + $0xb1] sm:$0xff] %vm51_vm0, %v174_v15  ;;  %v222_v14 = vld [vmem:[%s18221_s0 + $0x1e8] sm:$0xff] }
  0x3e   :  { %240 = vst.msk [vmem:[#allocation2 + $0xc1] sm:$0xff] %vm51_vm0, %v175_v16  ;;  %241 = vst.msk [vmem:[#allocation2 + $0xc9] sm:$0xff] %vm51_vm0, %v176_v17  ;;  %v292_v27 = vld [vmem:[#allocation2 + $0x18] sm:$0xff]  ;;  %v293_v29 = vld [vmem:[#allocation2 + $0x20] sm:$0xff] }
  0x3f   :  { %242 = vst.msk [vmem:[#allocation2 + $0xd9] sm:$0xff] %vm51_vm0, %v177_v18  ;;  %243 = vst.msk [vmem:[#allocation2 + $0xe1] sm:$0xff] %vm51_vm0, %v178_v19  ;;  %367 = vperm.xlu1 %11990, %v292_v27   ;;  %v294_v30 = vld [vmem:[#allocation2 + $0x30] sm:$0xff]  ;;  %v295_v31 = vld [vmem:[#allocation2 + $0x38] sm:$0xff] }
  0x40   :  { %244 = vst.msk [vmem:[#allocation2 + $0xf1] sm:$0xff] %vm51_vm0, %v179_v20  ;;  %245 = vst.msk [vmem:[#allocation2 + $0xf9] sm:$0xff] %vm51_vm0, %v180_v21  ;;  %v296_v32 = vld [vmem:[#allocation2 + $0x48] sm:$0xff]  ;;  %377 = vperm.xlu0 %11989, %v294_v30   ;;  %v297_v39 = vld [vmem:[#allocation2 + $0x50] sm:$0xff] }
  0x41   :  { %246 = vst.msk [vmem:[#allocation2 + $0x109] sm:$0xff] %vm51_vm0, %v181_v22  ;;  %247 = vst.msk [vmem:[#allocation2 + $0x111] sm:$0xff] %vm51_vm0, %v182_v23  ;;  %v298_v41 = vld [vmem:[#allocation2 + $0x60] sm:$0xff]  ;;  %v299_v45 = vld [vmem:[#allocation2 + $0x68] sm:$0xff] }
  0x42   :  { %248 = vst.msk [vmem:[#allocation2 + $0x121] sm:$0xff] %vm51_vm0, %v183_v24  ;;  %249 = vst.msk [vmem:[#allocation2 + $0x129] sm:$0xff] %vm51_vm0, %v184_v26  ;;  %v300_v58 = vld [vmem:[#allocation2 + $0x78] sm:$0xff]  ;;  %v301_v59 = vld [vmem:[#allocation2 + $0x80] sm:$0xff] }
  0x43   :  { %372 = vperm.xlu1 %11990, %v293_v29   ;;  %250 = vst.msk [vmem:[#allocation2 + $0x139] sm:$0xff] %vm51_vm0, %v185_v33  ;;  %251 = vst.msk [vmem:[#allocation2 + $0x141] sm:$0xff] %vm51_vm0, %v186_v34  ;;  %v302_v62 = vld [vmem:[#allocation2 + $0x90] sm:$0xff]  ;;  %v303_v63 = vld [vmem:[#allocation2 + $0x98] sm:$0xff] }
  0x44   :  { %252 = vst.msk [vmem:[#allocation2 + $0x151] sm:$0xff] %vm51_vm0, %v187_v35  ;;  %253 = vst.msk [vmem:[#allocation2 + $0x159] sm:$0xff] %vm51_vm0, %v188_v36  ;;  %387 = vperm.xlu0 %11989, %v296_v32   ;;  %v304_v0 = vld [vmem:[#allocation2 + $0xa8] sm:$0xff]  ;;  %v305_v8 = vld [vmem:[#allocation2 + $0xb0] sm:$0xff] }
  0x45   :  { %254 = vst.msk [vmem:[#allocation2 + $0x169] sm:$0xff] %vm51_vm0, %v189_v37  ;;  %255 = vst.msk [vmem:[#allocation2 + $0x171] sm:$0xff] %vm51_vm0, %v190_v38  ;;  %v306_v15 = vld [vmem:[#allocation2 + $0xc0] sm:$0xff]  ;;  %v307_v16 = vld [vmem:[#allocation2 + $0xc8] sm:$0xff] }
  0x46   :  { %258 = vst.msk [vmem:[#allocation2 + $0x1c9] sm:$0xff] %vm51_vm0, %v193_v40  ;;  %259 = vst.msk [vmem:[#allocation2 + $0x1d1] sm:$0xff] %vm51_vm0, %v194_v42  ;;  %v308_v17 = vld [vmem:[#allocation2 + $0xd8] sm:$0xff]  ;;  %v309_v18 = vld [vmem:[#allocation2 + $0xe0] sm:$0xff] }
  0x47   :  { %382 = vperm.xlu1 %11990, %v295_v31   ;;  %260 = vst.msk [vmem:[#allocation2 + $0x1e1] sm:$0xff] %vm51_vm0, %v195_v43  ;;  %261 = vst.msk [vmem:[#allocation2 + $0x1e9] sm:$0xff] %vm51_vm0, %v196_v44  ;;  %v310_v19 = vld [vmem:[#allocation2 + $0xf0] sm:$0xff]  ;;  %v311_v20 = vld [vmem:[#allocation2 + $0xf8] sm:$0xff] }
  0x48   :  { %262 = vst.msk [vmem:[#allocation2 + $0x1f9] sm:$0xff] %vm51_vm0, %v197_v46  ;;  %263 = vst.msk [vmem:[#allocation2 + $0x201] sm:$0xff] %vm51_vm0, %v198_v47  ;;  %397 = vperm.xlu0 %11989, %v298_v41  }
  0x49   :  { %264 = vst.msk [vmem:[#allocation2 + $0x211] sm:$0xff] %vm51_vm0, %v199_v48  ;;  %265 = vst.msk [vmem:[#allocation2 + $0x219] sm:$0xff] %vm51_vm0, %v200_v49 }
  0x4a   :  { %266 = vst.msk [vmem:[#allocation2 + $0x229] sm:$0xff] %vm51_vm0, %v201_v50  ;;  %267 = vst.msk [vmem:[#allocation2 + $0x231] sm:$0xff] %vm51_vm0, %v202_v51 }
  0x4b   :  { %392 = vperm.xlu1 %11990, %v297_v39   ;;  %268 = vst.msk [vmem:[#allocation2 + $0x241] sm:$0xff] %vm51_vm0, %v203_v52  ;;  %269 = vst.msk [vmem:[#allocation2 + $0x249] sm:$0xff] %vm51_vm0, %v204_v53 }
  0x4c   :  { %270 = vst.msk [vmem:[#allocation2 + $0x259] sm:$0xff] %vm51_vm0, %v205_v54  ;;  %271 = vst.msk [vmem:[#allocation2 + $0x261] sm:$0xff] %vm51_vm0, %v206_v55  ;;  %407 = vperm.xlu0 %11989, %v300_v58  }
  0x4d   :  { %272 = vst.msk [vmem:[#allocation2 + $0x271] sm:$0xff] %vm51_vm0, %v207_v56  ;;  %273 = vst.msk [vmem:[#allocation2 + $0x279] sm:$0xff] %vm51_vm0, %v208_v57 }
  0x4e   :  { %274 = vst.msk [vmem:[#allocation2 + $0x289] sm:$0xff] %vm51_vm0, %v209_v60  ;;  %275 = vst.msk [vmem:[#allocation2 + $0x291] sm:$0xff] %vm51_vm0, %v210_v61 }
  0x4f   :  { %402 = vperm.xlu1 %11990, %v299_v45   ;;  %276 = vst.msk [vmem:[#allocation2 + $0x2a1] sm:$0xff] %vm51_vm0, %v211_v1  ;;  %277 = vst.msk [vmem:[#allocation2 + $0x2a9] sm:$0xff] %vm51_vm0, %v212_v2 }
  0x50   :  { %417 = vperm.xlu0 %11989, %v302_v62   ;;  %278 = vst.msk [vmem:[#allocation2 + $0x2b9] sm:$0xff] %vm51_vm0, %v213_v4  ;;  %279 = vst.msk [vmem:[#allocation2 + $0x2c1] sm:$0xff] %vm51_vm0, %v214_v5 }
  0x51   :  { %280 = vst.msk [vmem:[#allocation2 + $0x2d1] sm:$0xff] %vm51_vm0, %v215_v6  ;;  %281 = vst.msk [vmem:[#allocation2 + $0x2d9] sm:$0xff] %vm51_vm0, %v216_v7 }
  0x52   :  { %282 = vst.msk [vmem:[#allocation2 + $0x2e9] sm:$0xff] %vm51_vm0, %v217_v9  ;;  %283 = vst.msk [vmem:[#allocation2 + $0x2f1] sm:$0xff] %vm51_vm0, %v218_v10 }
  0x53   :  { %412 = vperm.xlu1 %11990, %v301_v59   ;;  %284 = vst.msk [vmem:[#allocation2 + $0x301] sm:$0xff] %vm51_vm0, %v219_v11  ;;  %285 = vst.msk [vmem:[#allocation2 + $0x309] sm:$0xff] %vm51_vm0, %v220_v12 }
  0x54   :  { %427 = vperm.xlu0 %11989, %v304_v0   ;;  %286 = vst.msk [vmem:[#allocation2 + $0x319] sm:$0xff] %vm51_vm0, %v221_v13  ;;  %287 = vst.msk [vmem:[#allocation2 + $0x321] sm:$0xff] %vm51_vm0, %v222_v14 }
  0x57   :  { %422 = vperm.xlu1 %11990, %v303_v63  }
  0x58   :  { %437 = vperm.xlu0 %11989, %v306_v15  }
  0x5b   :  { %432 = vperm.xlu1 %11990, %v305_v8  }
  0x5c   :  { %447 = vperm.xlu0 %11989, %v308_v17  }
  0x5f   :  { %442 = vperm.xlu1 %11990, %v307_v16  }
  0x60   :  { %457 = vperm.xlu0 %11989, %v310_v19  }
  0x63   :  { %452 = vperm.xlu1 %11990, %v309_v18  }
  0x64   :  { %20 = vsyncpa [#allocation8], 0  ;;  %v312_v21 = vld [vmem:[#allocation2 + $0x108] sm:$0xff]  ;;  %v313_v22 = vld [vmem:[#allocation2 + $0x110] sm:$0xff]  ;;  %vm7781_vm2 = vcmask 130048   ;;  %vm7783_vm3 = vcmask 123904  }
  0x65   :  { %467 = vperm.xlu0 %11989, %v312_v21   ;;  %v314_v23 = vld [vmem:[#allocation2 + $0x120] sm:$0xff]  ;;  %v315_v24 = vld [vmem:[#allocation2 + $0x128] sm:$0xff]  ;;  %v316_v25 = vld [vmem:[#allocation2 + $0x138] sm:$0xff]  ;;  %vm8463_vm4 = vcmask 1041409   ;;  %vm8465_vm5 = vcmask 1042434   ;;  %vm8467_vm6 = vcmask 1043459  }
  0x66   :  { %v317_v26 = vld [vmem:[#allocation2 + $0x140] sm:$0xff]  ;;  %v318_v27 = vld [vmem:[#allocation2 + $0x150] sm:$0xff]  ;;  %v319_v28 = vld [vmem:[#allocation2 + $0x158] sm:$0xff]  ;;  %vm8469_vm7 = vcmask 1044484   ;;  %vm8471_vm8 = vcmask 1045509   ;;  %vm8473_vm9 = vcmask 1046534  }
  0x67   :  { %462 = vperm.xlu1 %11990, %v311_v20   ;;  %v320_v29 = vld [vmem:[#allocation2 + $0x168] sm:$0xff]  ;;  %v321_v30 = vld [vmem:[#allocation2 + $0x170] sm:$0xff]  ;;  %v323_v32 = vld [vmem:[#allocation2 + $0x1b8] sm:$0xff]  ;;  %vm8475_vm10 = vcmask 1047559   ;;  %s12095_s26 = smov 32   ;;  %s12096_s27 = smov 48  }
  0x68   :  { %v322_v31 = vld [vmem:[#allocation2 + $0x1b0] sm:$0xff]  ;;  %v324_v33 = vld [vmem:[#allocation2 + $0x1c8] sm:$0xff]  ;;  %v326_v35 = vld [vmem:[#allocation2 + $0x1e0] sm:$0xff]  ;;  %s12097_s28 = smov 64   ;;  %s12098_s29 = smov 80   ;;  %vm8727_vm11 = vcmask 261248  }
  0x69   :  { %477 = vperm.xlu0 %11989, %v314_v23   ;;  %v325_v34 = vld [vmem:[#allocation2 + $0x1d0] sm:$0xff]  ;;  %v327_v36 = vld [vmem:[#allocation2 + $0x1e8] sm:$0xff]  ;;  %v328_v37 = vld [vmem:[#allocation2 + $0x1f8] sm:$0xff]  ;;  %s12099_s30 = smov 96   ;;  %s12100_s16 = smov 112   ;;  %vm8824_vm12 = vcmask 392448  }
  0x6a   :  { %v329_v38 = vld [vmem:[#allocation2 + $0x200] sm:$0xff]  ;;  %v330_v39 = vld [vmem:[#allocation2 + $0x210] sm:$0xff]  ;;  %v331_v40 = vld [vmem:[#allocation2 + $0x218] sm:$0xff]  ;;  %vm8921_vm13 = vcmask 523648   ;;  %vm9018_vm14 = vcmask 654848   ;;  %vm9115_vm15 = vcmask 786048  }
  0x6b   :  { %472 = vperm.xlu1 %11990, %v313_v22   ;;  %v332_v41 = vld [vmem:[#allocation2 + $0x228] sm:$0xff]  ;;  %v333_v42 = vld [vmem:[#allocation2 + $0x230] sm:$0xff]  ;;  %v334_v43 = vld [vmem:[#allocation2 + $0x240] sm:$0xff]  ;;  %vm9310_vm1 = vcmask 1048448  }
  0x6c   :  { %v335_v44 = vld [vmem:[#allocation2 + $0x248] sm:$0xff]  ;;  %v336_v45 = vld [vmem:[#allocation2 + $0x258] sm:$0xff]  ;;  %v337_v46 = vld [vmem:[#allocation2 + $0x260] sm:$0xff] }
  0x6d   :  { %487 = vperm.xlu0 %11989, %v316_v25   ;;  %v338_v47 = vld [vmem:[#allocation2 + $0x270] sm:$0xff]  ;;  %v339_v48 = vld [vmem:[#allocation2 + $0x278] sm:$0xff]  ;;  %v340_v49 = vld [vmem:[#allocation2 + $0x288] sm:$0xff] }
  0x6e   :  { %v341_v50 = vld [vmem:[#allocation2 + $0x290] sm:$0xff]  ;;  %v342_v51 = vld [vmem:[#allocation2 + $0x2a0] sm:$0xff]  ;;  %v343_v52 = vld [vmem:[#allocation2 + $0x2a8] sm:$0xff] }
  0x6f   :  { %482 = vperm.xlu1 %11990, %v315_v24   ;;  %v344_v53 = vld [vmem:[#allocation2 + $0x2b8] sm:$0xff]  ;;  %v345_v54 = vld [vmem:[#allocation2 + $0x2c0] sm:$0xff]  ;;  %v346_v55 = vld [vmem:[#allocation2 + $0x2d0] sm:$0xff] }
  0x70   :  { %v347_v56 = vld [vmem:[#allocation2 + $0x2d8] sm:$0xff]  ;;  %v348_v57 = vld [vmem:[#allocation2 + $0x2e8] sm:$0xff]  ;;  %v349_v58 = vld [vmem:[#allocation2 + $0x2f0] sm:$0xff] }
  0x71   :  { %497 = vperm.xlu0 %11989, %v318_v27   ;;  %v350_v59 = vld [vmem:[#allocation2 + $0x300] sm:$0xff]  ;;  %v351_v60 = vld [vmem:[#allocation2 + $0x308] sm:$0xff]  ;;  %v352_v61 = vld [vmem:[#allocation2 + $0x318] sm:$0xff] }
  0x72   :  { %v353_v62 = vld [vmem:[#allocation2 + $0x320] sm:$0xff]  ;;  %v808_v0 = vld [vmem:[#allocation2 + $0x9] sm:$0xff]  ;;  %v811_v8 = vld [vmem:[#allocation2 + $0x31] sm:$0xff] }
  0x73   :  { %492 = vperm.xlu1 %11990, %v317_v26   ;;  %v807_v63 = vld [vmem:[#allocation2 + $0x1] sm:$0xff]  ;;  %v809_v4 = vld [vmem:[#allocation2 + $0x19] sm:$0xff]  ;;  %v813_v12 = vld [vmem:[#allocation2 + $0x49] sm:$0xff] }
  0x74   :  { %v810_v5 = vld [vmem:[#allocation2 + $0x21] sm:$0xff]  ;;  %v812_v9 = vld [vmem:[#allocation2 + $0x39] sm:$0xff]  ;;  %v814_v13 = vld [vmem:[#allocation2 + $0x51] sm:$0xff] }
  0x75   :  { %507 = vperm.xlu0 %11989, %v320_v29   ;;  %v815_v16 = vld [vmem:[#allocation2 + $0x61] sm:$0xff]  ;;  %v816_v17 = vld [vmem:[#allocation2 + $0x69] sm:$0xff]  ;;  %v817_v20 = vld [vmem:[#allocation2 + $0x79] sm:$0xff] }
  0x76   :  { %v818_v21 = vld [vmem:[#allocation2 + $0x81] sm:$0xff]  ;;  %v819_v24 = vld [vmem:[#allocation2 + $0x91] sm:$0xff]  ;;  %v820_v25 = vld [vmem:[#allocation2 + $0x99] sm:$0xff] }
  0x77   :  { %502 = vperm.xlu1 %11990, %v319_v28   ;;  %v821_v28 = vld [vmem:[#allocation2 + $0xa9] sm:$0xff]  ;;  %v822_v29 = vld [vmem:[#allocation2 + $0xb1] sm:$0xff]  ;;  %v864_v3 = vld [vmem:[#allocation2 + $0x2d9] sm:$0xff] }
  0x79   :  { %517 = vperm.xlu0 %11989, %v322_v31  }
  0x7b   :  { %512 = vperm.xlu1 %11990, %v321_v30  }
  0x7d   :  { %527 = vperm.xlu0 %11989, %v324_v33   ;;  %v824_v33 = vld [vmem:[#allocation2 + $0xc9] sm:$0xff] }
  0x7f   :  { %522 = vperm.xlu1 %11990, %v323_v32   ;;  %v823_v32 = vld [vmem:[#allocation2 + $0xc1] sm:$0xff] }
  0x81   :  { %537 = vperm.xlu0 %11989, %v326_v35  }
  0x83   :  { %532 = vperm.xlu1 %11990, %v325_v34  }
  0x85   :  { %547 = vperm.xlu0 %11989, %v328_v37   ;;  %v826_v37 = vld [vmem:[#allocation2 + $0xe1] sm:$0xff] }
  0x87   :  { %542 = vperm.xlu1 %11990, %v327_v36   ;;  %v825_v36 = vld [vmem:[#allocation2 + $0xd9] sm:$0xff] }
  0x89   :  { %557 = vperm.xlu0 %11989, %v330_v39  }
  0x8b   :  { %552 = vperm.xlu1 %11990, %v329_v38  }
  0x8c   :  { %v12646_v1 = vpop.permute.xlu0 %357 }
  0x8d   :  { %567 = vperm.xlu0 %11989, %v332_v41   ;;  %v828_v41 = vld [vmem:[#allocation2 + $0xf9] sm:$0xff] }
  0x8f   :  { %562 = vperm.xlu1 %11990, %v331_v40   ;;  %v827_v40 = vld [vmem:[#allocation2 + $0xf1] sm:$0xff] }
  0x90   :  { %v12650_v6 = vpop.permute.xlu0 %362 }
  0x91   :  { %577 = vperm.xlu0 %11989, %v334_v43  }
  0x93   :  { %572 = vperm.xlu1 %11990, %v333_v42  }
  0x95   :  { %587 = vperm.xlu0 %11989, %v336_v45   ;;  %v830_v45 = vld [vmem:[#allocation2 + $0x111] sm:$0xff] }
  0x97   :  { %582 = vperm.xlu1 %11990, %v335_v44   ;;  %v829_v44 = vld [vmem:[#allocation2 + $0x109] sm:$0xff] }
  0x99   :  { %597 = vperm.xlu0 %11989, %v338_v47  }
  0x9b   :  { %592 = vperm.xlu1 %11990, %v337_v46  }
  0x9d   :  { %607 = vperm.xlu0 %11989, %v340_v49   ;;  %v832_v49 = vld [vmem:[#allocation2 + $0x129] sm:$0xff] }
  0x9f   :  { %602 = vperm.xlu1 %11990, %v339_v48   ;;  %v831_v48 = vld [vmem:[#allocation2 + $0x121] sm:$0xff] }
  0xa1   :  { %617 = vperm.xlu0 %11989, %v342_v51  }
  0xa3   :  { %612 = vperm.xlu1 %11990, %v341_v50  }
  0xa5   :  { %627 = vperm.xlu0 %11989, %v344_v53   ;;  %v834_v53 = vld [vmem:[#allocation2 + $0x141] sm:$0xff] }
  0xa7   :  { %622 = vperm.xlu1 %11990, %v343_v52   ;;  %v833_v52 = vld [vmem:[#allocation2 + $0x139] sm:$0xff] }
  0xa9   :  { %637 = vperm.xlu0 %11989, %v346_v55  }
  0xab   :  { %632 = vperm.xlu1 %11990, %v345_v54  }
  0xad   :  { %647 = vperm.xlu0 %11989, %v348_v57   ;;  %v836_v57 = vld [vmem:[#allocation2 + $0x159] sm:$0xff] }
  0xaf   :  { %642 = vperm.xlu1 %11990, %v347_v56   ;;  %v835_v56 = vld [vmem:[#allocation2 + $0x151] sm:$0xff] }
  0xb1   :  { %657 = vperm.xlu0 %11989, %v350_v59  }
  0xb3   :  { %652 = vperm.xlu1 %11990, %v349_v58  }
  0xb5   :  { %667 = vperm.xlu0 %11989, %v352_v61   ;;  %v838_v61 = vld [vmem:[#allocation2 + $0x171] sm:$0xff] }
  0xb7   :  { %662 = vperm.xlu1 %11990, %v351_v60   ;;  %v837_v60 = vld [vmem:[#allocation2 + $0x169] sm:$0xff] }
  0xb9   :  { %874 = vperm.xlu0 %11989, %v807_v63  }
  0xbb   :  { %672 = vperm.xlu1 %11990, %v353_v62  }
  0xbd   :  { %884 = vperm.xlu0 %11989, %v809_v4   ;;  %v840_v4 = vld [vmem:[#allocation2 + $0x1b9] sm:$0xff] }
  0xbe   :  { %v12648_v2 = vpop.permute.xlu1 %367 }
  0xbf   :  { %879 = vperm.xlu1 %11990, %v808_v0   ;;  %v12654_v10 = vpop.permute.xlu0 %377  ;;  %v839_v0 = vld [vmem:[#allocation2 + $0x1b1] sm:$0xff] }
  0xc1   :  { %894 = vperm.xlu0 %11989, %v811_v8  }
  0xc2   :  { %v12652_v7 = vpop.permute.xlu1 %372 }
  0xc3   :  { %889 = vperm.xlu1 %11990, %v810_v5   ;;  %v12658_v14 = vpop.permute.xlu0 %387 }
  0xc5   :  { %904 = vperm.xlu0 %11989, %v813_v12   ;;  %v842_v12 = vld [vmem:[#allocation2 + $0x1d1] sm:$0xff] }
  0xc6   :  { %v12656_v11 = vpop.permute.xlu1 %382 }
  0xc7   :  { %899 = vperm.xlu1 %11990, %v812_v9   ;;  %v12662_v18 = vpop.permute.xlu0 %397  ;;  %v841_v9 = vld [vmem:[#allocation2 + $0x1c9] sm:$0xff] }
  0xc9   :  { %914 = vperm.xlu0 %11989, %v815_v16  }
  0xca   :  { %v12660_v15 = vpop.permute.xlu1 %392 }
  0xcb   :  { %909 = vperm.xlu1 %11990, %v814_v13   ;;  %v12666_v22 = vpop.permute.xlu0 %407 }
  0xcd   :  { %924 = vperm.xlu0 %11989, %v817_v20   ;;  %v844_v20 = vld [vmem:[#allocation2 + $0x1e9] sm:$0xff] }
  0xce   :  { %v12664_v19 = vpop.permute.xlu1 %402 }
  0xcf   :  { %919 = vperm.xlu1 %11990, %v816_v17   ;;  %v12670_v26 = vpop.permute.xlu0 %417  ;;  %v843_v17 = vld [vmem:[#allocation2 + $0x1e1] sm:$0xff] }
  0xd1   :  { %934 = vperm.xlu0 %11989, %v819_v24  }
  0xd2   :  { %v12668_v23 = vpop.permute.xlu1 %412 }
  0xd3   :  { %929 = vperm.xlu1 %11990, %v818_v21   ;;  %v12674_v30 = vpop.permute.xlu0 %427 }
  0xd5   :  { %944 = vperm.xlu0 %11989, %v821_v28   ;;  %v846_v28 = vld [vmem:[#allocation2 + $0x201] sm:$0xff] }
  0xd6   :  { %v12672_v27 = vpop.permute.xlu1 %422 }
  0xd7   :  { %939 = vperm.xlu1 %11990, %v820_v25   ;;  %v12678_v34 = vpop.permute.xlu0 %437  ;;  %v845_v25 = vld [vmem:[#allocation2 + $0x1f9] sm:$0xff] }
  0xd9   :  { %954 = vperm.xlu0 %11989, %v823_v32  }
  0xda   :  { %v12676_v31 = vpop.permute.xlu1 %432 }
  0xdb   :  { %949 = vperm.xlu1 %11990, %v822_v29   ;;  %v12682_v38 = vpop.permute.xlu0 %447 }
  0xdd   :  { %964 = vperm.xlu0 %11989, %v825_v36   ;;  %v848_v36 = vld [vmem:[#allocation2 + $0x219] sm:$0xff] }
  0xde   :  { %v12680_v35 = vpop.permute.xlu1 %442 }
  0xdf   :  { %959 = vperm.xlu1 %11990, %v824_v33   ;;  %v12686_v42 = vpop.permute.xlu0 %457  ;;  %v847_v33 = vld [vmem:[#allocation2 + $0x211] sm:$0xff] }
  0xe1   :  { %974 = vperm.xlu0 %11989, %v827_v40  }
  0xe2   :  { %v12684_v39 = vpop.permute.xlu1 %452 }
  0xe3   :  { %969 = vperm.xlu1 %11990, %v826_v37  }
  0xe4   :  { %v12690_v46 = vpop.permute.xlu0 %467 }
  0xe5   :  { %984 = vperm.xlu0 %11989, %v829_v44   ;;  %v850_v44 = vld [vmem:[#allocation2 + $0x231] sm:$0xff] }
  0xe6   :  { %v12688_v43 = vpop.permute.xlu1 %462 }
  0xe7   :  { %979 = vperm.xlu1 %11990, %v828_v41   ;;  %v849_v41 = vld [vmem:[#allocation2 + $0x229] sm:$0xff] }
  0xe8   :  { %v12694_v50 = vpop.permute.xlu0 %477 }
  0xe9   :  { %994 = vperm.xlu0 %11989, %v831_v48  }
  0xea   :  { %v12692_v47 = vpop.permute.xlu1 %472 }
  0xeb   :  { %989 = vperm.xlu1 %11990, %v830_v45  }
  0xec   :  { %v12698_v54 = vpop.permute.xlu0 %487 }
  0xed   :  { %1004 = vperm.xlu0 %11989, %v833_v52   ;;  %v852_v52 = vld [vmem:[#allocation2 + $0x249] sm:$0xff] }
  0xee   :  { %v12696_v51 = vpop.permute.xlu1 %482 }
  0xef   :  { %999 = vperm.xlu1 %11990, %v832_v49   ;;  %v851_v49 = vld [vmem:[#allocation2 + $0x241] sm:$0xff] }
  0xf0   :  { %v12702_v58 = vpop.permute.xlu0 %497 }
  0xf1   :  { %1014 = vperm.xlu0 %11989, %v835_v56  }
  0xf2   :  { %v12700_v55 = vpop.permute.xlu1 %492 }
  0xf3   :  { %1009 = vperm.xlu1 %11990, %v834_v53  }
  0xf4   :  { %v12706_v62 = vpop.permute.xlu0 %507 }
  0xf5   :  { %1024 = vperm.xlu0 %11989, %v837_v60   ;;  %v854_v60 = vld [vmem:[#allocation2 + $0x261] sm:$0xff] }
  0xf6   :  { %v12704_v59 = vpop.permute.xlu1 %502 }
  0xf7   :  { %1019 = vperm.xlu1 %11990, %v836_v57   ;;  %v853_v57 = vld [vmem:[#allocation2 + $0x259] sm:$0xff] }
  0xf8   :  { %v12710_v5 = vpop.permute.xlu0 %517 }
  0xf9   :  { %1034 = vperm.xlu0 %11989, %v839_v0  }
  0xfa   :  { %v12708_v63 = vpop.permute.xlu1 %512 }
  0xfb   :  { %1029 = vperm.xlu1 %11990, %v838_v61  }
  0xfc   :  { %v12714_v13 = vpop.permute.xlu0 %527 }
  0xfd   :  { %1044 = vperm.xlu0 %11989, %v841_v9   ;;  %v856_v9 = vld [vmem:[#allocation2 + $0x279] sm:$0xff] }
  0xfe   :  { %v12712_v8 = vpop.permute.xlu1 %522 }
  0xff   :  { %1039 = vperm.xlu1 %11990, %v840_v4   ;;  %v855_v4 = vld [vmem:[#allocation2 + $0x271] sm:$0xff] }
 0x100   :  { %v12718_v21 = vpop.permute.xlu0 %537 }
 0x101   :  { %1054 = vperm.xlu0 %11989, %v843_v17  }
 0x102   :  { %v12716_v16 = vpop.permute.xlu1 %532 }
 0x103   :  { %1049 = vperm.xlu1 %11990, %v842_v12  }
 0x104   :  { %v12722_v29 = vpop.permute.xlu0 %547 }
 0x105   :  { %1064 = vperm.xlu0 %11989, %v845_v25   ;;  %v858_v25 = vld [vmem:[#allocation2 + $0x291] sm:$0xff] }
 0x106   :  { %v12720_v24 = vpop.permute.xlu1 %542 }
 0x107   :  { %1059 = vperm.xlu1 %11990, %v844_v20   ;;  %v857_v20 = vld [vmem:[#allocation2 + $0x289] sm:$0xff] }
 0x108   :  { %v12726_v37 = vpop.permute.xlu0 %557 }
 0x109   :  { %1074 = vperm.xlu0 %11989, %v847_v33  }
 0x10a   :  { %v12724_v32 = vpop.permute.xlu1 %552 }
 0x10b   :  { %1069 = vperm.xlu1 %11990, %v846_v28  }
 0x10c   :  { %v12730_v45 = vpop.permute.xlu0 %567 }
 0x10d   :  { %1084 = vperm.xlu0 %11989, %v849_v41   ;;  %v860_v41 = vld [vmem:[#allocation2 + $0x2a9] sm:$0xff] }
 0x10e   :  { %v12728_v40 = vpop.permute.xlu1 %562 }
 0x10f   :  { %1079 = vperm.xlu1 %11990, %v848_v36   ;;  %v859_v36 = vld [vmem:[#allocation2 + $0x2a1] sm:$0xff] }
 0x110   :  { %v12734_v53 = vpop.permute.xlu0 %577 }
 0x111   :  { %1094 = vperm.xlu0 %11989, %v851_v49  }
 0x112   :  { %v12732_v48 = vpop.permute.xlu1 %572 }
 0x113   :  { %1089 = vperm.xlu1 %11990, %v850_v44  }
 0x114   :  { %v12738_v61 = vpop.permute.xlu0 %587 }
 0x115   :  { %1104 = vperm.xlu0 %11989, %v853_v57   ;;  %v862_v57 = vld [vmem:[#allocation2 + $0x2c1] sm:$0xff] }
 0x116   :  { %v12736_v56 = vpop.permute.xlu1 %582 }
 0x117   :  { %1099 = vperm.xlu1 %11990, %v852_v52   ;;  %v861_v52 = vld [vmem:[#allocation2 + $0x2b9] sm:$0xff] }
 0x118   :  { %v12742_v12 = vpop.permute.xlu0 %597 }
 0x119   :  { %1114 = vperm.xlu0 %11989, %v855_v4  }
 0x11a   :  { %v12740_v0 = vpop.permute.xlu1 %592 }
 0x11b   :  { %1109 = vperm.xlu1 %11990, %v854_v60  }
 0x11c   :  { %v12746_v28 = vpop.permute.xlu0 %607 }
 0x11d   :  { %1124 = vperm.xlu0 %11989, %v857_v20  }
 0x11e   :  { %v12744_v17 = vpop.permute.xlu1 %602 }
 0x11f   :  { %1119 = vperm.xlu1 %11990, %v856_v9   ;;  %v863_v9 = vld [vmem:[#allocation2 + $0x2d1] sm:$0xff] }
 0x120   :  { %v12750_v44 = vpop.permute.xlu0 %617 }
 0x121   :  { %18247 = vst [vmem:[#allocation10_spill] sm:$0xff] %v12750_v44  ;;  %1134 = vperm.xlu0 %11989, %v859_v36   ;;  %v865_v44 = vld [vmem:[#allocation2 + $0x2e9] sm:$0xff] }
 0x122   :  { %v12748_v33 = vpop.permute.xlu1 %612 }
 0x123   :  { %1129 = vperm.xlu1 %11990, %v858_v25  }
 0x124   :  { %v12754_v60 = vpop.permute.xlu0 %627 }
 0x125   :  { %18249 = vst [vmem:[#allocation12_spill] sm:$0xff] %v12754_v60  ;;  %1144 = vperm.xlu0 %11989, %v861_v52   ;;  %v867_v60 = vld [vmem:[#allocation2 + $0x301] sm:$0xff] }
 0x126   :  { %v12752_v49 = vpop.permute.xlu1 %622 }
 0x127   :  { %18248 = vst [vmem:[#allocation11_spill] sm:$0xff] %v12752_v49  ;;  %1139 = vperm.xlu1 %11990, %v860_v41   ;;  %v866_v49 = vld [vmem:[#allocation2 + $0x2f1] sm:$0xff] }
 0x128   :  { %v12758_v20 = vpop.permute.xlu0 %637 }
 0x129   :  { %18251 = vst [vmem:[#allocation14_spill] sm:$0xff] %v12758_v20  ;;  %1154 = vperm.xlu0 %11989, %v863_v9   ;;  %v869_v20 = vld [vmem:[#allocation2 + $0x319] sm:$0xff] }
 0x12a   :  { %v12756_v4 = vpop.permute.xlu1 %632 }
 0x12b   :  { %18250 = vst [vmem:[#allocation13_spill] sm:$0xff] %v12756_v4  ;;  %1149 = vperm.xlu1 %11990, %v862_v57   ;;  %v868_v4 = vld [vmem:[#allocation2 + $0x309] sm:$0xff] }
 0x12c   :  { %v12762_v36 = vpop.permute.xlu0 %647 }
 0x12d   :  { %18253 = vst [vmem:[#allocation16_spill] sm:$0xff] %v12762_v36  ;;  %1164 = vperm.xlu0 %11989, %v865_v44   ;;  %v1324_v36 = vld [vmem:[#allocation2 + $0x2] sm:$0xff] }
 0x12e   :  { %v12760_v25 = vpop.permute.xlu1 %642 }
 0x12f   :  { %18252 = vst [vmem:[#allocation15_spill] sm:$0xff] %v12760_v25  ;;  %1159 = vperm.xlu1 %11990, %v864_v3   ;;  %v870_v25 = vld [vmem:[#allocation2 + $0x321] sm:$0xff] }
 0x130   :  { %v12766_v52 = vpop.permute.xlu0 %657 }
 0x131   :  { %18255 = vst [vmem:[#allocation18_spill] sm:$0xff] %v12766_v52  ;;  %1174 = vperm.xlu0 %11989, %v867_v60   ;;  %v1326_v52 = vld [vmem:[#allocation2 + $0x1a] sm:$0xff] }
 0x132   :  { %v12764_v41 = vpop.permute.xlu1 %652 }
 0x133   :  { %18254 = vst [vmem:[#allocation17_spill] sm:$0xff] %v12764_v41  ;;  %1169 = vperm.xlu1 %11990, %v866_v49   ;;  %v1325_v41 = vld [vmem:[#allocation2 + $0xa] sm:$0xff] }
 0x134   :  { %v12770_v9 = vpop.permute.xlu0 %667 }
 0x135   :  { %18257 = vst [vmem:[#allocation20_spill] sm:$0xff] %v12770_v9  ;;  %1184 = vperm.xlu0 %11989, %v869_v20   ;;  %v1328_v9 = vld [vmem:[#allocation2 + $0x32] sm:$0xff] }
 0x136   :  { %v12768_v57 = vpop.permute.xlu1 %662 }
 0x137   :  { %18256 = vst [vmem:[#allocation19_spill] sm:$0xff] %v12768_v57  ;;  %1179 = vperm.xlu1 %11990, %v868_v4   ;;  %v1327_v57 = vld [vmem:[#allocation2 + $0x22] sm:$0xff] }
 0x138   :  { %v12774_v44 = vpop.permute.xlu0 %874 }
 0x139   :  { %18259 = vst [vmem:[#allocation22_spill] sm:$0xff] %v12774_v44  ;;  %1391 = vperm.xlu0 %11989, %v1324_v36   ;;  %v1330_v44 = vld [vmem:[#allocation2 + $0x4a] sm:$0xff] }
 0x13a   :  { %v12772_v3 = vpop.permute.xlu1 %672 }
 0x13b   :  { %18258 = vst [vmem:[#allocation21_spill] sm:$0xff] %v12772_v3  ;;  %1189 = vperm.xlu1 %11990, %v870_v25   ;;  %v1329_v3 = vld [vmem:[#allocation2 + $0x3a] sm:$0xff] }
 0x13c   :  { %v12778_v60 = vpop.permute.xlu0 %884 }
 0x13d   :  { %18261 = vst [vmem:[#allocation24_spill] sm:$0xff] %v12778_v60  ;;  %1401 = vperm.xlu0 %11989, %v1326_v52   ;;  %v1332_v60 = vld [vmem:[#allocation2 + $0x62] sm:$0xff] }
 0x13e   :  { %v12776_v49 = vpop.permute.xlu1 %879 }
 0x13f   :  { %18260 = vst [vmem:[#allocation23_spill] sm:$0xff] %v12776_v49  ;;  %1396 = vperm.xlu1 %11990, %v1325_v41   ;;  %v1331_v49 = vld [vmem:[#allocation2 + $0x52] sm:$0xff] }
 0x140   :  { %v12782_v20 = vpop.permute.xlu0 %894 }
 0x141   :  { %18263 = vst [vmem:[#allocation26_spill] sm:$0xff] %v12782_v20  ;;  %1411 = vperm.xlu0 %11989, %v1328_v9   ;;  %v1334_v20 = vld [vmem:[#allocation2 + $0x7a] sm:$0xff] }
 0x142   :  { %v12780_v4 = vpop.permute.xlu1 %889 }
 0x143   :  { %18262 = vst [vmem:[#allocation25_spill] sm:$0xff] %v12780_v4  ;;  %1406 = vperm.xlu1 %11990, %v1327_v57   ;;  %v1333_v4 = vld [vmem:[#allocation2 + $0x6a] sm:$0xff] }
 0x144   :  { %v12786_v36 = vpop.permute.xlu0 %904 }
 0x145   :  { %18265 = vst [vmem:[#allocation28_spill] sm:$0xff] %v12786_v36  ;;  %1421 = vperm.xlu0 %11989, %v1330_v44   ;;  %v1336_v36 = vld [vmem:[#allocation2 + $0x92] sm:$0xff] }
 0x146   :  { %v12784_v25 = vpop.permute.xlu1 %899 }
 0x147   :  { %18264 = vst [vmem:[#allocation27_spill] sm:$0xff] %v12784_v25  ;;  %1416 = vperm.xlu1 %11990, %v1329_v3   ;;  %v1335_v25 = vld [vmem:[#allocation2 + $0x82] sm:$0xff] }
 0x148   :  { %v12790_v52 = vpop.permute.xlu0 %914 }
 0x149   :  { %18267 = vst [vmem:[#allocation30_spill] sm:$0xff] %v12790_v52  ;;  %1431 = vperm.xlu0 %11989, %v1332_v60   ;;  %v1338_v52 = vld [vmem:[#allocation2 + $0xaa] sm:$0xff] }
 0x14a   :  { %v12788_v41 = vpop.permute.xlu1 %909 }
 0x14b   :  { %18266 = vst [vmem:[#allocation29_spill] sm:$0xff] %v12788_v41  ;;  %1426 = vperm.xlu1 %11990, %v1331_v49   ;;  %v1337_v41 = vld [vmem:[#allocation2 + $0x9a] sm:$0xff] }
 0x14c   :  { %v12794_v9 = vpop.permute.xlu0 %924 }
 0x14d   :  { %18269 = vst [vmem:[#allocation32_spill] sm:$0xff] %v12794_v9  ;;  %1441 = vperm.xlu0 %11989, %v1334_v20   ;;  %v1340_v9 = vld [vmem:[#allocation2 + $0xc2] sm:$0xff] }
 0x14e   :  { %v12792_v57 = vpop.permute.xlu1 %919 }
 0x14f   :  { %18268 = vst [vmem:[#allocation31_spill] sm:$0xff] %v12792_v57  ;;  %1436 = vperm.xlu1 %11990, %v1333_v4   ;;  %v1339_v57 = vld [vmem:[#allocation2 + $0xb2] sm:$0xff] }
 0x150   :  { %v12798_v44 = vpop.permute.xlu0 %934 }
 0x151   :  { %18271 = vst [vmem:[#allocation34_spill] sm:$0xff] %v12798_v44  ;;  %1451 = vperm.xlu0 %11989, %v1336_v36   ;;  %v1342_v44 = vld [vmem:[#allocation2 + $0xda] sm:$0xff] }
 0x152   :  { %v12796_v3 = vpop.permute.xlu1 %929 }
 0x153   :  { %18270 = vst [vmem:[#allocation33_spill] sm:$0xff] %v12796_v3  ;;  %1446 = vperm.xlu1 %11990, %v1335_v25   ;;  %v1341_v3 = vld [vmem:[#allocation2 + $0xca] sm:$0xff] }
 0x154   :  { %v12802_v60 = vpop.permute.xlu0 %944 }
 0x155   :  { %18273 = vst [vmem:[#allocation36_spill] sm:$0xff] %v12802_v60  ;;  %1461 = vperm.xlu0 %11989, %v1338_v52   ;;  %v1344_v60 = vld [vmem:[#allocation2 + $0xf2] sm:$0xff] }
 0x156   :  { %v12800_v49 = vpop.permute.xlu1 %939 }
 0x157   :  { %18272 = vst [vmem:[#allocation35_spill] sm:$0xff] %v12800_v49  ;;  %1456 = vperm.xlu1 %11990, %v1337_v41   ;;  %v1343_v49 = vld [vmem:[#allocation2 + $0xe2] sm:$0xff] }
 0x158   :  { %v12806_v20 = vpop.permute.xlu0 %954 }
 0x159   :  { %18275 = vst [vmem:[#allocation38_spill] sm:$0xff] %v12806_v20  ;;  %1471 = vperm.xlu0 %11989, %v1340_v9   ;;  %v1346_v20 = vld [vmem:[#allocation2 + $0x10a] sm:$0xff] }
 0x15a   :  { %v12804_v4 = vpop.permute.xlu1 %949 }
 0x15b   :  { %18274 = vst [vmem:[#allocation37_spill] sm:$0xff] %v12804_v4  ;;  %1466 = vperm.xlu1 %11990, %v1339_v57   ;;  %v1345_v4 = vld [vmem:[#allocation2 + $0xfa] sm:$0xff] }
 0x15c   :  { %v12810_v36 = vpop.permute.xlu0 %964 }
 0x15d   :  { %18277 = vst [vmem:[#allocation40_spill] sm:$0xff] %v12810_v36  ;;  %1481 = vperm.xlu0 %11989, %v1342_v44   ;;  %v1348_v36 = vld [vmem:[#allocation2 + $0x122] sm:$0xff] }
 0x15e   :  { %v12808_v25 = vpop.permute.xlu1 %959 }
 0x15f   :  { %18276 = vst [vmem:[#allocation39_spill] sm:$0xff] %v12808_v25  ;;  %1476 = vperm.xlu1 %11990, %v1341_v3   ;;  %v1347_v25 = vld [vmem:[#allocation2 + $0x112] sm:$0xff] }
 0x160   :  { %v12814_v52 = vpop.permute.xlu0 %974 }
 0x161   :  { %18279 = vst [vmem:[#allocation42_spill] sm:$0xff] %v12814_v52  ;;  %1491 = vperm.xlu0 %11989, %v1344_v60   ;;  %v1350_v52 = vld [vmem:[#allocation2 + $0x13a] sm:$0xff] }
 0x162   :  { %v12812_v41 = vpop.permute.xlu1 %969 }
 0x163   :  { %18278 = vst [vmem:[#allocation41_spill] sm:$0xff] %v12812_v41  ;;  %1486 = vperm.xlu1 %11990, %v1343_v49   ;;  %v1349_v41 = vld [vmem:[#allocation2 + $0x12a] sm:$0xff] }
 0x164   :  { %v12818_v9 = vpop.permute.xlu0 %984 }
 0x165   :  { %18281 = vst [vmem:[#allocation44_spill] sm:$0xff] %v12818_v9  ;;  %1501 = vperm.xlu0 %11989, %v1346_v20   ;;  %v192_v20 = vld [vmem:[%s18221_s0 + $0xf8] sm:$0xff] }
 0x166   :  { %v12816_v57 = vpop.permute.xlu1 %979  ;;  %257 = vst.msk [vmem:[#allocation2 + $0x189] sm:$0xff] %vm51_vm0, %v192_v20 }
 0x167   :  { %18280 = vst [vmem:[#allocation43_spill] sm:$0xff] %v12816_v57  ;;  %1496 = vperm.xlu1 %11990, %v1345_v4   ;;  %v1351_v57 = vld [vmem:[#allocation2 + $0x142] sm:$0xff]  ;;  %v191_v4 = vld [vmem:[%s18221_s0 + $0xf0] sm:$0xff] }
 0x168   :  { %v12822_v44 = vpop.permute.xlu0 %994  ;;  %256 = vst.msk [vmem:[#allocation2 + $0x181] sm:$0xff] %vm51_vm0, %v191_v4 }
 0x169   :  { %18283 = vst [vmem:[#allocation46_spill] sm:$0xff] %v12822_v44  ;;  %1511 = vperm.xlu0 %11989, %v1348_v36   ;;  %v1353_v36 = vld [vmem:[#allocation2 + $0x15a] sm:$0xff]  ;;  %v1356_v44 = vld [vmem:[#allocation2 + $0x1b2] sm:$0xff] }
 0x16a   :  { %v12820_v3 = vpop.permute.xlu1 %989 }
 0x16b   :  { %18282 = vst [vmem:[#allocation45_spill] sm:$0xff] %v12820_v3  ;;  %1506 = vperm.xlu1 %11990, %v1347_v25   ;;  %v1352_v25 = vld [vmem:[#allocation2 + $0x152] sm:$0xff] }
 0x16c   :  { %v12826_v60 = vpop.permute.xlu0 %1004 }
 0x16d   :  { %18285 = vst [vmem:[#allocation48_spill] sm:$0xff] %v12826_v60  ;;  %1521 = vperm.xlu0 %11989, %v1350_v52  }
 0x16e   :  { %v12824_v49 = vpop.permute.xlu1 %999 }
 0x16f   :  { %18284 = vst [vmem:[#allocation47_spill] sm:$0xff] %v12824_v49  ;;  %1516 = vperm.xlu1 %11990, %v1349_v41   ;;  %v1354_v49 = vld [vmem:[#allocation2 + $0x16a] sm:$0xff] }
 0x170   :  { %v12838_v41 = vpop.permute.xlu0 %1014 }
 0x171   :  { %18287 = vst [vmem:[#allocation50_spill] sm:$0xff] %v12838_v41  ;;  %1531 = vperm.xlu0 %11989, %v1352_v25   ;;  %v1358_v41 = vld [vmem:[#allocation2 + $0x1ca] sm:$0xff] }
 0x172   :  { %v12831_v9 = vpop.permute.xlu1 %1009 }
 0x173   :  { %18286 = vst [vmem:[#allocation49_spill] sm:$0xff] %v12831_v9  ;;  %1526 = vperm.xlu1 %11990, %v1351_v57   ;;  %v1355_v9 = vld [vmem:[#allocation2 + $0x172] sm:$0xff]  ;;  %v1357_v57 = vld [vmem:[#allocation2 + $0x1ba] sm:$0xff] }
 0x174   :  { %v12842_v52 = vpop.permute.xlu0 %1024 }
 0x175   :  { %18289 = vst [vmem:[#allocation52_spill] sm:$0xff] %v12842_v52  ;;  %1541 = vperm.xlu0 %11989, %v1354_v49   ;;  %v1360_v52 = vld [vmem:[#allocation2 + $0x1e2] sm:$0xff] }
 0x176   :  { %v12840_v60 = vpop.permute.xlu1 %1019 }
 0x177   :  { %18288 = vst [vmem:[#allocation51_spill] sm:$0xff] %v12840_v60  ;;  %1536 = vperm.xlu1 %11990, %v1353_v36   ;;  %v1359_v60 = vld [vmem:[#allocation2 + $0x1d2] sm:$0xff] }
 0x178   :  { %v12846_v3 = vpop.permute.xlu0 %1034 }
 0x179   :  { %18291 = vst [vmem:[#allocation54_spill] sm:$0xff] %v12846_v3  ;;  %1551 = vperm.xlu0 %11989, %v1356_v44   ;;  %v1362_v3 = vld [vmem:[#allocation2 + $0x1fa] sm:$0xff] }
 0x17a   :  { %v12844_v4 = vpop.permute.xlu1 %1029 }
 0x17b   :  { %18290 = vst [vmem:[#allocation53_spill] sm:$0xff] %v12844_v4  ;;  %1546 = vperm.xlu1 %11990, %v1355_v9   ;;  %v1361_v4 = vld [vmem:[#allocation2 + $0x1ea] sm:$0xff] }
 0x17c   :  { %v12850_v25 = vpop.permute.xlu0 %1044 }
 0x17d   :  { %18293 = vst [vmem:[#allocation56_spill] sm:$0xff] %v12850_v25  ;;  %1561 = vperm.xlu0 %11989, %v1358_v41   ;;  %v1364_v25 = vld [vmem:[#allocation2 + $0x212] sm:$0xff] }
 0x17e   :  { %v12848_v20 = vpop.permute.xlu1 %1039 }
 0x17f   :  { %18292 = vst [vmem:[#allocation55_spill] sm:$0xff] %v12848_v20  ;;  %1556 = vperm.xlu1 %11990, %v1357_v57   ;;  %v1363_v20 = vld [vmem:[#allocation2 + $0x202] sm:$0xff] }
 0x180   :  { %v12854_v49 = vpop.permute.xlu0 %1054 }
 0x181   :  { %18295 = vst [vmem:[#allocation58_spill] sm:$0xff] %v12854_v49  ;;  %1571 = vperm.xlu0 %11989, %v1360_v52   ;;  %v1366_v49 = vld [vmem:[#allocation2 + $0x22a] sm:$0xff] }
 0x182   :  { %v12852_v36 = vpop.permute.xlu1 %1049 }
 0x183   :  { %18294 = vst [vmem:[#allocation57_spill] sm:$0xff] %v12852_v36  ;;  %1566 = vperm.xlu1 %11990, %v1359_v60   ;;  %v1365_v36 = vld [vmem:[#allocation2 + $0x21a] sm:$0xff] }
 0x184   :  { %v12858_v44 = vpop.permute.xlu0 %1064 }
 0x185   :  { %18297 = vst [vmem:[#allocation60_spill] sm:$0xff] %v12858_v44  ;;  %1581 = vperm.xlu0 %11989, %v1362_v3   ;;  %v1368_v44 = vld [vmem:[#allocation2 + $0x242] sm:$0xff] }
 0x186   :  { %v12856_v9 = vpop.permute.xlu1 %1059 }
 0x187   :  { %18296 = vst [vmem:[#allocation59_spill] sm:$0xff] %v12856_v9  ;;  %1576 = vperm.xlu1 %11990, %v1361_v4   ;;  %v1367_v9 = vld [vmem:[#allocation2 + $0x232] sm:$0xff] }
 0x188   :  { %v12862_v41 = vpop.permute.xlu0 %1074 }
 0x189   :  { %18299 = vst [vmem:[#allocation62_spill] sm:$0xff] %v12862_v41  ;;  %1591 = vperm.xlu0 %11989, %v1364_v25   ;;  %v1370_v41 = vld [vmem:[#allocation2 + $0x25a] sm:$0xff] }
 0x18a   :  { %v12860_v57 = vpop.permute.xlu1 %1069 }
 0x18b   :  { %18298 = vst [vmem:[#allocation61_spill] sm:$0xff] %v12860_v57  ;;  %1586 = vperm.xlu1 %11990, %v1363_v20   ;;  %v1369_v57 = vld [vmem:[#allocation2 + $0x24a] sm:$0xff] }
 0x18c   :  { %v12866_v52 = vpop.permute.xlu0 %1084 }
 0x18d   :  { %18301 = vst [vmem:[#allocation64_spill] sm:$0xff] %v12866_v52  ;;  %1601 = vperm.xlu0 %11989, %v1366_v49   ;;  %v1372_v52 = vld [vmem:[#allocation2 + $0x272] sm:$0xff] }
 0x18e   :  { %v12864_v60 = vpop.permute.xlu1 %1079 }
 0x18f   :  { %18300 = vst [vmem:[#allocation63_spill] sm:$0xff] %v12864_v60  ;;  %1596 = vperm.xlu1 %11990, %v1365_v36   ;;  %v1371_v60 = vld [vmem:[#allocation2 + $0x262] sm:$0xff] }
 0x190   :  { %v12870_v3 = vpop.permute.xlu0 %1094 }
 0x191   :  { %18303 = vst [vmem:[#allocation66_spill] sm:$0xff] %v12870_v3  ;;  %1611 = vperm.xlu0 %11989, %v1368_v44   ;;  %v1374_v3 = vld [vmem:[#allocation2 + $0x28a] sm:$0xff] }
 0x192   :  { %v12868_v4 = vpop.permute.xlu1 %1089 }
 0x193   :  { %18302 = vst [vmem:[#allocation65_spill] sm:$0xff] %v12868_v4  ;;  %1606 = vperm.xlu1 %11990, %v1367_v9   ;;  %v1373_v4 = vld [vmem:[#allocation2 + $0x27a] sm:$0xff] }
 0x194   :  { %v12874_v25 = vpop.permute.xlu0 %1104 }
 0x195   :  { %18305 = vst [vmem:[#allocation68_spill] sm:$0xff] %v12874_v25  ;;  %1621 = vperm.xlu0 %11989, %v1370_v41   ;;  %v1376_v25 = vld [vmem:[#allocation2 + $0x2a2] sm:$0xff] }
 0x196   :  { %v12872_v20 = vpop.permute.xlu1 %1099 }
 0x197   :  { %18304 = vst [vmem:[#allocation67_spill] sm:$0xff] %v12872_v20  ;;  %1616 = vperm.xlu1 %11990, %v1369_v57   ;;  %v1375_v20 = vld [vmem:[#allocation2 + $0x292] sm:$0xff] }
 0x198   :  { %v12878_v49 = vpop.permute.xlu0 %1114 }
 0x199   :  { %18307 = vst [vmem:[#allocation70_spill] sm:$0xff] %v12878_v49  ;;  %1631 = vperm.xlu0 %11989, %v1372_v52   ;;  %v1378_v49 = vld [vmem:[#allocation2 + $0x2ba] sm:$0xff] }
 0x19a   :  { %v12876_v36 = vpop.permute.xlu1 %1109 }
 0x19b   :  { %18306 = vst [vmem:[#allocation69_spill] sm:$0xff] %v12876_v36  ;;  %1626 = vperm.xlu1 %11990, %v1371_v60   ;;  %v1377_v36 = vld [vmem:[#allocation2 + $0x2aa] sm:$0xff] }
 0x19c   :  { %v12882_v44 = vpop.permute.xlu0 %1124 }
 0x19d   :  { %18309 = vst [vmem:[#allocation72_spill] sm:$0xff] %v12882_v44  ;;  %1641 = vperm.xlu0 %11989, %v1374_v3   ;;  %v1380_v44 = vld [vmem:[#allocation2 + $0x2d2] sm:$0xff] }
 0x19e   :  { %v12880_v9 = vpop.permute.xlu1 %1119 }
 0x19f   :  { %18308 = vst [vmem:[#allocation71_spill] sm:$0xff] %v12880_v9  ;;  %1636 = vperm.xlu1 %11990, %v1373_v4   ;;  %v1379_v9 = vld [vmem:[#allocation2 + $0x2c2] sm:$0xff] }
 0x1a0   :  { %v12886_v41 = vpop.permute.xlu0 %1134 }
 0x1a1   :  { %18311 = vst [vmem:[#allocation74_spill] sm:$0xff] %v12886_v41  ;;  %1651 = vperm.xlu0 %11989, %v1376_v25   ;;  %v1382_v41 = vld [vmem:[#allocation2 + $0x2ea] sm:$0xff] }
 0x1a2   :  { %v12884_v57 = vpop.permute.xlu1 %1129 }
 0x1a3   :  { %18310 = vst [vmem:[#allocation73_spill] sm:$0xff] %v12884_v57  ;;  %1646 = vperm.xlu1 %11990, %v1375_v20   ;;  %v1381_v57 = vld [vmem:[#allocation2 + $0x2da] sm:$0xff] }
 0x1a4   :  { %v12890_v52 = vpop.permute.xlu0 %1144 }
 0x1a5   :  { %18313 = vst [vmem:[#allocation76_spill] sm:$0xff] %v12890_v52  ;;  %1661 = vperm.xlu0 %11989, %v1378_v49   ;;  %v224_v49 = vld [vmem:[%s18221_s0 + $0x1f8] sm:$0xff] }
 0x1a6   :  { %v12888_v60 = vpop.permute.xlu1 %1139  ;;  %289 = vst.msk [vmem:[#allocation2 + $0x339] sm:$0xff] %vm51_vm0, %v224_v49 }
 0x1a7   :  { %18312 = vst [vmem:[#allocation75_spill] sm:$0xff] %v12888_v60  ;;  %1656 = vperm.xlu1 %11990, %v1377_v36   ;;  %v1383_v60 = vld [vmem:[#allocation2 + $0x2f2] sm:$0xff] }
 0x1a8   :  { %v12894_v3 = vpop.permute.xlu0 %1154  ;;  %v223_v36 = vld [vmem:[%s18221_s0 + $0x1f0] sm:$0xff]  ;;  %s12094_s0 = smov 16  }
 0x1a9   :  { %18315 = vst [vmem:[#allocation78_spill] sm:$0xff] %v12894_v3  ;;  %1671 = vperm.xlu0 %11989, %v1380_v44   ;;  %288 = vst.msk [vmem:[#allocation2 + $0x331] sm:$0xff] %vm51_vm0, %v223_v36  ;;  %v1385_v44 = vld [vmem:[#allocation2 + $0x30a] sm:$0xff]  ;;  %v1841_v3 = vld [vmem:[#allocation2 + $0x18] sm:$0xff]  ;;  %vm9213_vm0 = vcmask 917248  }
 0x1aa   :  { %v12892_v4 = vpop.permute.xlu1 %1149 }
 0x1ab   :  { %18314 = vst [vmem:[#allocation77_spill] sm:$0xff] %v12892_v4  ;;  %1666 = vperm.xlu1 %11990, %v1379_v9   ;;  %v1384_v9 = vld [vmem:[#allocation2 + $0x302] sm:$0xff] }
 0x1ac   :  { %v12898_v25 = vpop.permute.xlu0 %1164 }
 0x1ad   :  { %18317 = vst [vmem:[#allocation80_spill] sm:$0xff] %v12898_v25  ;;  %1681 = vperm.xlu0 %11989, %v1382_v41  }
 0x1ae   :  { %v12896_v20 = vpop.permute.xlu1 %1159 }
 0x1af   :  { %18316 = vst [vmem:[#allocation79_spill] sm:$0xff] %v12896_v20  ;;  %1676 = vperm.xlu1 %11990, %v1381_v57   ;;  %v1386_v20 = vld [vmem:[#allocation2 + $0x31a] sm:$0xff] }
 0x1b0   :  { %v12910_v57 = vpop.permute.xlu0 %1174 }
 0x1b1   :  { %18319 = vst [vmem:[#allocation82_spill] sm:$0xff] %v12910_v57  ;;  %1691 = vperm.xlu0 %11989, %v1384_v9   ;;  %v1843_v57 = vld [vmem:[#allocation2 + $0x30] sm:$0xff] }
 0x1b2   :  { %v12903_v52 = vpop.permute.xlu1 %1169 }
 0x1b3   :  { %18318 = vst [vmem:[#allocation81_spill] sm:$0xff] %v12903_v52  ;;  %1686 = vperm.xlu1 %11990, %v1383_v60   ;;  %v1387_v52 = vld [vmem:[#allocation2 + $0x322] sm:$0xff] }
 0x1b4   :  { %v12914_v41 = vpop.permute.xlu0 %1184  ;;  %v1842_v60 = vld [vmem:[#allocation2 + $0x20] sm:$0xff] }
 0x1b5   :  { %18321 = vst [vmem:[#allocation84_spill] sm:$0xff] %v12914_v41  ;;  %1701 = vperm.xlu0 %11989, %v1386_v20   ;;  %v1845_v41 = vld [vmem:[#allocation2 + $0x48] sm:$0xff] }
 0x1b6   :  { %v12912_v25 = vpop.permute.xlu1 %1179 }
 0x1b7   :  { %18320 = vst [vmem:[#allocation83_spill] sm:$0xff] %v12912_v25  ;;  %1696 = vperm.xlu1 %11990, %v1385_v44   ;;  %v1844_v25 = vld [vmem:[#allocation2 + $0x38] sm:$0xff] }
 0x1b8   :  { %v12918_v4 = vpop.permute.xlu0 %1391 }
 0x1b9   :  { %18323 = vst [vmem:[#allocation86_spill] sm:$0xff] %v12918_v4  ;;  %1908 = vperm.xlu0 %11989, %v1841_v3   ;;  %v1847_v4 = vld [vmem:[#allocation2 + $0x60] sm:$0xff] }
 0x1ba   :  { %v12916_v36 = vpop.permute.xlu1 %1189 }
 0x1bb   :  { %18322 = vst [vmem:[#allocation85_spill] sm:$0xff] %v12916_v36  ;;  %1706 = vperm.xlu1 %11990, %v1387_v52   ;;  %v1846_v36 = vld [vmem:[#allocation2 + $0x50] sm:$0xff] }
 0x1bc   :  { %v12922_v9 = vpop.permute.xlu0 %1401 }
 0x1bd   :  { %18325 = vst [vmem:[#allocation88_spill] sm:$0xff] %v12922_v9  ;;  %1918 = vperm.xlu0 %11989, %v1843_v57   ;;  %v1849_v9 = vld [vmem:[#allocation2 + $0x78] sm:$0xff] }
 0x1be   :  { %v12920_v49 = vpop.permute.xlu1 %1396 }
 0x1bf   :  { %18324 = vst [vmem:[#allocation87_spill] sm:$0xff] %v12920_v49  ;;  %1913 = vperm.xlu1 %11990, %v1842_v60   ;;  %v1848_v49 = vld [vmem:[#allocation2 + $0x68] sm:$0xff] }
 0x1c0   :  { %v12926_v20 = vpop.permute.xlu0 %1411 }
 0x1c1   :  { %18327 = vst [vmem:[#allocation90_spill] sm:$0xff] %v12926_v20  ;;  %1928 = vperm.xlu0 %11989, %v1845_v41   ;;  %v1851_v20 = vld [vmem:[#allocation2 + $0x90] sm:$0xff] }
 0x1c2   :  { %v12924_v44 = vpop.permute.xlu1 %1406 }
 0x1c3   :  { %18326 = vst [vmem:[#allocation89_spill] sm:$0xff] %v12924_v44  ;;  %1923 = vperm.xlu1 %11990, %v1844_v25   ;;  %v1850_v44 = vld [vmem:[#allocation2 + $0x80] sm:$0xff] }
 0x1c4   :  { %v12930_v3 = vpop.permute.xlu0 %1421 }
 0x1c5   :  { %18329 = vst [vmem:[#allocation92_spill] sm:$0xff] %v12930_v3  ;;  %1938 = vperm.xlu0 %11989, %v1847_v4   ;;  %v1853_v3 = vld [vmem:[#allocation2 + $0xa8] sm:$0xff] }
 0x1c6   :  { %v12928_v52 = vpop.permute.xlu1 %1416 }
 0x1c7   :  { %18328 = vst [vmem:[#allocation91_spill] sm:$0xff] %v12928_v52  ;;  %1933 = vperm.xlu1 %11990, %v1846_v36   ;;  %v1852_v52 = vld [vmem:[#allocation2 + $0x98] sm:$0xff] }
 0x1c8   :  { %v12934_v57 = vpop.permute.xlu0 %1431 }
 0x1c9   :  { %18331 = vst [vmem:[#allocation94_spill] sm:$0xff] %v12934_v57  ;;  %1948 = vperm.xlu0 %11989, %v1849_v9   ;;  %v1855_v57 = vld [vmem:[#allocation2 + $0xc0] sm:$0xff] }
 0x1ca   :  { %v12932_v60 = vpop.permute.xlu1 %1426 }
 0x1cb   :  { %18330 = vst [vmem:[#allocation93_spill] sm:$0xff] %v12932_v60  ;;  %1943 = vperm.xlu1 %11990, %v1848_v49   ;;  %v1854_v60 = vld [vmem:[#allocation2 + $0xb0] sm:$0xff] }
 0x1cc   :  { %v12938_v41 = vpop.permute.xlu0 %1441 }
 0x1cd   :  { %18333 = vst [vmem:[#allocation96_spill] sm:$0xff] %v12938_v41  ;;  %1958 = vperm.xlu0 %11989, %v1851_v20   ;;  %v1857_v41 = vld [vmem:[#allocation2 + $0xd8] sm:$0xff] }
 0x1ce   :  { %v12936_v25 = vpop.permute.xlu1 %1436 }
 0x1cf   :  { %18332 = vst [vmem:[#allocation95_spill] sm:$0xff] %v12936_v25  ;;  %1953 = vperm.xlu1 %11990, %v1850_v44   ;;  %v1856_v25 = vld [vmem:[#allocation2 + $0xc8] sm:$0xff] }
 0x1d0   :  { %v12942_v4 = vpop.permute.xlu0 %1451 }
 0x1d1   :  { %18335 = vst [vmem:[#allocation98_spill] sm:$0xff] %v12942_v4  ;;  %1968 = vperm.xlu0 %11989, %v1853_v3   ;;  %v1859_v4 = vld [vmem:[#allocation2 + $0xf0] sm:$0xff] }
 0x1d2   :  { %v12940_v36 = vpop.permute.xlu1 %1446 }
 0x1d3   :  { %18334 = vst [vmem:[#allocation97_spill] sm:$0xff] %v12940_v36  ;;  %1963 = vperm.xlu1 %11990, %v1852_v52   ;;  %v1858_v36 = vld [vmem:[#allocation2 + $0xe0] sm:$0xff] }
 0x1d4   :  { %v12946_v9 = vpop.permute.xlu0 %1461 }
 0x1d5   :  { %18337 = vst [vmem:[#allocation100_spill] sm:$0xff] %v12946_v9  ;;  %1978 = vperm.xlu0 %11989, %v1855_v57   ;;  %v1861_v9 = vld [vmem:[#allocation2 + $0x108] sm:$0xff] }
 0x1d6   :  { %v12944_v49 = vpop.permute.xlu1 %1456 }
 0x1d7   :  { %18336 = vst [vmem:[#allocation99_spill] sm:$0xff] %v12944_v49  ;;  %1973 = vperm.xlu1 %11990, %v1854_v60   ;;  %v1860_v49 = vld [vmem:[#allocation2 + $0xf8] sm:$0xff] }
 0x1d8   :  { %v12950_v20 = vpop.permute.xlu0 %1471 }
 0x1d9   :  { %18339 = vst [vmem:[#allocation102_spill] sm:$0xff] %v12950_v20  ;;  %1988 = vperm.xlu0 %11989, %v1857_v41   ;;  %v1863_v20 = vld [vmem:[#allocation2 + $0x120] sm:$0xff] }
 0x1da   :  { %v12948_v44 = vpop.permute.xlu1 %1466 }
 0x1db   :  { %18338 = vst [vmem:[#allocation101_spill] sm:$0xff] %v12948_v44  ;;  %1983 = vperm.xlu1 %11990, %v1856_v25   ;;  %v1862_v44 = vld [vmem:[#allocation2 + $0x110] sm:$0xff] }
 0x1dc   :  { %v12954_v3 = vpop.permute.xlu0 %1481 }
 0x1dd   :  { %18341 = vst [vmem:[#allocation104_spill] sm:$0xff] %v12954_v3  ;;  %1998 = vperm.xlu0 %11989, %v1859_v4   ;;  %v1865_v3 = vld [vmem:[#allocation2 + $0x138] sm:$0xff] }
 0x1de   :  { %v12952_v52 = vpop.permute.xlu1 %1476 }
 0x1df   :  { %18340 = vst [vmem:[#allocation103_spill] sm:$0xff] %v12952_v52  ;;  %1993 = vperm.xlu1 %11990, %v1858_v36   ;;  %v1864_v52 = vld [vmem:[#allocation2 + $0x128] sm:$0xff] }
 0x1e0   :  { %v12958_v57 = vpop.permute.xlu0 %1491 }
 0x1e1   :  { %18343 = vst [vmem:[#allocation106_spill] sm:$0xff] %v12958_v57  ;;  %2008 = vperm.xlu0 %11989, %v1861_v9   ;;  %v1867_v57 = vld [vmem:[#allocation2 + $0x150] sm:$0xff] }
 0x1e2   :  { %v12956_v60 = vpop.permute.xlu1 %1486 }
 0x1e3   :  { %18342 = vst [vmem:[#allocation105_spill] sm:$0xff] %v12956_v60  ;;  %2003 = vperm.xlu1 %11990, %v1860_v49   ;;  %v1866_v60 = vld [vmem:[#allocation2 + $0x140] sm:$0xff] }
 0x1e4   :  { %v12962_v41 = vpop.permute.xlu0 %1501 }
 0x1e5   :  { %18345 = vst [vmem:[#allocation108_spill] sm:$0xff] %v12962_v41  ;;  %2018 = vperm.xlu0 %11989, %v1863_v20   ;;  %v1869_v41 = vld [vmem:[#allocation2 + $0x168] sm:$0xff] }
 0x1e6   :  { %v12960_v25 = vpop.permute.xlu1 %1496 }
 0x1e7   :  { %18344 = vst [vmem:[#allocation107_spill] sm:$0xff] %v12960_v25  ;;  %2013 = vperm.xlu1 %11990, %v1862_v44   ;;  %v1868_v25 = vld [vmem:[#allocation2 + $0x158] sm:$0xff] }
 0x1e8   :  { %v12966_v4 = vpop.permute.xlu0 %1511 }
 0x1e9   :  { %18347 = vst [vmem:[#allocation110_spill] sm:$0xff] %v12966_v4  ;;  %2028 = vperm.xlu0 %11989, %v1865_v3   ;;  %v1871_v4 = vld [vmem:[#allocation2 + $0x180] sm:$0xff] }
 0x1ea   :  { %v12964_v36 = vpop.permute.xlu1 %1506 }
 0x1eb   :  { %18346 = vst [vmem:[#allocation109_spill] sm:$0xff] %v12964_v36  ;;  %2023 = vperm.xlu1 %11990, %v1864_v52   ;;  %v1870_v36 = vld [vmem:[#allocation2 + $0x170] sm:$0xff] }
 0x1ec   :  { %v12970_v9 = vpop.permute.xlu0 %1521 }
 0x1ed   :  { %18349 = vst [vmem:[#allocation112_spill] sm:$0xff] %v12970_v9  ;;  %2038 = vperm.xlu0 %11989, %v1867_v57   ;;  %v1873_v9 = vld [vmem:[#allocation2 + $0x1c8] sm:$0xff] }
 0x1ee   :  { %v12968_v49 = vpop.permute.xlu1 %1516 }
 0x1ef   :  { %18348 = vst [vmem:[#allocation111_spill] sm:$0xff] %v12968_v49  ;;  %2033 = vperm.xlu1 %11990, %v1866_v60   ;;  %v1872_v49 = vld [vmem:[#allocation2 + $0x188] sm:$0xff] }
 0x1f0   :  { %v12974_v20 = vpop.permute.xlu0 %1531 }
 0x1f1   :  { %18351 = vst [vmem:[#allocation114_spill] sm:$0xff] %v12974_v20  ;;  %2048 = vperm.xlu0 %11989, %v1869_v41   ;;  %v1875_v20 = vld [vmem:[#allocation2 + $0x1e0] sm:$0xff] }
 0x1f2   :  { %v12972_v44 = vpop.permute.xlu1 %1526 }
 0x1f3   :  { %18350 = vst [vmem:[#allocation113_spill] sm:$0xff] %v12972_v44  ;;  %2043 = vperm.xlu1 %11990, %v1868_v25   ;;  %v1874_v44 = vld [vmem:[#allocation2 + $0x1d0] sm:$0xff] }
 0x1f4   :  { %v12978_v3 = vpop.permute.xlu0 %1541 }
 0x1f5   :  { %18353 = vst [vmem:[#allocation116_spill] sm:$0xff] %v12978_v3  ;;  %2058 = vperm.xlu0 %11989, %v1871_v4   ;;  %v1877_v3 = vld [vmem:[#allocation2 + $0x1f8] sm:$0xff] }
 0x1f6   :  { %v12976_v52 = vpop.permute.xlu1 %1536 }
 0x1f7   :  { %18352 = vst [vmem:[#allocation115_spill] sm:$0xff] %v12976_v52  ;;  %2053 = vperm.xlu1 %11990, %v1870_v36   ;;  %v1876_v52 = vld [vmem:[#allocation2 + $0x1e8] sm:$0xff] }
 0x1f8   :  { %v12982_v57 = vpop.permute.xlu0 %1551 }
 0x1f9   :  { %18355 = vst [vmem:[#allocation118_spill] sm:$0xff] %v12982_v57  ;;  %2068 = vperm.xlu0 %11989, %v1873_v9   ;;  %v1879_v57 = vld [vmem:[#allocation2 + $0x210] sm:$0xff] }
 0x1fa   :  { %v12980_v60 = vpop.permute.xlu1 %1546 }
 0x1fb   :  { %18354 = vst [vmem:[#allocation117_spill] sm:$0xff] %v12980_v60  ;;  %2063 = vperm.xlu1 %11990, %v1872_v49   ;;  %v1878_v60 = vld [vmem:[#allocation2 + $0x200] sm:$0xff] }
 0x1fc   :  { %v12986_v41 = vpop.permute.xlu0 %1561 }
 0x1fd   :  { %18357 = vst [vmem:[#allocation120_spill] sm:$0xff] %v12986_v41  ;;  %2078 = vperm.xlu0 %11989, %v1875_v20   ;;  %v1881_v41 = vld [vmem:[#allocation2 + $0x228] sm:$0xff] }
 0x1fe   :  { %v12984_v25 = vpop.permute.xlu1 %1556 }
 0x1ff   :  { %18356 = vst [vmem:[#allocation119_spill] sm:$0xff] %v12984_v25  ;;  %2073 = vperm.xlu1 %11990, %v1874_v44   ;;  %v1880_v25 = vld [vmem:[#allocation2 + $0x218] sm:$0xff] }
 0x200   :  { %v12990_v4 = vpop.permute.xlu0 %1571 }
 0x201   :  { %18359 = vst [vmem:[#allocation122_spill] sm:$0xff] %v12990_v4  ;;  %2088 = vperm.xlu0 %11989, %v1877_v3   ;;  %v1883_v4 = vld [vmem:[#allocation2 + $0x240] sm:$0xff] }
 0x202   :  { %v12988_v36 = vpop.permute.xlu1 %1566 }
 0x203   :  { %18358 = vst [vmem:[#allocation121_spill] sm:$0xff] %v12988_v36  ;;  %2083 = vperm.xlu1 %11990, %v1876_v52   ;;  %v1882_v36 = vld [vmem:[#allocation2 + $0x230] sm:$0xff] }
 0x204   :  { %v12994_v9 = vpop.permute.xlu0 %1581 }
 0x205   :  { %18361 = vst [vmem:[#allocation124_spill] sm:$0xff] %v12994_v9  ;;  %2098 = vperm.xlu0 %11989, %v1879_v57   ;;  %v1885_v9 = vld [vmem:[#allocation2 + $0x258] sm:$0xff] }
 0x206   :  { %v12992_v49 = vpop.permute.xlu1 %1576 }
 0x207   :  { %18360 = vst [vmem:[#allocation123_spill] sm:$0xff] %v12992_v49  ;;  %2093 = vperm.xlu1 %11990, %v1878_v60   ;;  %v1884_v49 = vld [vmem:[#allocation2 + $0x248] sm:$0xff] }
 0x208   :  { %v12998_v20 = vpop.permute.xlu0 %1591 }
 0x209   :  { %18363 = vst [vmem:[#allocation126_spill] sm:$0xff] %v12998_v20  ;;  %2108 = vperm.xlu0 %11989, %v1881_v41   ;;  %v1887_v20 = vld [vmem:[#allocation2 + $0x270] sm:$0xff] }
 0x20a   :  { %v12996_v44 = vpop.permute.xlu1 %1586 }
 0x20b   :  { %18362 = vst [vmem:[#allocation125_spill] sm:$0xff] %v12996_v44  ;;  %2103 = vperm.xlu1 %11990, %v1880_v25   ;;  %v1886_v44 = vld [vmem:[#allocation2 + $0x260] sm:$0xff] }
 0x20c   :  { %v13002_v3 = vpop.permute.xlu0 %1601 }
 0x20d   :  { %18365 = vst [vmem:[#allocation128_spill] sm:$0xff] %v13002_v3  ;;  %2118 = vperm.xlu0 %11989, %v1883_v4   ;;  %v1889_v3 = vld [vmem:[#allocation2 + $0x288] sm:$0xff] }
 0x20e   :  { %v13000_v52 = vpop.permute.xlu1 %1596 }
 0x20f   :  { %18364 = vst [vmem:[#allocation127_spill] sm:$0xff] %v13000_v52  ;;  %2113 = vperm.xlu1 %11990, %v1882_v36   ;;  %v1888_v52 = vld [vmem:[#allocation2 + $0x278] sm:$0xff] }
 0x210   :  { %v13006_v57 = vpop.permute.xlu0 %1611 }
 0x211   :  { %18367 = vst [vmem:[#allocation130_spill] sm:$0xff] %v13006_v57  ;;  %2128 = vperm.xlu0 %11989, %v1885_v9   ;;  %v1891_v57 = vld [vmem:[#allocation2 + $0x2a0] sm:$0xff] }
 0x212   :  { %v13004_v60 = vpop.permute.xlu1 %1606 }
 0x213   :  { %18366 = vst [vmem:[#allocation129_spill] sm:$0xff] %v13004_v60  ;;  %2123 = vperm.xlu1 %11990, %v1884_v49   ;;  %v1890_v60 = vld [vmem:[#allocation2 + $0x290] sm:$0xff] }
 0x214   :  { %v13010_v41 = vpop.permute.xlu0 %1621 }
 0x215   :  { %18369 = vst [vmem:[#allocation132_spill] sm:$0xff] %v13010_v41  ;;  %2138 = vperm.xlu0 %11989, %v1887_v20   ;;  %v1893_v41 = vld [vmem:[#allocation2 + $0x2b8] sm:$0xff] }
 0x216   :  { %v13008_v25 = vpop.permute.xlu1 %1616 }
 0x217   :  { %18368 = vst [vmem:[#allocation131_spill] sm:$0xff] %v13008_v25  ;;  %2133 = vperm.xlu1 %11990, %v1886_v44   ;;  %v1892_v25 = vld [vmem:[#allocation2 + $0x2a8] sm:$0xff] }
 0x218   :  { %v13014_v4 = vpop.permute.xlu0 %1631 }
 0x219   :  { %18371 = vst [vmem:[#allocation134_spill] sm:$0xff] %v13014_v4  ;;  %2148 = vperm.xlu0 %11989, %v1889_v3   ;;  %v1895_v4 = vld [vmem:[#allocation2 + $0x2d0] sm:$0xff] }
 0x21a   :  { %v13012_v36 = vpop.permute.xlu1 %1626 }
 0x21b   :  { %18370 = vst [vmem:[#allocation133_spill] sm:$0xff] %v13012_v36  ;;  %2143 = vperm.xlu1 %11990, %v1888_v52   ;;  %v1894_v36 = vld [vmem:[#allocation2 + $0x2c0] sm:$0xff] }
 0x21c   :  { %v13018_v9 = vpop.permute.xlu0 %1641 }
 0x21d   :  { %18373 = vst [vmem:[#allocation136_spill] sm:$0xff] %v13018_v9  ;;  %2158 = vperm.xlu0 %11989, %v1891_v57   ;;  %v1897_v9 = vld [vmem:[#allocation2 + $0x2e8] sm:$0xff] }
 0x21e   :  { %v13016_v49 = vpop.permute.xlu1 %1636 }
 0x21f   :  { %18372 = vst [vmem:[#allocation135_spill] sm:$0xff] %v13016_v49  ;;  %2153 = vperm.xlu1 %11990, %v1890_v60   ;;  %v1896_v49 = vld [vmem:[#allocation2 + $0x2d8] sm:$0xff] }
 0x220   :  { %v13022_v20 = vpop.permute.xlu0 %1651 }
 0x221   :  { %18375 = vst [vmem:[#allocation138_spill] sm:$0xff] %v13022_v20  ;;  %2168 = vperm.xlu0 %11989, %v1893_v41   ;;  %v1899_v20 = vld [vmem:[#allocation2 + $0x300] sm:$0xff] }
 0x222   :  { %v13020_v44 = vpop.permute.xlu1 %1646 }
 0x223   :  { %18374 = vst [vmem:[#allocation137_spill] sm:$0xff] %v13020_v44  ;;  %2163 = vperm.xlu1 %11990, %v1892_v25   ;;  %v1898_v44 = vld [vmem:[#allocation2 + $0x2f0] sm:$0xff] }
 0x224   :  { %v13026_v3 = vpop.permute.xlu0 %1661 }
 0x225   :  { %18377 = vst [vmem:[#allocation140_spill] sm:$0xff] %v13026_v3  ;;  %2178 = vperm.xlu0 %11989, %v1895_v4   ;;  %v1901_v3 = vld [vmem:[#allocation2 + $0x318] sm:$0xff] }
 0x226   :  { %v13024_v52 = vpop.permute.xlu1 %1656 }
 0x227   :  { %18376 = vst [vmem:[#allocation139_spill] sm:$0xff] %v13024_v52  ;;  %2173 = vperm.xlu1 %11990, %v1894_v36   ;;  %v1900_v52 = vld [vmem:[#allocation2 + $0x308] sm:$0xff] }
 0x228   :  { %v13030_v57 = vpop.permute.xlu0 %1671 }
 0x229   :  { %18379 = vst [vmem:[#allocation142_spill] sm:$0xff] %v13030_v57  ;;  %2188 = vperm.xlu0 %11989, %v1897_v9   ;;  %v1903_v57 = vld [vmem:[#allocation2 + $0x330] sm:$0xff] }
 0x22a   :  { %v13028_v60 = vpop.permute.xlu1 %1666 }
 0x22b   :  { %18378 = vst [vmem:[#allocation141_spill] sm:$0xff] %v13028_v60  ;;  %2183 = vperm.xlu1 %11990, %v1896_v49   ;;  %v1902_v60 = vld [vmem:[#allocation2 + $0x320] sm:$0xff] }
 0x22c   :  { %v13034_v41 = vpop.permute.xlu0 %1681 }
 0x22d   :  { %18381 = vst [vmem:[#allocation144_spill] sm:$0xff] %v13034_v41  ;;  %2198 = vperm.xlu0 %11989, %v1899_v20   ;;  %v2358_v41 = vld [vmem:[#allocation2 + $0x19] sm:$0xff] }
 0x22e   :  { %v13032_v25 = vpop.permute.xlu1 %1676 }
 0x22f   :  { %18380 = vst [vmem:[#allocation143_spill] sm:$0xff] %v13032_v25  ;;  %2193 = vperm.xlu1 %11990, %v1898_v44   ;;  %v1904_v25 = vld [vmem:[#allocation2 + $0x338] sm:$0xff] }
 0x230   :  { %v13038_v4 = vpop.permute.xlu0 %1691 }
 0x231   :  { %18383 = vst [vmem:[#allocation146_spill] sm:$0xff] %v13038_v4  ;;  %2208 = vperm.xlu0 %11989, %v1901_v3   ;;  %v2360_v4 = vld [vmem:[#allocation2 + $0x31] sm:$0xff] }
 0x232   :  { %v13036_v36 = vpop.permute.xlu1 %1686 }
 0x233   :  { %18382 = vst [vmem:[#allocation145_spill] sm:$0xff] %v13036_v36  ;;  %2203 = vperm.xlu1 %11990, %v1900_v52   ;;  %v2359_v36 = vld [vmem:[#allocation2 + $0x21] sm:$0xff] }
 0x234   :  { %v13042_v9 = vpop.permute.xlu0 %1701 }
 0x235   :  { %18385 = vst [vmem:[#allocation148_spill] sm:$0xff] %v13042_v9  ;;  %2218 = vperm.xlu0 %11989, %v1903_v57   ;;  %v2362_v9 = vld [vmem:[#allocation2 + $0x49] sm:$0xff] }
 0x236   :  { %v13040_v49 = vpop.permute.xlu1 %1696 }
 0x237   :  { %18384 = vst [vmem:[#allocation147_spill] sm:$0xff] %v13040_v49  ;;  %2213 = vperm.xlu1 %11990, %v1902_v60   ;;  %v2361_v49 = vld [vmem:[#allocation2 + $0x39] sm:$0xff] }
 0x238   :  { %v13046_v20 = vpop.permute.xlu0 %1908 }
 0x239   :  { %18387 = vst [vmem:[#allocation150_spill] sm:$0xff] %v13046_v20  ;;  %2425 = vperm.xlu0 %11989, %v2358_v41   ;;  %v2364_v20 = vld [vmem:[#allocation2 + $0x61] sm:$0xff] }
 0x23a   :  { %v13044_v44 = vpop.permute.xlu1 %1706 }
 0x23b   :  { %18386 = vst [vmem:[#allocation149_spill] sm:$0xff] %v13044_v44  ;;  %2223 = vperm.xlu1 %11990, %v1904_v25   ;;  %v2363_v44 = vld [vmem:[#allocation2 + $0x51] sm:$0xff] }
 0x23c   :  { %v13050_v3 = vpop.permute.xlu0 %1918 }
 0x23d   :  { %18389 = vst [vmem:[#allocation152_spill] sm:$0xff] %v13050_v3  ;;  %2435 = vperm.xlu0 %11989, %v2360_v4   ;;  %v2366_v3 = vld [vmem:[#allocation2 + $0x79] sm:$0xff] }
 0x23e   :  { %v13048_v52 = vpop.permute.xlu1 %1913 }
 0x23f   :  { %18388 = vst [vmem:[#allocation151_spill] sm:$0xff] %v13048_v52  ;;  %2430 = vperm.xlu1 %11990, %v2359_v36   ;;  %v2365_v52 = vld [vmem:[#allocation2 + $0x69] sm:$0xff] }
 0x240   :  { %v13054_v57 = vpop.permute.xlu0 %1928 }
 0x241   :  { %18391 = vst [vmem:[#allocation154_spill] sm:$0xff] %v13054_v57  ;;  %2445 = vperm.xlu0 %11989, %v2362_v9   ;;  %v2368_v57 = vld [vmem:[#allocation2 + $0x91] sm:$0xff] }
 0x242   :  { %v13052_v60 = vpop.permute.xlu1 %1923 }
 0x243   :  { %18390 = vst [vmem:[#allocation153_spill] sm:$0xff] %v13052_v60  ;;  %2440 = vperm.xlu1 %11990, %v2361_v49   ;;  %v2367_v60 = vld [vmem:[#allocation2 + $0x81] sm:$0xff] }
 0x244   :  { %v13058_v41 = vpop.permute.xlu0 %1938 }
 0x245   :  { %18393 = vst [vmem:[#allocation156_spill] sm:$0xff] %v13058_v41  ;;  %2455 = vperm.xlu0 %11989, %v2364_v20   ;;  %v2370_v41 = vld [vmem:[#allocation2 + $0xa9] sm:$0xff] }
 0x246   :  { %v13056_v25 = vpop.permute.xlu1 %1933 }
 0x247   :  { %18392 = vst [vmem:[#allocation155_spill] sm:$0xff] %v13056_v25  ;;  %2450 = vperm.xlu1 %11990, %v2363_v44   ;;  %v2369_v25 = vld [vmem:[#allocation2 + $0x99] sm:$0xff] }
 0x248   :  { %v13062_v4 = vpop.permute.xlu0 %1948 }
 0x249   :  { %18395 = vst [vmem:[#allocation158_spill] sm:$0xff] %v13062_v4  ;;  %2465 = vperm.xlu0 %11989, %v2366_v3   ;;  %v2372_v4 = vld [vmem:[#allocation2 + $0xc1] sm:$0xff] }
 0x24a   :  { %v13060_v36 = vpop.permute.xlu1 %1943 }
 0x24b   :  { %18394 = vst [vmem:[#allocation157_spill] sm:$0xff] %v13060_v36  ;;  %2460 = vperm.xlu1 %11990, %v2365_v52   ;;  %v2371_v36 = vld [vmem:[#allocation2 + $0xb1] sm:$0xff] }
 0x24c   :  { %v13066_v9 = vpop.permute.xlu0 %1958 }
 0x24d   :  { %18397 = vst [vmem:[#allocation160_spill] sm:$0xff] %v13066_v9  ;;  %2475 = vperm.xlu0 %11989, %v2368_v57   ;;  %v2374_v9 = vld [vmem:[#allocation2 + $0xd9] sm:$0xff] }
 0x24e   :  { %v13064_v49 = vpop.permute.xlu1 %1953 }
 0x24f   :  { %18396 = vst [vmem:[#allocation159_spill] sm:$0xff] %v13064_v49  ;;  %2470 = vperm.xlu1 %11990, %v2367_v60   ;;  %v2373_v49 = vld [vmem:[#allocation2 + $0xc9] sm:$0xff] }
 0x250   :  { %v13070_v20 = vpop.permute.xlu0 %1968 }
 0x251   :  { %18399 = vst [vmem:[#allocation162_spill] sm:$0xff] %v13070_v20  ;;  %2485 = vperm.xlu0 %11989, %v2370_v41   ;;  %v2376_v20 = vld [vmem:[#allocation2 + $0xf1] sm:$0xff] }
 0x252   :  { %v13068_v44 = vpop.permute.xlu1 %1963 }
 0x253   :  { %18398 = vst [vmem:[#allocation161_spill] sm:$0xff] %v13068_v44  ;;  %2480 = vperm.xlu1 %11990, %v2369_v25   ;;  %v2375_v44 = vld [vmem:[#allocation2 + $0xe1] sm:$0xff] }
 0x254   :  { %v13074_v3 = vpop.permute.xlu0 %1978 }
 0x255   :  { %18401 = vst [vmem:[#allocation164_spill] sm:$0xff] %v13074_v3  ;;  %2495 = vperm.xlu0 %11989, %v2372_v4   ;;  %v2378_v3 = vld [vmem:[#allocation2 + $0x109] sm:$0xff] }
 0x256   :  { %v13072_v52 = vpop.permute.xlu1 %1973 }
 0x257   :  { %18400 = vst [vmem:[#allocation163_spill] sm:$0xff] %v13072_v52  ;;  %2490 = vperm.xlu1 %11990, %v2371_v36   ;;  %v2377_v52 = vld [vmem:[#allocation2 + $0xf9] sm:$0xff] }
 0x258   :  { %v13078_v57 = vpop.permute.xlu0 %1988 }
 0x259   :  { %18403 = vst [vmem:[#allocation166_spill] sm:$0xff] %v13078_v57  ;;  %2505 = vperm.xlu0 %11989, %v2374_v9   ;;  %v2380_v57 = vld [vmem:[#allocation2 + $0x121] sm:$0xff] }
 0x25a   :  { %v13076_v60 = vpop.permute.xlu1 %1983 }
 0x25b   :  { %18402 = vst [vmem:[#allocation165_spill] sm:$0xff] %v13076_v60  ;;  %2500 = vperm.xlu1 %11990, %v2373_v49   ;;  %v2379_v60 = vld [vmem:[#allocation2 + $0x111] sm:$0xff] }
 0x25c   :  { %v13082_v41 = vpop.permute.xlu0 %1998 }
 0x25d   :  { %18405 = vst [vmem:[#allocation168_spill] sm:$0xff] %v13082_v41  ;;  %2515 = vperm.xlu0 %11989, %v2376_v20   ;;  %v2382_v41 = vld [vmem:[#allocation2 + $0x139] sm:$0xff] }
 0x25e   :  { %v13080_v25 = vpop.permute.xlu1 %1993 }
 0x25f   :  { %18404 = vst [vmem:[#allocation167_spill] sm:$0xff] %v13080_v25  ;;  %2510 = vperm.xlu1 %11990, %v2375_v44   ;;  %v2381_v25 = vld [vmem:[#allocation2 + $0x129] sm:$0xff] }
 0x260   :  { %v13086_v4 = vpop.permute.xlu0 %2008 }
 0x261   :  { %18407 = vst [vmem:[#allocation170_spill] sm:$0xff] %v13086_v4  ;;  %2525 = vperm.xlu0 %11989, %v2378_v3   ;;  %v2384_v4 = vld [vmem:[#allocation2 + $0x151] sm:$0xff] }
 0x262   :  { %v13084_v36 = vpop.permute.xlu1 %2003 }
 0x263   :  { %18406 = vst [vmem:[#allocation169_spill] sm:$0xff] %v13084_v36  ;;  %2520 = vperm.xlu1 %11990, %v2377_v52   ;;  %v2383_v36 = vld [vmem:[#allocation2 + $0x141] sm:$0xff] }
 0x264   :  { %v13090_v9 = vpop.permute.xlu0 %2018 }
 0x265   :  { %18409 = vst [vmem:[#allocation172_spill] sm:$0xff] %v13090_v9  ;;  %2535 = vperm.xlu0 %11989, %v2380_v57   ;;  %v2386_v9 = vld [vmem:[#allocation2 + $0x169] sm:$0xff] }
 0x266   :  { %v13088_v49 = vpop.permute.xlu1 %2013 }
 0x267   :  { %18408 = vst [vmem:[#allocation171_spill] sm:$0xff] %v13088_v49  ;;  %2530 = vperm.xlu1 %11990, %v2379_v60   ;;  %v2385_v49 = vld [vmem:[#allocation2 + $0x159] sm:$0xff] }
 0x268   :  { %v13094_v20 = vpop.permute.xlu0 %2028 }
 0x269   :  { %18411 = vst [vmem:[#allocation174_spill] sm:$0xff] %v13094_v20  ;;  %2545 = vperm.xlu0 %11989, %v2382_v41   ;;  %v2388_v20 = vld [vmem:[#allocation2 + $0x181] sm:$0xff] }
 0x26a   :  { %v13092_v44 = vpop.permute.xlu1 %2023 }
 0x26b   :  { %18410 = vst [vmem:[#allocation173_spill] sm:$0xff] %v13092_v44  ;;  %2540 = vperm.xlu1 %11990, %v2381_v25   ;;  %v2387_v44 = vld [vmem:[#allocation2 + $0x171] sm:$0xff] }
 0x26c   :  { %v13098_v3 = vpop.permute.xlu0 %2038 }
 0x26d   :  { %18413 = vst [vmem:[#allocation176_spill] sm:$0xff] %v13098_v3  ;;  %2555 = vperm.xlu0 %11989, %v2384_v4   ;;  %v2390_v3 = vld [vmem:[#allocation2 + $0x1c9] sm:$0xff] }
 0x26e   :  { %v13096_v52 = vpop.permute.xlu1 %2033 }
 0x26f   :  { %18412 = vst [vmem:[#allocation175_spill] sm:$0xff] %v13096_v52  ;;  %2550 = vperm.xlu1 %11990, %v2383_v36   ;;  %v2389_v52 = vld [vmem:[#allocation2 + $0x189] sm:$0xff] }
 0x270   :  { %v13102_v57 = vpop.permute.xlu0 %2048 }
 0x271   :  { %18415 = vst [vmem:[#allocation178_spill] sm:$0xff] %v13102_v57  ;;  %2565 = vperm.xlu0 %11989, %v2386_v9   ;;  %v2392_v57 = vld [vmem:[#allocation2 + $0x1e1] sm:$0xff] }
 0x272   :  { %v13100_v60 = vpop.permute.xlu1 %2043 }
 0x273   :  { %18414 = vst [vmem:[#allocation177_spill] sm:$0xff] %v13100_v60  ;;  %2560 = vperm.xlu1 %11990, %v2385_v49   ;;  %v2391_v60 = vld [vmem:[#allocation2 + $0x1d1] sm:$0xff] }
 0x274   :  { %v13106_v41 = vpop.permute.xlu0 %2058 }
 0x275   :  { %18417 = vst [vmem:[#allocation180_spill] sm:$0xff] %v13106_v41  ;;  %2575 = vperm.xlu0 %11989, %v2388_v20   ;;  %v2394_v41 = vld [vmem:[#allocation2 + $0x1f9] sm:$0xff] }
 0x276   :  { %v13104_v25 = vpop.permute.xlu1 %2053 }
 0x277   :  { %18416 = vst [vmem:[#allocation179_spill] sm:$0xff] %v13104_v25  ;;  %2570 = vperm.xlu1 %11990, %v2387_v44   ;;  %v2393_v25 = vld [vmem:[#allocation2 + $0x1e9] sm:$0xff] }
 0x278   :  { %v13110_v4 = vpop.permute.xlu0 %2068 }
 0x279   :  { %18419 = vst [vmem:[#allocation182_spill] sm:$0xff] %v13110_v4  ;;  %2585 = vperm.xlu0 %11989, %v2390_v3   ;;  %v2396_v4 = vld [vmem:[#allocation2 + $0x211] sm:$0xff] }
 0x27a   :  { %v13108_v36 = vpop.permute.xlu1 %2063 }
 0x27b   :  { %18418 = vst [vmem:[#allocation181_spill] sm:$0xff] %v13108_v36  ;;  %2580 = vperm.xlu1 %11990, %v2389_v52   ;;  %v2395_v36 = vld [vmem:[#allocation2 + $0x201] sm:$0xff] }
 0x27c   :  { %v13114_v9 = vpop.permute.xlu0 %2078 }
 0x27d   :  { %18421 = vst [vmem:[#allocation184_spill] sm:$0xff] %v13114_v9  ;;  %2595 = vperm.xlu0 %11989, %v2392_v57   ;;  %v2398_v9 = vld [vmem:[#allocation2 + $0x229] sm:$0xff] }
 0x27e   :  { %v13112_v49 = vpop.permute.xlu1 %2073 }
 0x27f   :  { %18420 = vst [vmem:[#allocation183_spill] sm:$0xff] %v13112_v49  ;;  %2590 = vperm.xlu1 %11990, %v2391_v60   ;;  %v2397_v49 = vld [vmem:[#allocation2 + $0x219] sm:$0xff] }
 0x280   :  { %v13118_v20 = vpop.permute.xlu0 %2088 }
 0x281   :  { %18423 = vst [vmem:[#allocation186_spill] sm:$0xff] %v13118_v20  ;;  %2605 = vperm.xlu0 %11989, %v2394_v41   ;;  %v2400_v20 = vld [vmem:[#allocation2 + $0x241] sm:$0xff] }
 0x282   :  { %v13116_v44 = vpop.permute.xlu1 %2083 }
 0x283   :  { %18422 = vst [vmem:[#allocation185_spill] sm:$0xff] %v13116_v44  ;;  %2600 = vperm.xlu1 %11990, %v2393_v25   ;;  %v2399_v44 = vld [vmem:[#allocation2 + $0x231] sm:$0xff] }
 0x284   :  { %v13122_v3 = vpop.permute.xlu0 %2098 }
 0x285   :  { %18425 = vst [vmem:[#allocation188_spill] sm:$0xff] %v13122_v3  ;;  %2615 = vperm.xlu0 %11989, %v2396_v4   ;;  %v2402_v3 = vld [vmem:[#allocation2 + $0x259] sm:$0xff] }
 0x286   :  { %v13120_v52 = vpop.permute.xlu1 %2093 }
 0x287   :  { %18424 = vst [vmem:[#allocation187_spill] sm:$0xff] %v13120_v52  ;;  %2610 = vperm.xlu1 %11990, %v2395_v36   ;;  %v2401_v52 = vld [vmem:[#allocation2 + $0x249] sm:$0xff] }
 0x288   :  { %v13126_v57 = vpop.permute.xlu0 %2108 }
 0x289   :  { %18427 = vst [vmem:[#allocation190_spill] sm:$0xff] %v13126_v57  ;;  %2625 = vperm.xlu0 %11989, %v2398_v9   ;;  %v2404_v57 = vld [vmem:[#allocation2 + $0x271] sm:$0xff] }
 0x28a   :  { %v13124_v60 = vpop.permute.xlu1 %2103 }
 0x28b   :  { %18426 = vst [vmem:[#allocation189_spill] sm:$0xff] %v13124_v60  ;;  %2620 = vperm.xlu1 %11990, %v2397_v49   ;;  %v2403_v60 = vld [vmem:[#allocation2 + $0x261] sm:$0xff] }
 0x28c   :  { %v13130_v41 = vpop.permute.xlu0 %2118 }
 0x28d   :  { %18429 = vst [vmem:[#allocation192_spill] sm:$0xff] %v13130_v41  ;;  %2635 = vperm.xlu0 %11989, %v2400_v20   ;;  %v2406_v41 = vld [vmem:[#allocation2 + $0x289] sm:$0xff] }
 0x28e   :  { %v13128_v25 = vpop.permute.xlu1 %2113 }
 0x28f   :  { %18428 = vst [vmem:[#allocation191_spill] sm:$0xff] %v13128_v25  ;;  %2630 = vperm.xlu1 %11990, %v2399_v44   ;;  %v2405_v25 = vld [vmem:[#allocation2 + $0x279] sm:$0xff] }
 0x290   :  { %v13134_v4 = vpop.permute.xlu0 %2128 }
 0x291   :  { %18431 = vst [vmem:[#allocation194_spill] sm:$0xff] %v13134_v4  ;;  %2645 = vperm.xlu0 %11989, %v2402_v3   ;;  %v2408_v4 = vld [vmem:[#allocation2 + $0x2a1] sm:$0xff] }
 0x292   :  { %v13132_v36 = vpop.permute.xlu1 %2123 }
 0x293   :  { %18430 = vst [vmem:[#allocation193_spill] sm:$0xff] %v13132_v36  ;;  %2640 = vperm.xlu1 %11990, %v2401_v52   ;;  %v2407_v36 = vld [vmem:[#allocation2 + $0x291] sm:$0xff] }
 0x294   :  { %v13138_v9 = vpop.permute.xlu0 %2138 }
 0x295   :  { %18433 = vst [vmem:[#allocation196_spill] sm:$0xff] %v13138_v9  ;;  %2655 = vperm.xlu0 %11989, %v2404_v57   ;;  %v2410_v9 = vld [vmem:[#allocation2 + $0x2b9] sm:$0xff] }
 0x296   :  { %v13136_v49 = vpop.permute.xlu1 %2133 }
 0x297   :  { %18432 = vst [vmem:[#allocation195_spill] sm:$0xff] %v13136_v49  ;;  %2650 = vperm.xlu1 %11990, %v2403_v60   ;;  %v2409_v49 = vld [vmem:[#allocation2 + $0x2a9] sm:$0xff] }
 0x298   :  { %v13142_v20 = vpop.permute.xlu0 %2148 }
 0x299   :  { %18435 = vst [vmem:[#allocation198_spill] sm:$0xff] %v13142_v20  ;;  %2665 = vperm.xlu0 %11989, %v2406_v41   ;;  %v2412_v20 = vld [vmem:[#allocation2 + $0x2d1] sm:$0xff] }
 0x29a   :  { %v13140_v44 = vpop.permute.xlu1 %2143 }
 0x29b   :  { %18434 = vst [vmem:[#allocation197_spill] sm:$0xff] %v13140_v44  ;;  %2660 = vperm.xlu1 %11990, %v2405_v25   ;;  %v2411_v44 = vld [vmem:[#allocation2 + $0x2c1] sm:$0xff] }
 0x29c   :  { %v13146_v3 = vpop.permute.xlu0 %2158 }
 0x29d   :  { %18437 = vst [vmem:[#allocation200_spill] sm:$0xff] %v13146_v3  ;;  %2675 = vperm.xlu0 %11989, %v2408_v4   ;;  %v2414_v3 = vld [vmem:[#allocation2 + $0x2e9] sm:$0xff] }
 0x29e   :  { %v13144_v52 = vpop.permute.xlu1 %2153 }
 0x29f   :  { %18436 = vst [vmem:[#allocation199_spill] sm:$0xff] %v13144_v52  ;;  %2670 = vperm.xlu1 %11990, %v2407_v36   ;;  %v2413_v52 = vld [vmem:[#allocation2 + $0x2d9] sm:$0xff] }
 0x2a0   :  { %v13150_v57 = vpop.permute.xlu0 %2168 }
 0x2a1   :  { %18439 = vst [vmem:[#allocation202_spill] sm:$0xff] %v13150_v57  ;;  %2685 = vperm.xlu0 %11989, %v2410_v9   ;;  %v2416_v57 = vld [vmem:[#allocation2 + $0x301] sm:$0xff] }
 0x2a2   :  { %v13148_v60 = vpop.permute.xlu1 %2163 }
 0x2a3   :  { %18438 = vst [vmem:[#allocation201_spill] sm:$0xff] %v13148_v60  ;;  %2680 = vperm.xlu1 %11990, %v2409_v49   ;;  %v2415_v60 = vld [vmem:[#allocation2 + $0x2f1] sm:$0xff] }
 0x2a4   :  { %v13154_v41 = vpop.permute.xlu0 %2178 }
 0x2a5   :  { %18441 = vst [vmem:[#allocation204_spill] sm:$0xff] %v13154_v41  ;;  %2695 = vperm.xlu0 %11989, %v2412_v20   ;;  %v2418_v41 = vld [vmem:[#allocation2 + $0x319] sm:$0xff] }
 0x2a6   :  { %v13152_v25 = vpop.permute.xlu1 %2173 }
 0x2a7   :  { %18440 = vst [vmem:[#allocation203_spill] sm:$0xff] %v13152_v25  ;;  %2690 = vperm.xlu1 %11990, %v2411_v44   ;;  %v2417_v25 = vld [vmem:[#allocation2 + $0x309] sm:$0xff] }
 0x2a8   :  { %v13158_v4 = vpop.permute.xlu0 %2188 }
 0x2a9   :  { %18443 = vst [vmem:[#allocation206_spill] sm:$0xff] %v13158_v4  ;;  %2705 = vperm.xlu0 %11989, %v2414_v3   ;;  %v2420_v4 = vld [vmem:[#allocation2 + $0x331] sm:$0xff] }
 0x2aa   :  { %v13156_v36 = vpop.permute.xlu1 %2183 }
 0x2ab   :  { %18442 = vst [vmem:[#allocation205_spill] sm:$0xff] %v13156_v36  ;;  %2700 = vperm.xlu1 %11990, %v2413_v52   ;;  %v2419_v36 = vld [vmem:[#allocation2 + $0x321] sm:$0xff] }
 0x2ac   :  { %v13162_v9 = vpop.permute.xlu0 %2198 }
 0x2ad   :  { %18445 = vst [vmem:[#allocation208_spill] sm:$0xff] %v13162_v9  ;;  %2715 = vperm.xlu0 %11989, %v2416_v57   ;;  %v2875_v9 = vld [vmem:[#allocation2 + $0x1a] sm:$0xff] }
 0x2ae   :  { %v13160_v49 = vpop.permute.xlu1 %2193 }
 0x2af   :  { %18444 = vst [vmem:[#allocation207_spill] sm:$0xff] %v13160_v49  ;;  %2710 = vperm.xlu1 %11990, %v2415_v60   ;;  %v2421_v49 = vld [vmem:[#allocation2 + $0x339] sm:$0xff] }
 0x2b0   :  { %v13166_v20 = vpop.permute.xlu0 %2208 }
 0x2b1   :  { %18447 = vst [vmem:[#allocation210_spill] sm:$0xff] %v13166_v20  ;;  %2725 = vperm.xlu0 %11989, %v2418_v41   ;;  %v13178_v20 = vld [vmem:[#allocation2 + $0x32] sm:$0xff]  ;;  %v2878_v41 = vld [vmem:[#allocation2 + $0x3a] sm:$0xff] }
 0x2b2   :  { %v13164_v44 = vpop.permute.xlu1 %2203  ;;  %18453 = vst [vmem:[#allocation216_spill] sm:$0xff] %v13178_v20 }
 0x2b3   :  { %18446 = vst [vmem:[#allocation209_spill] sm:$0xff] %v13164_v44  ;;  %2720 = vperm.xlu1 %11990, %v2417_v25   ;;  %v2876_v44 = vld [vmem:[#allocation2 + $0x22] sm:$0xff] }
 0x2b4   :  { %v13170_v3 = vpop.permute.xlu0 %2218 }
 0x2b5   :  { %18449 = vst [vmem:[#allocation212_spill] sm:$0xff] %v13170_v3  ;;  %2735 = vperm.xlu0 %11989, %v2420_v4   ;;  %v13185_v4 = vld [vmem:[#allocation2 + $0x4a] sm:$0xff] }
 0x2b6   :  { %v13168_v52 = vpop.permute.xlu1 %2213  ;;  %18456 = vst [vmem:[#allocation219_spill] sm:$0xff] %v13185_v4 }
 0x2b7   :  { %18448 = vst [vmem:[#allocation211_spill] sm:$0xff] %v13168_v52  ;;  %2730 = vperm.xlu1 %11990, %v2419_v36  }
 0x2b8   :  { %v13174_v57 = vpop.permute.xlu0 %2425 }
 0x2b9   :  { %18451 = vst [vmem:[#allocation214_spill] sm:$0xff] %v13174_v57  ;;  %2942 = vperm.xlu0 %11989, %v2875_v9   ;;  %v13192_v9 = vld [vmem:[#allocation2 + $0x62] sm:$0xff] }
 0x2ba   :  { %v13172_v60 = vpop.permute.xlu1 %2223  ;;  %18459 = vst [vmem:[#allocation222_spill] sm:$0xff] %v13192_v9 }
 0x2bb   :  { %18450 = vst [vmem:[#allocation213_spill] sm:$0xff] %v13172_v60  ;;  %2740 = vperm.xlu1 %11990, %v2421_v49   ;;  %v2880_v49 = vld [vmem:[#allocation2 + $0x52] sm:$0xff] }
 0x2bc   :  { %v13180_v36 = vpop.permute.xlu0 %2435 }
 0x2bd   :  { %18454 = vst [vmem:[#allocation217_spill] sm:$0xff] %v13180_v36  ;;  %2952 = vperm.xlu0 %11989, %v13178_v20  }
 0x2be   :  { %v13176_v25 = vpop.permute.xlu1 %2430 }
 0x2bf   :  { %18452 = vst [vmem:[#allocation215_spill] sm:$0xff] %v13176_v25  ;;  %2947 = vperm.xlu1 %11990, %v2876_v44   ;;  %v2882_v44 = vld [vmem:[#allocation2 + $0x6a] sm:$0xff] }
 0x2c0   :  { %v13187_v60 = vpop.permute.xlu0 %2445 }
 0x2c1   :  { %18457 = vst [vmem:[#allocation220_spill] sm:$0xff] %v13187_v60  ;;  %2962 = vperm.xlu0 %11989, %v13185_v4  }
 0x2c2   :  { %v13182_v52 = vpop.permute.xlu1 %2440 }
 0x2c3   :  { %18455 = vst [vmem:[#allocation218_spill] sm:$0xff] %v13182_v52  ;;  %2957 = vperm.xlu1 %11990, %v2878_v41   ;;  %v13199_v41 = vld [vmem:[#allocation2 + $0x7a] sm:$0xff]  ;;  %v2884_v52 = vld [vmem:[#allocation2 + $0x82] sm:$0xff] }
 0x2c4   :  { %v13194_v25 = vpop.permute.xlu0 %2455  ;;  %18462 = vst [vmem:[#allocation225_spill] sm:$0xff] %v13199_v41 }
 0x2c5   :  { %18460 = vst [vmem:[#allocation223_spill] sm:$0xff] %v13194_v25  ;;  %2972 = vperm.xlu0 %11989, %v13192_v9  }
 0x2c6   :  { %v13189_v57 = vpop.permute.xlu1 %2450 }
 0x2c7   :  { %18458 = vst [vmem:[#allocation221_spill] sm:$0xff] %v13189_v57  ;;  %2967 = vperm.xlu1 %11990, %v2880_v49   ;;  %v2885_v49 = vld [vmem:[#allocation2 + $0x92] sm:$0xff]  ;;  %v2886_v57 = vld [vmem:[#allocation2 + $0x9a] sm:$0xff] }
 0x2c8   :  { %v13201_v3 = vpop.permute.xlu0 %2465 }
 0x2c9   :  { %18463 = vst [vmem:[#allocation226_spill] sm:$0xff] %v13201_v3  ;;  %2982 = vperm.xlu0 %11989, %v13199_v41   ;;  %v2890_v3 = vld [vmem:[#allocation2 + $0xca] sm:$0xff] }
 0x2ca   :  { %v13196_v36 = vpop.permute.xlu1 %2460 }
 0x2cb   :  { %18461 = vst [vmem:[#allocation224_spill] sm:$0xff] %v13196_v36  ;;  %2977 = vperm.xlu1 %11990, %v2882_v44   ;;  %v2887_v36 = vld [vmem:[#allocation2 + $0xaa] sm:$0xff]  ;;  %v2888_v44 = vld [vmem:[#allocation2 + $0xb2] sm:$0xff] }
 0x2cc   :  { %v13206_v4 = vpop.permute.xlu0 %2475 }
 0x2cd   :  { %18465 = vst [vmem:[#allocation228_spill] sm:$0xff] %v13206_v4  ;;  %2992 = vperm.xlu0 %11989, %v2885_v49   ;;  %v2891_v4 = vld [vmem:[#allocation2 + $0xda] sm:$0xff] }
 0x2ce   :  { %v13203_v60 = vpop.permute.xlu1 %2470 }
 0x2cf   :  { %18464 = vst [vmem:[#allocation227_spill] sm:$0xff] %v13203_v60  ;;  %2987 = vperm.xlu1 %11990, %v2884_v52   ;;  %v2889_v60 = vld [vmem:[#allocation2 + $0xc2] sm:$0xff] }
 0x2d0   :  { %v13210_v9 = vpop.permute.xlu0 %2485 }
 0x2d1   :  { %18467 = vst [vmem:[#allocation230_spill] sm:$0xff] %v13210_v9  ;;  %3002 = vperm.xlu0 %11989, %v2887_v36   ;;  %v2893_v9 = vld [vmem:[#allocation2 + $0xf2] sm:$0xff] }
 0x2d2   :  { %v13208_v25 = vpop.permute.xlu1 %2480 }
 0x2d3   :  { %18466 = vst [vmem:[#allocation229_spill] sm:$0xff] %v13208_v25  ;;  %2997 = vperm.xlu1 %11990, %v2886_v57   ;;  %v2892_v25 = vld [vmem:[#allocation2 + $0xe2] sm:$0xff] }
 0x2d4   :  { %v13214_v41 = vpop.permute.xlu0 %2495 }
 0x2d5   :  { %18469 = vst [vmem:[#allocation232_spill] sm:$0xff] %v13214_v41  ;;  %3012 = vperm.xlu0 %11989, %v2889_v60   ;;  %v2895_v41 = vld [vmem:[#allocation2 + $0x10a] sm:$0xff] }
 0x2d6   :  { %v13212_v20 = vpop.permute.xlu1 %2490 }
 0x2d7   :  { %18468 = vst [vmem:[#allocation231_spill] sm:$0xff] %v13212_v20  ;;  %3007 = vperm.xlu1 %11990, %v2888_v44   ;;  %v2894_v20 = vld [vmem:[#allocation2 + $0xfa] sm:$0xff] }
 0x2d8   :  { %v13218_v49 = vpop.permute.xlu0 %2505 }
 0x2d9   :  { %18471 = vst [vmem:[#allocation234_spill] sm:$0xff] %v13218_v49  ;;  %3022 = vperm.xlu0 %11989, %v2891_v4   ;;  %v2897_v49 = vld [vmem:[#allocation2 + $0x122] sm:$0xff] }
 0x2da   :  { %v13216_v52 = vpop.permute.xlu1 %2500 }
 0x2db   :  { %18470 = vst [vmem:[#allocation233_spill] sm:$0xff] %v13216_v52  ;;  %3017 = vperm.xlu1 %11990, %v2890_v3   ;;  %v2896_v52 = vld [vmem:[#allocation2 + $0x112] sm:$0xff] }
 0x2dc   :  { %v13222_v36 = vpop.permute.xlu0 %2515 }
 0x2dd   :  { %18473 = vst [vmem:[#allocation236_spill] sm:$0xff] %v13222_v36  ;;  %3032 = vperm.xlu0 %11989, %v2893_v9   ;;  %v2899_v36 = vld [vmem:[#allocation2 + $0x13a] sm:$0xff] }
 0x2de   :  { %v13220_v57 = vpop.permute.xlu1 %2510 }
 0x2df   :  { %18472 = vst [vmem:[#allocation235_spill] sm:$0xff] %v13220_v57  ;;  %3027 = vperm.xlu1 %11990, %v2892_v25   ;;  %v2898_v57 = vld [vmem:[#allocation2 + $0x12a] sm:$0xff] }
 0x2e0   :  { %v13226_v60 = vpop.permute.xlu0 %2525 }
 0x2e1   :  { %18475 = vst [vmem:[#allocation238_spill] sm:$0xff] %v13226_v60  ;;  %3042 = vperm.xlu0 %11989, %v2895_v41   ;;  %v2901_v60 = vld [vmem:[#allocation2 + $0x152] sm:$0xff] }
 0x2e2   :  { %v13224_v44 = vpop.permute.xlu1 %2520 }
 0x2e3   :  { %18474 = vst [vmem:[#allocation237_spill] sm:$0xff] %v13224_v44  ;;  %3037 = vperm.xlu1 %11990, %v2894_v20   ;;  %v2900_v44 = vld [vmem:[#allocation2 + $0x142] sm:$0xff] }
 0x2e4   :  { %v13230_v4 = vpop.permute.xlu0 %2535 }
 0x2e5   :  { %18477 = vst [vmem:[#allocation240_spill] sm:$0xff] %v13230_v4  ;;  %3052 = vperm.xlu0 %11989, %v2897_v49   ;;  %v2903_v4 = vld [vmem:[#allocation2 + $0x16a] sm:$0xff] }
 0x2e6   :  { %v13228_v3 = vpop.permute.xlu1 %2530 }
 0x2e7   :  { %18476 = vst [vmem:[#allocation239_spill] sm:$0xff] %v13228_v3  ;;  %3047 = vperm.xlu1 %11990, %v2896_v52   ;;  %v2902_v3 = vld [vmem:[#allocation2 + $0x15a] sm:$0xff] }
 0x2e8   :  { %v13234_v9 = vpop.permute.xlu0 %2545 }
 0x2e9   :  { %18479 = vst [vmem:[#allocation242_spill] sm:$0xff] %v13234_v9  ;;  %3062 = vperm.xlu0 %11989, %v2899_v36   ;;  %v2905_v9 = vld [vmem:[#allocation2 + $0x182] sm:$0xff] }
 0x2ea   :  { %v13232_v25 = vpop.permute.xlu1 %2540 }
 0x2eb   :  { %18478 = vst [vmem:[#allocation241_spill] sm:$0xff] %v13232_v25  ;;  %3057 = vperm.xlu1 %11990, %v2898_v57   ;;  %v2904_v25 = vld [vmem:[#allocation2 + $0x172] sm:$0xff] }
 0x2ec   :  { %v13238_v41 = vpop.permute.xlu0 %2555 }
 0x2ed   :  { %18481 = vst [vmem:[#allocation244_spill] sm:$0xff] %v13238_v41  ;;  %3072 = vperm.xlu0 %11989, %v2901_v60   ;;  %v2907_v41 = vld [vmem:[#allocation2 + $0x1ca] sm:$0xff] }
 0x2ee   :  { %v13236_v20 = vpop.permute.xlu1 %2550 }
 0x2ef   :  { %18480 = vst [vmem:[#allocation243_spill] sm:$0xff] %v13236_v20  ;;  %3067 = vperm.xlu1 %11990, %v2900_v44   ;;  %v2906_v20 = vld [vmem:[#allocation2 + $0x18a] sm:$0xff] }
 0x2f0   :  { %v13242_v49 = vpop.permute.xlu0 %2565 }
 0x2f1   :  { %18483 = vst [vmem:[#allocation246_spill] sm:$0xff] %v13242_v49  ;;  %3082 = vperm.xlu0 %11989, %v2903_v4   ;;  %v2909_v49 = vld [vmem:[#allocation2 + $0x1e2] sm:$0xff] }
 0x2f2   :  { %v13240_v52 = vpop.permute.xlu1 %2560 }
 0x2f3   :  { %18482 = vst [vmem:[#allocation245_spill] sm:$0xff] %v13240_v52  ;;  %3077 = vperm.xlu1 %11990, %v2902_v3   ;;  %v2908_v52 = vld [vmem:[#allocation2 + $0x1d2] sm:$0xff] }
 0x2f4   :  { %v13246_v36 = vpop.permute.xlu0 %2575 }
 0x2f5   :  { %18485 = vst [vmem:[#allocation248_spill] sm:$0xff] %v13246_v36  ;;  %3092 = vperm.xlu0 %11989, %v2905_v9   ;;  %v2911_v36 = vld [vmem:[#allocation2 + $0x1fa] sm:$0xff] }
 0x2f6   :  { %v13244_v57 = vpop.permute.xlu1 %2570 }
 0x2f7   :  { %18484 = vst [vmem:[#allocation247_spill] sm:$0xff] %v13244_v57  ;;  %3087 = vperm.xlu1 %11990, %v2904_v25   ;;  %v2910_v57 = vld [vmem:[#allocation2 + $0x1ea] sm:$0xff] }
 0x2f8   :  { %v13250_v60 = vpop.permute.xlu0 %2585 }
 0x2f9   :  { %18487 = vst [vmem:[#allocation250_spill] sm:$0xff] %v13250_v60  ;;  %3102 = vperm.xlu0 %11989, %v2907_v41   ;;  %v2913_v60 = vld [vmem:[#allocation2 + $0x212] sm:$0xff] }
 0x2fa   :  { %v13248_v44 = vpop.permute.xlu1 %2580 }
 0x2fb   :  { %18486 = vst [vmem:[#allocation249_spill] sm:$0xff] %v13248_v44  ;;  %3097 = vperm.xlu1 %11990, %v2906_v20   ;;  %v2912_v44 = vld [vmem:[#allocation2 + $0x202] sm:$0xff] }
 0x2fc   :  { %v13254_v4 = vpop.permute.xlu0 %2595 }
 0x2fd   :  { %18489 = vst [vmem:[#allocation252_spill] sm:$0xff] %v13254_v4  ;;  %3112 = vperm.xlu0 %11989, %v2909_v49   ;;  %v2915_v4 = vld [vmem:[#allocation2 + $0x22a] sm:$0xff] }
 0x2fe   :  { %v13252_v3 = vpop.permute.xlu1 %2590 }
 0x2ff   :  { %18488 = vst [vmem:[#allocation251_spill] sm:$0xff] %v13252_v3  ;;  %3107 = vperm.xlu1 %11990, %v2908_v52   ;;  %v2914_v3 = vld [vmem:[#allocation2 + $0x21a] sm:$0xff] }
 0x300   :  { %v13258_v9 = vpop.permute.xlu0 %2605 }
 0x301   :  { %18491 = vst [vmem:[#allocation254_spill] sm:$0xff] %v13258_v9  ;;  %3122 = vperm.xlu0 %11989, %v2911_v36   ;;  %v2917_v9 = vld [vmem:[#allocation2 + $0x242] sm:$0xff] }
 0x302   :  { %v13256_v25 = vpop.permute.xlu1 %2600 }
 0x303   :  { %18490 = vst [vmem:[#allocation253_spill] sm:$0xff] %v13256_v25  ;;  %3117 = vperm.xlu1 %11990, %v2910_v57   ;;  %v2916_v25 = vld [vmem:[#allocation2 + $0x232] sm:$0xff] }
 0x304   :  { %v13262_v41 = vpop.permute.xlu0 %2615 }
 0x305   :  { %18493 = vst [vmem:[#allocation256_spill] sm:$0xff] %v13262_v41  ;;  %3132 = vperm.xlu0 %11989, %v2913_v60   ;;  %v2919_v41 = vld [vmem:[#allocation2 + $0x25a] sm:$0xff] }
 0x306   :  { %v13260_v20 = vpop.permute.xlu1 %2610 }
 0x307   :  { %18492 = vst [vmem:[#allocation255_spill] sm:$0xff] %v13260_v20  ;;  %3127 = vperm.xlu1 %11990, %v2912_v44   ;;  %v2918_v20 = vld [vmem:[#allocation2 + $0x24a] sm:$0xff] }
 0x308   :  { %v13266_v49 = vpop.permute.xlu0 %2625 }
 0x309   :  { %18495 = vst [vmem:[#allocation258_spill] sm:$0xff] %v13266_v49  ;;  %3142 = vperm.xlu0 %11989, %v2915_v4   ;;  %v2921_v49 = vld [vmem:[#allocation2 + $0x272] sm:$0xff] }
 0x30a   :  { %v13264_v52 = vpop.permute.xlu1 %2620 }
 0x30b   :  { %18494 = vst [vmem:[#allocation257_spill] sm:$0xff] %v13264_v52  ;;  %3137 = vperm.xlu1 %11990, %v2914_v3   ;;  %v2920_v52 = vld [vmem:[#allocation2 + $0x262] sm:$0xff] }
 0x30c   :  { %v13270_v36 = vpop.permute.xlu0 %2635 }
 0x30d   :  { %18497 = vst [vmem:[#allocation260_spill] sm:$0xff] %v13270_v36  ;;  %3152 = vperm.xlu0 %11989, %v2917_v9   ;;  %v2923_v36 = vld [vmem:[#allocation2 + $0x28a] sm:$0xff] }
 0x30e   :  { %v13268_v57 = vpop.permute.xlu1 %2630 }
 0x30f   :  { %18496 = vst [vmem:[#allocation259_spill] sm:$0xff] %v13268_v57  ;;  %3147 = vperm.xlu1 %11990, %v2916_v25   ;;  %v2922_v57 = vld [vmem:[#allocation2 + $0x27a] sm:$0xff] }
 0x310   :  { %v13274_v60 = vpop.permute.xlu0 %2645 }
 0x311   :  { %18499 = vst [vmem:[#allocation262_spill] sm:$0xff] %v13274_v60  ;;  %3162 = vperm.xlu0 %11989, %v2919_v41   ;;  %v13289_v41 = vld [vmem:[%s18222_s1] ss:$0 sm:$0xff] }
 0x312   :  { %v13272_v44 = vpop.permute.xlu1 %2640 }
 0x313   :  { %18498 = vst [vmem:[#allocation261_spill] sm:$0xff] %v13272_v44  ;;  %3157 = vperm.xlu1 %11990, %v2918_v20   ;;  %v2924_v44 = vld [vmem:[#allocation2 + $0x292] sm:$0xff] }
 0x314   :  { %v13278_v4 = vpop.permute.xlu0 %2655 }
 0x315   :  { %18501 = vst [vmem:[#allocation264_spill] sm:$0xff] %v13278_v4  ;;  %3172 = vperm.xlu0 %11989, %v2921_v49   ;;  %v13295_v49 = vmul.f32 %v13289_v41, %v12646_v1  ;;  %v13317_v1 = vmul.f32 %v13289_v41, %v12656_v11  ;;  %v13337_v11 = vmul.f32 %v13289_v41, %v12666_v22 }
 0x316   :  { %v13276_v3 = vpop.permute.xlu1 %2650  ;;  %v13357_v22 = vmul.f32 %v13289_v41, %v12676_v31 }
 0x317   :  { %18500 = vst [vmem:[#allocation263_spill] sm:$0xff] %v13276_v3  ;;  %3167 = vperm.xlu1 %11990, %v2920_v52   ;;  %v2925_v52 = vld [vmem:[#allocation2 + $0x2a2] sm:$0xff]  ;;  %v2926_v3 = vld [vmem:[#allocation2 + $0x2aa] sm:$0xff] }
 0x318   :  { %v13282_v9 = vpop.permute.xlu0 %2665 }
 0x319   :  { %18503 = vst [vmem:[#allocation266_spill] sm:$0xff] %v13282_v9  ;;  %3182 = vperm.xlu0 %11989, %v2923_v36   ;;  %v13303_v36 = vmul.f32 %v13289_v41, %v12650_v6  ;;  %v13325_v6 = vmul.f32 %v13289_v41, %v12660_v15  ;;  %v2928_v15 = vld [vmem:[#allocation2 + $0x2c2] sm:$0xff]  ;;  %v13504_v9 = vmul.f32 %v13289_v41, %v12742_v12 }
 0x31a   :  { %v13280_v25 = vpop.permute.xlu1 %2660  ;;  %v18523_v12 = vld [vmem:[#allocation22_spill] sm:$0xff] }
 0x31b   :  { %18502 = vst [vmem:[#allocation265_spill] sm:$0xff] %v13280_v25  ;;  %3177 = vperm.xlu1 %11990, %v2922_v57   ;;  %v13299_v57 = vmul.f32 %v13289_v41, %v12648_v2  ;;  %v13321_v2 = vmul.f32 %v13289_v41, %v12658_v14  ;;  %v13341_v14 = vmul.f32 %v13289_v41, %v12668_v23  ;;  %18516 = vst [vmem:[#allocation279_spill] sm:$0xff] %v13504_v9  ;;  %v18525_v9 = vld [vmem:[#allocation24_spill] sm:$0xff] }
 0x31c   :  { %v13291_v4 = vpop.permute.xlu0 %2675  ;;  %v13363_v23 = vmul.f32 %v13289_v41, %v12678_v34  ;;  %v13385_v34 = vmul.f32 %v13289_v41, %v12688_v43  ;;  %v13405_v43 = vmul.f32 %v13289_v41, %v12698_v54  ;;  %v13425_v54 = vmul.f32 %v13289_v41, %v12708_v63 }
 0x31d   :  { %18505 = vst [vmem:[#allocation268_spill] sm:$0xff] %v13291_v4  ;;  %3192 = vperm.xlu0 %11989, %v2925_v52   ;;  %v13313_v4 = vmul.f32 %v13289_v41, %v12654_v10  ;;  %v13329_v52 = vmul.f32 %v13289_v41, %v12662_v18  ;;  %v13333_v10 = vmul.f32 %v13289_v41, %v12664_v19 }
 0x31e   :  { %v13284_v20 = vpop.permute.xlu1 %2670  ;;  %v13349_v18 = vmul.f32 %v13289_v41, %v12672_v27  ;;  %v13353_v19 = vmul.f32 %v13289_v41, %v12674_v30  ;;  %v13371_v27 = vmul.f32 %v13289_v41, %v12682_v38  ;;  %v13375_v30 = vmul.f32 %v13289_v41, %v12684_v39  ;;  %v2929_v39 = vld [vmem:[#allocation2 + $0x2d2] sm:$0xff] }
 0x31f   :  { %18504 = vst [vmem:[#allocation267_spill] sm:$0xff] %v13284_v20  ;;  %3187 = vperm.xlu1 %11990, %v2924_v44   ;;  %v13307_v20 = vmul.f32 %v13289_v41, %v12652_v7  ;;  %v2927_v7 = vld [vmem:[#allocation2 + $0x2ba] sm:$0xff]  ;;  %v13393_v38 = vmul.f32 %v13289_v41, %v12692_v47 }
 0x320   :  { %v2930_v47 = vld [vmem:[#allocation2 + $0x2da] sm:$0xff] }
 0x321   :  { %3202 = vperm.xlu0 %11989, %v2927_v7   ;;  %v13397_v7 = vmul.f32 %v13289_v41, %v12694_v50  ;;  %v13417_v50 = vmul.f32 %v13289_v41, %v12704_v59  ;;  %v13439_v59 = vmul.f32 %v13289_v41, %v12714_v13  ;;  %v13461_v13 = vmul.f32 %v13289_v41, %v12724_v32  ;;  %v13482_v32 = vld [vmem:[%s18222_s1 + $0x1] ss:$0 sm:$0xff] }
 0x322   :  { %v13309_v44 = vpop.permute.xlu1 %2680  ;;  %v1196_v60 = vmul.f32 %v13482_v32, %v18523_v12  ;;  %v18532_v12 = vld [vmem:[#allocation25_spill] sm:$0xff] }
 0x323   :  { %18506 = vst [vmem:[#allocation269_spill] sm:$0xff] %v13309_v44  ;;  %3197 = vperm.xlu1 %11990, %v2926_v3   ;;  %v13345_v3 = vmul.f32 %v13289_v41, %v12670_v26  ;;  %v13359_v44 = vpop.permute.xlu0 %2685  ;;  %v13367_v26 = vmul.f32 %v13289_v41, %v12680_v35  ;;  %v13389_v35 = vmul.f32 %v13289_v41, %v12690_v46 }
 0x324   :  { %18507 = vst [vmem:[#allocation270_spill] sm:$0xff] %v13359_v44  ;;  %v13381_v44 = vmul.f32 %v13289_v41, %v12686_v42  ;;  %v13401_v42 = vmul.f32 %v13289_v41, %v12696_v51  ;;  %v13409_v46 = vmul.f32 %v13289_v41, %v12700_v55  ;;  %v13421_v51 = vmul.f32 %v13289_v41, %v12706_v62 }
 0x325   :  { %v13431_v55 = vmul.f32 %v13289_v41, %v12710_v5  ;;  %v13443_v62 = vmul.f32 %v13289_v41, %v12716_v16  ;;  %3212 = vperm.xlu0 %11989, %v2929_v39   ;;  %v13453_v5 = vmul.f32 %v13289_v41, %v12720_v24  ;;  %v2931_v16 = vld [vmem:[#allocation2 + $0x2ea] sm:$0xff]  ;;  %v13465_v39 = vmul.f32 %v13289_v41, %v12726_v37 }
 0x326   :  { %v13377_v31 = vpop.permute.xlu1 %2690  ;;  %v13473_v24 = vmul.f32 %v13289_v41, %v12730_v45  ;;  %v13486_v37 = vmul.f32 %v13289_v41, %v12734_v53  ;;  %v13494_v45 = vmul.f32 %v13289_v41, %v12738_v61  ;;  %v13508_v53 = vmul.f32 %v13289_v41, %v12744_v17  ;;  %v18524_v17 = vld [vmem:[#allocation23_spill] sm:$0xff] }
 0x327   :  { %18508 = vst [vmem:[#allocation271_spill] sm:$0xff] %v13377_v31  ;;  %3207 = vperm.xlu1 %11990, %v2928_v15   ;;  %v13413_v15 = vmul.f32 %v13289_v41, %v12702_v58  ;;  %v13427_v31 = vpop.permute.xlu0 %2695  ;;  %v13435_v58 = vmul.f32 %v13289_v41, %v12712_v8  ;;  %v13457_v8 = vmul.f32 %v13289_v41, %v12722_v29 }
 0x328   :  { %18509 = vst [vmem:[#allocation272_spill] sm:$0xff] %v13427_v31  ;;  %v13449_v31 = vmul.f32 %v13289_v41, %v12718_v21  ;;  %v13469_v21 = vmul.f32 %v13289_v41, %v12728_v40  ;;  %v13477_v29 = vmul.f32 %v13289_v41, %v12732_v48  ;;  %18511 = vst [vmem:[#allocation274_spill] sm:$0xff] %v13486_v37  ;;  %v18543_v37 = vld [vmem:[#allocation18_spill] sm:$0xff] }
 0x329   :  { %v13490_v40 = vmul.f32 %v13289_v41, %v12736_v56  ;;  %18513 = vst [vmem:[#allocation276_spill] sm:$0xff] %v13494_v45  ;;  %v13498_v48 = vmul.f32 %v13289_v41, %v12740_v0  ;;  %18517 = vst [vmem:[#allocation280_spill] sm:$0xff] %v13508_v53  ;;  %v13512_v56 = vmul.f32 %v13289_v41, %v12746_v28  ;;  %3222 = vperm.xlu0 %11989, %v2931_v16   ;;  %v18528_v16 = vld [vmem:[#allocation12_spill] sm:$0xff]  ;;  %v18533_v45 = vld [vmem:[#allocation14_spill] sm:$0xff] }
 0x32a   :  { %v13445_v63 = vpop.permute.xlu1 %2700  ;;  %v13516_v61 = vmul.f32 %v13289_v41, %v12748_v33  ;;  %v1197_v53 = vmul.f32 %v13482_v32, %v18524_v17  ;;  %v1198_v28 = vmul.f32 %v13482_v32, %v18525_v9  ;;  %v18526_v33 = vld [vmem:[#allocation11_spill] sm:$0xff]  ;;  %v1199_v17 = vmul.f32 %v13482_v32, %v18532_v12 }
 0x32b   :  { %18510 = vst [vmem:[#allocation273_spill] sm:$0xff] %v13445_v63  ;;  %3217 = vperm.xlu1 %11990, %v2930_v47   ;;  %v2932_v47 = vld [vmem:[#allocation2 + $0x2f2] sm:$0xff]  ;;  %18512 = vst [vmem:[#allocation275_spill] sm:$0xff] %v13490_v40  ;;  %v13500_v63 = vpop.permute.xlu0 %2705  ;;  %v13546_v9 = vmul.f32 %v13289_v41, %v18533_v45  ;;  %v18541_v40 = vld [vmem:[#allocation17_spill] sm:$0xff]  ;;  %v13566_v45 = vmul.f32 %v13289_v41, %v18543_v37 }
 0x32c   :  { %18514 = vst [vmem:[#allocation277_spill] sm:$0xff] %v13498_v48  ;;  %18515 = vst [vmem:[#allocation278_spill] sm:$0xff] %v13500_v63  ;;  %v18521_v63 = vld [vmem:[#allocation10_spill] sm:$0xff]  ;;  %v2934_v48 = vld [vmem:[#allocation2 + $0x30a] sm:$0xff]  ;;  %v13562_v12 = vmul.f32 %v13289_v41, %v18541_v40  ;;  %v13583_v40 = vadd.f32 %v1196_v60, %v13295_v49  ;;  %v13586_v37 = vadd.f32 %v1197_v53, %v13303_v36 }
 0x32d   :  { %18518 = vst [vmem:[#allocation281_spill] sm:$0xff] %v13512_v56  ;;  %18519 = vst [vmem:[#allocation282_spill] sm:$0xff] %v13516_v61  ;;  %v13522_v25 = vmul.f32 %v13289_v41, %v18521_v63  ;;  %v2933_v56 = vld [vmem:[#allocation2 + $0x302] sm:$0xff]  ;;  %v13532_v61 = vmul.f32 %v13289_v41, %v18526_v33  ;;  %v18530_v63 = vld [vmem:[#allocation13_spill] sm:$0xff] }
 0x32e   :  { %v13518_v0 = vpop.permute.xlu1 %2710  ;;  %18534 = vst [vmem:[#allocation11_spill] sm:$0xff] %v13546_v9  ;;  %18542 = vst [vmem:[#allocation14_spill] sm:$0xff] %v13562_v12  ;;  %v18545_v9 = vld [vmem:[#allocation19_spill] sm:$0xff]  ;;  %3232 = vperm.xlu0 %11989, %v2933_v56   ;;  %v2936_v49 = vld [vmem:[#allocation2 + $0x322] sm:$0xff] }
 0x32f   :  { %18520 = vst [vmem:[#allocation283_spill] sm:$0xff] %v13518_v0  ;;  %18522 = vst [vmem:[#allocation10_spill] sm:$0xff] %v13522_v25  ;;  %3227 = vperm.xlu1 %11990, %v2932_v47   ;;  %v13536_v0 = vmul.f32 %v13289_v41, %v18528_v16  ;;  %v13540_v25 = vmul.f32 %v13289_v41, %v18530_v63  ;;  %v18535_v47 = vld [vmem:[#allocation15_spill] sm:$0xff] }
 0x330   :  { %18527 = vst [vmem:[#allocation22_spill] sm:$0xff] %v13532_v61  ;;  %v13550_v33 = vmul.f32 %v13289_v41, %v18535_v47  ;;  %v18537_v61 = vld [vmem:[#allocation16_spill] sm:$0xff]  ;;  %18544 = vst [vmem:[#allocation15_spill] sm:$0xff] %v13566_v45  ;;  %v13570_v47 = vmul.f32 %v13289_v41, %v18545_v9  ;;  %v13589_v9 = vadd.f32 %v1198_v28, %v13299_v57  ;;  %v18560_v57 = vld [vmem:[#allocation30_spill] sm:$0xff] }
 0x331   :  { %18529 = vst [vmem:[#allocation23_spill] sm:$0xff] %v13536_v0  ;;  %18531 = vst [vmem:[#allocation24_spill] sm:$0xff] %v13540_v25  ;;  %v13554_v16 = vmul.f32 %v13289_v41, %v18537_v61  ;;  %v18539_v0 = vld [vmem:[#allocation26_spill] sm:$0xff]  ;;  %v13558_v25 = vpop.permute.xlu0 %2715  ;;  %v18561_v53 = vld [vmem:[#allocation31_spill] sm:$0xff] }
 0x332   :  { %18536 = vst [vmem:[#allocation12_spill] sm:$0xff] %v13550_v33  ;;  %v1200_v63 = vmul.f32 %v13482_v32, %v18539_v0  ;;  %18540 = vst [vmem:[#allocation25_spill] sm:$0xff] %v13558_v25  ;;  %v18547_v33 = vld [vmem:[#allocation20_spill] sm:$0xff]  ;;  %v18550_v0 = vld [vmem:[#allocation21_spill] sm:$0xff] }
 0x333   :  { %18538 = vst [vmem:[#allocation13_spill] sm:$0xff] %v13554_v16  ;;  %18546 = vst [vmem:[#allocation16_spill] sm:$0xff] %v13570_v47  ;;  %v13574_v61 = vmul.f32 %v13289_v41, %v18547_v33  ;;  %v13576_v16 = vpop.permute.xlu1 %2720  ;;  %v13580_v25 = vmul.f32 %v13289_v41, %v18550_v0  ;;  %3237 = vperm.xlu1 %11990, %v2934_v48   ;;  %v2935_v47 = vld [vmem:[#allocation2 + $0x31a] sm:$0xff]  ;;  %v13592_v33 = vadd.f32 %v1199_v17, %v13307_v20  ;;  %v18562_v28 = vld [vmem:[#allocation32_spill] sm:$0xff] }
 0x334   :  { %18549 = vst [vmem:[#allocation17_spill] sm:$0xff] %v13576_v16  ;;  %18552 = vst [vmem:[#allocation19_spill] sm:$0xff] %v13583_v40  ;;  %v18556_v16 = vld [vmem:[#allocation27_spill] sm:$0xff]  ;;  %v18558_v0 = vld [vmem:[#allocation29_spill] sm:$0xff]  ;;  %v13601_v36 = vadd.f32 %v1200_v63, %v13313_v4  ;;  %v1204_v48 = vmul.f32 %v13482_v32, %v18560_v57  ;;  %v1205_v20 = vmul.f32 %v13482_v32, %v18561_v53  ;;  %3242 = vperm.xlu0 %11989, %v2935_v47  }
 0x335   :  { %18548 = vst [vmem:[#allocation26_spill] sm:$0xff] %v13574_v61  ;;  %18551 = vst [vmem:[#allocation18_spill] sm:$0xff] %v13580_v25  ;;  %v1201_v56 = vmul.f32 %v13482_v32, %v18556_v16  ;;  %v18557_v61 = vld [vmem:[#allocation28_spill] sm:$0xff]  ;;  %v1203_v60 = vmul.f32 %v13482_v32, %v18558_v0  ;;  %v1206_v17 = vmul.f32 %v13482_v32, %v18562_v28  ;;  %v13609_v16 = vpop.permute.xlu0 %2725  ;;  %v18569_v53 = vld [vmem:[#allocation37_spill] sm:$0xff] }
 0x336   :  { %18553 = vst [vmem:[#allocation20_spill] sm:$0xff] %v13586_v37  ;;  %18554 = vst [vmem:[#allocation21_spill] sm:$0xff] %v13589_v9  ;;  %v1202_v41 = vmul.f32 %v13482_v32, %v18557_v61  ;;  %v18565_v9 = vld [vmem:[#allocation34_spill] sm:$0xff]  ;;  %v18566_v37 = vld [vmem:[#allocation35_spill] sm:$0xff]  ;;  %v1211_v28 = vmul.f32 %v13482_v32, %v18569_v53 }
 0x337   :  { %18555 = vst [vmem:[#allocation284_spill] sm:$0xff] %v13592_v33  ;;  %18559 = vst [vmem:[#allocation27_spill] sm:$0xff] %v13601_v36  ;;  %v18564_v33 = vld [vmem:[#allocation33_spill] sm:$0xff]  ;;  %v1208_v0 = vmul.f32 %v13482_v32, %v18565_v9  ;;  %v1209_v4 = vmul.f32 %v13482_v32, %v18566_v37  ;;  %v18567_v63 = vld [vmem:[#allocation36_spill] sm:$0xff]  ;;  %v13619_v36 = vpop.permute.xlu1 %2730  ;;  %3247 = vperm.xlu1 %11990, %v2936_v49   ;;  %v13630_v12 = vadd.f32 %v1201_v56, %v13317_v1 }
 0x338   :  { %18563 = vst [vmem:[#allocation28_spill] sm:$0xff] %v13609_v16  ;;  %v1207_v61 = vmul.f32 %v13482_v32, %v18564_v33  ;;  %v1210_v57 = vmul.f32 %v13482_v32, %v18567_v63  ;;  %18568 = vst [vmem:[#allocation29_spill] sm:$0xff] %v13619_v36  ;;  %v18570_v40 = vld [vmem:[#allocation38_spill] sm:$0xff]  ;;  %v18571_v25 = vld [vmem:[#allocation39_spill] sm:$0xff]  ;;  %v13633_v63 = vadd.f32 %v1202_v41, %v13321_v2 }
 0x339   :  { %v1212_v16 = vmul.f32 %v13482_v32, %v18570_v40  ;;  %v1213_v33 = vmul.f32 %v13482_v32, %v18571_v25  ;;  %v18572_v45 = vld [vmem:[#allocation40_spill] sm:$0xff]  ;;  %v13636_v47 = vadd.f32 %v1203_v60, %v13325_v6  ;;  %v18573_v53 = vld [vmem:[#allocation41_spill] sm:$0xff]  ;;  %v13641_v25 = vadd.f32 %v1204_v48, %v13329_v52  ;;  %v18574_v1 = vld [vmem:[#allocation42_spill] sm:$0xff]  ;;  %v13651_v56 = vpop.permute.xlu0 %2735 }
 0x33a   :  { %v1214_v9 = vmul.f32 %v13482_v32, %v18572_v45  ;;  %v2937_v37 = vld [vmem:[#allocation2 + $0x332] sm:$0xff]  ;;  %v1215_v40 = vmul.f32 %v13482_v32, %v18573_v53  ;;  %v2938_v36 = vld [vmem:[#allocation2 + $0x33a] sm:$0xff]  ;;  %v13644_v45 = vadd.f32 %v1205_v20, %v13333_v10  ;;  %v13647_v49 = vadd.f32 %v1206_v17, %v13337_v11  ;;  %18575 = vst [vmem:[#allocation30_spill] sm:$0xff] %v13651_v56  ;;  %v18577_v20 = vld [vmem:[#allocation43_spill] sm:$0xff] }
 0x33b   :  { %v1216_v2 = vmul.f32 %v13482_v32, %v18574_v1  ;;  %v13654_v6 = vadd.f32 %v1207_v61, %v13341_v14  ;;  %v13657_v41 = vadd.f32 %v1208_v0, %v13345_v3  ;;  %v13660_v52 = vadd.f32 %v1209_v4, %v13349_v18  ;;  %v13665_v60 = vpop.permute.xlu1 %2740  ;;  %3252 = vperm.xlu0 %11989, %v2937_v37   ;;  %v3393_v18 = vld [vmem:[#allocation2 + $0x30] sm:$0xff]  ;;  %v18579_v0 = vld [vmem:[#allocation45_spill] sm:$0xff]  ;;  %v18585_v53 = vld [vmem:[#allocation50_spill] sm:$0xff] }
 0x33c   :  { %v13663_v10 = vadd.f32 %v1210_v57, %v13353_v19  ;;  %18576 = vst [vmem:[#allocation31_spill] sm:$0xff] %v13665_v60  ;;  %v13668_v11 = vadd.f32 %v1211_v28, %v13357_v22  ;;  %v13671_v48 = vadd.f32 %v1212_v16, %v13363_v23  ;;  %v13674_v14 = vadd.f32 %v1213_v33, %v13367_v26  ;;  %v18578_v61 = vld [vmem:[#allocation44_spill] sm:$0xff]  ;;  %v18581_v4 = vld [vmem:[#allocation47_spill] sm:$0xff] }
 0x33d   :  { %v13677_v3 = vadd.f32 %v1214_v9, %v13371_v27  ;;  %3257 = vperm.xlu1 %11990, %v2938_v36   ;;  %v13680_v19 = vadd.f32 %v1215_v40, %v13375_v30  ;;  %v1217_v17 = vmul.f32 %v13482_v32, %v18577_v20  ;;  %v1218_v22 = vmul.f32 %v13482_v32, %v18578_v61  ;;  %v3394_v16 = vld [vmem:[#allocation2 + $0x38] sm:$0xff]  ;;  %v18580_v27 = vld [vmem:[#allocation46_spill] sm:$0xff]  ;;  %v13697_v33 = vpop.permute.xlu0 %2942  ;;  %v18586_v1 = vld [vmem:[#allocation51_spill] sm:$0xff] }
 0x33e   :  { %v1219_v23 = vmul.f32 %v13482_v32, %v18579_v0  ;;  %v13689_v26 = vadd.f32 %v1216_v2, %v13381_v44  ;;  %v1220_v36 = vmul.f32 %v13482_v32, %v18580_v27  ;;  %v1221_v30 = vmul.f32 %v13482_v32, %v18581_v4  ;;  %v18582_v57 = vld [vmem:[#allocation48_spill] sm:$0xff]  ;;  %18583 = vst [vmem:[#allocation32_spill] sm:$0xff] %v13697_v33  ;;  %v18584_v9 = vld [vmem:[#allocation49_spill] sm:$0xff]  ;;  %v18590_v4 = vld [vmem:[#allocation54_spill] sm:$0xff] }
 0x33f   :  { %v1222_v28 = vmul.f32 %v13482_v32, %v18582_v57  ;;  %v1223_v37 = vmul.f32 %v13482_v32, %v18584_v9  ;;  %v1224_v40 = vmul.f32 %v13482_v32, %v18585_v53  ;;  %v1225_v44 = vmul.f32 %v13482_v32, %v18586_v1  ;;  %v18587_v2 = vld [vmem:[#allocation52_spill] sm:$0xff]  ;;  %v13707_v61 = vpop.permute.xlu1 %2947  ;;  %3460 = vperm.xlu0 %11989, %v3393_v18   ;;  %v18589_v0 = vld [vmem:[#allocation53_spill] sm:$0xff]  ;;  %v18591_v33 = vld [vmem:[#allocation55_spill] sm:$0xff] }
 0x340   :  { %v1226_v20 = vmul.f32 %v13482_v32, %v18587_v2  ;;  %18588 = vst [vmem:[#allocation33_spill] sm:$0xff] %v13707_v61  ;;  %v1227_v27 = vmul.f32 %v13482_v32, %v18589_v0  ;;  %v1228_v57 = vmul.f32 %v13482_v32, %v18590_v4  ;;  %v1229_v9 = vmul.f32 %v13482_v32, %v18591_v33  ;;  %v18592_v60 = vld [vmem:[#allocation56_spill] sm:$0xff]  ;;  %v3395_v1 = vld [vmem:[#allocation2 + $0x48] sm:$0xff]  ;;  %v18593_v0 = vld [vmem:[#allocation57_spill] sm:$0xff] }
 0x341   :  { %v1230_v53 = vmul.f32 %v13482_v32, %v18592_v60  ;;  %3465 = vperm.xlu1 %11990, %v3394_v16   ;;  %v13718_v56 = vadd.f32 %v1217_v17, %v13385_v34  ;;  %v13721_v2 = vadd.f32 %v1218_v22, %v13389_v35  ;;  %v13724_v18 = vadd.f32 %v1219_v23, %v13393_v38  ;;  %v3910_v61 = vld [vmem:[#allocation2 + $0x31] sm:$0xff]  ;;  %v18594_v34 = vld [vmem:[#allocation58_spill] sm:$0xff]  ;;  %v13739_v17 = vpop.permute.xlu0 %2952 }
 0x342   :  { %v1231_v4 = vmul.f32 %v13482_v32, %v18593_v0  ;;  %v13729_v33 = vadd.f32 %v1220_v36, %v13397_v7  ;;  %v13732_v60 = vadd.f32 %v1221_v30, %v13401_v42  ;;  %v13735_v16 = vadd.f32 %v1222_v28, %v13405_v43  ;;  %18595 = vst [vmem:[#allocation34_spill] sm:$0xff] %v13739_v17  ;;  %v18597_v30 = vld [vmem:[#allocation59_spill] sm:$0xff]  ;;  %v18605_v0 = vld [vmem:[#allocation66_spill] sm:$0xff] }
 0x343   :  { %v1232_v35 = vmul.f32 %v13482_v32, %v18594_v34  ;;  %v13742_v38 = vadd.f32 %v1223_v37, %v13409_v46  ;;  %v13745_v22 = vadd.f32 %v1224_v40, %v13413_v15  ;;  %v13748_v7 = vadd.f32 %v1225_v44, %v13417_v50  ;;  %v13753_v23 = vpop.permute.xlu1 %2957  ;;  %3470 = vperm.xlu0 %11989, %v3395_v1   ;;  %v3912_v50 = vld [vmem:[#allocation2 + $0x49] sm:$0xff]  ;;  %v18598_v37 = vld [vmem:[#allocation60_spill] sm:$0xff]  ;;  %v18599_v40 = vld [vmem:[#allocation61_spill] sm:$0xff] }
 0x344   :  { %v13751_v42 = vadd.f32 %v1226_v20, %v13421_v51  ;;  %18596 = vst [vmem:[#allocation35_spill] sm:$0xff] %v13753_v23  ;;  %v13756_v43 = vadd.f32 %v1227_v27, %v13425_v54  ;;  %v13759_v36 = vadd.f32 %v1228_v57, %v13431_v55  ;;  %v13762_v46 = vadd.f32 %v1229_v9, %v13435_v58  ;;  %v3397_v44 = vld [vmem:[#allocation2 + $0x60] sm:$0xff]  ;;  %v18602_v27 = vld [vmem:[#allocation64_spill] sm:$0xff]  ;;  %v18606_v34 = vld [vmem:[#allocation67_spill] sm:$0xff] }
 0x345   :  { %v13765_v15 = vadd.f32 %v1230_v53, %v13439_v59  ;;  %3977 = vperm.xlu1 %11990, %v3910_v61   ;;  %v13768_v51 = vadd.f32 %v1231_v4, %v13443_v62  ;;  %v1233_v28 = vmul.f32 %v13482_v32, %v18597_v30  ;;  %v1234_v54 = vmul.f32 %v13482_v32, %v18598_v37  ;;  %v18600_v59 = vld [vmem:[#allocation62_spill] sm:$0xff]  ;;  %v18601_v61 = vld [vmem:[#allocation63_spill] sm:$0xff]  ;;  %v13785_v9 = vpop.permute.xlu0 %2962  ;;  %v18604_v53 = vld [vmem:[#allocation65_spill] sm:$0xff] }
 0x346   :  { %v1235_v55 = vmul.f32 %v13482_v32, %v18599_v40  ;;  %v13777_v58 = vadd.f32 %v1232_v35, %v13449_v31  ;;  %v1236_v20 = vmul.f32 %v13482_v32, %v18600_v59  ;;  %v1237_v62 = vmul.f32 %v13482_v32, %v18601_v61  ;;  %18603 = vst [vmem:[#allocation36_spill] sm:$0xff] %v13785_v9  ;;  %v18607_v35 = vld [vmem:[#allocation68_spill] sm:$0xff]  ;;  %v18609_v40 = vld [vmem:[#allocation69_spill] sm:$0xff]  ;;  %v18610_v61 = vld [vmem:[#allocation70_spill] sm:$0xff] }
 0x347   :  { %v1238_v57 = vmul.f32 %v13482_v32, %v18602_v27  ;;  %v1239_v1 = vmul.f32 %v13482_v32, %v18604_v53  ;;  %v1240_v4 = vmul.f32 %v13482_v32, %v18605_v0  ;;  %v1241_v31 = vmul.f32 %v13482_v32, %v18606_v34  ;;  %v13795_v37 = vpop.permute.xlu1 %2967  ;;  %3987 = vperm.xlu0 %11989, %v3912_v50   ;;  %v18611_v9 = vld [vmem:[#allocation71_spill] sm:$0xff]  ;;  %v18612_v23 = vld [vmem:[#allocation72_spill] sm:$0xff] }
 0x348   :  { %v1242_v30 = vmul.f32 %v13482_v32, %v18607_v35  ;;  %18608 = vst [vmem:[#allocation37_spill] sm:$0xff] %v13795_v37  ;;  %v1243_v59 = vmul.f32 %v13482_v32, %v18609_v40  ;;  %v1244_v27 = vmul.f32 %v13482_v32, %v18610_v61  ;;  %v1245_v53 = vmul.f32 %v13482_v32, %v18611_v9  ;;  %v3399_v34 = vld [vmem:[#allocation2 + $0x78] sm:$0xff]  ;;  %v3396_v37 = vld [vmem:[#allocation2 + $0x50] sm:$0xff] }
 0x349   :  { %v1246_v0 = vmul.f32 %v13482_v32, %v18612_v23  ;;  %3480 = vperm.xlu1 %11990, %v3397_v44   ;;  %v13806_v17 = vadd.f32 %v1233_v28, %v13453_v5  ;;  %v13809_v35 = vadd.f32 %v1234_v54, %v13457_v8  ;;  %v13812_v50 = vadd.f32 %v1235_v55, %v13461_v13  ;;  %v18615_v40 = vld [vmem:[#allocation73_spill] sm:$0xff]  ;;  %v18619_v5 = vld [vmem:[#allocation74_spill] sm:$0xff]  ;;  %v13827_v28 = vpop.permute.xlu0 %2972 }
 0x34a   :  { %v1247_v61 = vmul.f32 %v13482_v32, %v18615_v40  ;;  %v13817_v9 = vadd.f32 %v1236_v20, %v13465_v39  ;;  %v13820_v23 = vadd.f32 %v1237_v62, %v13469_v21  ;;  %v13823_v44 = vadd.f32 %v1238_v57, %v13473_v24  ;;  %18620 = vst [vmem:[#allocation43_spill] sm:$0xff] %v13827_v28  ;;  %v18622_v54 = vld [vmem:[#allocation274_spill] sm:$0xff]  ;;  %v18624_v40 = vld [vmem:[#allocation275_spill] sm:$0xff]  ;;  %v18626_v20 = vld [vmem:[#allocation276_spill] sm:$0xff] }
 0x34b   :  { %18613 = vst [vmem:[#allocation38_spill] sm:$0xff] %v13809_v35  ;;  %18614 = vst [vmem:[#allocation39_spill] sm:$0xff] %v13812_v50  ;;  %v1248_v8 = vmul.f32 %v13482_v32, %v18619_v5  ;;  %v13830_v13 = vadd.f32 %v1239_v1, %v13477_v29  ;;  %v13833_v55 = vadd.f32 %v1240_v4, %v18622_v54  ;;  %v13841_v62 = vpop.permute.xlu1 %2977  ;;  %3490 = vperm.xlu0 %11989, %v3399_v34   ;;  %v18629_v24 = vld [vmem:[#allocation277_spill] sm:$0xff]  ;;  %v18631_v5 = vld [vmem:[#allocation279_spill] sm:$0xff] }
 0x34c   :  { %18616 = vst [vmem:[#allocation40_spill] sm:$0xff] %v13817_v9  ;;  %18617 = vst [vmem:[#allocation41_spill] sm:$0xff] %v13820_v23  ;;  %v13836_v39 = vadd.f32 %v1241_v31, %v18624_v40  ;;  %v13839_v21 = vadd.f32 %v1242_v30, %v18626_v20  ;;  %v13844_v57 = vadd.f32 %v1243_v59, %v18629_v24  ;;  %v18633_v29 = vld [vmem:[#allocation280_spill] sm:$0xff]  ;;  %v18635_v4 = vld [vmem:[#allocation281_spill] sm:$0xff] }
 0x34d   :  { %18618 = vst [vmem:[#allocation42_spill] sm:$0xff] %v13823_v44  ;;  %18621 = vst [vmem:[#allocation44_spill] sm:$0xff] %v13830_v13  ;;  %v13847_v28 = vadd.f32 %v1244_v27, %v18631_v5  ;;  %v13850_v1 = vadd.f32 %v1245_v53, %v18633_v29  ;;  %v13853_v54 = vadd.f32 %v1246_v0, %v18635_v4  ;;  %3475 = vperm.xlu1 %11990, %v3396_v37   ;;  %v18637_v31 = vld [vmem:[#allocation282_spill] sm:$0xff]  ;;  %v18639_v30 = vld [vmem:[#allocation75_spill] sm:$0xff] }
 0x34e   :  { %18623 = vst [vmem:[#allocation45_spill] sm:$0xff] %v13833_v55  ;;  %18625 = vst [vmem:[#allocation46_spill] sm:$0xff] %v13836_v39  ;;  %v13856_v40 = vadd.f32 %v1247_v61, %v18637_v31  ;;  %v1249_v20 = vmul.f32 %v13482_v32, %v18639_v30  ;;  %v18640_v34 = vld [vmem:[#allocation76_spill] sm:$0xff]  ;;  %v18641_v24 = vld [vmem:[#allocation77_spill] sm:$0xff] }
 0x34f   :  { %18627 = vst [vmem:[#allocation47_spill] sm:$0xff] %v13839_v21  ;;  %18628 = vst [vmem:[#allocation48_spill] sm:$0xff] %v13841_v62  ;;  %v1250_v59 = vmul.f32 %v13482_v32, %v18640_v34  ;;  %v1251_v27 = vmul.f32 %v13482_v32, %v18641_v24  ;;  %v13867_v53 = vld [vmem:[%s18222_s1 + $0x2] ss:$0 sm:$0xff]  ;;  %v18645_v29 = vld [vmem:[#allocation79_spill] sm:$0xff]  ;;  %v13878_v34 = vpop.permute.xlu0 %2982 }
 0x350   :  { %18630 = vst [vmem:[#allocation49_spill] sm:$0xff] %v13844_v57  ;;  %18632 = vst [vmem:[#allocation50_spill] sm:$0xff] %v13847_v28  ;;  %v18642_v0 = vld [vmem:[#allocation10_spill] sm:$0xff]  ;;  %v1253_v4 = vmul.f32 %v13482_v32, %v18645_v29  ;;  %v18646_v31 = vld [vmem:[#allocation80_spill] sm:$0xff] }
 0x351   :  { %18634 = vst [vmem:[#allocation51_spill] sm:$0xff] %v13850_v1  ;;  %18636 = vst [vmem:[#allocation52_spill] sm:$0xff] %v13853_v54  ;;  %v13870_v5 = vadd.f32 %v1248_v8, %v18642_v0  ;;  %v18644_v37 = vld [vmem:[#allocation78_spill] sm:$0xff]  ;;  %v1254_v30 = vmul.f32 %v13482_v32, %v18646_v31  ;;  %v18648_v24 = vld [vmem:[#allocation81_spill] sm:$0xff] }
 0x352   :  { %18638 = vst [vmem:[#allocation53_spill] sm:$0xff] %v13856_v40  ;;  %v1252_v61 = vmul.f32 %v13482_v32, %v18644_v37  ;;  %18647 = vst [vmem:[#allocation55_spill] sm:$0xff] %v13878_v34  ;;  %v1255_v62 = vmul.f32 %v13482_v32, %v18648_v24  ;;  %v18649_v40 = vld [vmem:[#allocation82_spill] sm:$0xff]  ;;  %v18650_v1 = vld [vmem:[#allocation83_spill] sm:$0xff] }
 0x353   :  { %18643 = vst [vmem:[#allocation54_spill] sm:$0xff] %v13870_v5  ;;  %v1256_v54 = vmul.f32 %v13482_v32, %v18649_v40  ;;  %v1257_v8 = vmul.f32 %v13482_v32, %v18650_v1  ;;  %v18651_v0 = vld [vmem:[#allocation84_spill] sm:$0xff]  ;;  %v13888_v5 = vpop.permute.xlu1 %2987  ;;  %v18654_v28 = vld [vmem:[#allocation85_spill] sm:$0xff]  ;;  %v18655_v34 = vld [vmem:[#allocation86_spill] sm:$0xff] }
 0x354   :  { %v1258_v37 = vmul.f32 %v13482_v32, %v18651_v0  ;;  %18652 = vst [vmem:[#allocation56_spill] sm:$0xff] %v13888_v5  ;;  %v18653_v29 = vld [vmem:[#allocation216_spill] sm:$0xff]  ;;  %v1259_v31 = vmul.f32 %v13482_v32, %v18654_v28  ;;  %v1713_v57 = vmul.f32 %v13867_v53, %v18655_v34  ;;  %v18656_v24 = vld [vmem:[#allocation87_spill] sm:$0xff]  ;;  %v3914_v55 = vld [vmem:[#allocation2 + $0x61] sm:$0xff] }
 0x355   :  { %4494 = vperm.xlu0 %11989, %v18653_v29   ;;  %v1714_v21 = vmul.f32 %v13867_v53, %v18656_v24  ;;  %v18657_v40 = vld [vmem:[#allocation88_spill] sm:$0xff]  ;;  %v18658_v1 = vld [vmem:[#allocation219_spill] sm:$0xff]  ;;  %v18659_v0 = vld [vmem:[#allocation22_spill] sm:$0xff] }
 0x356   :  { %v1715_v39 = vmul.f32 %v13867_v53, %v18657_v40  ;;  %4504 = vperm.xlu1 %11990, %v18658_v1   ;;  %v13901_v13 = vadd.f32 %v1249_v20, %v18659_v0  ;;  %v18660_v5 = vld [vmem:[#allocation23_spill] sm:$0xff]  ;;  %v18661_v44 = vld [vmem:[#allocation24_spill] sm:$0xff]  ;;  %v18663_v28 = vld [vmem:[#allocation89_spill] sm:$0xff] }
 0x357   :  { %v13904_v29 = vadd.f32 %v1250_v59, %v18660_v5  ;;  %v13907_v32 = vadd.f32 %v1251_v27, %v18661_v44  ;;  %v1716_v34 = vmul.f32 %v13867_v53, %v18663_v28  ;;  %v3916_v23 = vld [vmem:[#allocation2 + $0x79] sm:$0xff]  ;;  %v18664_v24 = vld [vmem:[#allocation11_spill] sm:$0xff]  ;;  %v18667_v20 = vld [vmem:[#allocation90_spill] sm:$0xff]  ;;  %v13922_v5 = vpop.permute.xlu0 %2992 }
 0x358   :  { %v13912_v9 = vadd.f32 %v1252_v61, %v18664_v24  ;;  %v18665_v40 = vld [vmem:[#allocation12_spill] sm:$0xff]  ;;  %v18666_v1 = vld [vmem:[#allocation13_spill] sm:$0xff]  ;;  %v1717_v59 = vmul.f32 %v13867_v53, %v18667_v20  ;;  %18668 = vst [vmem:[#allocation58_spill] sm:$0xff] %v13922_v5  ;;  %v18669_v44 = vld [vmem:[#allocation14_spill] sm:$0xff] }
 0x359   :  { %18662 = vst [vmem:[#allocation57_spill] sm:$0xff] %v13907_v32  ;;  %v13915_v50 = vadd.f32 %v1253_v4, %v18665_v40  ;;  %v13918_v35 = vadd.f32 %v1254_v30, %v18666_v1  ;;  %v13925_v27 = vadd.f32 %v1255_v62, %v18669_v44  ;;  %v18670_v0 = vld [vmem:[#allocation15_spill] sm:$0xff]  ;;  %v18672_v32 = vld [vmem:[#allocation16_spill] sm:$0xff]  ;;  %v18674_v24 = vld [vmem:[#allocation26_spill] sm:$0xff]  ;;  %v13936_v40 = vpop.permute.xlu1 %2997  ;;  %3997 = vperm.xlu0 %11989, %v3914_v55  }
 0x35a   :  { %v13928_v28 = vadd.f32 %v1256_v54, %v18670_v0  ;;  %v13931_v61 = vadd.f32 %v1257_v8, %v18672_v32  ;;  %v13934_v4 = vadd.f32 %v1258_v37, %v18674_v24  ;;  %18676 = vst [vmem:[#allocation62_spill] sm:$0xff] %v13936_v40  ;;  %v18677_v30 = vld [vmem:[#allocation18_spill] sm:$0xff]  ;;  %v18679_v20 = vld [vmem:[#allocation19_spill] sm:$0xff]  ;;  %v18681_v62 = vld [vmem:[#allocation20_spill] sm:$0xff]  ;;  %4007 = vperm.xlu1 %11990, %v3916_v23  }
 0x35b   :  { %v13939_v1 = vadd.f32 %v1259_v31, %v18677_v30  ;;  %v13942_v5 = vadd.f32 %v1713_v57, %v18679_v20  ;;  %v13945_v44 = vadd.f32 %v1714_v21, %v18681_v62  ;;  %v18683_v54 = vld [vmem:[#allocation21_spill] sm:$0xff]  ;;  %v18685_v32 = vld [vmem:[#allocation284_spill] sm:$0xff]  ;;  %v18687_v24 = vld [vmem:[#allocation91_spill] sm:$0xff] }
 0x35c   :  { %18671 = vst [vmem:[#allocation59_spill] sm:$0xff] %v13928_v28  ;;  %18673 = vst [vmem:[#allocation60_spill] sm:$0xff] %v13931_v61  ;;  %v13948_v0 = vadd.f32 %v1715_v39, %v18683_v54  ;;  %v3911_v8 = vld [vmem:[#allocation2 + $0x39] sm:$0xff]  ;;  %v13951_v37 = vadd.f32 %v1716_v34, %v18685_v32  ;;  %v1718_v55 = vmul.f32 %v13867_v53, %v18687_v24  ;;  %v3913_v20 = vld [vmem:[#allocation2 + $0x51] sm:$0xff]  ;;  %v13968_v24 = vpop.permute.xlu0 %3002 }
 0x35d   :  { %18675 = vst [vmem:[#allocation61_spill] sm:$0xff] %v13934_v4  ;;  %18678 = vst [vmem:[#allocation63_spill] sm:$0xff] %v13939_v1  ;;  %v18688_v40 = vld [vmem:[#allocation92_spill] sm:$0xff]  ;;  %v18689_v30 = vld [vmem:[#allocation93_spill] sm:$0xff]  ;;  %3982 = vperm.xlu0 %11989, %v3911_v8  }
 0x35e   :  { %18680 = vst [vmem:[#allocation64_spill] sm:$0xff] %v13942_v5  ;;  %18682 = vst [vmem:[#allocation65_spill] sm:$0xff] %v13945_v44  ;;  %v1719_v31 = vmul.f32 %v13867_v53, %v18688_v40  ;;  %v1720_v57 = vmul.f32 %v13867_v53, %v18689_v30  ;;  %v18690_v21 = vld [vmem:[#allocation27_spill] sm:$0xff]  ;;  %v18692_v39 = vld [vmem:[#allocation94_spill] sm:$0xff]  ;;  %3992 = vperm.xlu1 %11990, %v3913_v20   ;;  %v13989_v28 = vadd.f32 %v1718_v55, %v13630_v12 }
 0x35f   :  { %18684 = vst [vmem:[#allocation66_spill] sm:$0xff] %v13948_v0  ;;  %18686 = vst [vmem:[#allocation67_spill] sm:$0xff] %v13951_v37  ;;  %v13960_v62 = vadd.f32 %v1717_v59, %v18690_v21  ;;  %v1721_v23 = vmul.f32 %v13867_v53, %v18692_v39  ;;  %v18693_v54 = vld [vmem:[#allocation95_spill] sm:$0xff]  ;;  %v18694_v32 = vld [vmem:[#allocation96_spill] sm:$0xff] }
 0x360   :  { %v1722_v34 = vmul.f32 %v13867_v53, %v18693_v54  ;;  %v1723_v37 = vmul.f32 %v13867_v53, %v18694_v32  ;;  %18695 = vst [vmem:[#allocation69_spill] sm:$0xff] %v13968_v24  ;;  %v18696_v0 = vld [vmem:[#allocation97_spill] sm:$0xff]  ;;  %v18697_v44 = vld [vmem:[#allocation98_spill] sm:$0xff]  ;;  %v18698_v5 = vld [vmem:[#allocation99_spill] sm:$0xff]  ;;  %v13995_v8 = vadd.f32 %v1720_v57, %v13636_v47  ;;  %v14010_v55 = vpop.permute.xlu0 %3012 }
 0x361   :  { %18691 = vst [vmem:[#allocation68_spill] sm:$0xff] %v13960_v62  ;;  %v1724_v40 = vmul.f32 %v13867_v53, %v18696_v0  ;;  %v1725_v30 = vmul.f32 %v13867_v53, %v18697_v44  ;;  %v1726_v59 = vmul.f32 %v13867_v53, %v18698_v5  ;;  %v18699_v21 = vld [vmem:[#allocation100_spill] sm:$0xff]  ;;  %v13978_v62 = vpop.permute.xlu1 %3007  ;;  %v18701_v54 = vld [vmem:[#allocation101_spill] sm:$0xff]  ;;  %v18702_v1 = vld [vmem:[#allocation102_spill] sm:$0xff] }
 0x362   :  { %v1727_v39 = vmul.f32 %v13867_v53, %v18699_v21  ;;  %18700 = vst [vmem:[#allocation70_spill] sm:$0xff] %v13978_v62  ;;  %v1728_v32 = vmul.f32 %v13867_v53, %v18701_v54  ;;  %v1729_v24 = vmul.f32 %v13867_v53, %v18702_v1  ;;  %v18703_v4 = vld [vmem:[#allocation103_spill] sm:$0xff]  ;;  %v18704_v61 = vld [vmem:[#allocation104_spill] sm:$0xff]  ;;  %v13992_v21 = vadd.f32 %v1719_v31, %v13633_v63  ;;  %v18705_v54 = vld [vmem:[#allocation105_spill] sm:$0xff] }
 0x363   :  { %v1730_v0 = vmul.f32 %v13867_v53, %v18703_v4  ;;  %v1731_v44 = vmul.f32 %v13867_v53, %v18704_v61  ;;  %v3398_v5 = vld [vmem:[#allocation2 + $0x68] sm:$0xff]  ;;  %v1732_v1 = vmul.f32 %v13867_v53, %v18705_v54  ;;  %v3400_v62 = vld [vmem:[#allocation2 + $0x80] sm:$0xff]  ;;  %v14000_v4 = vadd.f32 %v1721_v23, %v13641_v25  ;;  %18707 = vst [vmem:[#allocation71_spill] sm:$0xff] %v14010_v55 }
 0x364   :  { %v14003_v61 = vadd.f32 %v1722_v34, %v13644_v45  ;;  %v14006_v20 = vadd.f32 %v1723_v37, %v13647_v49  ;;  %v18706_v12 = vld [vmem:[#allocation106_spill] sm:$0xff]  ;;  %v14013_v47 = vadd.f32 %v1724_v40, %v13654_v6  ;;  %v14016_v31 = vadd.f32 %v1725_v30, %v13657_v41  ;;  %3485 = vperm.xlu0 %11989, %v3398_v5   ;;  %v18709_v23 = vld [vmem:[#allocation107_spill] sm:$0xff]  ;;  %v18710_v40 = vld [vmem:[#allocation108_spill] sm:$0xff] }
 0x365   :  { %v1733_v63 = vmul.f32 %v13867_v53, %v18706_v12  ;;  %v14019_v25 = vadd.f32 %v1726_v59, %v13660_v52  ;;  %v14022_v45 = vadd.f32 %v1727_v39, %v13663_v10  ;;  %v14024_v57 = vpop.permute.xlu1 %3017  ;;  %v14027_v49 = vadd.f32 %v1728_v32, %v13668_v11  ;;  %3495 = vperm.xlu1 %11990, %v3400_v62   ;;  %v3401_v52 = vld [vmem:[#allocation2 + $0x90] sm:$0xff]  ;;  %v18711_v30 = vld [vmem:[#allocation109_spill] sm:$0xff]  ;;  %v18717_v54 = vld [vmem:[#allocation114_spill] sm:$0xff] }
 0x366   :  { %18708 = vst [vmem:[#allocation72_spill] sm:$0xff] %v14024_v57  ;;  %v14030_v37 = vadd.f32 %v1729_v24, %v13671_v48  ;;  %v14033_v6 = vadd.f32 %v1730_v0, %v13674_v14  ;;  %v14036_v41 = vadd.f32 %v1731_v44, %v13677_v3  ;;  %v14039_v10 = vadd.f32 %v1732_v1, %v13680_v19  ;;  %v3403_v24 = vld [vmem:[#allocation2 + $0xa8] sm:$0xff]  ;;  %v18714_v39 = vld [vmem:[#allocation112_spill] sm:$0xff]  ;;  %v14056_v0 = vpop.permute.xlu0 %3022  ;;  %v18716_v44 = vld [vmem:[#allocation113_spill] sm:$0xff] }
 0x367   :  { %v1734_v34 = vmul.f32 %v13867_v53, %v18709_v23  ;;  %v1735_v11 = vmul.f32 %v13867_v53, %v18710_v40  ;;  %v1736_v48 = vmul.f32 %v13867_v53, %v18711_v30  ;;  %v14048_v14 = vadd.f32 %v1733_v63, %v13689_v26  ;;  %v18712_v3 = vld [vmem:[#allocation110_spill] sm:$0xff]  ;;  %v18713_v59 = vld [vmem:[#allocation111_spill] sm:$0xff]  ;;  %18715 = vst [vmem:[#allocation73_spill] sm:$0xff] %v14056_v0  ;;  %v18719_v63 = vld [vmem:[#allocation116_spill] sm:$0xff] }
 0x368   :  { %v1737_v62 = vmul.f32 %v13867_v53, %v18712_v3  ;;  %v1738_v19 = vmul.f32 %v13867_v53, %v18713_v59  ;;  %v1739_v32 = vmul.f32 %v13867_v53, %v18714_v39  ;;  %v1740_v5 = vmul.f32 %v13867_v53, %v18716_v44  ;;  %v18718_v12 = vld [vmem:[#allocation115_spill] sm:$0xff]  ;;  %3500 = vperm.xlu0 %11989, %v3401_v52   ;;  %v18721_v30 = vld [vmem:[#allocation117_spill] sm:$0xff]  ;;  %v18722_v59 = vld [vmem:[#allocation118_spill] sm:$0xff] }
 0x369   :  { %v1741_v1 = vmul.f32 %v13867_v53, %v18717_v54  ;;  %v1742_v26 = vmul.f32 %v13867_v53, %v18718_v12  ;;  %v1743_v23 = vmul.f32 %v13867_v53, %v18719_v63  ;;  %v14066_v40 = vpop.permute.xlu1 %3027  ;;  %v1744_v3 = vmul.f32 %v13867_v53, %v18721_v30  ;;  %v18723_v0 = vld [vmem:[#allocation119_spill] sm:$0xff]  ;;  %v18724_v57 = vld [vmem:[#allocation120_spill] sm:$0xff]  ;;  %3510 = vperm.xlu1 %11990, %v3403_v24   ;;  %v18725_v30 = vld [vmem:[#allocation121_spill] sm:$0xff] }
 0x36a   :  { %18720 = vst [vmem:[#allocation74_spill] sm:$0xff] %v14066_v40  ;;  %v1745_v39 = vmul.f32 %v13867_v53, %v18722_v59  ;;  %v1746_v44 = vmul.f32 %v13867_v53, %v18723_v0  ;;  %v1747_v54 = vmul.f32 %v13867_v53, %v18724_v57  ;;  %v14077_v12 = vadd.f32 %v1734_v34, %v13718_v56  ;;  %v18726_v56 = vld [vmem:[#allocation122_spill] sm:$0xff]  ;;  %v18753_v55 = vld [vmem:[#allocation39_spill] sm:$0xff] }
 0x36b   :  { %v14080_v63 = vadd.f32 %v1735_v11, %v13721_v2  ;;  %v14083_v52 = vadd.f32 %v1736_v48, %v13724_v18  ;;  %v1748_v40 = vmul.f32 %v13867_v53, %v18725_v30  ;;  %v14088_v59 = vadd.f32 %v1737_v62, %v13729_v33  ;;  %v14098_v2 = vpop.permute.xlu0 %3032  ;;  %v18744_v30 = vld [vmem:[#allocation130_spill] sm:$0xff] }
 0x36c   :  { %v14091_v0 = vadd.f32 %v1738_v19, %v13732_v60  ;;  %v14094_v57 = vadd.f32 %v1739_v32, %v13735_v16  ;;  %v1749_v34 = vmul.f32 %v13867_v53, %v18726_v56  ;;  %18727 = vst [vmem:[#allocation274_spill] sm:$0xff] %v14098_v2  ;;  %v14101_v18 = vadd.f32 %v1740_v5, %v13742_v38  ;;  %v18729_v16 = vld [vmem:[#allocation222_spill] sm:$0xff]  ;;  %v18735_v19 = vld [vmem:[#allocation123_spill] sm:$0xff]  ;;  %v18736_v5 = vld [vmem:[#allocation124_spill] sm:$0xff] }
 0x36d   :  { %v14104_v11 = vadd.f32 %v1741_v1, %v13745_v22  ;;  %v14107_v33 = vadd.f32 %v1742_v26, %v13748_v7  ;;  %v14110_v60 = vadd.f32 %v1743_v23, %v13751_v42  ;;  %v14112_v48 = vpop.permute.xlu1 %3037  ;;  %4514 = vperm.xlu0 %11989, %v18729_v16   ;;  %v14116_v24 = vadd.f32 %v1744_v3, %v13756_v43  ;;  %v18733_v7 = vld [vmem:[#allocation225_spill] sm:$0xff]  ;;  %v18739_v26 = vld [vmem:[#allocation126_spill] sm:$0xff]  ;;  %v18740_v23 = vld [vmem:[#allocation127_spill] sm:$0xff] }
 0x36e   :  { %18728 = vst [vmem:[#allocation275_spill] sm:$0xff] %v14112_v48  ;;  %v14119_v62 = vadd.f32 %v1745_v39, %v13759_v36  ;;  %v14122_v38 = vadd.f32 %v1746_v44, %v13762_v46  ;;  %v14125_v22 = vadd.f32 %v1747_v54, %v13765_v15  ;;  %4524 = vperm.xlu1 %11990, %v18733_v7   ;;  %v18737_v1 = vld [vmem:[#allocation125_spill] sm:$0xff]  ;;  %v18745_v16 = vld [vmem:[#allocation131_spill] sm:$0xff] }
 0x36f   :  { %v14129_v42 = vadd.f32 %v1748_v40, %v13768_v51  ;;  %v1750_v32 = vmul.f32 %v13867_v53, %v18735_v19  ;;  %v1751_v43 = vmul.f32 %v13867_v53, %v18736_v5  ;;  %v1752_v36 = vmul.f32 %v13867_v53, %v18737_v1  ;;  %v18741_v51 = vld [vmem:[#allocation128_spill] sm:$0xff]  ;;  %v14146_v39 = vpop.permute.xlu0 %3042  ;;  %v18743_v44 = vld [vmem:[#allocation129_spill] sm:$0xff]  ;;  %v3915_v2 = vld [vmem:[#allocation2 + $0x69] sm:$0xff] }
 0x370   :  { %18730 = vst [vmem:[#allocation276_spill] sm:$0xff] %v14119_v62  ;;  %18731 = vst [vmem:[#allocation277_spill] sm:$0xff] %v14122_v38  ;;  %v14138_v46 = vadd.f32 %v1749_v34, %v13777_v58  ;;  %v1753_v15 = vmul.f32 %v13867_v53, %v18739_v26  ;;  %v1754_v3 = vmul.f32 %v13867_v53, %v18740_v23  ;;  %v18746_v34 = vld [vmem:[#allocation132_spill] sm:$0xff]  ;;  %v12027_v5 = vld [vmem:[#allocation2 + $0x3a] sm:$0xff] }
 0x371   :  { %18732 = vst [vmem:[#allocation279_spill] sm:$0xff] %v14125_v22  ;;  %18734 = vst [vmem:[#allocation280_spill] sm:$0xff] %v14129_v42  ;;  %v1755_v40 = vmul.f32 %v13867_v53, %v18741_v51  ;;  %v1756_v54 = vmul.f32 %v13867_v53, %v18743_v44  ;;  %v1757_v56 = vmul.f32 %v13867_v53, %v18744_v30  ;;  %v14156_v19 = vpop.permute.xlu1 %3047  ;;  %4499 = vperm.xlu0 %11989, %v12027_v5   ;;  %v18748_v1 = vld [vmem:[#allocation133_spill] sm:$0xff]  ;;  %v18749_v23 = vld [vmem:[#allocation134_spill] sm:$0xff] }
 0x372   :  { %18738 = vst [vmem:[#allocation281_spill] sm:$0xff] %v14138_v46  ;;  %18742 = vst [vmem:[#allocation282_spill] sm:$0xff] %v14146_v39  ;;  %v1758_v58 = vmul.f32 %v13867_v53, %v18745_v16  ;;  %v1759_v7 = vmul.f32 %v13867_v53, %v18746_v34  ;;  %v1760_v26 = vmul.f32 %v13867_v53, %v18748_v1  ;;  %v18750_v44 = vld [vmem:[#allocation135_spill] sm:$0xff]  ;;  %v18751_v30 = vld [vmem:[#allocation136_spill] sm:$0xff] }
 0x373   :  { %18747 = vst [vmem:[#allocation75_spill] sm:$0xff] %v14156_v19  ;;  %v1761_v51 = vmul.f32 %v13867_v53, %v18749_v23  ;;  %v1762_v39 = vmul.f32 %v13867_v53, %v18750_v44  ;;  %v1763_v48 = vmul.f32 %v13867_v53, %v18751_v30  ;;  %v12028_v16 = vld [vmem:[#allocation2 + $0x52] sm:$0xff]  ;;  %v14167_v34 = vadd.f32 %v1750_v32, %v13806_v17  ;;  %v18752_v19 = vld [vmem:[#allocation38_spill] sm:$0xff]  ;;  %v18755_v46 = vld [vmem:[#allocation137_spill] sm:$0xff] }
 0x374   :  { %4509 = vperm.xlu1 %11990, %v12028_v16   ;;  %v14170_v5 = vadd.f32 %v1751_v43, %v18752_v19  ;;  %v14173_v1 = vadd.f32 %v1752_v36, %v18753_v55  ;;  %v1764_v23 = vmul.f32 %v13867_v53, %v18755_v46  ;;  %v3917_v42 = vld [vmem:[#allocation2 + $0x81] sm:$0xff]  ;;  %v18756_v44 = vld [vmem:[#allocation40_spill] sm:$0xff]  ;;  %v14188_v43 = vpop.permute.xlu0 %3052 }
 0x375   :  { %v14178_v22 = vadd.f32 %v1753_v15, %v18756_v44  ;;  %v18757_v30 = vld [vmem:[#allocation41_spill] sm:$0xff]  ;;  %v18758_v16 = vld [vmem:[#allocation42_spill] sm:$0xff]  ;;  %18760 = vst [vmem:[#allocation77_spill] sm:$0xff] %v14188_v43  ;;  %v18761_v55 = vld [vmem:[#allocation44_spill] sm:$0xff]  ;;  %4002 = vperm.xlu0 %11989, %v3915_v2  }
 0x376   :  { %18754 = vst [vmem:[#allocation76_spill] sm:$0xff] %v14173_v1  ;;  %v14181_v38 = vadd.f32 %v1754_v3, %v18757_v30  ;;  %v14184_v62 = vadd.f32 %v1755_v40, %v18758_v16  ;;  %v18759_v17 = vld [vmem:[#allocation138_spill] sm:$0xff]  ;;  %v14191_v36 = vadd.f32 %v1756_v54, %v18761_v55  ;;  %v18763_v19 = vld [vmem:[#allocation45_spill] sm:$0xff]  ;;  %v18767_v44 = vld [vmem:[#allocation47_spill] sm:$0xff]  ;;  %v14202_v30 = vpop.permute.xlu1 %3057 }
 0x377   :  { %v1765_v32 = vmul.f32 %v13867_v53, %v18759_v17  ;;  %v14194_v46 = vadd.f32 %v1757_v56, %v18763_v19  ;;  %v18765_v1 = vld [vmem:[#allocation46_spill] sm:$0xff]  ;;  %v14200_v3 = vadd.f32 %v1759_v7, %v18767_v44  ;;  %18769 = vst [vmem:[#allocation81_spill] sm:$0xff] %v14202_v30  ;;  %v18770_v40 = vld [vmem:[#allocation49_spill] sm:$0xff]  ;;  %v18774_v54 = vld [vmem:[#allocation51_spill] sm:$0xff] }
 0x378   :  { %18762 = vst [vmem:[#allocation10_spill] sm:$0xff] %v14191_v36  ;;  %v14197_v15 = vadd.f32 %v1758_v58, %v18765_v1  ;;  %v14205_v16 = vadd.f32 %v1760_v26, %v18770_v40  ;;  %v18772_v17 = vld [vmem:[#allocation50_spill] sm:$0xff]  ;;  %v14211_v55 = vadd.f32 %v1762_v39, %v18774_v54  ;;  %v18776_v56 = vld [vmem:[#allocation52_spill] sm:$0xff]  ;;  %4012 = vperm.xlu1 %11990, %v3917_v42   ;;  %v18778_v1 = vld [vmem:[#allocation53_spill] sm:$0xff] }
 0x379   :  { %18764 = vst [vmem:[#allocation78_spill] sm:$0xff] %v14194_v46  ;;  %18768 = vst [vmem:[#allocation80_spill] sm:$0xff] %v14200_v3  ;;  %v14208_v43 = vadd.f32 %v1761_v51, %v18772_v17  ;;  %v14214_v19 = vadd.f32 %v1763_v48, %v18776_v56  ;;  %v3918_v58 = vld [vmem:[#allocation2 + $0x91] sm:$0xff]  ;;  %v14217_v7 = vadd.f32 %v1764_v23, %v18778_v1  ;;  %v18782_v40 = vld [vmem:[#allocation141_spill] sm:$0xff] }
 0x37a   :  { %18766 = vst [vmem:[#allocation79_spill] sm:$0xff] %v14197_v15  ;;  %18771 = vst [vmem:[#allocation82_spill] sm:$0xff] %v14205_v16  ;;  %v18780_v44 = vld [vmem:[#allocation139_spill] sm:$0xff]  ;;  %v18781_v30 = vld [vmem:[#allocation140_spill] sm:$0xff]  ;;  %v1768_v51 = vmul.f32 %v13867_v53, %v18782_v40  ;;  %4017 = vperm.xlu0 %11989, %v3918_v58  }
 0x37b   :  { %18773 = vst [vmem:[#allocation83_spill] sm:$0xff] %v14208_v43  ;;  %18775 = vst [vmem:[#allocation84_spill] sm:$0xff] %v14211_v55  ;;  %v1766_v2 = vmul.f32 %v13867_v53, %v18780_v44  ;;  %v1767_v26 = vmul.f32 %v13867_v53, %v18781_v30  ;;  %v14228_v39 = vld [vmem:[%s18222_s1 + $0x3] ss:$0 sm:$0xff]  ;;  %v3920_v48 = vld [vmem:[#allocation2 + $0xa9] sm:$0xff] }
 0x37c   :  { %18777 = vst [vmem:[#allocation216_spill] sm:$0xff] %v14214_v19  ;;  %18779 = vst [vmem:[#allocation85_spill] sm:$0xff] %v14217_v7  ;;  %v18783_v42 = vld [vmem:[#allocation54_spill] sm:$0xff]  ;;  %v18786_v56 = vld [vmem:[#allocation143_spill] sm:$0xff]  ;;  %v14239_v7 = vpop.permute.xlu0 %3062  ;;  %4027 = vperm.xlu1 %11990, %v3920_v48  }
 0x37d   :  { %v14231_v17 = vadd.f32 %v1765_v32, %v18783_v42  ;;  %v18785_v23 = vld [vmem:[#allocation142_spill] sm:$0xff]  ;;  %v1770_v1 = vmul.f32 %v13867_v53, %v18786_v56  ;;  %v18787_v44 = vld [vmem:[#allocation144_spill] sm:$0xff]  ;;  %18788 = vst [vmem:[#allocation87_spill] sm:$0xff] %v14239_v7  ;;  %v18789_v40 = vld [vmem:[#allocation145_spill] sm:$0xff]  ;;  %v14260_v36 = vadd.f32 %v1766_v2, %v13901_v13 }
 0x37e   :  { %v1769_v54 = vmul.f32 %v13867_v53, %v18785_v23  ;;  %v1771_v30 = vmul.f32 %v13867_v53, %v18787_v44  ;;  %v1772_v19 = vmul.f32 %v13867_v53, %v18789_v40  ;;  %v18790_v55 = vld [vmem:[#allocation146_spill] sm:$0xff]  ;;  %v18791_v16 = vld [vmem:[#allocation147_spill] sm:$0xff]  ;;  %v18792_v42 = vld [vmem:[#allocation148_spill] sm:$0xff] }
 0x37f   :  { %18784 = vst [vmem:[#allocation86_spill] sm:$0xff] %v14231_v17  ;;  %v1773_v43 = vmul.f32 %v13867_v53, %v18790_v55  ;;  %v1774_v32 = vmul.f32 %v13867_v53, %v18791_v16  ;;  %v1775_v23 = vmul.f32 %v13867_v53, %v18792_v42  ;;  %v14249_v17 = vpop.permute.xlu1 %3067  ;;  %v18794_v56 = vld [vmem:[#allocation149_spill] sm:$0xff]  ;;  %v18795_v3 = vld [vmem:[#allocation150_spill] sm:$0xff]  ;;  %v18796_v15 = vld [vmem:[#allocation151_spill] sm:$0xff]  ;;  %v14263_v42 = vadd.f32 %v1767_v26, %v13904_v29 }
 0x380   :  { %18793 = vst [vmem:[#allocation88_spill] sm:$0xff] %v14249_v17  ;;  %v1776_v44 = vmul.f32 %v13867_v53, %v18794_v56  ;;  %v2230_v7 = vmul.f32 %v14228_v39, %v18795_v3  ;;  %v2231_v40 = vmul.f32 %v14228_v39, %v18796_v15  ;;  %v18797_v46 = vld [vmem:[#allocation152_spill] sm:$0xff]  ;;  %v18798_v58 = vld [vmem:[#allocation57_spill] sm:$0xff]  ;;  %v14271_v15 = vadd.f32 %v1769_v54, %v13912_v9  ;;  %v18800_v13 = vld [vmem:[#allocation154_spill] sm:$0xff]  ;;  %v14281_v2 = vpop.permute.xlu0 %3072 }
 0x381   :  { %v2232_v55 = vmul.f32 %v14228_v39, %v18797_v46  ;;  %v3402_v16 = vld [vmem:[#allocation2 + $0x98] sm:$0xff]  ;;  %v14266_v17 = vadd.f32 %v1768_v51, %v18798_v58  ;;  %v3404_v56 = vld [vmem:[#allocation2 + $0xb0] sm:$0xff]  ;;  %v14274_v46 = vadd.f32 %v1770_v1, %v13915_v50  ;;  %v14277_v48 = vadd.f32 %v1771_v30, %v13918_v35  ;;  %18801 = vst [vmem:[#allocation219_spill] sm:$0xff] %v14281_v2 }
 0x382   :  { %v18799_v53 = vld [vmem:[#allocation153_spill] sm:$0xff]  ;;  %v2234_v29 = vmul.f32 %v14228_v39, %v18800_v13  ;;  %v14284_v26 = vadd.f32 %v1772_v19, %v13925_v27  ;;  %v18802_v51 = vld [vmem:[#allocation59_spill] sm:$0xff]  ;;  %3505 = vperm.xlu0 %11989, %v3402_v16   ;;  %v18810_v13 = vld [vmem:[#allocation64_spill] sm:$0xff]  ;;  %3515 = vperm.xlu1 %11990, %v3404_v56  }
 0x383   :  { %v2233_v3 = vmul.f32 %v14228_v39, %v18799_v53  ;;  %v14287_v58 = vadd.f32 %v1773_v43, %v18802_v51  ;;  %v18803_v53 = vld [vmem:[#allocation60_spill] sm:$0xff]  ;;  %v18805_v54 = vld [vmem:[#allocation61_spill] sm:$0xff]  ;;  %v14295_v1 = vpop.permute.xlu1 %3077  ;;  %v18808_v35 = vld [vmem:[#allocation63_spill] sm:$0xff]  ;;  %v14301_v2 = vadd.f32 %v2230_v7, %v18810_v13 }
 0x384   :  { %v14290_v9 = vadd.f32 %v1774_v32, %v18803_v53  ;;  %v14293_v50 = vadd.f32 %v1775_v23, %v18805_v54  ;;  %18807 = vst [vmem:[#allocation24_spill] sm:$0xff] %v14295_v1  ;;  %v14298_v30 = vadd.f32 %v1776_v44, %v18808_v35  ;;  %v18812_v27 = vld [vmem:[#allocation65_spill] sm:$0xff]  ;;  %v18814_v43 = vld [vmem:[#allocation66_spill] sm:$0xff]  ;;  %v18816_v53 = vld [vmem:[#allocation67_spill] sm:$0xff] }
 0x385   :  { %18811 = vst [vmem:[#allocation11_spill] sm:$0xff] %v14301_v2  ;;  %v14304_v19 = vadd.f32 %v2231_v40, %v18812_v27  ;;  %v14307_v51 = vadd.f32 %v2232_v55, %v18814_v43  ;;  %v3405_v32 = vld [vmem:[#allocation2 + $0xc0] sm:$0xff]  ;;  %v14310_v23 = vadd.f32 %v2233_v3, %v18816_v53  ;;  %v18818_v54 = vld [vmem:[#allocation155_spill] sm:$0xff]  ;;  %v18819_v1 = vld [vmem:[#allocation156_spill] sm:$0xff] }
 0x386   :  { %18804 = vst [vmem:[#allocation22_spill] sm:$0xff] %v14290_v9  ;;  %18806 = vst [vmem:[#allocation23_spill] sm:$0xff] %v14293_v50  ;;  %v2235_v16 = vmul.f32 %v14228_v39, %v18818_v54  ;;  %v2236_v44 = vmul.f32 %v14228_v39, %v18819_v1  ;;  %v18820_v35 = vld [vmem:[#allocation157_spill] sm:$0xff]  ;;  %v18821_v40 = vld [vmem:[#allocation68_spill] sm:$0xff]  ;;  %v14327_v54 = vpop.permute.xlu0 %3082  ;;  %3520 = vperm.xlu0 %11989, %v3405_v32  }
 0x387   :  { %18809 = vst [vmem:[#allocation89_spill] sm:$0xff] %v14298_v30  ;;  %18813 = vst [vmem:[#allocation12_spill] sm:$0xff] %v14304_v19  ;;  %v2237_v7 = vmul.f32 %v14228_v39, %v18820_v35  ;;  %v3407_v13 = vld [vmem:[#allocation2 + $0xd8] sm:$0xff]  ;;  %v14319_v27 = vadd.f32 %v2234_v29, %v18821_v40  ;;  %v18823_v55 = vld [vmem:[#allocation158_spill] sm:$0xff] }
 0x388   :  { %18815 = vst [vmem:[#allocation13_spill] sm:$0xff] %v14307_v51  ;;  %18817 = vst [vmem:[#allocation90_spill] sm:$0xff] %v14310_v23  ;;  %v2238_v56 = vmul.f32 %v14228_v39, %v18823_v55  ;;  %v18824_v43 = vld [vmem:[#allocation159_spill] sm:$0xff]  ;;  %v18825_v53 = vld [vmem:[#allocation160_spill] sm:$0xff]  ;;  %3530 = vperm.xlu1 %11990, %v3407_v13  }
 0x389   :  { %18822 = vst [vmem:[#allocation14_spill] sm:$0xff] %v14319_v27  ;;  %v2239_v3 = vmul.f32 %v14228_v39, %v18824_v43  ;;  %v2240_v23 = vmul.f32 %v14228_v39, %v18825_v53  ;;  %18826 = vst [vmem:[#allocation15_spill] sm:$0xff] %v14327_v54  ;;  %v18827_v51 = vld [vmem:[#allocation161_spill] sm:$0xff]  ;;  %v18828_v19 = vld [vmem:[#allocation162_spill] sm:$0xff]  ;;  %v14337_v27 = vpop.permute.xlu1 %3087  ;;  %v14354_v32 = vadd.f32 %v2237_v7, %v13995_v8 }
 0x38a   :  { %v2241_v1 = vmul.f32 %v14228_v39, %v18827_v51  ;;  %v2242_v35 = vmul.f32 %v14228_v39, %v18828_v19  ;;  %v18829_v2 = vld [vmem:[#allocation163_spill] sm:$0xff]  ;;  %v18830_v40 = vld [vmem:[#allocation164_spill] sm:$0xff]  ;;  %18831 = vst [vmem:[#allocation16_spill] sm:$0xff] %v14337_v27  ;;  %v18832_v43 = vld [vmem:[#allocation165_spill] sm:$0xff] }
 0x38b   :  { %v2243_v29 = vmul.f32 %v14228_v39, %v18829_v2  ;;  %v2244_v55 = vmul.f32 %v14228_v39, %v18830_v40  ;;  %v2245_v53 = vmul.f32 %v14228_v39, %v18832_v43  ;;  %v18833_v30 = vld [vmem:[#allocation166_spill] sm:$0xff]  ;;  %v18834_v50 = vld [vmem:[#allocation167_spill] sm:$0xff]  ;;  %v18835_v9 = vld [vmem:[#allocation168_spill] sm:$0xff]  ;;  %v14348_v2 = vadd.f32 %v2235_v16, %v13989_v28 }
 0x38c   :  { %v2246_v54 = vmul.f32 %v14228_v39, %v18833_v30  ;;  %v2247_v51 = vmul.f32 %v14228_v39, %v18834_v50  ;;  %v2248_v19 = vmul.f32 %v14228_v39, %v18835_v9  ;;  %v14351_v40 = vadd.f32 %v2236_v44, %v13992_v21  ;;  %v18836_v43 = vld [vmem:[#allocation169_spill] sm:$0xff]  ;;  %v18837_v28 = vld [vmem:[#allocation170_spill] sm:$0xff]  ;;  %v14369_v21 = vpop.permute.xlu0 %3092 }
 0x38d   :  { %v2249_v27 = vmul.f32 %v14228_v39, %v18836_v43  ;;  %v14359_v30 = vadd.f32 %v2238_v56, %v14000_v4  ;;  %v14362_v50 = vadd.f32 %v2239_v3, %v14003_v61  ;;  %v14365_v9 = vadd.f32 %v2240_v23, %v14006_v20  ;;  %18838 = vst [vmem:[#allocation26_spill] sm:$0xff] %v14369_v21  ;;  %v14383_v7 = vpop.permute.xlu1 %3097  ;;  %v12029_v20 = vld [vmem:[#allocation2 + $0x6a] sm:$0xff]  ;;  %v18876_v21 = vld [vmem:[#allocation281_spill] sm:$0xff] }
 0x38e   :  { %v2250_v16 = vmul.f32 %v14228_v39, %v18837_v28  ;;  %v14372_v8 = vadd.f32 %v2241_v1, %v14013_v47  ;;  %v14375_v44 = vadd.f32 %v2242_v35, %v14016_v31  ;;  %v14378_v4 = vadd.f32 %v2243_v29, %v14019_v25  ;;  %18839 = vst [vmem:[#allocation18_spill] sm:$0xff] %v14383_v7  ;;  %v12030_v25 = vld [vmem:[#allocation2 + $0x82] sm:$0xff]  ;;  %v18840_v56 = vld [vmem:[#allocation171_spill] sm:$0xff]  ;;  %v18841_v1 = vld [vmem:[#allocation172_spill] sm:$0xff] }
 0x38f   :  { %v14381_v61 = vadd.f32 %v2244_v55, %v14022_v45  ;;  %4519 = vperm.xlu0 %11989, %v12029_v20   ;;  %v14386_v23 = vadd.f32 %v2245_v53, %v14027_v49  ;;  %v14389_v13 = vadd.f32 %v2246_v54, %v14030_v37  ;;  %v14392_v47 = vadd.f32 %v2247_v51, %v14033_v6  ;;  %v18842_v35 = vld [vmem:[#allocation173_spill] sm:$0xff]  ;;  %v18843_v54 = vld [vmem:[#allocation174_spill] sm:$0xff]  ;;  %v18844_v29 = vld [vmem:[#allocation175_spill] sm:$0xff] }
 0x390   :  { %v14395_v31 = vadd.f32 %v2248_v19, %v14036_v41  ;;  %4529 = vperm.xlu1 %11990, %v12030_v25   ;;  %v14398_v45 = vadd.f32 %v2249_v27, %v14039_v10  ;;  %v2251_v3 = vmul.f32 %v14228_v39, %v18840_v56  ;;  %v2252_v49 = vmul.f32 %v14228_v39, %v18841_v1  ;;  %v18845_v27 = vld [vmem:[#allocation176_spill] sm:$0xff]  ;;  %v14421_v53 = vpop.permute.xlu0 %3102  ;;  %v18847_v51 = vld [vmem:[#allocation177_spill] sm:$0xff]  ;;  %v18850_v20 = vld [vmem:[#allocation179_spill] sm:$0xff] }
 0x391   :  { %v2253_v37 = vmul.f32 %v14228_v39, %v18842_v35  ;;  %v14407_v6 = vadd.f32 %v2250_v16, %v14048_v14  ;;  %v14411_v41 = vmul.f32 %v14228_v39, %v18843_v54  ;;  %v14415_v10 = vmul.f32 %v14228_v39, %v18844_v29  ;;  %18846 = vst [vmem:[#allocation19_spill] sm:$0xff] %v14421_v53  ;;  %v18848_v14 = vld [vmem:[#allocation178_spill] sm:$0xff]  ;;  %v14431_v28 = vpop.permute.xlu1 %3107  ;;  %v12031_v16 = vld [vmem:[#allocation2 + $0x92] sm:$0xff]  ;;  %v18852_v35 = vld [vmem:[#allocation181_spill] sm:$0xff] }
 0x392   :  { %v14419_v55 = vmul.f32 %v14228_v39, %v18845_v27  ;;  %v14425_v19 = vmul.f32 %v14228_v39, %v18847_v51  ;;  %v14429_v43 = vmul.f32 %v14228_v39, %v18848_v14  ;;  %18849 = vst [vmem:[#allocation20_spill] sm:$0xff] %v14431_v28  ;;  %v14435_v25 = vmul.f32 %v14228_v39, %v18850_v20  ;;  %v18851_v56 = vld [vmem:[#allocation180_spill] sm:$0xff]  ;;  %v18853_v29 = vld [vmem:[#allocation182_spill] sm:$0xff]  ;;  %v12032_v51 = vld [vmem:[#allocation2 + $0xaa] sm:$0xff] }
 0x393   :  { %4534 = vperm.xlu0 %11989, %v12031_v16   ;;  %v14439_v1 = vmul.f32 %v14228_v39, %v18851_v56  ;;  %v14443_v54 = vmul.f32 %v14228_v39, %v18852_v35  ;;  %v14447_v27 = vmul.f32 %v14228_v39, %v18853_v29  ;;  %v3919_v14 = vld [vmem:[#allocation2 + $0x99] sm:$0xff]  ;;  %v18854_v16 = vmov 0.0   ;;  %v18855_v29 = vld [vmem:[#allocation183_spill] sm:$0xff] }
 0x394   :  { %4544 = vperm.xlu1 %11990, %v12032_v51   ;;  %7785 = vst.msk [vmem:[#allocation3 + $0x10] sm:$0xff] %vm7781_vm2, %v18854_v16  ;;  %7782 = vst.msk [vmem:[#allocation3] sm:$0xff] %vm7781_vm2, %v18854_v16  ;;  %v14530_v20 = vadd.f32 %v2251_v3, %v14077_v12  ;;  %v14533_v56 = vadd.f32 %v2252_v49, %v14080_v63  ;;  %v14536_v35 = vadd.f32 %v2253_v37, %v14083_v52  ;;  %v3921_v28 = vld [vmem:[#allocation2 + $0xb1] sm:$0xff]  ;;  %v14554_v3 = vpop.permute.xlu0 %3112  ;;  %v18858_v37 = vld [vmem:[#allocation185_spill] sm:$0xff] }
 0x395   :  { %7786 = vst.msk [vmem:[#allocation3 + $0x18] sm:$0x3] %vm7783_vm3, %v18854_v16  ;;  %7784 = vst.msk [vmem:[#allocation3 + $0x8] sm:$0x3] %vm7783_vm3, %v18854_v16  ;;  %v2263_v51 = vmul.f32 %v14228_v39, %v18855_v29  ;;  %v14542_v53 = vadd.f32 %v14411_v41, %v14088_v59  ;;  %v14550_v12 = vadd.f32 %v14419_v55, %v14094_v57  ;;  %v18856_v63 = vld [vmem:[#allocation184_spill] sm:$0xff]  ;;  %v18859_v41 = vld [vmem:[#allocation186_spill] sm:$0xff] }
 0x396   :  { %7787 = vst.msk [vmem:[#allocation3 + $0x20] sm:$0xff] %vm7781_vm2, %v18854_v16  ;;  %7789 = vst.msk [vmem:[#allocation3 + $0x30] sm:$0xff] %vm7781_vm2, %v18854_v16  ;;  %v2264_v52 = vmul.f32 %v14228_v39, %v18856_v63  ;;  %v14558_v49 = vadd.f32 %v14425_v19, %v14101_v18  ;;  %v14562_v59 = vadd.f32 %v14429_v43, %v14104_v11  ;;  %v18861_v19 = vld [vmem:[#allocation276_spill] sm:$0xff]  ;;  %v3922_v29 = vld [vmem:[#allocation2 + $0xc1] sm:$0xff] }
 0x397   :  { %7788 = vst.msk [vmem:[#allocation3 + $0x28] sm:$0x3] %vm7783_vm3, %v18854_v16  ;;  %7790 = vst.msk [vmem:[#allocation3 + $0x38] sm:$0x3] %vm7783_vm3, %v18854_v16  ;;  %v2266_v57 = vmul.f32 %v14228_v39, %v18859_v41  ;;  %4022 = vperm.xlu0 %11989, %v3919_v14   ;;  %v14572_v55 = vadd.f32 %v14435_v25, %v14107_v33  ;;  %v14576_v18 = vadd.f32 %v14439_v1, %v14110_v60  ;;  %v18863_v63 = vld [vmem:[#allocation277_spill] sm:$0xff]  ;;  %v18866_v25 = vld [vmem:[#allocation188_spill] sm:$0xff] }
 0x398   :  { %7791 = vst.msk [vmem:[#allocation3 + $0x40] sm:$0xff] %vm7781_vm2, %v18854_v16  ;;  %7793 = vst.msk [vmem:[#allocation3 + $0x50] sm:$0xff] %vm7781_vm2, %v18854_v16  ;;  %v14580_v11 = vadd.f32 %v14443_v54, %v14116_v24  ;;  %v14584_v43 = vadd.f32 %v14447_v27, %v18861_v19  ;;  %4032 = vperm.xlu1 %11990, %v3921_v28   ;;  %v14587_v14 = vadd.f32 %v2263_v51, %v18863_v63  ;;  %v18867_v1 = vld [vmem:[#allocation189_spill] sm:$0xff]  ;;  %v18868_v54 = vld [vmem:[#allocation279_spill] sm:$0xff] }
 0x399   :  { %7792 = vst.msk [vmem:[#allocation3 + $0x48] sm:$0x3] %vm7783_vm3, %v18854_v16  ;;  %7794 = vst.msk [vmem:[#allocation3 + $0x58] sm:$0x3] %vm7783_vm3, %v18854_v16  ;;  %v2268_v60 = vmul.f32 %v14228_v39, %v18866_v25  ;;  %v2269_v41 = vmul.f32 %v14228_v39, %v18867_v1  ;;  %v3924_v24 = vld [vmem:[#allocation2 + $0xd9] sm:$0xff]  ;;  %v18870_v27 = vld [vmem:[#allocation190_spill] sm:$0xff]  ;;  %v14610_v1 = vadd.f32 %v2266_v57, %v18876_v21 }
 0x39a   :  { %7795 = vst.msk [vmem:[#allocation3 + $0x60] sm:$0xff] %vm7781_vm2, %v18854_v16  ;;  %7797 = vst.msk [vmem:[#allocation3 + $0x70] sm:$0xff] %vm7781_vm2, %v18854_v16  ;;  %v2270_v28 = vmul.f32 %v14228_v39, %v18870_v27  ;;  %v18871_v19 = vld [vmem:[#allocation191_spill] sm:$0xff]  ;;  %v18872_v63 = vld [vmem:[#allocation192_spill] sm:$0xff] }
 0x39b   :  { %7796 = vst.msk [vmem:[#allocation3 + $0x68] sm:$0x3] %vm7783_vm3, %v18854_v16  ;;  %7798 = vst.msk [vmem:[#allocation3 + $0x78] sm:$0x3] %vm7783_vm3, %v18854_v16  ;;  %v2271_v51 = vmul.f32 %v14228_v39, %v18871_v19  ;;  %v18874_v7 = vld [vmem:[#allocation280_spill] sm:$0xff]  ;;  %4037 = vperm.xlu0 %11989, %v3922_v29   ;;  %v18881_v19 = vld [vmem:[#allocation195_spill] sm:$0xff] }
 0x39c   :  { %7799 = vst.msk [vmem:[#allocation3 + $0x80] sm:$0xff] %vm7781_vm2, %v18854_v16  ;;  %7801 = vst.msk [vmem:[#allocation3 + $0x90] sm:$0xff] %vm7781_vm2, %v18854_v16  ;;  %v18884_v21 = vld [vmem:[#allocation198_spill] sm:$0xff]  ;;  %4047 = vperm.xlu1 %11990, %v3924_v24   ;;  %v18885_v29 = vld [vmem:[#allocation76_spill] sm:$0xff] }
 0x39d   :  { %7800 = vst.msk [vmem:[#allocation3 + $0x88] sm:$0x3] %vm7783_vm3, %v18854_v16  ;;  %7802 = vst.msk [vmem:[#allocation3 + $0x98] sm:$0x3] %vm7783_vm3, %v18854_v16  ;;  %v2278_v57 = vmul.f32 %v14228_v39, %v18884_v21  ;;  %v14641_v21 = vadd.f32 %v2271_v51, %v14181_v38 }
 0x39e   :  { %7803 = vst.msk [vmem:[#allocation3 + $0xa0] sm:$0xff] %vm7781_vm2, %v18854_v16  ;;  %7805 = vst.msk [vmem:[#allocation3 + $0xb0] sm:$0xff] %vm7781_vm2, %v18854_v16 }
 0x39f   :  { %7804 = vst.msk [vmem:[#allocation3 + $0xa8] sm:$0x3] %vm7783_vm3, %v18854_v16  ;;  %7806 = vst.msk [vmem:[#allocation3 + $0xb8] sm:$0x3] %vm7783_vm3, %v18854_v16 }
 0x3a0   :  { %7807 = vst.msk [vmem:[#allocation3 + $0xc0] sm:$0xff] %vm7781_vm2, %v18854_v16  ;;  %7809 = vst.msk [vmem:[#allocation3 + $0xd0] sm:$0xff] %vm7781_vm2, %v18854_v16 }
 0x3a1   :  { %7808 = vst.msk [vmem:[#allocation3 + $0xc8] sm:$0x3] %vm7783_vm3, %v18854_v16  ;;  %7810 = vst.msk [vmem:[#allocation3 + $0xd8] sm:$0x3] %vm7783_vm3, %v18854_v16 }
 0x3a2   :  { %7811 = vst.msk [vmem:[#allocation3 + $0xe0] sm:$0xff] %vm7781_vm2, %v18854_v16  ;;  %7813 = vst.msk [vmem:[#allocation3 + $0xf0] sm:$0xff] %vm7781_vm2, %v18854_v16 }
 0x3a3   :  { %7812 = vst.msk [vmem:[#allocation3 + $0xe8] sm:$0x3] %vm7783_vm3, %v18854_v16  ;;  %7814 = vst.msk [vmem:[#allocation3 + $0xf8] sm:$0x3] %vm7783_vm3, %v18854_v16 }
 0x3a4   :  { %7815 = vst.msk [vmem:[#allocation3 + $0x100] sm:$0xff] %vm7781_vm2, %v18854_v16  ;;  %7817 = vst.msk [vmem:[#allocation3 + $0x110] sm:$0xff] %vm7781_vm2, %v18854_v16 }
 0x3a5   :  { %7816 = vst.msk [vmem:[#allocation3 + $0x108] sm:$0x3] %vm7783_vm3, %v18854_v16  ;;  %7818 = vst.msk [vmem:[#allocation3 + $0x118] sm:$0x3] %vm7783_vm3, %v18854_v16 }
 0x3a6   :  { %7819 = vst.msk [vmem:[#allocation3 + $0x120] sm:$0xff] %vm7781_vm2, %v18854_v16  ;;  %7821 = vst.msk [vmem:[#allocation3 + $0x130] sm:$0xff] %vm7781_vm2, %v18854_v16 }
 0x3a7   :  { %7820 = vst.msk [vmem:[#allocation3 + $0x128] sm:$0x3] %vm7783_vm3, %v18854_v16  ;;  %7822 = vst.msk [vmem:[#allocation3 + $0x138] sm:$0x3] %vm7783_vm3, %v18854_v16  ;;  %v14546_v16 = vadd.f32 %v14415_v10, %v14091_v0  ;;  %v2265_v0 = vmul.f32 %v14228_v39, %v18858_v37  ;;  %v14568_v10 = vpop.permute.xlu1 %3117  ;;  %v18865_v37 = vld [vmem:[#allocation187_spill] sm:$0xff]  ;;  %vm10311_vm3 = vcmask 259072  }
 0x3a8   :  { %18857 = vst [vmem:[#allocation21_spill] sm:$0xff] %v14554_v3  ;;  %18860 = vst [vmem:[#allocation284_spill] sm:$0xff] %v14568_v10  ;;  %v2267_v33 = vmul.f32 %v14228_v39, %v18865_v37  ;;  %v14596_v10 = vadd.f32 %v2264_v52, %v18868_v54  ;;  %v2272_v3 = vmul.f32 %v14228_v39, %v18872_v63  ;;  %v14604_v37 = vpop.permute.xlu0 %3122  ;;  %v18879_v54 = vld [vmem:[#allocation194_spill] sm:$0xff] }
 0x3a9   :  { %18862 = vst [vmem:[#allocation91_spill] sm:$0xff] %v14584_v43  ;;  %18864 = vst [vmem:[#allocation92_spill] sm:$0xff] %v14587_v14  ;;  %v14607_v25 = vadd.f32 %v2265_v0, %v18874_v7  ;;  %v18878_v14 = vld [vmem:[#allocation193_spill] sm:$0xff]  ;;  %v2274_v27 = vmul.f32 %v14228_v39, %v18879_v54  ;;  %v2275_v63 = vmul.f32 %v14228_v39, %v18881_v19  ;;  %v18882_v43 = vld [vmem:[#allocation196_spill] sm:$0xff] }
 0x3aa   :  { %18869 = vst [vmem:[#allocation93_spill] sm:$0xff] %v14596_v10  ;;  %18873 = vst [vmem:[#allocation27_spill] sm:$0xff] %v14604_v37  ;;  %v2273_v52 = vmul.f32 %v14228_v39, %v18878_v14  ;;  %v2276_v37 = vmul.f32 %v14228_v39, %v18882_v43  ;;  %v18883_v7 = vld [vmem:[#allocation197_spill] sm:$0xff]  ;;  %v3406_v14 = vld [vmem:[#allocation2 + $0xc8] sm:$0xff]  ;;  %v14630_v54 = vadd.f32 %v2268_v60, %v14170_v5 }
 0x3ab   :  { %18875 = vst [vmem:[#allocation94_spill] sm:$0xff] %v14607_v25  ;;  %18877 = vst [vmem:[#allocation95_spill] sm:$0xff] %v14610_v1  ;;  %v14616_v10 = vpop.permute.xlu1 %3127  ;;  %v2277_v0 = vmul.f32 %v14228_v39, %v18883_v7  ;;  %v14627_v1 = vadd.f32 %v2267_v33, %v14167_v34  ;;  %v18887_v19 = vld [vmem:[#allocation199_spill] sm:$0xff]  ;;  %v3408_v25 = vld [vmem:[#allocation2 + $0xe0] sm:$0xff]  ;;  %v14638_v7 = vadd.f32 %v2270_v28, %v14178_v22  ;;  %3525 = vperm.xlu0 %11989, %v3406_v14  }
 0x3ac   :  { %18880 = vst [vmem:[#allocation96_spill] sm:$0xff] %v14616_v10  ;;  %v14633_v10 = vadd.f32 %v2269_v41, %v18885_v29  ;;  %v2279_v43 = vmul.f32 %v14228_v39, %v18887_v19  ;;  %v14644_v24 = vadd.f32 %v2272_v3, %v14184_v62  ;;  %v18889_v34 = vld [vmem:[#allocation200_spill] sm:$0xff]  ;;  %v14648_v33 = vpop.permute.xlu0 %3132  ;;  %v18891_v60 = vld [vmem:[#allocation10_spill] sm:$0xff]  ;;  %v18898_v62 = vld [vmem:[#allocation79_spill] sm:$0xff]  ;;  %3535 = vperm.xlu1 %11990, %v3408_v25  }
 0x3ad   :  { %v2280_v5 = vmul.f32 %v14228_v39, %v18889_v34  ;;  %18890 = vst [vmem:[#allocation99_spill] sm:$0xff] %v14648_v33  ;;  %v14651_v41 = vadd.f32 %v2273_v52, %v18891_v60  ;;  %v18893_v29 = vld [vmem:[#allocation78_spill] sm:$0xff]  ;;  %v14663_v3 = vadd.f32 %v2275_v63, %v18898_v62  ;;  %v18900_v34 = vld [vmem:[#allocation80_spill] sm:$0xff]  ;;  %v18910_v62 = vld [vmem:[#allocation205_spill] sm:$0xff] }
 0x3ae   :  { %18886 = vst [vmem:[#allocation97_spill] sm:$0xff] %v14633_v10  ;;  %18888 = vst [vmem:[#allocation98_spill] sm:$0xff] %v14644_v24  ;;  %v14654_v19 = vadd.f32 %v2274_v27, %v18893_v29  ;;  %v18895_v10 = vld [vmem:[#allocation201_spill] sm:$0xff]  ;;  %v18896_v28 = vld [vmem:[#allocation202_spill] sm:$0xff]  ;;  %v14666_v33 = vadd.f32 %v2276_v37, %v18900_v34  ;;  %v2285_v37 = vmul.f32 %v14228_v39, %v18910_v62 }
 0x3af   :  { %18892 = vst [vmem:[#allocation100_spill] sm:$0xff] %v14651_v41  ;;  %v2281_v22 = vmul.f32 %v14228_v39, %v18895_v10  ;;  %v2282_v38 = vmul.f32 %v14228_v39, %v18896_v28  ;;  %v14660_v51 = vpop.permute.xlu1 %3137  ;;  %18899 = vst [vmem:[#allocation103_spill] sm:$0xff] %v14663_v3  ;;  %v18902_v52 = vld [vmem:[#allocation82_spill] sm:$0xff]  ;;  %v18904_v27 = vld [vmem:[#allocation83_spill] sm:$0xff] }
 0x3b0   :  { %18894 = vst [vmem:[#allocation101_spill] sm:$0xff] %v14654_v19  ;;  %18897 = vst [vmem:[#allocation102_spill] sm:$0xff] %v14660_v51  ;;  %v14669_v60 = vadd.f32 %v2277_v0, %v18902_v52  ;;  %v14672_v29 = vadd.f32 %v2278_v57, %v18904_v27  ;;  %v3409_v10 = vld [vmem:[#allocation2 + $0xf0] sm:$0xff]  ;;  %v14686_v0 = vld [vmem:[%s18222_s1 + $0x4] ss:$0 sm:$0xff] }
 0x3b1   :  { %18901 = vst [vmem:[#allocation104_spill] sm:$0xff] %v14666_v33  ;;  %v18906_v19 = vld [vmem:[#allocation84_spill] sm:$0xff]  ;;  %v18908_v28 = vld [vmem:[#allocation203_spill] sm:$0xff]  ;;  %v18917_v62 = vld [vmem:[#allocation85_spill] sm:$0xff]  ;;  %3540 = vperm.xlu0 %11989, %v3409_v10   ;;  %v14726_v10 = vadd.f32 %v2285_v37, %v14266_v17 }
 0x3b2   :  { %18903 = vst [vmem:[#allocation105_spill] sm:$0xff] %v14669_v60  ;;  %18905 = vst [vmem:[#allocation106_spill] sm:$0xff] %v14672_v29  ;;  %v14675_v41 = vadd.f32 %v2279_v43, %v18906_v19  ;;  %v2283_v14 = vmul.f32 %v14228_v39, %v18908_v28  ;;  %v18909_v51 = vld [vmem:[#allocation204_spill] sm:$0xff]  ;;  %v3411_v57 = vld [vmem:[#allocation2 + $0x108] sm:$0xff]  ;;  %v14700_v29 = vadd.f32 %v2281_v22, %v18917_v62 }
 0x3b3   :  { %v2284_v63 = vmul.f32 %v14228_v39, %v18909_v51  ;;  %v18911_v25 = vld [vmem:[#allocation216_spill] sm:$0xff]  ;;  %v18913_v43 = vld [vmem:[#allocation206_spill] sm:$0xff]  ;;  %v18914_v52 = vld [vmem:[#allocation207_spill] sm:$0xff]  ;;  %3550 = vperm.xlu1 %11990, %v3411_v57  }
 0x3b4   :  { %18907 = vst [vmem:[#allocation107_spill] sm:$0xff] %v14675_v41  ;;  %v14689_v34 = vadd.f32 %v2280_v5, %v18911_v25  ;;  %v2286_v19 = vmul.f32 %v14228_v39, %v18913_v43  ;;  %v2287_v27 = vmul.f32 %v14228_v39, %v18914_v52  ;;  %v18915_v28 = vld [vmem:[#allocation208_spill] sm:$0xff]  ;;  %v14697_v41 = vpop.permute.xlu0 %3142  ;;  %v18918_v60 = vld [vmem:[#allocation86_spill] sm:$0xff]  ;;  %v18919_v3 = vld [vmem:[#allocation209_spill] sm:$0xff] }
 0x3b5   :  { %v2288_v51 = vmul.f32 %v14228_v39, %v18915_v28  ;;  %18916 = vst [vmem:[#allocation109_spill] sm:$0xff] %v14697_v41  ;;  %v14703_v33 = vadd.f32 %v2282_v38, %v18918_v60  ;;  %v2289_v5 = vmul.f32 %v14228_v39, %v18919_v3  ;;  %v18920_v25 = vld [vmem:[#allocation210_spill] sm:$0xff]  ;;  %v18922_v52 = vld [vmem:[#allocation211_spill] sm:$0xff]  ;;  %v18923_v24 = vld [vmem:[#allocation212_spill] sm:$0xff]  ;;  %v14720_v3 = vadd.f32 %v2283_v14, %v14260_v36 }
 0x3b6   :  { %18912 = vst [vmem:[#allocation108_spill] sm:$0xff] %v14689_v34  ;;  %v2290_v43 = vmul.f32 %v14228_v39, %v18920_v25  ;;  %v14709_v34 = vpop.permute.xlu1 %3147  ;;  %v2291_v28 = vmul.f32 %v14228_v39, %v18922_v52  ;;  %v2292_v41 = vmul.f32 %v14228_v39, %v18923_v24  ;;  %v18924_v22 = vld [vmem:[#allocation213_spill] sm:$0xff]  ;;  %v18925_v38 = vld [vmem:[#allocation214_spill] sm:$0xff]  ;;  %v14723_v25 = vadd.f32 %v2284_v63, %v14263_v42  ;;  %v18926_v52 = vld [vmem:[#allocation215_spill] sm:$0xff] }
 0x3b7   :  { %18921 = vst [vmem:[#allocation110_spill] sm:$0xff] %v14709_v34  ;;  %v2293_v62 = vmul.f32 %v14228_v39, %v18924_v22  ;;  %v2747_v60 = vmul.f32 %v14686_v0, %v18925_v38  ;;  %v2748_v34 = vmul.f32 %v14686_v0, %v18926_v52  ;;  %v14731_v24 = vadd.f32 %v2286_v19, %v14271_v15  ;;  %v18927_v36 = vld [vmem:[#allocation217_spill] sm:$0xff]  ;;  %v18929_v37 = vld [vmem:[#allocation218_spill] sm:$0xff]  ;;  %v18930_v19 = vld [vmem:[#allocation220_spill] sm:$0xff] }
 0x3b8   :  { %v14734_v39 = vadd.f32 %v2287_v27, %v14274_v46  ;;  %v14737_v57 = vadd.f32 %v2288_v51, %v14277_v48  ;;  %v2749_v14 = vmul.f32 %v14686_v0, %v18927_v36  ;;  %v14741_v42 = vpop.permute.xlu0 %3152  ;;  %v14744_v17 = vadd.f32 %v2289_v5, %v14284_v26  ;;  %v12033_v48 = vld [vmem:[#allocation2 + $0x9a] sm:$0xff]  ;;  %v18932_v51 = vld [vmem:[#allocation22_spill] sm:$0xff]  ;;  %v18934_v38 = vld [vmem:[#allocation23_spill] sm:$0xff] }
 0x3b9   :  { %18928 = vst [vmem:[#allocation111_spill] sm:$0xff] %v14741_v42  ;;  %v14747_v63 = vadd.f32 %v2290_v43, %v14287_v58  ;;  %v2750_v15 = vmul.f32 %v14686_v0, %v18929_v37  ;;  %v2751_v46 = vmul.f32 %v14686_v0, %v18930_v19  ;;  %4539 = vperm.xlu0 %11989, %v12033_v48   ;;  %v18936_v26 = vld [vmem:[#allocation89_spill] sm:$0xff]  ;;  %v18938_v58 = vld [vmem:[#allocation11_spill] sm:$0xff]  ;;  %v12034_v36 = vld [vmem:[#allocation2 + $0xb2] sm:$0xff] }
 0x3ba   :  { %v14753_v27 = vpop.permute.xlu1 %3157  ;;  %v14756_v22 = vadd.f32 %v2291_v28, %v18932_v51  ;;  %v14759_v52 = vadd.f32 %v2292_v41, %v18934_v38  ;;  %v14762_v5 = vadd.f32 %v2293_v62, %v18936_v26  ;;  %v14765_v43 = vadd.f32 %v2747_v60, %v18938_v58  ;;  %4549 = vperm.xlu1 %11990, %v12034_v36   ;;  %v18940_v37 = vld [vmem:[#allocation12_spill] sm:$0xff]  ;;  %v18943_v42 = vld [vmem:[#allocation223_spill] sm:$0xff]  ;;  %v18945_v38 = vld [vmem:[#allocation13_spill] sm:$0xff] }
 0x3bb   :  { %18931 = vst [vmem:[#allocation112_spill] sm:$0xff] %v14753_v27  ;;  %v14768_v19 = vadd.f32 %v2748_v34, %v18940_v37  ;;  %v18942_v27 = vld [vmem:[#allocation221_spill] sm:$0xff]  ;;  %v2753_v28 = vmul.f32 %v14686_v0, %v18943_v42  ;;  %v18944_v51 = vld [vmem:[#allocation224_spill] sm:$0xff]  ;;  %v14777_v62 = vadd.f32 %v2749_v14, %v18945_v38  ;;  %v18947_v26 = vld [vmem:[#allocation226_spill] sm:$0xff] }
 0x3bc   :  { %18933 = vst [vmem:[#allocation113_spill] sm:$0xff] %v14756_v22  ;;  %18935 = vst [vmem:[#allocation114_spill] sm:$0xff] %v14759_v52  ;;  %v2752_v48 = vmul.f32 %v14686_v0, %v18942_v27  ;;  %v2754_v41 = vmul.f32 %v14686_v0, %v18944_v51  ;;  %v2755_v60 = vmul.f32 %v14686_v0, %v18947_v26  ;;  %v18948_v58 = vld [vmem:[#allocation227_spill] sm:$0xff]  ;;  %v18949_v34 = vld [vmem:[#allocation228_spill] sm:$0xff] }
 0x3bd   :  { %18937 = vst [vmem:[#allocation115_spill] sm:$0xff] %v14762_v5  ;;  %18939 = vst [vmem:[#allocation116_spill] sm:$0xff] %v14765_v43  ;;  %v2756_v36 = vmul.f32 %v14686_v0, %v18948_v58  ;;  %v2757_v37 = vmul.f32 %v14686_v0, %v18949_v34  ;;  %v18951_v27 = vld [vmem:[#allocation90_spill] sm:$0xff]  ;;  %v18955_v51 = vld [vmem:[#allocation229_spill] sm:$0xff] }
 0x3be   :  { %18941 = vst [vmem:[#allocation117_spill] sm:$0xff] %v14768_v19  ;;  %18946 = vst [vmem:[#allocation118_spill] sm:$0xff] %v14777_v62  ;;  %v14785_v19 = vpop.permute.xlu0 %3162  ;;  %v14788_v43 = vadd.f32 %v2750_v15, %v18951_v27  ;;  %v18953_v42 = vld [vmem:[#allocation14_spill] sm:$0xff]  ;;  %v2758_v14 = vmul.f32 %v14686_v0, %v18955_v51  ;;  %v14797_v62 = vpop.permute.xlu1 %3167  ;;  %v18958_v52 = vld [vmem:[#allocation231_spill] sm:$0xff] }
 0x3bf   :  { %18950 = vst [vmem:[#allocation119_spill] sm:$0xff] %v14785_v19  ;;  %v14791_v5 = vadd.f32 %v2751_v46, %v18953_v42  ;;  %v18956_v38 = vld [vmem:[#allocation230_spill] sm:$0xff]  ;;  %18957 = vst [vmem:[#allocation122_spill] sm:$0xff] %v14797_v62  ;;  %v2760_v34 = vmul.f32 %v14686_v0, %v18958_v52  ;;  %v18959_v19 = vld [vmem:[#allocation232_spill] sm:$0xff]  ;;  %v14814_v52 = vadd.f32 %v2754_v41, %v14354_v32 }
 0x3c0   :  { %18952 = vst [vmem:[#allocation120_spill] sm:$0xff] %v14788_v43  ;;  %v2759_v26 = vmul.f32 %v14686_v0, %v18956_v38  ;;  %v12035_v58 = vld [vmem:[#allocation2 + $0xc2] sm:$0xff]  ;;  %v2761_v15 = vmul.f32 %v14686_v0, %v18959_v19  ;;  %v18960_v27 = vld [vmem:[#allocation233_spill] sm:$0xff]  ;;  %v14808_v38 = vadd.f32 %v2752_v48, %v14348_v2  ;;  %v18962_v62 = vld [vmem:[#allocation235_spill] sm:$0xff]  ;;  %v14832_v32 = vadd.f32 %v2758_v14, %v14372_v8 }
 0x3c1   :  { %18954 = vst [vmem:[#allocation121_spill] sm:$0xff] %v14791_v5  ;;  %4554 = vperm.xlu0 %11989, %v12035_v58   ;;  %v2762_v46 = vmul.f32 %v14686_v0, %v18960_v27  ;;  %v18961_v42 = vld [vmem:[#allocation234_spill] sm:$0xff]  ;;  %v12036_v51 = vld [vmem:[#allocation2 + $0xda] sm:$0xff]  ;;  %v14811_v58 = vadd.f32 %v2753_v28, %v14351_v40  ;;  %v2764_v19 = vmul.f32 %v14686_v0, %v18962_v62  ;;  %v18963_v2 = vld [vmem:[#allocation236_spill] sm:$0xff] }
 0x3c2   :  { %v2763_v5 = vmul.f32 %v14686_v0, %v18961_v42  ;;  %4564 = vperm.xlu1 %11990, %v12036_v51   ;;  %v3923_v43 = vld [vmem:[#allocation2 + $0xc9] sm:$0xff]  ;;  %v3925_v22 = vld [vmem:[#allocation2 + $0xe1] sm:$0xff]  ;;  %v14819_v27 = vadd.f32 %v2755_v60, %v14359_v30  ;;  %v14822_v42 = vadd.f32 %v2756_v36, %v14362_v50  ;;  %v14825_v51 = vadd.f32 %v2757_v37, %v14365_v9  ;;  %v14829_v48 = vpop.permute.xlu0 %3172  ;;  %v14841_v60 = vpop.permute.xlu1 %3177  ;;  %v3926_v37 = vld [vmem:[#allocation2 + $0xf1] sm:$0xff] }
 0x3c3   :  { %v2765_v40 = vmul.f32 %v14686_v0, %v18963_v2  ;;  %18964 = vst [vmem:[#allocation222_spill] sm:$0xff] %v14829_v48  ;;  %v14835_v28 = vadd.f32 %v2759_v26, %v14375_v44  ;;  %v18965_v41 = vld [vmem:[#allocation237_spill] sm:$0xff]  ;;  %v18966_v62 = vld [vmem:[#allocation238_spill] sm:$0xff]  ;;  %18967 = vst [vmem:[#allocation225_spill] sm:$0xff] %v14841_v60  ;;  %v14844_v9 = vadd.f32 %v2760_v34, %v14378_v4 }
 0x3c4   :  { %v2766_v30 = vmul.f32 %v14686_v0, %v18965_v41  ;;  %v2767_v50 = vmul.f32 %v14686_v0, %v18966_v62  ;;  %v14847_v36 = vadd.f32 %v2761_v15, %v14381_v61  ;;  %v14850_v8 = vadd.f32 %v2762_v46, %v14386_v23  ;;  %v18968_v26 = vld [vmem:[#allocation239_spill] sm:$0xff]  ;;  %v18969_v2 = vld [vmem:[#allocation240_spill] sm:$0xff]  ;;  %v18970_v34 = vld [vmem:[#allocation241_spill] sm:$0xff] }
 0x3c5   :  { %4042 = vperm.xlu0 %11989, %v3923_v43   ;;  %v14853_v44 = vadd.f32 %v2763_v5, %v14389_v13  ;;  %v14856_v14 = vadd.f32 %v2764_v19, %v14392_v47  ;;  %v2768_v43 = vmul.f32 %v14686_v0, %v18968_v26  ;;  %v2769_v4 = vmul.f32 %v14686_v0, %v18969_v2  ;;  %v3928_v15 = vld [vmem:[#allocation2 + $0x109] sm:$0xff]  ;;  %v18973_v46 = vld [vmem:[#allocation244_spill] sm:$0xff]  ;;  %v18975_v2 = vld [vmem:[#allocation245_spill] sm:$0xff] }
 0x3c6   :  { %4052 = vperm.xlu1 %11990, %v3925_v22   ;;  %v2770_v61 = vmul.f32 %v14686_v0, %v18970_v34  ;;  %v14865_v23 = vadd.f32 %v2765_v40, %v14395_v31  ;;  %v18971_v13 = vld [vmem:[#allocation242_spill] sm:$0xff]  ;;  %v18972_v5 = vld [vmem:[#allocation243_spill] sm:$0xff]  ;;  %v2773_v19 = vmul.f32 %v14686_v0, %v18973_v46  ;;  %v14873_v41 = vpop.permute.xlu0 %3182  ;;  %v14876_v62 = vadd.f32 %v2766_v30, %v14398_v45  ;;  %v18979_v60 = vld [vmem:[#allocation248_spill] sm:$0xff] }
 0x3c7   :  { %v2771_v22 = vmul.f32 %v14686_v0, %v18971_v13  ;;  %v2772_v47 = vmul.f32 %v14686_v0, %v18972_v5  ;;  %18974 = vst [vmem:[#allocation123_spill] sm:$0xff] %v14873_v41  ;;  %v14879_v26 = vadd.f32 %v2767_v50, %v14407_v6  ;;  %v2774_v31 = vmul.f32 %v14686_v0, %v18975_v2  ;;  %v18976_v40 = vld [vmem:[#allocation246_spill] sm:$0xff]  ;;  %v14885_v13 = vpop.permute.xlu1 %3187  ;;  %v18978_v5 = vld [vmem:[#allocation247_spill] sm:$0xff]  ;;  %v18980_v45 = vld [vmem:[#allocation249_spill] sm:$0xff] }
 0x3c8   :  { %v2775_v34 = vmul.f32 %v14686_v0, %v18976_v40  ;;  %18977 = vst [vmem:[#allocation124_spill] sm:$0xff] %v14885_v13  ;;  %v2776_v46 = vmul.f32 %v14686_v0, %v18978_v5  ;;  %v2777_v41 = vmul.f32 %v14686_v0, %v18979_v60  ;;  %v2778_v30 = vmul.f32 %v14686_v0, %v18980_v45  ;;  %v18981_v6 = vld [vmem:[#allocation250_spill] sm:$0xff]  ;;  %v3410_v2 = vld [vmem:[#allocation2 + $0xf8] sm:$0xff]  ;;  %v18982_v5 = vld [vmem:[#allocation251_spill] sm:$0xff] }
 0x3c9   :  { %4057 = vperm.xlu0 %11989, %v3926_v37   ;;  %v2779_v50 = vmul.f32 %v14686_v0, %v18981_v6  ;;  %v14896_v48 = vadd.f32 %v2768_v43, %v14530_v20  ;;  %v14899_v40 = vadd.f32 %v2769_v4, %v14533_v56  ;;  %v14902_v37 = vadd.f32 %v2770_v61, %v14536_v35  ;;  %v3412_v13 = vld [vmem:[#allocation2 + $0x110] sm:$0xff]  ;;  %v18985_v61 = vld [vmem:[#allocation253_spill] sm:$0xff] }
 0x3ca   :  { %4067 = vperm.xlu1 %11990, %v3928_v15   ;;  %v2780_v60 = vmul.f32 %v14686_v0, %v18982_v5  ;;  %v14907_v45 = vadd.f32 %v2771_v22, %v14542_v53  ;;  %v14910_v6 = vadd.f32 %v2772_v47, %v14546_v16  ;;  %v14913_v15 = vadd.f32 %v2773_v19, %v14550_v12  ;;  %v18983_v20 = vld [vmem:[#allocation252_spill] sm:$0xff]  ;;  %v14917_v43 = vpop.permute.xlu0 %3192  ;;  %v18986_v22 = vld [vmem:[#allocation254_spill] sm:$0xff] }
 0x3cb   :  { %v2781_v56 = vmul.f32 %v14686_v0, %v18983_v20  ;;  %18984 = vst [vmem:[#allocation125_spill] sm:$0xff] %v14917_v43  ;;  %v14920_v35 = vadd.f32 %v2774_v31, %v14558_v49  ;;  %v14923_v4 = vadd.f32 %v2775_v34, %v14562_v59  ;;  %v2782_v53 = vmul.f32 %v14686_v0, %v18985_v61  ;;  %v14929_v47 = vpop.permute.xlu1 %3197  ;;  %v18989_v59 = vld [vmem:[#allocation91_spill] sm:$0xff]  ;;  %v3413_v34 = vld [vmem:[#allocation2 + $0x120] sm:$0xff]  ;;  %v18991_v5 = vld [vmem:[#allocation92_spill] sm:$0xff] }
 0x3cc   :  { %v2783_v16 = vmul.f32 %v14686_v0, %v18986_v22  ;;  %18987 = vst [vmem:[#allocation126_spill] sm:$0xff] %v14929_v47  ;;  %v14932_v12 = vadd.f32 %v2776_v46, %v14572_v55  ;;  %v14935_v19 = vadd.f32 %v2777_v41, %v14576_v18  ;;  %v14938_v49 = vadd.f32 %v2778_v30, %v14580_v11  ;;  %v18993_v61 = vld [vmem:[#allocation255_spill] sm:$0xff]  ;;  %v18994_v22 = vld [vmem:[#allocation256_spill] sm:$0xff]  ;;  %v18995_v46 = vld [vmem:[#allocation257_spill] sm:$0xff] }
 0x3cd   :  { %3545 = vperm.xlu0 %11989, %v3410_v2   ;;  %v14941_v31 = vadd.f32 %v2779_v50, %v18989_v59  ;;  %v14944_v20 = vadd.f32 %v2780_v60, %v18991_v5  ;;  %v2784_v2 = vmul.f32 %v14686_v0, %v18993_v61  ;;  %v2785_v55 = vmul.f32 %v14686_v0, %v18994_v22  ;;  %v3415_v41 = vld [vmem:[#allocation2 + $0x138] sm:$0xff]  ;;  %v18998_v50 = vld [vmem:[#allocation258_spill] sm:$0xff]  ;;  %v18999_v59 = vld [vmem:[#allocation259_spill] sm:$0xff] }
 0x3ce   :  { %18988 = vst [vmem:[#allocation127_spill] sm:$0xff] %v14938_v49  ;;  %3555 = vperm.xlu1 %11990, %v3412_v13   ;;  %v2786_v18 = vmul.f32 %v14686_v0, %v18995_v46  ;;  %v18996_v11 = vld [vmem:[#allocation93_spill] sm:$0xff]  ;;  %v2787_v13 = vmul.f32 %v14686_v0, %v18998_v50  ;;  %v2788_v60 = vmul.f32 %v14686_v0, %v18999_v59  ;;  %v19000_v5 = vld [vmem:[#allocation260_spill] sm:$0xff]  ;;  %v14961_v61 = vpop.permute.xlu0 %3202  ;;  %v19002_v43 = vld [vmem:[#allocation94_spill] sm:$0xff] }
 0x3cf   :  { %18990 = vst [vmem:[#allocation128_spill] sm:$0xff] %v14941_v31  ;;  %18992 = vst [vmem:[#allocation129_spill] sm:$0xff] %v14944_v20  ;;  %v14953_v30 = vadd.f32 %v2781_v56, %v18996_v11  ;;  %v2789_v47 = vmul.f32 %v14686_v0, %v19000_v5  ;;  %v14964_v22 = vadd.f32 %v2782_v53, %v19002_v43  ;;  %v19004_v20 = vld [vmem:[#allocation95_spill] sm:$0xff]  ;;  %v19006_v31 = vld [vmem:[#allocation261_spill] sm:$0xff] }
 0x3d0   :  { %19001 = vst [vmem:[#allocation131_spill] sm:$0xff] %v14961_v61  ;;  %v14967_v46 = vadd.f32 %v2783_v16, %v19004_v20  ;;  %v2790_v56 = vmul.f32 %v14686_v0, %v19006_v31  ;;  %v19007_v11 = vld [vmem:[#allocation262_spill] sm:$0xff]  ;;  %v19009_v59 = vld [vmem:[#allocation263_spill] sm:$0xff]  ;;  %v19010_v49 = vld [vmem:[#allocation264_spill] sm:$0xff] }
 0x3d1   :  { %18997 = vst [vmem:[#allocation130_spill] sm:$0xff] %v14953_v30  ;;  %19003 = vst [vmem:[#allocation132_spill] sm:$0xff] %v14964_v22  ;;  %v2791_v50 = vmul.f32 %v14686_v0, %v19007_v11  ;;  %v14973_v30 = vpop.permute.xlu1 %3207  ;;  %3560 = vperm.xlu0 %11989, %v3413_v34   ;;  %v2792_v5 = vmul.f32 %v14686_v0, %v19009_v59  ;;  %v2793_v61 = vmul.f32 %v14686_v0, %v19010_v49  ;;  %v19011_v43 = vld [vmem:[#allocation265_spill] sm:$0xff]  ;;  %v19012_v16 = vld [vmem:[#allocation266_spill] sm:$0xff] }
 0x3d2   :  { %19005 = vst [vmem:[#allocation133_spill] sm:$0xff] %v14967_v46  ;;  %19008 = vst [vmem:[#allocation134_spill] sm:$0xff] %v14973_v30  ;;  %v2794_v53 = vmul.f32 %v14686_v0, %v19011_v43  ;;  %v2795_v20 = vmul.f32 %v14686_v0, %v19012_v16  ;;  %3570 = vperm.xlu1 %11990, %v3415_v41   ;;  %v4440_v31 = vld [vmem:[#allocation2 + $0xca] sm:$0xff]  ;;  %v14984_v46 = vadd.f32 %v2784_v2, %v14627_v1  ;;  %v19013_v34 = vld [vmem:[#allocation97_spill] sm:$0xff] }
 0x3d3   :  { %v14987_v11 = vadd.f32 %v2785_v55, %v14630_v54  ;;  %v14990_v30 = vadd.f32 %v2786_v18, %v19013_v34  ;;  %v19015_v59 = vld [vmem:[#allocation267_spill] sm:$0xff]  ;;  %v14995_v22 = vadd.f32 %v2787_v13, %v14638_v7  ;;  %v14998_v43 = vadd.f32 %v2788_v60, %v14641_v21  ;;  %v19016_v41 = vld [vmem:[#allocation98_spill] sm:$0xff]  ;;  %v19017_v1 = vld [vmem:[#allocation268_spill] sm:$0xff]  ;;  %v15005_v54 = vpop.permute.xlu0 %3212 }
 0x3d4   :  { %v2796_v49 = vmul.f32 %v14686_v0, %v19015_v59  ;;  %v15001_v16 = vadd.f32 %v2789_v47, %v19016_v41  ;;  %v2797_v2 = vmul.f32 %v14686_v0, %v19017_v1  ;;  %19018 = vst [vmem:[#allocation136_spill] sm:$0xff] %v15005_v54  ;;  %v19019_v55 = vld [vmem:[#allocation100_spill] sm:$0xff]  ;;  %v19021_v34 = vld [vmem:[#allocation101_spill] sm:$0xff]  ;;  %v19024_v13 = vld [vmem:[#allocation270_spill] sm:$0xff] }
 0x3d5   :  { %19014 = vst [vmem:[#allocation135_spill] sm:$0xff] %v14990_v30  ;;  %v15008_v18 = vadd.f32 %v2790_v56, %v19019_v55  ;;  %v15011_v30 = vadd.f32 %v2791_v50, %v19021_v34  ;;  %v19023_v59 = vld [vmem:[#allocation269_spill] sm:$0xff]  ;;  %v2799_v21 = vmul.f32 %v14686_v0, %v19024_v13  ;;  %v15017_v60 = vpop.permute.xlu1 %3217  ;;  %4559 = vperm.xlu0 %11989, %v4440_v31   ;;  %v19026_v47 = vld [vmem:[#allocation103_spill] sm:$0xff]  ;;  %v19027_v1 = vld [vmem:[#allocation104_spill] sm:$0xff] }
 0x3d6   :  { %v2798_v7 = vmul.f32 %v14686_v0, %v19023_v59  ;;  %19025 = vst [vmem:[#allocation137_spill] sm:$0xff] %v15017_v60  ;;  %v15020_v41 = vadd.f32 %v2792_v5, %v19026_v47  ;;  %v15023_v54 = vadd.f32 %v2793_v61, %v19027_v1  ;;  %v19028_v56 = vld [vmem:[#allocation105_spill] sm:$0xff]  ;;  %v19030_v50 = vld [vmem:[#allocation106_spill] sm:$0xff]  ;;  %v19032_v59 = vld [vmem:[#allocation107_spill] sm:$0xff] }
 0x3d7   :  { %19020 = vst [vmem:[#allocation38_spill] sm:$0xff] %v15008_v18  ;;  %19022 = vst [vmem:[#allocation39_spill] sm:$0xff] %v15011_v30  ;;  %v15026_v55 = vadd.f32 %v2794_v53, %v19028_v56  ;;  %v15029_v34 = vadd.f32 %v2795_v20, %v19030_v50  ;;  %v12037_v30 = vld [vmem:[#allocation2 + $0xe2] sm:$0xff]  ;;  %v15032_v18 = vadd.f32 %v2796_v49, %v19032_v59  ;;  %v19034_v13 = vld [vmem:[#allocation271_spill] sm:$0xff] }
 0x3d8   :  { %4569 = vperm.xlu1 %11990, %v12037_v30   ;;  %v2800_v31 = vmul.f32 %v14686_v0, %v19034_v13  ;;  %v19035_v60 = vld [vmem:[#allocation272_spill] sm:$0xff]  ;;  %v19036_v47 = vld [vmem:[#allocation273_spill] sm:$0xff]  ;;  %v19039_v56 = vld [vmem:[#allocation278_spill] sm:$0xff] }
 0x3d9   :  { %19029 = vst [vmem:[#allocation40_spill] sm:$0xff] %v15026_v55  ;;  %19031 = vst [vmem:[#allocation41_spill] sm:$0xff] %v15029_v34  ;;  %v2801_v5 = vmul.f32 %v14686_v0, %v19035_v60  ;;  %v2802_v61 = vmul.f32 %v14686_v0, %v19036_v47  ;;  %v19037_v1 = vld [vmem:[#allocation108_spill] sm:$0xff]  ;;  %v2803_v20 = vmul.f32 %v14686_v0, %v19039_v56  ;;  %v19040_v50 = vld [vmem:[#allocation283_spill] sm:$0xff]  ;;  %v15054_v60 = vpop.permute.xlu0 %3222 }
 0x3da   :  { %19033 = vst [vmem:[#allocation42_spill] sm:$0xff] %v15032_v18  ;;  %v15041_v53 = vadd.f32 %v2797_v2, %v19037_v1  ;;  %v2804_v30 = vmul.f32 %v14686_v0, %v19040_v50  ;;  %v19041_v49 = vld [vmem:[#allocation25_spill] sm:$0xff]  ;;  %v15052_v13 = vld [vmem:[%s18222_s1 + $0x5] ss:$0 sm:$0xff]  ;;  %19042 = vst [vmem:[#allocation44_spill] sm:$0xff] %v15054_v60  ;;  %v15057_v47 = vadd.f32 %v2798_v7, %v14700_v29 }
 0x3db   :  { %v2805_v59 = vmul.f32 %v14686_v0, %v19041_v49  ;;  %v15060_v2 = vadd.f32 %v2799_v21, %v14703_v33  ;;  %v19045_v1 = vld [vmem:[#allocation17_spill] sm:$0xff]  ;;  %v19046_v50 = vld [vmem:[#allocation28_spill] sm:$0xff]  ;;  %v15066_v49 = vpop.permute.xlu1 %3227  ;;  %v19049_v60 = vld [vmem:[#allocation30_spill] sm:$0xff] }
 0x3dc   :  { %19038 = vst [vmem:[#allocation138_spill] sm:$0xff] %v15041_v53  ;;  %19043 = vst [vmem:[#allocation45_spill] sm:$0xff] %v15057_v47  ;;  %v2806_v56 = vmul.f32 %v14686_v0, %v19045_v1  ;;  %v2807_v53 = vmul.f32 %v14686_v0, %v19046_v50  ;;  %v12038_v18 = vld [vmem:[#allocation2 + $0xf2] sm:$0xff]  ;;  %v19048_v34 = vld [vmem:[#allocation29_spill] sm:$0xff]  ;;  %v2809_v29 = vmul.f32 %v14686_v0, %v19049_v60 }
 0x3dd   :  { %19044 = vst [vmem:[#allocation46_spill] sm:$0xff] %v15060_v2  ;;  %19047 = vst [vmem:[#allocation47_spill] sm:$0xff] %v15066_v49  ;;  %4574 = vperm.xlu0 %11989, %v12038_v18   ;;  %v2808_v55 = vmul.f32 %v14686_v0, %v19048_v34  ;;  %v19050_v7 = vld [vmem:[#allocation31_spill] sm:$0xff]  ;;  %v3927_v2 = vld [vmem:[#allocation2 + $0xf9] sm:$0xff]  ;;  %v15075_v1 = vadd.f32 %v2800_v31, %v14720_v3  ;;  %v15078_v50 = vadd.f32 %v2801_v5, %v14723_v25  ;;  %v15096_v31 = vpop.permute.xlu0 %3232 }
 0x3de   :  { %v2810_v33 = vmul.f32 %v14686_v0, %v19050_v7  ;;  %v12039_v21 = vld [vmem:[#allocation2 + $0x10a] sm:$0xff]  ;;  %v15081_v18 = vadd.f32 %v2802_v61, %v14726_v10  ;;  %v19052_v49 = vld [vmem:[#allocation32_spill] sm:$0xff]  ;;  %v15086_v60 = vadd.f32 %v2803_v20, %v14731_v24  ;;  %v15089_v0 = vadd.f32 %v2804_v30, %v14734_v39  ;;  %v19056_v3 = vld [vmem:[#allocation33_spill] sm:$0xff]  ;;  %19057 = vst [vmem:[#allocation53_spill] sm:$0xff] %v15096_v31 }
 0x3df   :  { %4584 = vperm.xlu1 %11990, %v12039_v21   ;;  %v3264_v34 = vmul.f32 %v15052_v13, %v19052_v49  ;;  %v3929_v47 = vld [vmem:[#allocation2 + $0x111] sm:$0xff]  ;;  %v15092_v7 = vadd.f32 %v2805_v59, %v14737_v57  ;;  %v3265_v25 = vmul.f32 %v15052_v13, %v19056_v3  ;;  %v15099_v10 = vadd.f32 %v2806_v56, %v14744_v17  ;;  %v15104_v61 = vpop.permute.xlu1 %3237  ;;  %v19061_v30 = vld [vmem:[#allocation113_spill] sm:$0xff]  ;;  %v19063_v59 = vld [vmem:[#allocation114_spill] sm:$0xff] }
 0x3e0   :  { %19051 = vst [vmem:[#allocation49_spill] sm:$0xff] %v15081_v18  ;;  %19053 = vst [vmem:[#allocation50_spill] sm:$0xff] %v15086_v60  ;;  %v15102_v5 = vadd.f32 %v2807_v53, %v14747_v63  ;;  %v12093_v24 = vmov 1983009808   ;;  %v5289_v20 = vlaneseq  ;;  %v15107_v57 = vadd.f32 %v2808_v55, %v19061_v30  ;;  %v19065_v21 = vld [vmem:[#allocation115_spill] sm:$0xff]  ;;  %v19067_v17 = vld [vmem:[#allocation34_spill] sm:$0xff] }
 0x3e1   :  { %19054 = vst [vmem:[#allocation51_spill] sm:$0xff] %v15089_v0  ;;  %19055 = vst [vmem:[#allocation52_spill] sm:$0xff] %v15092_v7  ;;  %4062 = vperm.xlu0 %11989, %v3927_v2   ;;  %v5287_v39 = vunpack.c.l.s4 %v12093_v24  ;;  %v15110_v49 = vadd.f32 %v2809_v29, %v19063_v59  ;;  %v15113_v3 = vadd.f32 %v2810_v33, %v19065_v21  ;;  %v3930_v63 = vld [vmem:[#allocation2 + $0x121] sm:$0xff]  ;;  %v19068_v53 = vld [vmem:[#allocation116_spill] sm:$0xff] }
 0x3e2   :  { %19058 = vst [vmem:[#allocation139_spill] sm:$0xff] %v15099_v10  ;;  %19059 = vst [vmem:[#allocation140_spill] sm:$0xff] %v15102_v5  ;;  %v3266_v56 = vmul.f32 %v15052_v13, %v19067_v17  ;;  %v15118_v5 = vadd.f32 %v3264_v34, %v19068_v53  ;;  %v19069_v2 = vld [vmem:[#allocation35_spill] sm:$0xff]  ;;  %v19070_v10 = vld [vmem:[#allocation36_spill] sm:$0xff] }
 0x3e3   :  { %19060 = vst [vmem:[#allocation141_spill] sm:$0xff] %v15104_v61  ;;  %19062 = vst [vmem:[#allocation54_spill] sm:$0xff] %v15107_v57  ;;  %4072 = vperm.xlu1 %11990, %v3929_v47   ;;  %v3267_v24 = vmul.f32 %v15052_v13, %v19069_v2  ;;  %v3268_v55 = vmul.f32 %v15052_v13, %v19070_v10  ;;  %v19071_v30 = vld [vmem:[#allocation37_spill] sm:$0xff]  ;;  %v19075_v17 = vld [vmem:[#allocation48_spill] sm:$0xff]  ;;  %v15135_v2 = vpop.permute.xlu0 %3242  ;;  %v15141_v0 = vpop.permute.xlu1 %3247 }
 0x3e4   :  { %19064 = vst [vmem:[#allocation142_spill] sm:$0xff] %v15110_v49  ;;  %19066 = vst [vmem:[#allocation143_spill] sm:$0xff] %v15113_v3  ;;  %v3269_v29 = vmul.f32 %v15052_v13, %v19071_v30  ;;  %v3932_v59 = vld [vmem:[#allocation2 + $0x139] sm:$0xff]  ;;  %v19074_v3 = vld [vmem:[#allocation43_spill] sm:$0xff]  ;;  %v3271_v34 = vmul.f32 %v15052_v13, %v19075_v17 }
 0x3e5   :  { %v19072_v33 = vld [vmem:[#allocation117_spill] sm:$0xff]  ;;  %v3270_v47 = vmul.f32 %v15052_v13, %v19074_v3  ;;  %v19076_v53 = vld [vmem:[#allocation55_spill] sm:$0xff]  ;;  %19077 = vst [vmem:[#allocation145_spill] sm:$0xff] %v15135_v2  ;;  %v19078_v57 = vld [vmem:[#allocation56_spill] sm:$0xff]  ;;  %4077 = vperm.xlu0 %11989, %v3930_v63  }
 0x3e6   :  { %v15127_v21 = vadd.f32 %v3265_v25, %v19072_v33  ;;  %v3272_v49 = vmul.f32 %v15052_v13, %v19076_v53  ;;  %v3273_v10 = vmul.f32 %v15052_v13, %v19078_v57  ;;  %v19079_v7 = vld [vmem:[#allocation58_spill] sm:$0xff]  ;;  %v5288_v25 = vunpack.c.0.s8 %v5287_v39  ;;  %v19082_v53 = vld [vmem:[#allocation69_spill] sm:$0xff] }
 0x3e7   :  { %v3274_v30 = vmul.f32 %v15052_v13, %v19079_v7  ;;  %v5290_v33 = vshrl.u32 %v5289_v20, 7  ;;  %v19080_v3 = vld [vmem:[#allocation118_spill] sm:$0xff]  ;;  %v3276_v18 = vmul.f32 %v15052_v13, %v19082_v53  ;;  %4087 = vperm.xlu1 %11990, %v3932_v59   ;;  %v19084_v7 = vld [vmem:[#allocation120_spill] sm:$0xff]  ;;  %v19085_v63 = vld [vmem:[#allocation121_spill] sm:$0xff]  ;;  %v15159_v20 = vadd.f32 %v3269_v29, %v14808_v38 }
 0x3e8   :  { %19073 = vst [vmem:[#allocation144_spill] sm:$0xff] %v15127_v21  ;;  %v15144_v21 = vadd.f32 %v3266_v56, %v19080_v3  ;;  %v19081_v17 = vld [vmem:[#allocation62_spill] sm:$0xff]  ;;  %v15153_v31 = vadd.f32 %v3267_v24, %v19084_v7  ;;  %v15156_v39 = vadd.f32 %v3268_v55, %v19085_v63  ;;  %v19086_v56 = vld [vmem:[#allocation71_spill] sm:$0xff]  ;;  %v15164_v53 = vadd.f32 %v3270_v47, %v14811_v58  ;;  %v19087_v24 = vld [vmem:[#allocation72_spill] sm:$0xff]  ;;  %v15174_v7 = vpop.permute.xlu0 %3252  ;;  %v15184_v47 = vpop.permute.xlu1 %3257 }
 0x3e9   :  { %v3275_v60 = vmul.f32 %v15052_v13, %v19081_v17  ;;  %v19083_v2 = vld [vmem:[#allocation70_spill] sm:$0xff]  ;;  %v3278_v3 = vmul.f32 %v15052_v13, %v19086_v56  ;;  %v15170_v59 = vadd.f32 %v3272_v49, %v14819_v27  ;;  %v3279_v55 = vmul.f32 %v15052_v13, %v19087_v24  ;;  %v19088_v63 = vld [vmem:[#allocation73_spill] sm:$0xff]  ;;  %v19093_v56 = vld [vmem:[#allocation275_spill] sm:$0xff] }
 0x3ea   :  { %v3277_v57 = vmul.f32 %v15052_v13, %v19083_v2  ;;  %v3414_v61 = vld [vmem:[#allocation2 + $0x128] sm:$0xff]  ;;  %v3416_v17 = vld [vmem:[#allocation2 + $0x140] sm:$0xff]  ;;  %v15167_v2 = vadd.f32 %v3271_v34, %v14814_v52  ;;  %v15177_v38 = vadd.f32 %v3273_v10, %v14822_v42  ;;  %v15180_v29 = vadd.f32 %v3274_v30, %v14825_v51  ;;  %v3417_v10 = vld [vmem:[#allocation2 + $0x150] sm:$0xff] }
 0x3eb   :  { %v3280_v58 = vmul.f32 %v15052_v13, %v19088_v63  ;;  %3565 = vperm.xlu0 %11989, %v3414_v61   ;;  %v15186_v52 = vsub.s32 %v5288_v25, %v5290_v33  ;;  %v15189_v27 = vadd.f32 %v3275_v60, %v14832_v32  ;;  %v15192_v49 = vadd.f32 %v3276_v18, %v14835_v28  ;;  %v19090_v34 = vld [vmem:[#allocation74_spill] sm:$0xff]  ;;  %v19097_v24 = vld [vmem:[#allocation77_spill] sm:$0xff] }
 0x3ec   :  { %v15195_v42 = vadd.f32 %v3277_v57, %v14844_v9  ;;  %v3281_v51 = vmul.f32 %v15052_v13, %v19090_v34  ;;  %3575 = vperm.xlu1 %11990, %v3416_v17   ;;  %v15200_v30 = vadd.f32 %v3278_v3, %v14847_v36  ;;  %v19092_v61 = vld [vmem:[#allocation274_spill] sm:$0xff]  ;;  %v3283_v32 = vmul.f32 %v15052_v13, %v19093_v56  ;;  %v19096_v57 = vld [vmem:[#allocation75_spill] sm:$0xff]  ;;  %v19098_v3 = vld [vmem:[#allocation81_spill] sm:$0xff]  ;;  %v3461_v34 = vpop.permute.xlu0 %3460 }
 0x3ed   :  { %v3282_v25 = vmul.f32 %v15052_v13, %v19092_v61  ;;  %v19094_v60 = vld [vmem:[#allocation282_spill] sm:$0xff]  ;;  %v15209_v9 = vadd.f32 %v3279_v55, %v14850_v8  ;;  %v3285_v17 = vmul.f32 %v15052_v13, %v19096_v57  ;;  %v3286_v36 = vmul.f32 %v15052_v13, %v19097_v24  ;;  %v19100_v56 = vld [vmem:[#allocation87_spill] sm:$0xff]  ;;  %v15226_v57 = vpop.permute.xlu1 %3465 }
 0x3ee   :  { %19089 = vst [vmem:[#allocation146_spill] sm:$0xff] %v15195_v42  ;;  %19091 = vst [vmem:[#allocation147_spill] sm:$0xff] %v15200_v30  ;;  %v3284_v28 = vmul.f32 %v15052_v13, %v19094_v60  ;;  %v3419_v18 = vld [vmem:[#allocation2 + $0x168] sm:$0xff]  ;;  %v3287_v63 = vmul.f32 %v15052_v13, %v19098_v3  ;;  %v15218_v61 = vadd.f32 %v3280_v58, %v14853_v44  ;;  %v19101_v42 = vld [vmem:[#allocation88_spill] sm:$0xff] }
 0x3ef   :  { %19095 = vst [vmem:[#allocation148_spill] sm:$0xff] %v15209_v9  ;;  %v3288_v60 = vmul.f32 %v15052_v13, %v19100_v56  ;;  %v3289_v8 = vmul.f32 %v15052_v13, %v19101_v42  ;;  %v19102_v55 = vld [vmem:[#allocation219_spill] sm:$0xff]  ;;  %3580 = vperm.xlu0 %11989, %v3417_v10   ;;  %v15229_v24 = vadd.f32 %v3281_v51, %v14856_v14  ;;  %v19104_v3 = vld [vmem:[#allocation24_spill] sm:$0xff]  ;;  %v4444_v56 = vld [vmem:[#allocation2 + $0xfa] sm:$0xff] }
 0x3f0   :  { %19099 = vst [vmem:[#allocation149_spill] sm:$0xff] %v15218_v61  ;;  %v3290_v9 = vmul.f32 %v15052_v13, %v19102_v55  ;;  %v3291_v30 = vmul.f32 %v15052_v13, %v19104_v3  ;;  %v19105_v44 = vld [vmem:[#allocation15_spill] sm:$0xff]  ;;  %3590 = vperm.xlu1 %11990, %v3419_v18   ;;  %v15235_v61 = vsub.s32 0, %v5290_v33  ;;  %v15238_v42 = vadd.f32 %v3282_v25, %v14865_v23  ;;  %v19106_v14 = vld [vmem:[#allocation16_spill] sm:$0xff]  ;;  %v19108_v23 = vld [vmem:[#allocation26_spill] sm:$0xff]  ;;  %v3471_v25 = vpop.permute.xlu0 %3470 }
 0x3f1   :  { %19103 = vst [vmem:[#allocation150_spill] sm:$0xff] %v15229_v24  ;;  %v3292_v58 = vmul.f32 %v15052_v13, %v19105_v44  ;;  %v15241_v55 = vadd.f32 %v3283_v32, %v14876_v62  ;;  %v15244_v10 = vadd.f32 %v3284_v28, %v14879_v26  ;;  %v3293_v51 = vmul.f32 %v15052_v13, %v19106_v14  ;;  %v4446_v3 = vld [vmem:[#allocation2 + $0x112] sm:$0xff] }
 0x3f2   :  { %v15249_v24 = vadd.f32 %v3285_v17, %v14896_v48  ;;  %v15252_v18 = vadd.f32 %v3286_v36, %v14899_v40  ;;  %v15255_v33 = vadd.f32 %v3287_v63, %v14902_v37  ;;  %v3294_v62 = vmul.f32 %v15052_v13, %v19108_v23  ;;  %v19112_v48 = vld [vmem:[#allocation18_spill] sm:$0xff]  ;;  %v3978_v17 = vpop.permute.xlu1 %3977  ;;  %v19115_v63 = vld [vmem:[#allocation19_spill] sm:$0xff]  ;;  %v19122_v23 = vld [vmem:[#allocation96_spill] sm:$0xff] }
 0x3f3   :  { %v15260_v26 = vadd.f32 %v3288_v60, %v14907_v45  ;;  %v15263_v32 = vadd.f32 %v3289_v8, %v14910_v6  ;;  %v15266_v28 = vadd.f32 %v3290_v9, %v14913_v15  ;;  %v3295_v40 = vmul.f32 %v15052_v13, %v19112_v48  ;;  %4579 = vperm.xlu0 %11989, %v4444_v56   ;;  %v19116_v60 = vld [vmem:[#allocation20_spill] sm:$0xff]  ;;  %v4447_v15 = vld [vmem:[#allocation2 + $0x122] sm:$0xff]  ;;  %v19118_v8 = vld [vmem:[#allocation21_spill] sm:$0xff] }
 0x3f4   :  { %19107 = vst [vmem:[#allocation151_spill] sm:$0xff] %v15255_v33  ;;  %v15271_v37 = vadd.f32 %v3291_v30, %v14920_v35  ;;  %v15274_v36 = vadd.f32 %v3292_v58, %v14923_v4  ;;  %v3296_v45 = vmul.f32 %v15052_v13, %v19115_v63  ;;  %v3297_v6 = vmul.f32 %v15052_v13, %v19116_v60  ;;  %v19119_v56 = vld [vmem:[#allocation284_spill] sm:$0xff]  ;;  %v19120_v30 = vld [vmem:[#allocation27_spill] sm:$0xff]  ;;  %v4449_v58 = vld [vmem:[#allocation2 + $0x13a] sm:$0xff] }
 0x3f5   :  { %19109 = vst [vmem:[#allocation152_spill] sm:$0xff] %v15260_v26  ;;  %19110 = vst [vmem:[#allocation57_spill] sm:$0xff] %v15263_v32  ;;  %4589 = vperm.xlu1 %11990, %v4446_v3   ;;  %v15281_v9 = vadd.f32 %v3293_v51, %v14932_v12  ;;  %v3298_v44 = vmul.f32 %v15052_v13, %v19118_v8  ;;  %v3299_v35 = vmul.f32 %v15052_v13, %v19119_v56  ;;  %v19123_v48 = vld [vmem:[#allocation99_spill] sm:$0xff]  ;;  %v19124_v51 = vld [vmem:[#allocation102_spill] sm:$0xff]  ;;  %v3988_v8 = vpop.permute.xlu0 %3987 }
 0x3f6   :  { %19111 = vst [vmem:[#allocation153_spill] sm:$0xff] %v15266_v28  ;;  %19113 = vst [vmem:[#allocation154_spill] sm:$0xff] %v15271_v37  ;;  %v3300_v4 = vmul.f32 %v15052_v13, %v19120_v30  ;;  %v15290_v14 = vadd.f32 %v3294_v62, %v14935_v19  ;;  %v3301_v3 = vmul.f32 %v15052_v13, %v19122_v23  ;;  %v15301_v60 = vld [vmem:[%s18222_s1 + $0x6] ss:$0 sm:$0xff]  ;;  %v19125_v56 = vld [vmem:[#allocation127_spill] sm:$0xff] }
 0x3f7   :  { %19114 = vst [vmem:[#allocation59_spill] sm:$0xff] %v15274_v36  ;;  %19117 = vst [vmem:[#allocation60_spill] sm:$0xff] %v15281_v9  ;;  %v3302_v12 = vmul.f32 %v15052_v13, %v19123_v48  ;;  %v3303_v63 = vmul.f32 %v15052_v13, %v19124_v51  ;;  %v15304_v30 = vadd.f32 %v3295_v40, %v19125_v56  ;;  %v19127_v19 = vld [vmem:[#allocation109_spill] sm:$0xff]  ;;  %v19128_v9 = vld [vmem:[#allocation110_spill] sm:$0xff]  ;;  %v15312_v36 = vpop.permute.xlu1 %3480  ;;  %4594 = vperm.xlu0 %11989, %v4447_v15  }
 0x3f8   :  { %19121 = vst [vmem:[#allocation61_spill] sm:$0xff] %v15290_v14  ;;  %v3304_v62 = vmul.f32 %v15052_v13, %v19127_v19  ;;  %v3305_v23 = vmul.f32 %v15052_v13, %v19128_v9  ;;  %v19129_v14 = vld [vmem:[#allocation111_spill] sm:$0xff]  ;;  %v19130_v51 = vld [vmem:[#allocation128_spill] sm:$0xff]  ;;  %v19132_v32 = vld [vmem:[#allocation129_spill] sm:$0xff] }
 0x3f9   :  { %19126 = vst [vmem:[#allocation63_spill] sm:$0xff] %v15304_v30  ;;  %v3306_v48 = vmul.f32 %v15052_v13, %v19129_v14  ;;  %v15315_v37 = vadd.f32 %v3296_v45, %v19130_v51  ;;  %v15318_v28 = vadd.f32 %v3297_v6, %v19132_v32  ;;  %v19134_v40 = vld [vmem:[#allocation112_spill] sm:$0xff]  ;;  %v19135_v30 = vld [vmem:[#allocation119_spill] sm:$0xff]  ;;  %v15327_v9 = vld [vmem:[%s18222_s1 + $0x7] ss:$0 sm:$0xff]  ;;  %4604 = vperm.xlu1 %11990, %v4449_v58  }
 0x3fa   :  { %v3307_v56 = vmul.f32 %v15052_v13, %v19134_v40  ;;  %v3308_v19 = vmul.f32 %v15052_v13, %v19135_v30  ;;  %v3931_v14 = vld [vmem:[#allocation2 + $0x129] sm:$0xff]  ;;  %v19137_v45 = vld [vmem:[#allocation132_spill] sm:$0xff]  ;;  %v19139_v32 = vld [vmem:[#allocation133_spill] sm:$0xff]  ;;  %v3782_v40 = vmul.f32 %v15301_v60, %v3461_v34  ;;  %v15340_v30 = vadd.f32 %v3301_v3, %v14984_v46 }
 0x3fb   :  { %19131 = vst [vmem:[#allocation64_spill] sm:$0xff] %v15315_v37  ;;  %19133 = vst [vmem:[#allocation65_spill] sm:$0xff] %v15318_v28  ;;  %v19136_v15 = vld [vmem:[#allocation130_spill] sm:$0xff]  ;;  %v15333_v51 = vadd.f32 %v3299_v35, %v19137_v45  ;;  %v15336_v6 = vadd.f32 %v3300_v4, %v19139_v32  ;;  %v15343_v37 = vadd.f32 %v3302_v12, %v14987_v11  ;;  %v19143_v58 = vld [vmem:[#allocation135_spill] sm:$0xff]  ;;  %v15361_v11 = vpop.permute.xlu1 %3475  ;;  %4082 = vperm.xlu0 %11989, %v3931_v14  }
 0x3fc   :  { %v15330_v26 = vadd.f32 %v3298_v44, %v19136_v15  ;;  %v3933_v28 = vld [vmem:[#allocation2 + $0x141] sm:$0xff]  ;;  %19141 = vst [vmem:[#allocation155_spill] sm:$0xff] %v15340_v30  ;;  %v15346_v33 = vadd.f32 %v3303_v63, %v19143_v58  ;;  %v3784_v44 = vmul.f32 %v15301_v60, %v3471_v25  ;;  %v15349_v15 = vpop.permute.xlu0 %3490  ;;  %v15352_v35 = vadd.f32 %v3304_v62, %v14995_v22  ;;  %v19150_v25 = vld [vmem:[#allocation39_spill] sm:$0xff] }
 0x3fd   :  { %19138 = vst [vmem:[#allocation66_spill] sm:$0xff] %v15333_v51  ;;  %19140 = vst [vmem:[#allocation67_spill] sm:$0xff] %v15336_v6  ;;  %v15355_v4 = vadd.f32 %v3305_v23, %v14998_v43  ;;  %v15358_v34 = vadd.f32 %v3306_v48, %v15001_v16  ;;  %v4299_v46 = vmul.f32 %v15327_v9, %v3978_v17  ;;  %v19148_v3 = vld [vmem:[#allocation38_spill] sm:$0xff]  ;;  %4092 = vperm.xlu1 %11990, %v3933_v28   ;;  %v3934_v17 = vld [vmem:[#allocation2 + $0x151] sm:$0xff] }
 0x3fe   :  { %19142 = vst [vmem:[#allocation156_spill] sm:$0xff] %v15343_v37  ;;  %19144 = vst [vmem:[#allocation157_spill] sm:$0xff] %v15346_v33  ;;  %v15364_v12 = vadd.f32 %v3307_v56, %v19148_v3  ;;  %v15367_v63 = vadd.f32 %v3308_v19, %v19150_v25  ;;  %v19152_v45 = vld [vmem:[#allocation122_spill] sm:$0xff]  ;;  %v4301_v43 = vmul.f32 %v15327_v9, %v3988_v8  ;;  %v19154_v48 = vld [vmem:[#allocation225_spill] sm:$0xff] }
 0x3ff   :  { %19145 = vst [vmem:[#allocation68_spill] sm:$0xff] %v15352_v35  ;;  %19146 = vst [vmem:[#allocation158_spill] sm:$0xff] %v15355_v4  ;;  %v3309_v22 = vmul.f32 %v15052_v13, %v19152_v45  ;;  %v15375_v16 = vld [vmem:[%s18222_s1 + $0x8] ss:$0 sm:$0xff]  ;;  %v3311_v56 = vmul.f32 %v15052_v13, %v19154_v48  ;;  %v19155_v19 = vld [vmem:[#allocation123_spill] sm:$0xff]  ;;  %v3846_v32 = vadd.f32 %v3782_v40, %v15118_v5  ;;  %v4505_v35 = vpop.permute.xlu1 %4504  ;;  %4097 = vperm.xlu0 %11989, %v3934_v17  }
 0x400   :  { %19147 = vst [vmem:[#allocation159_spill] sm:$0xff] %v15358_v34  ;;  %19149 = vst [vmem:[#allocation160_spill] sm:$0xff] %v15364_v12  ;;  %v19153_v62 = vld [vmem:[#allocation222_spill] sm:$0xff]  ;;  %v3312_v14 = vmul.f32 %v15052_v13, %v19155_v19  ;;  %v19156_v8 = vld [vmem:[#allocation124_spill] sm:$0xff]  ;;  %v4495_v12 = vpop.permute.xlu0 %4494 }
 0x401   :  { %19151 = vst [vmem:[#allocation161_spill] sm:$0xff] %v15367_v63  ;;  %v3310_v23 = vmul.f32 %v15052_v13, %v19153_v62  ;;  %v3936_v58 = vld [vmem:[#allocation2 + $0x169] sm:$0xff]  ;;  %v3313_v28 = vmul.f32 %v15052_v13, %v19156_v8  ;;  %v19157_v3 = vld [vmem:[#allocation125_spill] sm:$0xff]  ;;  %v3848_v62 = vadd.f32 %v3784_v44, %v15144_v21  ;;  %v4363_v5 = vadd.f32 %v4299_v46, %v3846_v32  ;;  %v19164_v46 = vld [vmem:[#allocation40_spill] sm:$0xff] }
 0x402   :  { %v3314_v25 = vmul.f32 %v15052_v13, %v19157_v3  ;;  %v19158_v45 = vld [vmem:[#allocation126_spill] sm:$0xff]  ;;  %v19159_v4 = vld [vmem:[#allocation131_spill] sm:$0xff]  ;;  %v4816_v40 = vmul.f32 %v15375_v16, %v4495_v12  ;;  %v15397_v8 = vadd.f32 %v3309_v22, %v15020_v41  ;;  %v19162_v3 = vld [vmem:[#allocation136_spill] sm:$0xff]  ;;  %v4818_v44 = vmul.f32 %v15375_v16, %v4505_v35  ;;  %4107 = vperm.xlu1 %11990, %v3936_v58  }
 0x403   :  { %v3315_v63 = vmul.f32 %v15052_v13, %v19158_v45  ;;  %v3316_v48 = vmul.f32 %v15052_v13, %v19159_v4  ;;  %v19160_v34 = vld [vmem:[#allocation134_spill] sm:$0xff]  ;;  %v3318_v45 = vmul.f32 %v15052_v13, %v19162_v3  ;;  %v4365_v33 = vadd.f32 %v4301_v43, %v3848_v62  ;;  %v15404_v21 = vld [vmem:[%s18223_s2] ss:$0 sm:$0xff]  ;;  %v3418_v4 = vld [vmem:[#allocation2 + $0x158] sm:$0xff] }
 0x404   :  { %v3317_v19 = vmul.f32 %v15052_v13, %v19160_v34  ;;  %19161 = vst [vmem:[#allocation162_spill] sm:$0xff] %v15397_v8  ;;  %v15408_v34 = vadd.f32 %v3310_v23, %v15023_v54  ;;  %v15411_v12 = vadd.f32 %v3311_v56, %v19164_v46  ;;  %v19166_v41 = vld [vmem:[#allocation41_spill] sm:$0xff]  ;;  %v4880_v17 = vadd.f32 %v4816_v40, %v4363_v5  ;;  %v3420_v43 = vld [vmem:[#allocation2 + $0x170] sm:$0xff]  ;;  %v19168_v32 = vld [vmem:[#allocation42_spill] sm:$0xff]  ;;  %v15425_v54 = vpop.permute.xlu0 %3997  ;;  %v15436_v46 = vpop.permute.xlu1 %4007 }
 0x405   :  { %v15414_v22 = vadd.f32 %v3312_v14, %v19166_v41  ;;  %v15417_v62 = vadd.f32 %v3313_v28, %v19168_v32  ;;  %v19170_v3 = vld [vmem:[#allocation138_spill] sm:$0xff]  ;;  %v19172_v35 = vld [vmem:[#allocation45_spill] sm:$0xff]  ;;  %v4882_v30 = vadd.f32 %v4818_v44, %v4365_v33  ;;  %3585 = vperm.xlu0 %11989, %v3418_v4   ;;  %v19179_v33 = vld [vmem:[#allocation44_spill] sm:$0xff] }
 0x406   :  { %19163 = vst [vmem:[#allocation163_spill] sm:$0xff] %v15408_v34  ;;  %19165 = vst [vmem:[#allocation164_spill] sm:$0xff] %v15411_v12  ;;  %v15420_v8 = vadd.f32 %v3314_v25, %v19170_v3  ;;  %v15423_v58 = vadd.f32 %v3315_v63, %v19172_v35  ;;  %v19174_v23 = vld [vmem:[#allocation46_spill] sm:$0xff]  ;;  %v15431_v14 = vadd.f32 %v3317_v19, %v15075_v1  ;;  %v19177_v5 = vld [vmem:[#allocation137_spill] sm:$0xff]  ;;  %3595 = vperm.xlu1 %11990, %v3420_v43  }
 0x407   :  { %19167 = vst [vmem:[#allocation165_spill] sm:$0xff] %v15414_v22  ;;  %19169 = vst [vmem:[#allocation166_spill] sm:$0xff] %v15417_v62  ;;  %v15428_v56 = vadd.f32 %v3316_v48, %v19174_v23  ;;  %v3319_v40 = vmul.f32 %v15052_v13, %v19177_v5  ;;  %v4953_v28 = vadd.f32 %v15404_v21, %v4880_v17  ;;  %v19180_v44 = vld [vmem:[#allocation47_spill] sm:$0xff]  ;;  %v15448_v1 = vld [vmem:[%s18224_s3] ss:$0 sm:$0xff] }
 0x408   :  { %19171 = vst [vmem:[#allocation167_spill] sm:$0xff] %v15420_v8  ;;  %19173 = vst [vmem:[#allocation168_spill] sm:$0xff] %v15423_v58  ;;  %v15439_v63 = vadd.f32 %v3318_v45, %v15078_v50  ;;  %v3320_v25 = vmul.f32 %v15052_v13, %v19179_v33  ;;  %v3321_v48 = vmul.f32 %v15052_v13, %v19180_v44  ;;  %v3421_v41 = vld [vmem:[#allocation2 + $0x180] sm:$0xff]  ;;  %v3423_v23 = vld [vmem:[#allocation2 + $0x198] sm:$0xff] }
 0x409   :  { %19175 = vst [vmem:[#allocation169_spill] sm:$0xff] %v15428_v56  ;;  %19176 = vst [vmem:[#allocation170_spill] sm:$0xff] %v15431_v14  ;;  %v4955_v19 = vadd.f32 %v15404_v21, %v4882_v30  ;;  %v19181_v17 = vld [vmem:[#allocation53_spill] sm:$0xff]  ;;  %v5017_v35 = vmax.f32 %v4953_v28, 0.0  ;;  %v3325_v5 = vmul.f32 %v15052_v13, %v15141_v0  ;;  %v3326_v33 = vmul.f32 %v15052_v13, %v15174_v7  ;;  %v15476_v14 = vpop.permute.xlu1 %3992 }
 0x40a   :  { %19178 = vst [vmem:[#allocation171_spill] sm:$0xff] %v15439_v63  ;;  %v3322_v4 = vmul.f32 %v15052_v13, %v19181_v17  ;;  %v19182_v50 = vld [vmem:[#allocation141_spill] sm:$0xff]  ;;  %v3327_v30 = vmul.f32 %v15052_v13, %v15184_v47  ;;  %v3983_v17 = vpop.permute.xlu0 %3982  ;;  %v3783_v28 = vmul.f32 %v15301_v60, %v15226_v57  ;;  %v3786_v0 = vmul.f32 %v15301_v60, %v15312_v36  ;;  %v19188_v63 = vld [vmem:[#allocation51_spill] sm:$0xff] }
 0x40b   :  { %v3323_v45 = vmul.f32 %v15052_v13, %v19182_v50  ;;  %v19183_v32 = vld [vmem:[#allocation145_spill] sm:$0xff]  ;;  %v5019_v44 = vmax.f32 %v4955_v19, 0.0  ;;  %v5087_v7 = vmul.f32 %v15448_v1, %v5017_v35  ;;  %3600 = vperm.xlu0 %11989, %v3421_v41   ;;  %v15482_v19 = vadd.f32 %v3321_v48, %v19188_v63  ;;  %3610 = vperm.xlu1 %11990, %v3423_v23   ;;  %v4448_v57 = vld [vmem:[#allocation2 + $0x12a] sm:$0xff]  ;;  %v19194_v41 = vld [vmem:[#allocation140_spill] sm:$0xff] }
 0x40c   :  { %v3324_v3 = vmul.f32 %v15052_v13, %v19183_v32  ;;  %v15466_v43 = vld [vmem:[%s18225_s4] ss:$0 sm:$0xff]  ;;  %v19186_v13 = vld [vmem:[#allocation50_spill] sm:$0xff]  ;;  %v19192_v35 = vld [vmem:[#allocation139_spill] sm:$0xff]  ;;  %v4300_v8 = vmul.f32 %v15327_v9, %v3983_v17 }
 0x40d   :  { %v19184_v50 = vld [vmem:[#allocation49_spill] sm:$0xff]  ;;  %v15479_v47 = vadd.f32 %v3320_v25, %v19186_v13  ;;  %19189 = vst [vmem:[#allocation174_spill] sm:$0xff] %v15482_v19  ;;  %v15491_v56 = vadd.f32 %v3323_v45, %v19192_v35  ;;  %v5157_v25 = vadd.f32 %v15466_v43, %v5087_v7  ;;  %v4450_v63 = vld [vmem:[#allocation2 + $0x142] sm:$0xff]  ;;  %v19200_v23 = vld [vmem:[#allocation143_spill] sm:$0xff] }
 0x40e   :  { %v15469_v32 = vadd.f32 %v3319_v40, %v19184_v50  ;;  %v3788_v40 = vmul.f32 %v15301_v60, %v15349_v15  ;;  %v5089_v50 = vmul.f32 %v15448_v1, %v5019_v44  ;;  %v15494_v58 = vadd.f32 %v3324_v3, %v19194_v41  ;;  %v19196_v48 = vld [vmem:[#allocation54_spill] sm:$0xff]  ;;  %v19202_v45 = vld [vmem:[#allocation144_spill] sm:$0xff] }
 0x40f   :  { %19187 = vst [vmem:[#allocation173_spill] sm:$0xff] %v15479_v47  ;;  %19193 = vst [vmem:[#allocation176_spill] sm:$0xff] %v15491_v56  ;;  %v15498_v13 = vadd.f32 %v3325_v5, %v19196_v48  ;;  %v19198_v15 = vld [vmem:[#allocation142_spill] sm:$0xff]  ;;  %v15504_v44 = vadd.f32 %v3327_v30, %v19200_v23  ;;  %v3847_v35 = vadd.f32 %v3783_v28, %v19202_v45  ;;  %4599 = vperm.xlu0 %11989, %v4448_v57   ;;  %v4451_v48 = vld [vmem:[#allocation2 + $0x152] sm:$0xff] }
 0x410   :  { %19185 = vst [vmem:[#allocation172_spill] sm:$0xff] %v15469_v32  ;;  %v19190_v32 = vld [vmem:[#allocation52_spill] sm:$0xff]  ;;  %19195 = vst [vmem:[#allocation177_spill] sm:$0xff] %v15494_v58  ;;  %v15501_v19 = vadd.f32 %v3326_v33, %v19198_v15  ;;  %v3850_v3 = vadd.f32 %v3786_v0, %v15156_v39  ;;  %v5285_v41 = vcombine.high %v5157_v25, %v5157_v25  ;;  %v15512_v58 = vpop.permute.xlu1 %3495  ;;  %4609 = vperm.xlu1 %11990, %v4450_v63  }
 0x411   :  { %v15488_v36 = vadd.f32 %v3322_v4, %v19190_v32  ;;  %19197 = vst [vmem:[#allocation178_spill] sm:$0xff] %v15498_v13  ;;  %19201 = vst [vmem:[#allocation180_spill] sm:$0xff] %v15504_v44  ;;  %v5159_v4 = vadd.f32 %v15466_v43, %v5089_v50  ;;  %v15507_v32 = vpop.permute.xlu0 %3485  ;;  %v5292_v7 = vrot.slane %v5157_v25, %v15186_v52  ;;  %v4453_v25 = vld [vmem:[#allocation2 + $0x16a] sm:$0xff] }
 0x412   :  { %19199 = vst [vmem:[#allocation179_spill] sm:$0xff] %v15501_v19  ;;  %v3852_v5 = vadd.f32 %v3788_v40, %v15164_v53  ;;  %v3785_v33 = vmul.f32 %v15301_v60, %v15361_v11  ;;  %v5299_v28 = vrot.slane %v5285_v41, %v15186_v52  ;;  %v4303_v0 = vmul.f32 %v15327_v9, %v15425_v54 }
 0x413   :  { %19191 = vst [vmem:[#allocation175_spill] sm:$0xff] %v15488_v36  ;;  %v5319_v30 = vcombine.high %v5159_v4, %v5159_v4  ;;  %v5326_v50 = vrot.slane %v5159_v4, %v15186_v52  ;;  %v5300_v15 = vcombine.high %v5292_v7, %v5292_v7  ;;  %v11439_v39 = vrot.slane %v5292_v7, 9  ;;  %4614 = vperm.xlu0 %11989, %v4451_v48   ;;  %v3935_v36 = vld [vmem:[#allocation2 + $0x159] sm:$0xff] }
 0x414   :  { %v4305_v11 = vmul.f32 %v15327_v9, %v15436_v46  ;;  %v5301_v4 = vcombine.high %v5299_v28, %v5299_v28  ;;  %v11441_v45 = vrot.slane %v5299_v28, 9  ;;  %v3511_v41 = vpop.permute.xlu1 %3510  ;;  %4624 = vperm.xlu1 %11990, %v4453_v25   ;;  %v3937_v46 = vld [vmem:[#allocation2 + $0x171] sm:$0xff]  ;;  %v4367_v37 = vadd.f32 %v4303_v0, %v3850_v3  ;;  %v3940_v0 = vld [vmem:[#allocation2 + $0x199] sm:$0xff] }
 0x415   :  { %v5333_v57 = vrot.slane %v5319_v30, %v15186_v52  ;;  %v5334_v53 = vcombine.high %v5326_v50, %v5326_v50  ;;  %v11447_v40 = vrot.slane %v5326_v50, 9  ;;  %v3501_v23 = vpop.permute.xlu0 %3500  ;;  %v11440_v63 = vrot.slane %v5300_v15, 9 }
 0x416   :  { %v7397_v44 = vmax.f32 %v5292_v7, %v11439_v39  ;;  %v11442_v30 = vrot.slane %v5301_v4, 9  ;;  %v7399_v62 = vmax.f32 %v5299_v28, %v11441_v45  ;;  %v4302_v48 = vmul.f32 %v15327_v9, %v15476_v14  ;;  %v3424_v45 = vld [vmem:[#allocation2 + $0x1a0] sm:$0xff] }
 0x417   :  { %v5335_v13 = vcombine.high %v5333_v57, %v5333_v57  ;;  %v11448_v19 = vrot.slane %v5334_v53, 9  ;;  %v11449_v56 = vrot.slane %v5333_v57, 9  ;;  %v7405_v54 = vmax.f32 %v5326_v50, %v11447_v40  ;;  %4102 = vperm.xlu0 %11989, %v3935_v36  }
 0x418   :  { %v7398_v47 = vmax.f32 %v5300_v15, %v11440_v63  ;;  %v7400_v39 = vmax.f32 %v5301_v4, %v11442_v30  ;;  %v4525_v25 = vpop.permute.xlu1 %4524  ;;  %v3849_v28 = vadd.f32 %v3785_v33, %v15153_v31  ;;  %4112 = vperm.xlu1 %11990, %v3937_v46  }
 0x419   :  { %v11450_v22 = vrot.slane %v5335_v13, 9  ;;  %v7406_v12 = vmax.f32 %v5334_v53, %v11448_v19  ;;  %v7407_v34 = vmax.f32 %v5333_v57, %v11449_v56  ;;  %v7653_v51 = vmax.f32 %v7397_v44, %v7405_v54  ;;  %v4515_v7 = vpop.permute.xlu0 %4514  ;;  %v3938_v19 = vld [vmem:[#allocation2 + $0x181] sm:$0xff] }
 0x41a   :  { %v4820_v50 = vmul.f32 %v15375_v16, %v4515_v7  ;;  %v4369_v56 = vadd.f32 %v4305_v11, %v3852_v5  ;;  %v4364_v44 = vadd.f32 %v4300_v8, %v3847_v35  ;;  %v4822_v3 = vmul.f32 %v15375_v16, %v4525_v25 }
 0x41b   :  { %v7408_v15 = vmax.f32 %v5335_v13, %v11450_v22  ;;  %v7654_v17 = vmax.f32 %v7398_v47, %v7406_v12  ;;  %v7655_v40 = vmax.f32 %v7399_v62, %v7407_v34  ;;  %v7954_v14 = vrot.slane %v7653_v51, %v15235_v61  ;;  %4117 = vperm.xlu0 %11989, %v3938_v19   ;;  %v3422_v13 = vld [vmem:[#allocation2 + $0x188] sm:$0xff] }
 0x41c   :  { %v4884_v57 = vadd.f32 %v4820_v50, %v4367_v37  ;;  %v4366_v31 = vadd.f32 %v4302_v48, %v3849_v28  ;;  %v4886_v34 = vadd.f32 %v4822_v3, %v4369_v56  ;;  %v4510_v62 = vpop.permute.xlu1 %4509  ;;  %v3787_v8 = vmul.f32 %v15301_v60, %v15507_v32  ;;  %4127 = vperm.xlu1 %11990, %v3940_v0  }
 0x41d   :  { %v7656_v53 = vmax.f32 %v7400_v39, %v7408_v15  ;;  %v7958_v4 = vrot.slane %v7654_v17, %v15235_v61  ;;  %v7962_v36 = vrot.slane %v7655_v40, %v15235_v61  ;;  %v4500_v63 = vpop.permute.xlu0 %4499  ;;  %v3789_v51 = vmul.f32 %v15301_v60, %v15512_v58 }
 0x41e   :  { %v4957_v12 = vadd.f32 %v15404_v21, %v4884_v57  ;;  %v4817_v22 = vmul.f32 %v15375_v16, %v4500_v63  ;;  %v4819_v47 = vmul.f32 %v15375_v16, %v4510_v62  ;;  %v3790_v35 = vmul.f32 %v15301_v60, %v3501_v23  ;;  %v4454_v57 = vld [vmem:[#allocation2 + $0x172] sm:$0xff] }
 0x41f   :  { %v8464_v37 = vsel %vm8463_vm4, %v7958_v4, %v7954_v14  ;;  %v4959_v33 = vadd.f32 %v15404_v21, %v4886_v34  ;;  %v7966_v54 = vrot.slane %v7656_v53, %v15235_v61  ;;  %v3792_v32 = vmul.f32 %v15301_v60, %v3511_v41  ;;  %3605 = vperm.xlu0 %11989, %v3422_v13   ;;  %v4452_v41 = vld [vmem:[#allocation2 + $0x15a] sm:$0xff] }
 0x420   :  { %v5021_v5 = vmax.f32 %v4957_v12, 0.0  ;;  %v4881_v11 = vadd.f32 %v4817_v22, %v4364_v44  ;;  %v8466_v30 = vsel %vm8465_vm5, %v7962_v36, %v8464_v37  ;;  %v4883_v46 = vadd.f32 %v4819_v47, %v4366_v31  ;;  %v4013_v50 = vpop.permute.xlu1 %4012  ;;  %3615 = vperm.xlu1 %11990, %v3424_v45   ;;  %v4455_v22 = vld [vmem:[#allocation2 + $0x182] sm:$0xff]  ;;  %v4457_v47 = vld [vmem:[#allocation2 + $0x19a] sm:$0xff] }
 0x421   :  { %v4003_v7 = vpop.permute.xlu0 %4002  ;;  %v5023_v39 = vmax.f32 %v4959_v33, 0.0  ;;  %v3851_v25 = vadd.f32 %v3787_v8, %v15159_v20  ;;  %v3853_v28 = vadd.f32 %v3789_v51, %v15167_v2  ;;  %v4306_v17 = vmul.f32 %v15327_v9, %v4013_v50 }
 0x422   :  { %v5091_v58 = vmul.f32 %v15448_v1, %v5021_v5  ;;  %v4954_v48 = vadd.f32 %v15404_v21, %v4881_v11  ;;  %v4304_v23 = vmul.f32 %v15327_v9, %v4003_v7  ;;  %v4956_v15 = vadd.f32 %v15404_v21, %v4883_v46 }
 0x423   :  { %v3854_v40 = vadd.f32 %v3790_v35, %v15170_v59  ;;  %v5093_v56 = vmul.f32 %v15448_v1, %v5023_v39  ;;  %v15557_v3 = vadd.f32 %v3792_v32, %v15180_v29  ;;  %v15560_v2 = vsel %vm8467_vm6, %v7966_v54, %v8466_v30  ;;  %4619 = vperm.xlu0 %11989, %v4452_v41  }
 0x424   :  { %v5161_v19 = vadd.f32 %v15466_v43, %v5091_v58  ;;  %v5018_v44 = vmax.f32 %v4954_v48, 0.0  ;;  %v5020_v20 = vmax.f32 %v4956_v15, 0.0  ;;  %v15562_v0 = vadd.f32 %v4304_v23, %v3851_v25  ;;  %v4028_v63 = vpop.permute.xlu1 %4027  ;;  %4629 = vperm.xlu1 %11990, %v4454_v57   ;;  %v3425_v23 = vld [vmem:[#allocation2 + $0x1e0] sm:$0xff] }
 0x425   :  { %v4018_v53 = vpop.permute.xlu0 %4017  ;;  %v5163_v59 = vadd.f32 %v15466_v43, %v5093_v56  ;;  %v15568_v29 = vadd.f32 %v4306_v17, %v3853_v28  ;;  %v15572_v34 = vmul.f32 %v15327_v9, %v4028_v63  ;;  %v3427_v17 = vld [vmem:[#allocation2 + $0x1f8] sm:$0xff] }
 0x426   :  { %v5353_v14 = vcombine.high %v5161_v19, %v5161_v19  ;;  %v5360_v4 = vrot.slane %v5161_v19, %v15186_v52  ;;  %v5088_v36 = vmul.f32 %v15448_v1, %v5018_v44  ;;  %v5090_v31 = vmul.f32 %v15448_v1, %v5020_v20 }
 0x427   :  { %v4307_v12 = vmul.f32 %v15327_v9, %v4018_v53  ;;  %v5387_v51 = vcombine.high %v5163_v59, %v5163_v59  ;;  %v5394_v13 = vrot.slane %v5163_v59, %v15186_v52  ;;  %4634 = vperm.xlu0 %11989, %v4455_v22  }
 0x428   :  { %v5367_v62 = vrot.slane %v5353_v14, %v15186_v52  ;;  %v5368_v37 = vcombine.high %v5360_v4, %v5360_v4  ;;  %v11455_v8 = vrot.slane %v5360_v4, 9  ;;  %v5158_v35 = vadd.f32 %v15466_v43, %v5088_v36  ;;  %v15582_v46 = vpop.permute.xlu1 %3515  ;;  %4644 = vperm.xlu1 %11990, %v4457_v47  }
 0x429   :  { %v15578_v5 = vadd.f32 %v15466_v43, %v5090_v31  ;;  %v15580_v33 = vadd.f32 %v4307_v12, %v3854_v40  ;;  %v3506_v11 = vpop.permute.xlu0 %3505  ;;  %v5401_v7 = vrot.slane %v5387_v51, %v15186_v52  ;;  %v5402_v58 = vcombine.high %v5394_v13, %v5394_v13  ;;  %v3939_v12 = vld [vmem:[#allocation2 + $0x189] sm:$0xff]  ;;  %v3941_v51 = vld [vmem:[#allocation2 + $0x1a1] sm:$0xff] }
 0x42a   :  { %v5369_v45 = vcombine.high %v5367_v62, %v5367_v62  ;;  %v11456_v54 = vrot.slane %v5368_v37, 9  ;;  %v11457_v30 = vrot.slane %v5367_v62, 9  ;;  %v7413_v32 = vmax.f32 %v5360_v4, %v11455_v8 }
 0x42b   :  { %v11463_v39 = vrot.slane %v5394_v13, 9  ;;  %v5302_v48 = vcombine.high %v5158_v35, %v5158_v35  ;;  %v5309_v15 = vrot.slane %v5158_v35, %v15186_v52  ;;  %v5403_v41 = vcombine.high %v5401_v7, %v5401_v7  ;;  %3620 = vperm.xlu0 %11989, %v3425_v23  }
 0x42c   :  { %v11458_v50 = vrot.slane %v5369_v45, 9  ;;  %v7414_v25 = vmax.f32 %v5368_v37, %v11456_v54  ;;  %v7415_v28 = vmax.f32 %v5367_v62, %v11457_v30  ;;  %v11464_v40 = vrot.slane %v5402_v58, 9  ;;  %v3531_v4 = vpop.permute.xlu1 %3530  ;;  %3630 = vperm.xlu1 %11990, %v3427_v17  }
 0x42d   :  { %v11465_v19 = vrot.slane %v5401_v7, 9  ;;  %v7421_v56 = vmax.f32 %v5394_v13, %v11463_v39  ;;  %v3521_v44 = vpop.permute.xlu0 %3520  ;;  %v5316_v20 = vrot.slane %v5302_v48, %v15186_v52  ;;  %v5317_v53 = vcombine.high %v5309_v15, %v5309_v15 }
 0x42e   :  { %v7416_v57 = vmax.f32 %v5369_v45, %v11458_v50  ;;  %v11443_v14 = vrot.slane %v5309_v15, 9  ;;  %v11466_v59 = vrot.slane %v5403_v41, 9  ;;  %v7422_v36 = vmax.f32 %v5402_v58, %v11464_v40 }
 0x42f   :  { %v7423_v63 = vmax.f32 %v5401_v7, %v11465_v19  ;;  %v7661_v31 = vmax.f32 %v7413_v32, %v7421_v56  ;;  %v5318_v22 = vcombine.high %v5316_v20, %v5316_v20  ;;  %v11444_v62 = vrot.slane %v5317_v53, 9  ;;  %4122 = vperm.xlu0 %11989, %v3939_v12   ;;  %v3944_v19 = vld [vmem:[#allocation2 + $0x1f9] sm:$0xff] }
 0x430   :  { %v11445_v37 = vrot.slane %v5316_v20, 9  ;;  %v15587_v8 = vmax.f32 %v5309_v15, %v11443_v14  ;;  %v7424_v47 = vmax.f32 %v5403_v41, %v11466_v59  ;;  %v7662_v13 = vmax.f32 %v7414_v25, %v7422_v36  ;;  %v4530_v7 = vpop.permute.xlu1 %4529  ;;  %4132 = vperm.xlu1 %11990, %v3941_v51  }
 0x431   :  { %v7663_v35 = vmax.f32 %v7415_v28, %v7423_v63  ;;  %v7986_v45 = vrot.slane %v7661_v31, %v15235_v61  ;;  %v4520_v54 = vpop.permute.xlu0 %4519  ;;  %v11446_v30 = vrot.slane %v5318_v22, 9  ;;  %v15590_v39 = vmax.f32 %v5317_v53, %v11444_v62  ;;  %v3942_v28 = vld [vmem:[#allocation2 + $0x1e1] sm:$0xff] }
 0x432   :  { %v7403_v58 = vmax.f32 %v5316_v20, %v11445_v37  ;;  %v5336_v32 = vcombine.high %v15578_v5, %v15578_v5  ;;  %v7664_v48 = vmax.f32 %v7416_v57, %v7424_v47  ;;  %v7990_v23 = vrot.slane %v7662_v13, %v15235_v61  ;;  %v3431_v13 = vld [vmem:[#allocation2 + $0x228] sm:$0xff] }
 0x433   :  { %v7994_v50 = vrot.slane %v7663_v35, %v15235_v61  ;;  %v5343_v25 = vrot.slane %v15578_v5, %v15186_v52  ;;  %v7404_v15 = vmax.f32 %v5318_v22, %v11446_v30  ;;  %v4373_v41 = vadd.f32 %v15572_v34, %v15557_v3  ;;  %4137 = vperm.xlu0 %11989, %v3942_v28   ;;  %v3429_v22 = vld [vmem:[#allocation2 + $0x210] sm:$0xff] }
 0x434   :  { %v5350_v17 = vrot.slane %v5336_v32, %v15186_v52  ;;  %v3791_v40 = vmul.f32 %v15301_v60, %v3506_v11  ;;  %v7998_v56 = vrot.slane %v7664_v48, %v15235_v61  ;;  %v8477_v57 = vsel %vm8463_vm4, %v7990_v23, %v7986_v45  ;;  %v4545_v31 = vpop.permute.xlu1 %4544  ;;  %4147 = vperm.xlu1 %11990, %v3944_v19  }
 0x435   :  { %v5351_v20 = vcombine.high %v5343_v25, %v5343_v25  ;;  %v11451_v53 = vrot.slane %v5343_v25, 9  ;;  %v4535_v5 = vpop.permute.xlu0 %4534  ;;  %v8478_v14 = vsel %vm8465_vm5, %v7994_v50, %v8477_v57  ;;  %v3793_v11 = vmul.f32 %v15301_v60, %v15582_v46 }
 0x436   :  { %v5352_v59 = vcombine.high %v5350_v17, %v5350_v17  ;;  %v11453_v36 = vrot.slane %v5350_v17, 9  ;;  %v3855_v63 = vadd.f32 %v3791_v40, %v15177_v38  ;;  %v3794_v12 = vmul.f32 %v15301_v60, %v3521_v44  ;;  %v19203_v44 = vld [vmem:[#allocation147_spill] sm:$0xff]  ;;  %v4458_v40 = vld [vmem:[#allocation2 + $0x1a2] sm:$0xff] }
 0x437   :  { %v11452_v3 = vrot.slane %v5351_v20, 9  ;;  %v7409_v34 = vmax.f32 %v5343_v25, %v11451_v53  ;;  %v3796_v51 = vmul.f32 %v15301_v60, %v3531_v4  ;;  %v4821_v47 = vmul.f32 %v15375_v16, %v4520_v54  ;;  %3640 = vperm.xlu0 %11989, %v3429_v22  }
 0x438   :  { %v11454_v62 = vrot.slane %v5352_v59, 9  ;;  %v7411_v37 = vmax.f32 %v5350_v17, %v11453_v36  ;;  %v3857_v45 = vadd.f32 %v3793_v11, %v15189_v27  ;;  %v3858_v30 = vadd.f32 %v3794_v12, %v15192_v49  ;;  %v4033_v25 = vpop.permute.xlu1 %4032  ;;  %3650 = vperm.xlu1 %11990, %v3431_v13   ;;  %v4456_v27 = vld [vmem:[#allocation2 + $0x18a] sm:$0xff]  ;;  %v3428_v12 = vld [vmem:[#allocation2 + $0x200] sm:$0xff] }
 0x439   :  { %v7410_v35 = vmax.f32 %v5351_v20, %v11452_v3  ;;  %v7657_v38 = vmax.f32 %v15587_v8, %v7409_v34  ;;  %v4023_v32 = vpop.permute.xlu0 %4022  ;;  %v3860_v23 = vadd.f32 %v3796_v51, %v19203_v44  ;;  %v4885_v50 = vadd.f32 %v4821_v47, %v15562_v0  ;;  %v4459_v44 = vld [vmem:[#allocation2 + $0x1e2] sm:$0xff] }
 0x43a   :  { %v7412_v46 = vmax.f32 %v5352_v59, %v11454_v62  ;;  %v7659_v48 = vmax.f32 %v7403_v58, %v7411_v37  ;;  %v4823_v28 = vmul.f32 %v15375_v16, %v4530_v7  ;;  %v15620_v8 = vsel %vm8467_vm6, %v7998_v56, %v8478_v14 }
 0x43b   :  { %v7658_v4 = vmax.f32 %v15590_v39, %v7410_v35  ;;  %v7970_v54 = vrot.slane %v7657_v38, %v15235_v61  ;;  %v4958_v17 = vadd.f32 %v15404_v21, %v4885_v50  ;;  %v4824_v0 = vmul.f32 %v15375_v16, %v4535_v5  ;;  %4639 = vperm.xlu0 %11989, %v4456_v27  }
 0x43c   :  { %v7660_v49 = vmax.f32 %v7404_v15, %v7412_v46  ;;  %v7978_v58 = vrot.slane %v7659_v48, %v15235_v61  ;;  %v4887_v7 = vadd.f32 %v4823_v28, %v15568_v29  ;;  %v4826_v56 = vmul.f32 %v15375_v16, %v4545_v31  ;;  %v4048_v59 = vpop.permute.xlu1 %4047  ;;  %4649 = vperm.xlu1 %11990, %v4458_v40   ;;  %v3426_v29 = vld [vmem:[#allocation2 + $0x1e8] sm:$0xff]  ;;  %v4461_v28 = vld [vmem:[#allocation2 + $0x1fa] sm:$0xff] }
 0x43d   :  { %v7974_v19 = vrot.slane %v7658_v4, %v15235_v61  ;;  %v8470_v39 = vsel %vm8469_vm7, %v7970_v54, %v15560_v2  ;;  %v4038_v57 = vpop.permute.xlu0 %4037  ;;  %v5022_v15 = vmax.f32 %v4958_v17, 0.0  ;;  %v4888_v53 = vadd.f32 %v4824_v0, %v15580_v33 }
 0x43e   :  { %v7982_v20 = vrot.slane %v7660_v49, %v15235_v61  ;;  %v4308_v14 = vmul.f32 %v15327_v9, %v4023_v32  ;;  %v4960_v36 = vadd.f32 %v15404_v21, %v4887_v7  ;;  %v4890_v3 = vadd.f32 %v4826_v56, %v4373_v41 }
 0x43f   :  { %v8472_v5 = vsel %vm8471_vm8, %v7974_v19, %v8470_v39  ;;  %v4310_v2 = vmul.f32 %v15327_v9, %v4033_v25  ;;  %v5092_v34 = vmul.f32 %v15448_v1, %v5022_v15  ;;  %v4961_v11 = vadd.f32 %v15404_v21, %v4888_v53  ;;  %3625 = vperm.xlu0 %11989, %v3426_v29   ;;  %v3946_v53 = vld [vmem:[#allocation2 + $0x211] sm:$0xff] }
 0x440   :  { %v8474_v31 = vsel %vm8473_vm9, %v7978_v58, %v8472_v5  ;;  %v15639_v33 = vadd.f32 %v4308_v14, %v3855_v63  ;;  %v5024_v62 = vmax.f32 %v4960_v36, 0.0  ;;  %v4963_v37 = vadd.f32 %v15404_v21, %v4890_v3  ;;  %v3536_v63 = vpop.permute.xlu1 %3535  ;;  %3635 = vperm.xlu1 %11990, %v3428_v12   ;;  %v19204_v58 = vld [vmem:[#allocation146_spill] sm:$0xff] }
 0x441   :  { %v8476_v22 = vsel %vm8475_vm10, %v7982_v20, %v8474_v31  ;;  %v15643_v51 = vadd.f32 %v4310_v2, %v3857_v45  ;;  %v3526_v41 = vpop.permute.xlu0 %3525  ;;  %v5162_v47 = vadd.f32 %v15466_v43, %v5092_v34  ;;  %v5025_v13 = vmax.f32 %v4961_v11, 0.0  ;;  %v19205_v20 = vld [vmem:[#allocation148_spill] sm:$0xff]  ;;  %v3948_v3 = vld [vmem:[#allocation2 + $0x229] sm:$0xff] }
 0x442   :  { %8599 = vst.msk [vmem:[#allocation3 + $0x11] sm:$0xff] %vm7781_vm2, %v8476_v22  ;;  %v4311_v35 = vmul.f32 %v15327_v9, %v4038_v57  ;;  %v4313_v38 = vmul.f32 %v15327_v9, %v4048_v59  ;;  %v5094_v32 = vmul.f32 %v15448_v1, %v5024_v62  ;;  %v5027_v46 = vmax.f32 %v4963_v37, 0.0 }
 0x443   :  { %v3795_v48 = vmul.f32 %v15301_v60, %v3526_v41  ;;  %v3797_v45 = vmul.f32 %v15301_v60, %v3536_v63  ;;  %v5370_v50 = vcombine.high %v5162_v47, %v5162_v47  ;;  %v5377_v25 = vrot.slane %v5162_v47, %v15186_v52  ;;  %4654 = vperm.xlu0 %11989, %v4459_v44  }
 0x444   :  { %v5095_v4 = vmul.f32 %v15448_v1, %v5025_v13  ;;  %v15654_v54 = vadd.f32 %v4311_v35, %v3858_v30  ;;  %v5164_v9 = vadd.f32 %v15466_v43, %v5094_v32  ;;  %v5097_v27 = vmul.f32 %v15448_v1, %v5027_v46  ;;  %v15667_v30 = vpop.permute.xlu1 %3550  ;;  %4664 = vperm.xlu1 %11990, %v4461_v28   ;;  %v3943_v32 = vld [vmem:[#allocation2 + $0x1e9] sm:$0xff] }
 0x445   :  { %v15658_v49 = vadd.f32 %v4313_v38, %v3860_v23  ;;  %v15661_v17 = vadd.f32 %v3795_v48, %v19204_v58  ;;  %v15663_v0 = vpop.permute.xlu0 %3540  ;;  %v5384_v40 = vrot.slane %v5370_v50, %v15186_v52  ;;  %v5385_v19 = vcombine.high %v5377_v25, %v5377_v25  ;;  %v3945_v50 = vld [vmem:[#allocation2 + $0x201] sm:$0xff] }
 0x446   :  { %v11459_v39 = vrot.slane %v5377_v25, 9  ;;  %v5165_v7 = vadd.f32 %v15466_v43, %v5095_v4  ;;  %v5404_v56 = vcombine.high %v5164_v9, %v5164_v9  ;;  %v5411_v57 = vrot.slane %v5164_v9, %v15186_v52 }
 0x447   :  { %v15671_v23 = vadd.f32 %v15466_v43, %v5097_v27  ;;  %v15674_v15 = vadd.f32 %v3797_v45, %v19205_v20  ;;  %v5386_v14 = vcombine.high %v5384_v40, %v5384_v40  ;;  %v11460_v59 = vrot.slane %v5385_v19, 9  ;;  %4157 = vperm.xlu0 %11989, %v3946_v53  }
 0x448   :  { %v11461_v5 = vrot.slane %v5384_v40, 9  ;;  %v7417_v36 = vmax.f32 %v5377_v25, %v11459_v39  ;;  %v5418_v2 = vrot.slane %v5404_v56, %v15186_v52  ;;  %v5419_v29 = vcombine.high %v5411_v57, %v5411_v57  ;;  %v15678_v41 = vpop.permute.xlu1 %4549  ;;  %4167 = vperm.xlu1 %11990, %v3948_v3  }
 0x449   :  { %v11467_v31 = vrot.slane %v5411_v57, 9  ;;  %v5421_v34 = vcombine.high %v5165_v7, %v5165_v7  ;;  %v4540_v11 = vpop.permute.xlu0 %4539  ;;  %v11462_v12 = vrot.slane %v5386_v14, 9  ;;  %v7418_v22 = vmax.f32 %v5385_v19, %v11460_v59  ;;  %v8616_v47 = vld [vmem:[#allocation3 + $0x10] sm:$0xff] }
 0x44a   :  { %v7419_v62 = vmax.f32 %v5384_v40, %v11461_v5  ;;  %v5428_v37 = vrot.slane %v5165_v7, %v15186_v52  ;;  %v5420_v13 = vcombine.high %v5418_v2, %v5418_v2  ;;  %v11468_v35 = vrot.slane %v5419_v29, 9  ;;  %8632 = vst.msk [vmem:[#allocation5 + $0x10] sm:$0xff] %vm7781_vm2, %v8616_v47 }
 0x44b   :  { %v11469_v38 = vrot.slane %v5418_v2, 9  ;;  %v7425_v63 = vmax.f32 %v5411_v57, %v11467_v31  ;;  %v7420_v46 = vmax.f32 %v5386_v14, %v11462_v12  ;;  %v5435_v48 = vrot.slane %v5421_v34, %v15186_v52  ;;  %4142 = vperm.xlu0 %11989, %v3943_v32   ;;  %v3430_v14 = vld [vmem:[#allocation2 + $0x218] sm:$0xff] }
 0x44c   :  { %v5436_v45 = vcombine.high %v5428_v37, %v5428_v37  ;;  %v11471_v44 = vrot.slane %v5428_v37, 9  ;;  %v11470_v25 = vrot.slane %v5420_v13, 9  ;;  %v7426_v4 = vmax.f32 %v5419_v29, %v11468_v35  ;;  %v4565_v7 = vpop.permute.xlu1 %4564  ;;  %4152 = vperm.xlu1 %11990, %v3945_v50   ;;  %v3435_v50 = vld [vmem:[#allocation2 + $0x258] sm:$0xff] }
 0x44d   :  { %v7427_v28 = vmax.f32 %v5418_v2, %v11469_v38  ;;  %v7665_v9 = vmax.f32 %v7417_v36, %v7425_v63  ;;  %v4555_v27 = vpop.permute.xlu0 %4554  ;;  %v5437_v58 = vcombine.high %v5435_v48, %v5435_v48  ;;  %v11473_v19 = vrot.slane %v5435_v48, 9  ;;  %v3432_v2 = vld [vmem:[#allocation2 + $0x230] sm:$0xff] }
 0x44e   :  { %v11472_v40 = vrot.slane %v5436_v45, 9  ;;  %v15682_v39 = vmax.f32 %v5428_v37, %v11471_v44  ;;  %v7428_v56 = vmax.f32 %v5420_v13, %v11470_v25  ;;  %v7666_v57 = vmax.f32 %v7418_v22, %v7426_v4  ;;  %v19206_v4 = vld [vmem:[#allocation149_spill] sm:$0xff] }
 0x44f   :  { %v7667_v20 = vmax.f32 %v7419_v62, %v7427_v28  ;;  %v8002_v53 = vrot.slane %v7665_v9, %v15235_v61  ;;  %v11474_v59 = vrot.slane %v5437_v58, 9  ;;  %v7431_v3 = vmax.f32 %v5435_v48, %v11473_v19  ;;  %3645 = vperm.xlu0 %11989, %v3430_v14  }
 0x450   :  { %v15685_v5 = vmax.f32 %v5436_v45, %v11472_v40  ;;  %v5455_v36 = vcombine.high %v15671_v23, %v15671_v23  ;;  %v7668_v29 = vmax.f32 %v7420_v46, %v7428_v56  ;;  %v8006_v31 = vrot.slane %v7666_v57, %v15235_v61  ;;  %v4053_v35 = vpop.permute.xlu1 %4052  ;;  %3655 = vperm.xlu1 %11990, %v3432_v2   ;;  %v3433_v46 = vld [vmem:[#allocation2 + $0x240] sm:$0xff] }
 0x451   :  { %v8010_v34 = vrot.slane %v7667_v20, %v15235_v61  ;;  %v8480_v12 = vsel %vm8469_vm7, %v8002_v53, %v15620_v8  ;;  %v4043_v22 = vpop.permute.xlu0 %4042  ;;  %v7432_v62 = vmax.f32 %v5437_v58, %v11474_v59  ;;  %v5462_v37 = vrot.slane %v15671_v23, %v15186_v52  ;;  %v4463_v53 = vld [vmem:[#allocation2 + $0x212] sm:$0xff] }
 0x452   :  { %v5469_v47 = vrot.slane %v5455_v36, %v15186_v52  ;;  %v3798_v13 = vmul.f32 %v15301_v60, %v15663_v0  ;;  %v8014_v38 = vrot.slane %v7668_v29, %v15235_v61  ;;  %v8481_v63 = vsel %vm8471_vm8, %v8006_v31, %v8480_v12 }
 0x453   :  { %v3800_v32 = vmul.f32 %v15301_v60, %v15667_v30  ;;  %v4825_v8 = vmul.f32 %v15375_v16, %v4540_v11  ;;  %v8482_v23 = vsel %vm8473_vm9, %v8010_v34, %v8481_v63  ;;  %v5470_v48 = vcombine.high %v5462_v37, %v5462_v37  ;;  %3660 = vperm.xlu0 %11989, %v3433_v46  }
 0x454   :  { %v5471_v45 = vcombine.high %v5469_v47, %v5469_v47  ;;  %v11479_v44 = vrot.slane %v5462_v37, 9  ;;  %v8483_v0 = vsel %vm8475_vm10, %v8014_v38, %v8482_v23  ;;  %v11481_v25 = vrot.slane %v5469_v47, 9  ;;  %v15713_v19 = vpop.permute.xlu1 %4067  ;;  %3670 = vperm.xlu1 %11990, %v3435_v50   ;;  %v15740_v38 = vld [vmem:[%s18222_s1 + $0x7] ss:$0 sm:$0xff] }
 0x455   :  { %v15706_v28 = vadd.f32 %v3798_v13, %v19206_v4  ;;  %v15709_v9 = vadd.f32 %v3800_v32, %v15238_v42  ;;  %v4058_v60 = vpop.permute.xlu0 %4057  ;;  %8600 = vst.msk [vmem:[#allocation3 + $0x21] sm:$0xff] %vm7781_vm2, %v8483_v0  ;;  %v11480_v30 = vrot.slane %v5470_v48, 9  ;;  %v4889_v40 = vadd.f32 %v4825_v8, %v15639_v33  ;;  %v4465_v33 = vld [vmem:[#allocation2 + $0x22a] sm:$0xff]  ;;  %v4462_v32 = vld [vmem:[#allocation2 + $0x202] sm:$0xff] }
 0x456   :  { %v11482_v11 = vrot.slane %v5471_v45, 9  ;;  %v7437_v58 = vmax.f32 %v5462_v37, %v11479_v44  ;;  %v7439_v56 = vmax.f32 %v5469_v47, %v11481_v25  ;;  %v4827_v57 = vmul.f32 %v15375_v16, %v15678_v41 }
 0x457   :  { %v4828_v20 = vmul.f32 %v15375_v16, %v4555_v27  ;;  %v4830_v42 = vmul.f32 %v15375_v16, %v4565_v7  ;;  %v7438_v14 = vmax.f32 %v5470_v48, %v11480_v30  ;;  %v4962_v2 = vadd.f32 %v15404_v21, %v4889_v40  ;;  %4674 = vperm.xlu0 %11989, %v4463_v53   ;;  %v3947_v40 = vld [vmem:[#allocation2 + $0x219] sm:$0xff] }
 0x458   :  { %v7440_v59 = vmax.f32 %v5471_v45, %v11482_v11  ;;  %v7669_v36 = vmax.f32 %v15682_v39, %v7437_v58  ;;  %v7671_v29 = vmax.f32 %v7431_v3, %v7439_v56  ;;  %v4891_v31 = vadd.f32 %v4827_v57, %v15643_v51  ;;  %v15728_v47 = vpop.permute.xlu1 %3555  ;;  %4684 = vperm.xlu1 %11990, %v4465_v33  }
 0x459   :  { %v4892_v34 = vadd.f32 %v4828_v20, %v15654_v54  ;;  %v4894_v41 = vadd.f32 %v4830_v42, %v15658_v49  ;;  %v15724_v12 = vpop.permute.xlu0 %3545  ;;  %v7670_v16 = vmax.f32 %v15685_v5, %v7438_v14  ;;  %v5026_v37 = vmax.f32 %v4962_v2, 0.0  ;;  %v4460_v49 = vld [vmem:[#allocation2 + $0x1ea] sm:$0xff] }
 0x45a   :  { %v7672_v27 = vmax.f32 %v7432_v62, %v7440_v59  ;;  %v8018_v7 = vrot.slane %v7669_v36, %v15235_v61  ;;  %v8026_v39 = vrot.slane %v7671_v29, %v15235_v61  ;;  %v4964_v3 = vadd.f32 %v15404_v21, %v4891_v31  ;;  %v3949_v20 = vld [vmem:[#allocation2 + $0x231] sm:$0xff] }
 0x45b   :  { %v4965_v51 = vadd.f32 %v15404_v21, %v4892_v34  ;;  %v4967_v54 = vadd.f32 %v15404_v21, %v4894_v41  ;;  %v8022_v13 = vrot.slane %v7670_v16, %v15235_v61  ;;  %v5096_v62 = vmul.f32 %v15448_v1, %v5026_v37  ;;  %4659 = vperm.xlu0 %11989, %v4460_v49   ;;  %v3950_v41 = vld [vmem:[#allocation2 + $0x241] sm:$0xff] }
 0x45c   :  { %v8030_v5 = vrot.slane %v7672_v27, %v15235_v61  ;;  %v4312_v63 = vmul.f32 %v15740_v38, %v4043_v22  ;;  %v5028_v8 = vmax.f32 %v4964_v3, 0.0  ;;  %v4314_v21 = vmul.f32 %v15740_v38, %v4053_v35  ;;  %v9327_v45 = vld [vmem:[#allocation3 + $0x22] sm:$0xff]  ;;  %v15752_v4 = vpop.permute.xlu1 %3570  ;;  %4669 = vperm.xlu1 %11990, %v4462_v32  }
 0x45d   :  { %v5029_v46 = vmax.f32 %v4965_v51, 0.0  ;;  %v5031_v23 = vmax.f32 %v4967_v54, 0.0  ;;  %v15744_v48 = vpop.permute.xlu0 %3560  ;;  %v8484_v44 = vsel %vm8463_vm4, %v8022_v13, %v8018_v7  ;;  %v5166_v50 = vadd.f32 %v15466_v43, %v5096_v62  ;;  %9343 = vst.msk [vmem:[#allocation5 + $0x8] sm:$0xff] %vm7781_vm2, %v9327_v45  ;;  %v8617_v22 = vld [vmem:[#allocation3 + $0x20] sm:$0xff] }
 0x45e   :  { %v15749_v0 = vadd.f32 %v4312_v63, %v15661_v17  ;;  %v4315_v25 = vmul.f32 %v15740_v38, %v4058_v60  ;;  %v8485_v35 = vsel %vm8465_vm5, %v8026_v39, %v8484_v44  ;;  %v5098_v30 = vmul.f32 %v15448_v1, %v5028_v8  ;;  %8633 = vst.msk [vmem:[#allocation5 + $0x20] sm:$0xff] %vm7781_vm2, %v8617_v22  ;;  %v3952_v39 = vld [vmem:[#allocation2 + $0x259] sm:$0xff]  ;;  %v3434_v44 = vld [vmem:[#allocation2 + $0x248] sm:$0xff] }
 0x45f   :  { %v5099_v11 = vmul.f32 %v15448_v1, %v5029_v46  ;;  %v5101_v58 = vmul.f32 %v15448_v1, %v5031_v23  ;;  %v5438_v17 = vcombine.high %v5166_v50, %v5166_v50  ;;  %v5445_v60 = vrot.slane %v5166_v50, %v15186_v52  ;;  %4162 = vperm.xlu0 %11989, %v3947_v40  }
 0x460   :  { %v15762_v56 = vsel %vm8467_vm6, %v8030_v5, %v8485_v35  ;;  %v15765_v57 = vadd.f32 %v4314_v21, %v15674_v15  ;;  %v5168_v42 = vadd.f32 %v15466_v43, %v5098_v30  ;;  %v15773_v14 = vadd.f32 %v4315_v25, %v15706_v28  ;;  %v15782_v29 = vpop.permute.xlu1 %4569  ;;  %4172 = vperm.xlu1 %11990, %v3949_v20   ;;  %v3436_v30 = vld [vmem:[#allocation2 + $0x260] sm:$0xff] }
 0x461   :  { %v5169_v53 = vadd.f32 %v15466_v43, %v5099_v11  ;;  %v15770_v1 = vadd.f32 %v15466_v43, %v5101_v58  ;;  %v15775_v59 = vpop.permute.xlu0 %4559  ;;  %v5452_v36 = vrot.slane %v5438_v17, %v15186_v52  ;;  %v5453_v2 = vcombine.high %v5445_v60, %v5445_v60 }
 0x462   :  { %v11475_v33 = vrot.slane %v5445_v60, 9  ;;  %v15780_v15 = vmul.f32 %v15740_v38, %v15713_v19  ;;  %v5472_v31 = vcombine.high %v5168_v42, %v5168_v42  ;;  %v5479_v43 = vrot.slane %v5168_v42, %v15186_v52 }
 0x463   :  { %v5489_v34 = vcombine.high %v5169_v53, %v5169_v53  ;;  %v5496_v28 = vrot.slane %v5169_v53, %v15186_v52  ;;  %v5454_v16 = vcombine.high %v5452_v36, %v5452_v36  ;;  %v11476_v27 = vrot.slane %v5453_v2, 9  ;;  %4177 = vperm.xlu0 %11989, %v3950_v41   ;;  %v3437_v41 = vld [vmem:[#allocation2 + $0x270] sm:$0xff] }
 0x464   :  { %v11477_v7 = vrot.slane %v5452_v36, 9  ;;  %v7433_v37 = vmax.f32 %v5445_v60, %v11475_v33  ;;  %v5486_v3 = vrot.slane %v5472_v31, %v15186_v52  ;;  %v5487_v19 = vcombine.high %v5479_v43, %v5479_v43  ;;  %v9360_v49 = vld [vmem:[#allocation5 + $0x8] sm:$0xff]  ;;  %v15791_v8 = vpop.permute.xlu1 %4584  ;;  %4187 = vperm.xlu1 %11990, %v3952_v39  }
 0x465   :  { %v11483_v51 = vrot.slane %v5479_v43, 9  ;;  %v5503_v54 = vrot.slane %v5489_v34, %v15186_v52  ;;  %v15788_v13 = vpop.permute.xlu0 %4574  ;;  %v11478_v5 = vrot.slane %v5454_v16, 9  ;;  %v7434_v62 = vmax.f32 %v5453_v2, %v11476_v27  ;;  %11696 = vmatprep.mubr.msk.f32.mxu0 %vm7781_vm2, %v9360_v49 }
 0x466   :  { %v7435_v63 = vmax.f32 %v5452_v36, %v11477_v7  ;;  %v5504_v32 = vcombine.high %v5496_v28, %v5496_v28  ;;  %v5488_v46 = vcombine.high %v5486_v3, %v5486_v3  ;;  %v11484_v23 = vrot.slane %v5487_v19, 9 }
 0x467   :  { %v11485_v21 = vrot.slane %v5486_v3, 9  ;;  %v7441_v45 = vmax.f32 %v5479_v43, %v11483_v51  ;;  %v7436_v50 = vmax.f32 %v5454_v16, %v11478_v5  ;;  %v5505_v25 = vcombine.high %v5503_v54, %v5503_v54  ;;  %3665 = vperm.xlu0 %11989, %v3434_v44  }
 0x468   :  { %v11487_v22 = vrot.slane %v5496_v28, 9  ;;  %v11488_v35 = vrot.slane %v5504_v32, 9  ;;  %v11486_v11 = vrot.slane %v5488_v46, 9  ;;  %v7442_v58 = vmax.f32 %v5487_v19, %v11484_v23  ;;  %v15799_v2 = vpop.permute.xlu1 %4072  ;;  %3675 = vperm.xlu1 %11990, %v3436_v30   ;;  %v19207_v30 = vld [vmem:[#allocation150_spill] sm:$0xff] }
 0x469   :  { %v7443_v40 = vmax.f32 %v5486_v3, %v11485_v21  ;;  %v7673_v17 = vmax.f32 %v7433_v37, %v7441_v45  ;;  %v15793_v60 = vpop.permute.xlu0 %4062  ;;  %v11489_v20 = vrot.slane %v5503_v54, 9  ;;  %v11490_v42 = vrot.slane %v5505_v25, 9  ;;  %v3439_v37 = vld [vmem:[#allocation2 + $0x288] sm:$0xff] }
 0x46a   :  { %v15795_v53 = vmax.f32 %v5496_v28, %v11487_v22  ;;  %v15797_v36 = vmax.f32 %v5504_v32, %v11488_v35  ;;  %v7444_v33 = vmax.f32 %v5488_v46, %v11486_v11  ;;  %v7674_v31 = vmax.f32 %v7434_v62, %v7442_v58 }
 0x46b   :  { %v7675_v43 = vmax.f32 %v7435_v63, %v7443_v40  ;;  %v8034_v34 = vrot.slane %v7673_v17, %v15235_v61  ;;  %v7447_v16 = vmax.f32 %v5503_v54, %v11489_v20  ;;  %v15802_v27 = vmax.f32 %v5505_v25, %v11490_v42  ;;  %3680 = vperm.xlu0 %11989, %v3437_v41   ;;  %v4466_v25 = vld [vmem:[#allocation2 + $0x232] sm:$0xff] }
 0x46c   :  { %v5523_v7 = vcombine.high %v15770_v1, %v15770_v1  ;;  %v5530_v28 = vrot.slane %v15770_v1, %v15186_v52  ;;  %v7676_v39 = vmax.f32 %v7436_v50, %v7444_v33  ;;  %v8038_v3 = vrot.slane %v7674_v31, %v15235_v61  ;;  %v15819_v1 = vpop.permute.xlu1 %4087  ;;  %3690 = vperm.xlu1 %11990, %v3439_v37  }
 0x46d   :  { %v8042_v19 = vrot.slane %v7675_v43, %v15235_v61  ;;  %v8487_v51 = vsel %vm8469_vm7, %v8034_v34, %v15762_v56  ;;  %v15812_v49 = vpop.permute.xlu0 %4077  ;;  %v15817_v63 = vadd.f32 %v15780_v15, %v15709_v9  ;;  %v15826_v56 = vld [vmem:[%s18222_s1 + $0x6] ss:$0 sm:$0xff]  ;;  %v4464_v9 = vld [vmem:[#allocation2 + $0x21a] sm:$0xff] }
 0x46e   :  { %v5537_v54 = vrot.slane %v5523_v7, %v15186_v52  ;;  %v5538_v5 = vcombine.high %v5530_v28, %v5530_v28  ;;  %v11495_v62 = vrot.slane %v5530_v28, 9  ;;  %v8046_v32 = vrot.slane %v7676_v39, %v15235_v61 }
 0x46f   :  { %v8488_v46 = vsel %vm8471_vm8, %v8038_v3, %v8487_v51  ;;  %v3799_v23 = vmul.f32 %v15826_v56, %v15724_v12  ;;  %v3801_v21 = vmul.f32 %v15826_v56, %v15728_v47  ;;  %v3802_v20 = vmul.f32 %v15826_v56, %v15744_v48  ;;  %4679 = vperm.xlu0 %11989, %v4464_v9   ;;  %v4467_v48 = vld [vmem:[#allocation2 + $0x242] sm:$0xff] }
 0x470   :  { %v8489_v15 = vsel %vm8473_vm9, %v8042_v19, %v8488_v46  ;;  %v5539_v45 = vcombine.high %v5537_v54, %v5537_v54  ;;  %v11496_v44 = vrot.slane %v5538_v5, 9  ;;  %v11497_v50 = vrot.slane %v5537_v54, 9  ;;  %v3576_v42 = vpop.permute.xlu1 %3575  ;;  %4689 = vperm.xlu1 %11990, %v4466_v25  }
 0x471   :  { %v8490_v22 = vsel %vm8475_vm10, %v8046_v32, %v8489_v15  ;;  %v7453_v35 = vmax.f32 %v5530_v28, %v11495_v62  ;;  %v3863_v11 = vadd.f32 %v3799_v23, %v19207_v30  ;;  %v3865_v58 = vadd.f32 %v3801_v21, %v15241_v55  ;;  %v15836_v40 = vpop.permute.xlu0 %3565  ;;  %v15847_v55 = vld [vmem:[%s18222_s1 + $0x8] ss:$0 sm:$0xff] }
 0x472   :  { %8601 = vst.msk [vmem:[#allocation3 + $0x31] sm:$0xff] %vm7781_vm2, %v8490_v22  ;;  %v11498_v12 = vrot.slane %v5539_v45, 9  ;;  %v7454_v47 = vmax.f32 %v5538_v5, %v11496_v44  ;;  %v7455_v17 = vmax.f32 %v5537_v54, %v11497_v50  ;;  %v3804_v31 = vmul.f32 %v15826_v56, %v15752_v4  ;;  %v4469_v4 = vld [vmem:[#allocation2 + $0x25a] sm:$0xff]  ;;  %v3951_v5 = vld [vmem:[#allocation2 + $0x249] sm:$0xff] }
 0x473   :  { %v7677_v33 = vmax.f32 %v15795_v53, %v7453_v35  ;;  %v4829_v43 = vmul.f32 %v15847_v55, %v15775_v59  ;;  %v4831_v34 = vmul.f32 %v15847_v55, %v15782_v29  ;;  %v3866_v28 = vadd.f32 %v3802_v20, %v15244_v10  ;;  %4694 = vperm.xlu0 %11989, %v4467_v48   ;;  %v3953_v23 = vld [vmem:[#allocation2 + $0x261] sm:$0xff] }
 0x474   :  { %v7456_v41 = vmax.f32 %v5539_v45, %v11498_v12  ;;  %v7678_v7 = vmax.f32 %v15797_v36, %v7454_v47  ;;  %v7679_v53 = vmax.f32 %v7447_v16, %v7455_v17  ;;  %v3868_v39 = vadd.f32 %v3804_v31, %v15252_v18  ;;  %v3591_v16 = vpop.permute.xlu1 %3590  ;;  %v15869_v18 = vld [vmem:[%s18223_s2] ss:$0 sm:$0xff]  ;;  %4704 = vperm.xlu1 %11990, %v4469_v4   ;;  %v3956_v31 = vld [vmem:[#allocation2 + $0x289] sm:$0xff] }
 0x475   :  { %v8050_v37 = vrot.slane %v7677_v33, %v15235_v61  ;;  %v4893_v3 = vadd.f32 %v4829_v43, %v15749_v0  ;;  %v4895_v59 = vadd.f32 %v4831_v34, %v15765_v57  ;;  %v15859_v19 = vpop.permute.xlu0 %3580  ;;  %v4832_v10 = vmul.f32 %v15847_v55, %v15788_v13 }
 0x476   :  { %v7680_v29 = vmax.f32 %v15802_v27, %v7456_v41  ;;  %v8054_v51 = vrot.slane %v7678_v7, %v15235_v61  ;;  %v8058_v36 = vrot.slane %v7679_v53, %v15235_v61  ;;  %v4834_v27 = vmul.f32 %v15847_v55, %v15791_v8  ;;  %v19208_v53 = vld [vmem:[#allocation151_spill] sm:$0xff] }
 0x477   :  { %v4966_v0 = vadd.f32 %v15869_v18, %v4893_v3  ;;  %v4968_v57 = vadd.f32 %v15869_v18, %v4895_v59  ;;  %v4316_v54 = vmul.f32 %v15740_v38, %v15793_v60  ;;  %v4896_v32 = vadd.f32 %v4832_v10, %v15773_v14  ;;  %4182 = vperm.xlu0 %11989, %v3951_v5  }
 0x478   :  { %v8062_v13 = vrot.slane %v7680_v29, %v15235_v61  ;;  %v8491_v62 = vsel %vm8463_vm4, %v8054_v51, %v8050_v37  ;;  %v4318_v46 = vmul.f32 %v15740_v38, %v15799_v2  ;;  %v4898_v8 = vadd.f32 %v4834_v27, %v15817_v63  ;;  %v15894_v25 = vpop.permute.xlu1 %4589  ;;  %v15899_v63 = vld [vmem:[%s18224_s3] ss:$0 sm:$0xff]  ;;  %4192 = vperm.xlu1 %11990, %v3953_v23   ;;  %v3438_v51 = vld [vmem:[#allocation2 + $0x278] sm:$0xff] }
 0x479   :  { %v8492_v21 = vsel %vm8465_vm5, %v8058_v36, %v8491_v62  ;;  %v5030_v9 = vmax.f32 %v4966_v0, 0.0  ;;  %v5032_v15 = vmax.f32 %v4968_v57, 0.0  ;;  %v15884_v45 = vpop.permute.xlu0 %4579  ;;  %v4969_v44 = vadd.f32 %v15869_v18, %v4896_v32  ;;  %v9328_v2 = vld [vmem:[#allocation3 + $0x32] sm:$0xff] }
 0x47a   :  { %v15887_v60 = vsel %vm8467_vm6, %v8062_v13, %v8492_v21  ;;  %v15890_v50 = vadd.f32 %v4316_v54, %v3863_v11  ;;  %v15892_v14 = vadd.f32 %v4318_v46, %v3865_v58  ;;  %v8618_v22 = vld [vmem:[#allocation3 + $0x30] sm:$0xff]  ;;  %v4971_v12 = vadd.f32 %v15869_v18, %v4898_v8  ;;  %9344 = vst.msk [vmem:[#allocation5 + $0x18] sm:$0xff] %vm7781_vm2, %v9328_v2  ;;  %v3441_v8 = vld [vmem:[#allocation2 + $0x2a0] sm:$0xff] }
 0x47b   :  { %v5100_v35 = vmul.f32 %v15899_v63, %v5030_v9  ;;  %v5102_v30 = vmul.f32 %v15899_v63, %v5032_v15  ;;  %v4319_v11 = vmul.f32 %v15740_v38, %v15812_v49  ;;  %v3954_v58 = vld [vmem:[#allocation2 + $0x271] sm:$0xff]  ;;  %8634 = vst.msk [vmem:[#allocation5 + $0x30] sm:$0xff] %vm7781_vm2, %v8618_v22  ;;  %v5033_v47 = vmax.f32 %v4969_v44, 0.0  ;;  %v15916_v49 = vld [vmem:[%s18225_s4] ss:$0 sm:$0xff] }
 0x47c   :  { %v4321_v17 = vmul.f32 %v15740_v38, %v15819_v1  ;;  %v3803_v20 = vmul.f32 %v15826_v56, %v15836_v40  ;;  %v3805_v33 = vmul.f32 %v15826_v56, %v3576_v42  ;;  %v5035_v48 = vmax.f32 %v4971_v12, 0.0  ;;  %v15933_v37 = vpop.permute.xlu1 %4604  ;;  %4197 = vperm.xlu0 %11989, %v3954_v58   ;;  %4207 = vperm.xlu1 %11990, %v3956_v31   ;;  %v3440_v0 = vld [vmem:[#allocation2 + $0x290] sm:$0xff] }
 0x47d   :  { %v5170_v43 = vadd.f32 %v15916_v49, %v5100_v35  ;;  %v5172_v34 = vadd.f32 %v15916_v49, %v5102_v30  ;;  %v15920_v41 = vadd.f32 %v4319_v11, %v3866_v28  ;;  %v15922_v7 = vpop.permute.xlu0 %4594  ;;  %v5103_v1 = vmul.f32 %v15899_v63, %v5033_v47  ;;  %v3443_v30 = vld [vmem:[#allocation2 + $0x2b8] sm:$0xff] }
 0x47e   :  { %v15925_v40 = vadd.f32 %v4321_v17, %v3868_v39  ;;  %v15928_v42 = vadd.f32 %v3803_v20, %v15249_v24  ;;  %v15931_v4 = vadd.f32 %v3805_v33, %v19208_v53  ;;  %v5105_v36 = vmul.f32 %v15899_v63, %v5035_v48 }
 0x47f   :  { %v5506_v3 = vcombine.high %v5170_v43, %v5170_v43  ;;  %v5513_v59 = vrot.slane %v5170_v43, %v15186_v52  ;;  %v5540_v28 = vcombine.high %v5172_v34, %v5172_v34  ;;  %v5547_v29 = vrot.slane %v5172_v34, %v15186_v52 }
 0x480   :  { %v5173_v39 = vadd.f32 %v15916_v49, %v5103_v1  ;;  %v15941_v24 = vmul.f32 %v15826_v56, %v15859_v19  ;;  %v15944_v10 = vmul.f32 %v15826_v56, %v3591_v16  ;;  %v15951_v21 = vpop.permute.xlu1 %4092  ;;  %3685 = vperm.xlu0 %11989, %v3438_v51   ;;  %3695 = vperm.xlu1 %11990, %v3440_v0   ;;  %v4470_v0 = vld [vmem:[#allocation2 + $0x262] sm:$0xff] }
 0x481   :  { %v5520_v57 = vrot.slane %v5506_v3, %v15186_v52  ;;  %v5521_v27 = vcombine.high %v5513_v59, %v5513_v59  ;;  %v11491_v54 = vrot.slane %v5513_v59, 9  ;;  %v5554_v5 = vrot.slane %v5540_v28, %v15186_v52  ;;  %v15948_v13 = vpop.permute.xlu0 %4082 }
 0x482   :  { %v5555_v62 = vcombine.high %v5547_v29, %v5547_v29  ;;  %v11499_v32 = vrot.slane %v5547_v29, 9  ;;  %v5557_v46 = vcombine.high %v5173_v39, %v5173_v39  ;;  %v5564_v23 = vrot.slane %v5173_v39, %v15186_v52 }
 0x483   :  { %v5522_v19 = vcombine.high %v5520_v57, %v5520_v57  ;;  %v11492_v16 = vrot.slane %v5521_v27, 9  ;;  %v11493_v9 = vrot.slane %v5520_v57, 9  ;;  %v7449_v15 = vmax.f32 %v5513_v59, %v11491_v54  ;;  %v4468_v59 = vld [vmem:[#allocation2 + $0x24a] sm:$0xff] }
 0x484   :  { %v5556_v44 = vcombine.high %v5554_v5, %v5554_v5  ;;  %v11500_v2 = vrot.slane %v5555_v62, 9  ;;  %v11501_v22 = vrot.slane %v5554_v5, 9  ;;  %v7457_v35 = vmax.f32 %v5547_v29, %v11499_v32  ;;  %v15956_v34 = vpop.permute.xlu1 %4107  ;;  %3700 = vperm.xlu0 %11989, %v3441_v8   ;;  %3710 = vperm.xlu1 %11990, %v3443_v30   ;;  %v19209_v30 = vld [vmem:[#allocation152_spill] sm:$0xff] }
 0x485   :  { %v11494_v12 = vrot.slane %v5522_v19, 9  ;;  %v7450_v11 = vmax.f32 %v5521_v27, %v11492_v16  ;;  %v7451_v58 = vmax.f32 %v5520_v57, %v11493_v9  ;;  %v5571_v47 = vrot.slane %v5557_v46, %v15186_v52  ;;  %v15954_v17 = vpop.permute.xlu0 %4097 }
 0x486   :  { %v11502_v20 = vrot.slane %v5556_v44, 9  ;;  %v7458_v33 = vmax.f32 %v5555_v62, %v11500_v2  ;;  %v7459_v31 = vmax.f32 %v5554_v5, %v11501_v22  ;;  %v7681_v43 = vmax.f32 %v7449_v15, %v7457_v35  ;;  %v4471_v2 = vld [vmem:[#allocation2 + $0x272] sm:$0xff] }
 0x487   :  { %v7452_v48 = vmax.f32 %v5522_v19, %v11494_v12  ;;  %v5572_v1 = vcombine.high %v5564_v23, %v5564_v23  ;;  %v5573_v53 = vcombine.high %v5571_v47, %v5571_v47  ;;  %v11503_v3 = vrot.slane %v5564_v23, 9  ;;  %v19210_v12 = vld [vmem:[#allocation153_spill] sm:$0xff] }
 0x488   :  { %v7460_v28 = vmax.f32 %v5556_v44, %v11502_v20  ;;  %v7682_v29 = vmax.f32 %v7450_v11, %v7458_v33  ;;  %v7683_v51 = vmax.f32 %v7451_v58, %v7459_v31  ;;  %v8066_v39 = vrot.slane %v7681_v43, %v15235_v61  ;;  %v15967_v9 = vpop.permute.xlu1 %3595  ;;  %4699 = vperm.xlu0 %11989, %v4468_v59   ;;  %v4473_v58 = vld [vmem:[#allocation2 + $0x28a] sm:$0xff] }
 0x489   :  { %v11504_v57 = vrot.slane %v5572_v1, 9  ;;  %v11505_v27 = vrot.slane %v5571_v47, 9  ;;  %v11506_v54 = vrot.slane %v5573_v53, 9  ;;  %v15959_v5 = vmax.f32 %v5564_v23, %v11503_v3  ;;  %v15961_v62 = vpop.permute.xlu0 %3585  ;;  %4709 = vperm.xlu1 %11990, %v4470_v0  }
 0x48a   :  { %v7684_v32 = vmax.f32 %v7452_v48, %v7460_v28  ;;  %v8070_v46 = vrot.slane %v7682_v29, %v15235_v61  ;;  %v8074_v19 = vrot.slane %v7683_v51, %v15235_v61  ;;  %v8494_v16 = vsel %vm8469_vm7, %v8066_v39, %v15887_v60  ;;  %v3955_v28 = vld [vmem:[#allocation2 + $0x279] sm:$0xff]  ;;  %v3957_v51 = vld [vmem:[#allocation2 + $0x291] sm:$0xff] }
 0x48b   :  { %v15969_v15 = vmax.f32 %v5572_v1, %v11504_v57  ;;  %v15971_v8 = vmax.f32 %v5571_v47, %v11505_v27  ;;  %v15973_v44 = vmax.f32 %v5573_v53, %v11506_v54  ;;  %v5175_v23 = vadd.f32 %v15916_v49, %v5105_v36 }
 0x48c   :  { %v8078_v22 = vrot.slane %v7684_v32, %v15235_v61  ;;  %v8495_v35 = vsel %vm8471_vm8, %v8070_v46, %v8494_v16  ;;  %v15980_v60 = vadd.f32 %v15941_v24, %v19209_v30  ;;  %v15984_v11 = vadd.f32 %v15944_v10, %v19210_v12  ;;  %v15999_v1 = vpop.permute.xlu1 %3610  ;;  %4714 = vperm.xlu0 %11989, %v4471_v2   ;;  %v3960_v12 = vld [vmem:[#allocation2 + $0x2b9] sm:$0xff] }
 0x48d   :  { %v8496_v47 = vsel %vm8473_vm9, %v8074_v19, %v8495_v35  ;;  %v5591_v20 = vcombine.high %v5175_v23, %v5175_v23  ;;  %v5598_v36 = vrot.slane %v5175_v23, %v15186_v52  ;;  %v4833_v33 = vmul.f32 %v15847_v55, %v15884_v45  ;;  %v15990_v31 = vpop.permute.xlu0 %3600  ;;  %4724 = vperm.xlu1 %11990, %v4473_v58   ;;  %v3958_v23 = vld [vmem:[#allocation2 + $0x2a1] sm:$0xff] }
 0x48e   :  { %v8497_v43 = vsel %vm8475_vm10, %v8078_v22, %v8496_v47  ;;  %v4835_v24 = vmul.f32 %v15847_v55, %v15894_v25  ;;  %v4836_v10 = vmul.f32 %v15847_v55, %v15922_v7  ;;  %v4838_v48 = vmul.f32 %v15847_v55, %v15933_v37 }
 0x48f   :  { %8602 = vst.msk [vmem:[#allocation3 + $0x41] sm:$0xff] %vm7781_vm2, %v8497_v43  ;;  %v5605_v45 = vrot.slane %v5591_v20, %v15186_v52  ;;  %v5606_v53 = vcombine.high %v5598_v36, %v5598_v36  ;;  %v11511_v3 = vrot.slane %v5598_v36, 9  ;;  %v4897_v59 = vadd.f32 %v4833_v33, %v15890_v50 }
 0x490   :  { %v4899_v25 = vadd.f32 %v4835_v24, %v15892_v14  ;;  %v4900_v7 = vadd.f32 %v4836_v10, %v15920_v41  ;;  %v4902_v29 = vadd.f32 %v4838_v48, %v15925_v40  ;;  %v4320_v37 = vmul.f32 %v15740_v38, %v15948_v13  ;;  %v16015_v46 = vpop.permute.xlu1 %4609  ;;  %4202 = vperm.xlu0 %11989, %v3955_v28  }
 0x491   :  { %v5607_v39 = vcombine.high %v5605_v45, %v5605_v45  ;;  %v11512_v0 = vrot.slane %v5606_v53, 9  ;;  %v11513_v57 = vrot.slane %v5605_v45, 9  ;;  %v7469_v27 = vmax.f32 %v5598_v36, %v11511_v3  ;;  %v16009_v54 = vpop.permute.xlu0 %4599  ;;  %4212 = vperm.xlu1 %11990, %v3957_v51   ;;  %v3442_v3 = vld [vmem:[#allocation2 + $0x2a8] sm:$0xff] }
 0x492   :  { %v4970_v50 = vadd.f32 %v15869_v18, %v4897_v59  ;;  %v4972_v32 = vadd.f32 %v15869_v18, %v4899_v25  ;;  %v4973_v14 = vadd.f32 %v15869_v18, %v4900_v7  ;;  %v4975_v41 = vadd.f32 %v15869_v18, %v4902_v29 }
 0x493   :  { %v11514_v40 = vrot.slane %v5607_v39, 9  ;;  %v7470_v13 = vmax.f32 %v5606_v53, %v11512_v0  ;;  %v7471_v19 = vmax.f32 %v5605_v45, %v11513_v57  ;;  %v7685_v16 = vmax.f32 %v15959_v5, %v7469_v27 }
 0x494   :  { %v5034_v2 = vmax.f32 %v4970_v50, 0.0  ;;  %v5036_v22 = vmax.f32 %v4972_v32, 0.0  ;;  %v5037_v35 = vmax.f32 %v4973_v14, 0.0  ;;  %v5039_v30 = vmax.f32 %v4975_v41, 0.0  ;;  %v16027_v48 = vpop.permute.xlu1 %4624  ;;  %4217 = vperm.xlu0 %11989, %v3958_v23  }
 0x495   :  { %v7472_v58 = vmax.f32 %v5607_v39, %v11514_v40  ;;  %v7686_v47 = vmax.f32 %v15969_v15, %v7470_v13  ;;  %v7687_v20 = vmax.f32 %v15971_v8, %v7471_v19  ;;  %v8082_v36 = vrot.slane %v7685_v16, %v15235_v61  ;;  %v16021_v33 = vpop.permute.xlu0 %4614  ;;  %4227 = vperm.xlu1 %11990, %v3960_v12   ;;  %v3445_v19 = vld [vmem:[#allocation2 + $0x2d0] sm:$0xff] }
 0x496   :  { %v5104_v43 = vmul.f32 %v15899_v63, %v5034_v2  ;;  %v5106_v5 = vmul.f32 %v15899_v63, %v5036_v22  ;;  %v5107_v24 = vmul.f32 %v15899_v63, %v5037_v35  ;;  %v5109_v10 = vmul.f32 %v15899_v63, %v5039_v30  ;;  %v9329_v59 = vld [vmem:[#allocation3 + $0x42] sm:$0xff] }
 0x497   :  { %v7688_v45 = vmax.f32 %v15973_v44, %v7472_v58  ;;  %v8086_v15 = vrot.slane %v7686_v47, %v15235_v61  ;;  %v8090_v8 = vrot.slane %v7687_v20, %v15235_v61  ;;  %v16033_v53 = vadd.f32 %v4320_v37, %v15928_v42  ;;  %v3444_v44 = vld [vmem:[#allocation2 + $0x2c0] sm:$0xff]  ;;  %9345 = vst.msk [vmem:[#allocation5 + $0x28] sm:$0xff] %vm7781_vm2, %v9329_v59  ;;  %v3447_v35 = vld [vmem:[#allocation2 + $0x2e8] sm:$0xff] }
 0x498   :  { %v5174_v28 = vadd.f32 %v15916_v49, %v5104_v43  ;;  %v5176_v25 = vadd.f32 %v15916_v49, %v5106_v5  ;;  %v5177_v7 = vadd.f32 %v15916_v49, %v5107_v24  ;;  %v16039_v29 = vadd.f32 %v15916_v49, %v5109_v10  ;;  %v8619_v51 = vld [vmem:[#allocation3 + $0x40] sm:$0xff]  ;;  %v16057_v41 = vpop.permute.xlu1 %4112  ;;  %3705 = vperm.xlu0 %11989, %v3442_v3  }
 0x499   :  { %v8094_v39 = vrot.slane %v7688_v45, %v15235_v61  ;;  %v8498_v42 = vsel %vm8463_vm4, %v8086_v15, %v8082_v36  ;;  %v16046_v37 = vmul.f32 %v15740_v38, %v15951_v21  ;;  %v16050_v0 = vmul.f32 %v15740_v38, %v15954_v17  ;;  %v16052_v57 = vpop.permute.xlu0 %4102  ;;  %8635 = vst.msk [vmem:[#allocation5 + $0x40] sm:$0xff] %vm7781_vm2, %v8619_v51  ;;  %v4472_v59 = vld [vmem:[#allocation2 + $0x27a] sm:$0xff]  ;;  %v4474_v51 = vld [vmem:[#allocation2 + $0x292] sm:$0xff] }
 0x49a   :  { %v8499_v27 = vsel %vm8465_vm5, %v8090_v8, %v8498_v42  ;;  %v5574_v50 = vcombine.high %v5174_v28, %v5174_v28  ;;  %v5581_v32 = vrot.slane %v5174_v28, %v15186_v52  ;;  %v5608_v14 = vcombine.high %v5176_v25, %v5176_v25  ;;  %3715 = vperm.xlu1 %11990, %v3444_v44  }
 0x49b   :  { %v5615_v21 = vrot.slane %v5176_v25, %v15186_v52  ;;  %v8500_v40 = vsel %vm8467_vm6, %v8094_v39, %v8499_v27  ;;  %v5625_v13 = vcombine.high %v5177_v7, %v5177_v7  ;;  %v5632_v17 = vrot.slane %v5177_v7, %v15186_v52 }
 0x49c   :  { %v5588_v16 = vrot.slane %v5574_v50, %v15186_v52  ;;  %v5589_v23 = vcombine.high %v5581_v32, %v5581_v32  ;;  %v11507_v2 = vrot.slane %v5581_v32, 9  ;;  %v5622_v22 = vrot.slane %v5608_v14, %v15186_v52  ;;  %v16067_v10 = vpop.permute.xlu1 %4127  ;;  %3720 = vperm.xlu0 %11989, %v3445_v19  }
 0x49d   :  { %v5623_v30 = vcombine.high %v5615_v21, %v5615_v21  ;;  %v11515_v12 = vrot.slane %v5615_v21, 9  ;;  %v5639_v58 = vrot.slane %v5625_v13, %v15186_v52  ;;  %v5640_v47 = vcombine.high %v5632_v17, %v5632_v17  ;;  %v16065_v20 = vpop.permute.xlu0 %4117 }
 0x49e   :  { %v5590_v36 = vcombine.high %v5588_v16, %v5588_v16  ;;  %v11508_v43 = vrot.slane %v5589_v23, 9  ;;  %v11509_v5 = vrot.slane %v5588_v16, 9  ;;  %v7465_v24 = vmax.f32 %v5581_v32, %v11507_v2  ;;  %3730 = vperm.xlu1 %11990, %v3447_v35  }
 0x49f   :  { %v5624_v45 = vcombine.high %v5622_v22, %v5622_v22  ;;  %v11516_v15 = vrot.slane %v5623_v30, 9  ;;  %v11517_v8 = vrot.slane %v5622_v22, 9  ;;  %v7473_v3 = vmax.f32 %v5615_v21, %v11515_v12 }
 0x4a0   :  { %v11510_v28 = vrot.slane %v5590_v36, 9  ;;  %v7466_v25 = vmax.f32 %v5589_v23, %v11508_v43  ;;  %v7467_v7 = vmax.f32 %v5588_v16, %v11509_v5  ;;  %v5641_v44 = vcombine.high %v5639_v58, %v5639_v58  ;;  %v16071_v6 = vpop.permute.xlu1 %3615  ;;  %4719 = vperm.xlu0 %11989, %v4472_v59   ;;  %v4475_v23 = vld [vmem:[#allocation2 + $0x2a2] sm:$0xff] }
 0x4a1   :  { %v11518_v39 = vrot.slane %v5624_v45, 9  ;;  %v7474_v42 = vmax.f32 %v5623_v30, %v11516_v15  ;;  %v7475_v27 = vmax.f32 %v5622_v22, %v11517_v8  ;;  %v7689_v50 = vmax.f32 %v7465_v24, %v7473_v3  ;;  %v16069_v14 = vpop.permute.xlu0 %3605 }
 0x4a2   :  { %v7468_v32 = vmax.f32 %v5590_v36, %v11510_v28  ;;  %v11519_v13 = vrot.slane %v5632_v17, 9  ;;  %v11520_v19 = vrot.slane %v5640_v47, 9  ;;  %v11521_v2 = vrot.slane %v5639_v58, 9  ;;  %4729 = vperm.xlu1 %11990, %v4474_v51   ;;  %v4477_v36 = vld [vmem:[#allocation2 + $0x2ba] sm:$0xff]  ;;  %v3959_v51 = vld [vmem:[#allocation2 + $0x2a9] sm:$0xff] }
 0x4a3   :  { %v7476_v21 = vmax.f32 %v5624_v45, %v11518_v39  ;;  %v7690_v35 = vmax.f32 %v7466_v25, %v7474_v42  ;;  %v7691_v12 = vmax.f32 %v7467_v7, %v7475_v27  ;;  %v8098_v16 = vrot.slane %v7689_v50, %v15235_v61  ;;  %v3961_v42 = vld [vmem:[#allocation2 + $0x2c1] sm:$0xff] }
 0x4a4   :  { %v11522_v43 = vrot.slane %v5641_v44, 9  ;;  %v7477_v30 = vmax.f32 %v5632_v17, %v11519_v13  ;;  %v16074_v22 = vmax.f32 %v5640_v47, %v11520_v19  ;;  %v16076_v5 = vmax.f32 %v5639_v58, %v11521_v2  ;;  %v16091_v47 = vpop.permute.xlu1 %4629  ;;  %4734 = vperm.xlu0 %11989, %v4475_v23   ;;  %v3962_v23 = vld [vmem:[#allocation2 + $0x2d1] sm:$0xff] }
 0x4a5   :  { %v7692_v24 = vmax.f32 %v7468_v32, %v7476_v21  ;;  %v8102_v15 = vrot.slane %v7690_v35, %v15235_v61  ;;  %v8106_v8 = vrot.slane %v7691_v12, %v15235_v61  ;;  %v8501_v45 = vsel %vm8469_vm7, %v8098_v16, %v8500_v40  ;;  %v16081_v3 = vpop.permute.xlu0 %4619  ;;  %v19211_v35 = vld [vmem:[#allocation57_spill] sm:$0xff] }
 0x4a6   :  { %v16083_v59 = vmax.f32 %v5641_v44, %v11522_v43  ;;  %v5659_v28 = vcombine.high %v16039_v29, %v16039_v29  ;;  %v5666_v17 = vrot.slane %v16039_v29, %v15186_v52  ;;  %v4386_v58 = vadd.f32 %v16046_v37, %v15931_v4  ;;  %4744 = vperm.xlu1 %11990, %v4477_v36  }
 0x4a7   :  { %v8110_v25 = vrot.slane %v7692_v24, %v15235_v61  ;;  %v8502_v40 = vsel %vm8471_vm8, %v8102_v15, %v8501_v45  ;;  %v4387_v7 = vadd.f32 %v16050_v0, %v15980_v60  ;;  %v4325_v44 = vmul.f32 %v15740_v38, %v15956_v34  ;;  %v19213_v45 = vld [vmem:[#allocation59_spill] sm:$0xff] }
 0x4a8   :  { %v8503_v29 = vsel %vm8473_vm9, %v8106_v8, %v8502_v40  ;;  %v5673_v39 = vrot.slane %v5659_v28, %v15186_v52  ;;  %v5674_v4 = vcombine.high %v5666_v17, %v5666_v17  ;;  %v11527_v37 = vrot.slane %v5666_v17, 9  ;;  %v16110_v21 = vpop.permute.xlu1 %4644  ;;  %4222 = vperm.xlu0 %11989, %v3959_v51   ;;  %v3964_v8 = vld [vmem:[#allocation2 + $0x2e9] sm:$0xff] }
 0x4a9   :  { %v8504_v27 = vsel %vm8475_vm10, %v8110_v25, %v8503_v29  ;;  %v4389_v50 = vadd.f32 %v4325_v44, %v15984_v11  ;;  %v3807_v32 = vmul.f32 %v15826_v56, %v15961_v62  ;;  %v3809_v60 = vmul.f32 %v15826_v56, %v15967_v9  ;;  %v16107_v34 = vpop.permute.xlu0 %4634  ;;  %v19212_v11 = vld [vmem:[#allocation154_spill] sm:$0xff] }
 0x4aa   :  { %8603 = vst.msk [vmem:[#allocation3 + $0x51] sm:$0xff] %vm7781_vm2, %v8504_v27  ;;  %v5675_v0 = vcombine.high %v5673_v39, %v5673_v39  ;;  %v11528_v13 = vrot.slane %v5674_v4, 9  ;;  %v11529_v19 = vrot.slane %v5673_v39, 9  ;;  %v7485_v2 = vmax.f32 %v5666_v17, %v11527_v37  ;;  %4232 = vperm.xlu1 %11990, %v3961_v42   ;;  %v19214_v17 = vld [vmem:[#allocation61_spill] sm:$0xff] }
 0x4ab   :  { %v3871_v12 = vadd.f32 %v3807_v32, %v19211_v35  ;;  %v3873_v16 = vadd.f32 %v3809_v60, %v19212_v11  ;;  %v3810_v62 = vmul.f32 %v15826_v56, %v15990_v31  ;;  %v3812_v9 = vmul.f32 %v15826_v56, %v15999_v1  ;;  %v3446_v42 = vld [vmem:[#allocation2 + $0x2d8] sm:$0xff]  ;;  %v3448_v60 = vld [vmem:[#allocation2 + $0x2f0] sm:$0xff] }
 0x4ac   :  { %v11530_v43 = vrot.slane %v5675_v0, 9  ;;  %v7486_v36 = vmax.f32 %v5674_v4, %v11528_v13  ;;  %v7487_v24 = vmax.f32 %v5673_v39, %v11529_v19  ;;  %v7693_v15 = vmax.f32 %v7477_v30, %v7485_v2  ;;  %v16129_v39 = vpop.permute.xlu1 %3630  ;;  %4237 = vperm.xlu0 %11989, %v3962_v23   ;;  %v3449_v23 = vld [vmem:[#allocation2 + $0x300] sm:$0xff] }
 0x4ad   :  { %v3874_v28 = vadd.f32 %v3810_v62, %v19213_v45  ;;  %v3876_v25 = vadd.f32 %v3812_v9, %v19214_v17  ;;  %v4837_v40 = vmul.f32 %v15847_v55, %v16009_v54  ;;  %v4839_v31 = vmul.f32 %v15847_v55, %v16015_v46  ;;  %v16124_v44 = vpop.permute.xlu0 %3620 }
 0x4ae   :  { %v7488_v1 = vmax.f32 %v5675_v0, %v11530_v43  ;;  %v7694_v51 = vmax.f32 %v16074_v22, %v7486_v36  ;;  %v7695_v29 = vmax.f32 %v16076_v5, %v7487_v24  ;;  %v8114_v30 = vrot.slane %v7693_v15, %v15235_v61  ;;  %4247 = vperm.xlu1 %11990, %v3964_v8   ;;  %v3451_v24 = vld [vmem:[#allocation2 + $0x318] sm:$0xff] }
 0x4af   :  { %v4901_v4 = vadd.f32 %v4837_v40, %v16033_v53  ;;  %v4903_v37 = vadd.f32 %v4839_v31, %v4386_v58  ;;  %v4840_v54 = vmul.f32 %v15847_v55, %v16021_v33  ;;  %v4842_v46 = vmul.f32 %v15847_v55, %v16027_v48 }
 0x4b0   :  { %v7696_v22 = vmax.f32 %v16083_v59, %v7488_v1  ;;  %v8118_v5 = vrot.slane %v7694_v51, %v15235_v61  ;;  %v8122_v27 = vrot.slane %v7695_v29, %v15235_v61  ;;  %v4324_v32 = vmul.f32 %v15740_v38, %v16052_v57  ;;  %v16149_v35 = vpop.permute.xlu1 %4132  ;;  %3725 = vperm.xlu0 %11989, %v3446_v42  }
 0x4b1   :  { %v4974_v53 = vadd.f32 %v15869_v18, %v4901_v4  ;;  %v4976_v58 = vadd.f32 %v15869_v18, %v4903_v37  ;;  %v4904_v33 = vadd.f32 %v4840_v54, %v4387_v7  ;;  %v4906_v0 = vadd.f32 %v4842_v46, %v4389_v50  ;;  %v16143_v13 = vpop.permute.xlu0 %4122  ;;  %v9330_v57 = vld [vmem:[#allocation3 + $0x52] sm:$0xff]  ;;  %v19216_v54 = vld [vmem:[#allocation63_spill] sm:$0xff]  ;;  %v4478_v46 = vld [vmem:[#allocation2 + $0x2c2] sm:$0xff] }
 0x4b2   :  { %v8126_v48 = vrot.slane %v7696_v22, %v15235_v61  ;;  %v8505_v59 = vsel %vm8463_vm4, %v8118_v5, %v8114_v30  ;;  %v4388_v19 = vadd.f32 %v4324_v32, %v3871_v12  ;;  %v4326_v2 = vmul.f32 %v15740_v38, %v16057_v41  ;;  %v8620_v11 = vld [vmem:[#allocation3 + $0x50] sm:$0xff]  ;;  %3735 = vperm.xlu1 %11990, %v3448_v60  }
 0x4b3   :  { %v8506_v62 = vsel %vm8465_vm5, %v8122_v27, %v8505_v59  ;;  %v5038_v9 = vmax.f32 %v4974_v53, 0.0  ;;  %v5040_v7 = vmax.f32 %v4976_v58, 0.0  ;;  %v4977_v50 = vadd.f32 %v15869_v18, %v4904_v33  ;;  %9346 = vst.msk [vmem:[#allocation5 + $0x38] sm:$0xff] %vm7781_vm2, %v9330_v57  ;;  %8636 = vst.msk [vmem:[#allocation5 + $0x50] sm:$0xff] %vm7781_vm2, %v8620_v11  ;;  %v19215_v37 = vld [vmem:[#allocation60_spill] sm:$0xff] }
 0x4b4   :  { %v16156_v12 = vsel %vm8467_vm6, %v8126_v48, %v8506_v62  ;;  %v4979_v41 = vadd.f32 %v15869_v18, %v4906_v0  ;;  %v16159_v43 = vadd.f32 %v4326_v2, %v3873_v16  ;;  %v4327_v36 = vmul.f32 %v15740_v38, %v16065_v20  ;;  %v16175_v51 = vpop.permute.xlu1 %4147  ;;  %3740 = vperm.xlu0 %11989, %v3449_v23   ;;  %v4479_v2 = vld [vmem:[#allocation2 + $0x2d2] sm:$0xff] }
 0x4b5   :  { %v5108_v15 = vmul.f32 %v15899_v63, %v5038_v9  ;;  %v5110_v8 = vmul.f32 %v15899_v63, %v5040_v7  ;;  %v5041_v45 = vmax.f32 %v4977_v50, 0.0  ;;  %v4329_v17 = vmul.f32 %v15740_v38, %v16067_v10  ;;  %v16167_v40 = vpop.permute.xlu0 %4137  ;;  %v4481_v9 = vld [vmem:[#allocation2 + $0x2ea] sm:$0xff] }
 0x4b6   :  { %v5043_v31 = vmax.f32 %v4979_v41, 0.0  ;;  %v16169_v1 = vadd.f32 %v4327_v36, %v3874_v28  ;;  %v3811_v16 = vmul.f32 %v15826_v56, %v16069_v14  ;;  %v3813_v20 = vmul.f32 %v15826_v56, %v16071_v6  ;;  %3750 = vperm.xlu1 %11990, %v3451_v24   ;;  %v4476_v28 = vld [vmem:[#allocation2 + $0x2aa] sm:$0xff] }
 0x4b7   :  { %v5178_v29 = vadd.f32 %v15916_v49, %v5108_v15  ;;  %v5180_v30 = vadd.f32 %v15916_v49, %v5110_v8  ;;  %v5111_v38 = vmul.f32 %v15899_v63, %v5041_v45  ;;  %v16180_v10 = vadd.f32 %v4329_v17, %v3876_v25 }
 0x4b8   :  { %v5113_v4 = vmul.f32 %v15899_v63, %v5043_v31  ;;  %v16184_v14 = vadd.f32 %v3811_v16, %v19215_v37  ;;  %v16187_v6 = vadd.f32 %v3813_v20, %v19216_v54  ;;  %v4841_v56 = vmul.f32 %v15847_v55, %v16081_v3  ;;  %v16205_v3 = vpop.permute.xlu1 %3650  ;;  %4739 = vperm.xlu0 %11989, %v4476_v28   ;;  %v3965_v37 = vld [vmem:[#allocation2 + $0x2f1] sm:$0xff] }
 0x4b9   :  { %v5642_v42 = vcombine.high %v5178_v29, %v5178_v29  ;;  %v5649_v22 = vrot.slane %v5178_v29, %v15186_v52  ;;  %v5676_v5 = vcombine.high %v5180_v30, %v5180_v30  ;;  %v5683_v25 = vrot.slane %v5180_v30, %v15186_v52  ;;  %v16193_v27 = vpop.permute.xlu0 %3640  ;;  %v3963_v29 = vld [vmem:[#allocation2 + $0x2d9] sm:$0xff] }
 0x4ba   :  { %v5181_v32 = vadd.f32 %v15916_v49, %v5111_v38  ;;  %v16197_v60 = vadd.f32 %v15916_v49, %v5113_v4  ;;  %v16199_v53 = vadd.f32 %v4841_v56, %v4388_v19  ;;  %v16203_v58 = vmul.f32 %v15847_v55, %v16091_v47  ;;  %4749 = vperm.xlu1 %11990, %v4478_v46  }
 0x4bb   :  { %v5656_v33 = vrot.slane %v5642_v42, %v15186_v52  ;;  %v5657_v0 = vcombine.high %v5649_v22, %v5649_v22  ;;  %v11523_v48 = vrot.slane %v5649_v22, 9  ;;  %v5690_v59 = vrot.slane %v5676_v5, %v15186_v52 }
 0x4bc   :  { %v5691_v57 = vcombine.high %v5683_v25, %v5683_v25  ;;  %v11531_v11 = vrot.slane %v5683_v25, 9  ;;  %v5693_v62 = vcombine.high %v5181_v32, %v5181_v32  ;;  %v5700_v19 = vrot.slane %v5181_v32, %v15186_v52  ;;  %v16212_v45 = vpop.permute.xlu1 %4649  ;;  %4754 = vperm.xlu0 %11989, %v4479_v2  }
 0x4bd   :  { %v5658_v7 = vcombine.high %v5656_v33, %v5656_v33  ;;  %v11524_v47 = vrot.slane %v5657_v0, 9  ;;  %v11525_v50 = vrot.slane %v5656_v33, 9  ;;  %v7481_v23 = vmax.f32 %v5649_v22, %v11523_v48  ;;  %v16210_v41 = vpop.permute.xlu0 %4639 }
 0x4be   :  { %v5692_v36 = vcombine.high %v5690_v59, %v5690_v59  ;;  %v11532_v24 = vrot.slane %v5691_v57, 9  ;;  %v11533_v15 = vrot.slane %v5690_v59, 9  ;;  %v7489_v8 = vmax.f32 %v5683_v25, %v11531_v11  ;;  %4764 = vperm.xlu1 %11990, %v4481_v9   ;;  %v3966_v11 = vld [vmem:[#allocation2 + $0x301] sm:$0xff] }
 0x4bf   :  { %v11526_v17 = vrot.slane %v5658_v7, 9  ;;  %v7482_v31 = vmax.f32 %v5657_v0, %v11524_v47  ;;  %v7483_v16 = vmax.f32 %v5656_v33, %v11525_v50  ;;  %v5707_v20 = vrot.slane %v5693_v62, %v15186_v52  ;;  %v3968_v50 = vld [vmem:[#allocation2 + $0x319] sm:$0xff] }
 0x4c0   :  { %v11534_v30 = vrot.slane %v5692_v36, 9  ;;  %v7490_v38 = vmax.f32 %v5691_v57, %v11532_v24  ;;  %v7491_v28 = vmax.f32 %v5690_v59, %v11533_v15  ;;  %v7697_v4 = vmax.f32 %v7481_v23, %v7489_v8  ;;  %v16218_v0 = vpop.permute.xlu1 %3635  ;;  %4242 = vperm.xlu0 %11989, %v3963_v29  }
 0x4c1   :  { %v7484_v54 = vmax.f32 %v5658_v7, %v11526_v17  ;;  %v5708_v56 = vcombine.high %v5700_v19, %v5700_v19  ;;  %v5709_v46 = vcombine.high %v5707_v20, %v5707_v20  ;;  %v11535_v42 = vrot.slane %v5700_v19, 9  ;;  %v16215_v22 = vpop.permute.xlu0 %3625 }
 0x4c2   :  { %v7492_v5 = vmax.f32 %v5692_v36, %v11534_v30  ;;  %v7698_v25 = vmax.f32 %v7482_v31, %v7490_v38  ;;  %v7699_v32 = vmax.f32 %v7483_v16, %v7491_v28  ;;  %v8130_v33 = vrot.slane %v7697_v4, %v15235_v61  ;;  %4252 = vperm.xlu1 %11990, %v3965_v37   ;;  %v3450_v28 = vld [vmem:[#allocation2 + $0x308] sm:$0xff] }
 0x4c3   :  { %v11536_v48 = vrot.slane %v5708_v56, 9  ;;  %v11537_v2 = vrot.slane %v5707_v20, 9  ;;  %v11538_v57 = vrot.slane %v5709_v46, 9  ;;  %v7493_v59 = vmax.f32 %v5700_v19, %v11535_v42 }
 0x4c4   :  { %v7700_v62 = vmax.f32 %v7484_v54, %v7492_v5  ;;  %v8134_v9 = vrot.slane %v7698_v25, %v15235_v61  ;;  %v8138_v7 = vrot.slane %v7699_v32, %v15235_v61  ;;  %v8508_v47 = vsel %vm8469_vm7, %v8130_v33, %v16156_v12  ;;  %v16238_v16 = vpop.permute.xlu1 %4664  ;;  %4257 = vperm.xlu0 %11989, %v3966_v11   ;;  %v3452_v54 = vld [vmem:[#allocation2 + $0x320] sm:$0xff] }
 0x4c5   :  { %v16224_v23 = vmax.f32 %v5708_v56, %v11536_v48  ;;  %v7495_v36 = vmax.f32 %v5707_v20, %v11537_v2  ;;  %v16226_v24 = vmax.f32 %v5709_v46, %v11538_v57  ;;  %v5727_v15 = vcombine.high %v16197_v60, %v16197_v60  ;;  %v16230_v19 = vpop.permute.xlu0 %4654 }
 0x4c6   :  { %v8142_v8 = vrot.slane %v7700_v62, %v15235_v61  ;;  %v8509_v17 = vsel %vm8471_vm8, %v8134_v9, %v8508_v47  ;;  %v5734_v31 = vrot.slane %v16197_v60, %v15186_v52  ;;  %v4978_v12 = vadd.f32 %v15869_v18, %v16199_v53  ;;  %4267 = vperm.xlu1 %11990, %v3968_v50   ;;  %v3453_v62 = vld [vmem:[#allocation2 + $0x330] sm:$0xff]  ;;  %v3455_v50 = vld [vmem:[#allocation2 + $0x348] sm:$0xff] }
 0x4c7   :  { %v8510_v20 = vsel %vm8473_vm9, %v8138_v7, %v8509_v17  ;;  %v5741_v29 = vrot.slane %v5727_v15, %v15186_v52  ;;  %v4907_v30 = vadd.f32 %v16203_v58, %v16159_v43  ;;  %v4844_v38 = vmul.f32 %v15847_v55, %v16107_v34 }
 0x4c8   :  { %v8511_v60 = vsel %vm8475_vm10, %v8142_v8, %v8510_v20  ;;  %v5742_v4 = vcombine.high %v5734_v31, %v5734_v31  ;;  %v11543_v37 = vrot.slane %v5734_v31, 9  ;;  %v5042_v53 = vmax.f32 %v4978_v12, 0.0  ;;  %v16255_v33 = vpop.permute.xlu1 %4167  ;;  %3745 = vperm.xlu0 %11989, %v3450_v28  }
 0x4c9   :  { %8604 = vst.msk [vmem:[#allocation3 + $0x61] sm:$0xff] %vm7781_vm2, %v8511_v60  ;;  %v5743_v56 = vcombine.high %v5741_v29, %v5741_v29  ;;  %v11545_v46 = vrot.slane %v5741_v29, 9  ;;  %v4980_v42 = vadd.f32 %v15869_v18, %v4907_v30  ;;  %v4908_v5 = vadd.f32 %v4844_v38, %v16169_v1  ;;  %v16250_v43 = vpop.permute.xlu0 %4157  ;;  %v4480_v38 = vld [vmem:[#allocation2 + $0x2da] sm:$0xff] }
 0x4ca   :  { %v11544_v58 = vrot.slane %v5742_v4, 9  ;;  %v7501_v34 = vmax.f32 %v5734_v31, %v11543_v37  ;;  %v5112_v25 = vmul.f32 %v15899_v63, %v5042_v53  ;;  %v4846_v32 = vmul.f32 %v15847_v55, %v16110_v21  ;;  %3755 = vperm.xlu1 %11990, %v3452_v54   ;;  %v4482_v37 = vld [vmem:[#allocation2 + $0x2f2] sm:$0xff] }
 0x4cb   :  { %v11546_v48 = vrot.slane %v5743_v56, 9  ;;  %v7503_v2 = vmax.f32 %v5741_v29, %v11545_v46  ;;  %v5044_v57 = vmax.f32 %v4980_v42, 0.0  ;;  %v4981_v11 = vadd.f32 %v15869_v18, %v4908_v5 }
 0x4cc   :  { %v7502_v1 = vmax.f32 %v5742_v4, %v11544_v58  ;;  %v7701_v9 = vmax.f32 %v7493_v59, %v7501_v34  ;;  %v5182_v7 = vadd.f32 %v15916_v49, %v5112_v25  ;;  %v16260_v47 = vadd.f32 %v4846_v32, %v16180_v10  ;;  %v16268_v20 = vpop.permute.xlu1 %4152  ;;  %3760 = vperm.xlu0 %11989, %v3453_v62  }
 0x4cd   :  { %v7504_v15 = vmax.f32 %v5743_v56, %v11546_v48  ;;  %v7703_v55 = vmax.f32 %v7495_v36, %v7503_v2  ;;  %v5114_v21 = vmul.f32 %v15899_v63, %v5044_v57  ;;  %v5045_v8 = vmax.f32 %v4981_v11, 0.0  ;;  %v16263_v17 = vpop.permute.xlu0 %4142  ;;  %v4483_v11 = vld [vmem:[#allocation2 + $0x302] sm:$0xff] }
 0x4ce   :  { %v7702_v31 = vmax.f32 %v16224_v23, %v7502_v1  ;;  %v8146_v18 = vrot.slane %v7701_v9, %v15235_v61  ;;  %v5710_v12 = vcombine.high %v5182_v7, %v5182_v7  ;;  %v5717_v59 = vrot.slane %v5182_v7, %v15186_v52  ;;  %3770 = vperm.xlu1 %11990, %v3455_v50   ;;  %v4485_v50 = vld [vmem:[#allocation2 + $0x31a] sm:$0xff] }
 0x4cf   :  { %v7704_v10 = vmax.f32 %v16226_v24, %v7504_v15  ;;  %v8154_v29 = vrot.slane %v7703_v55, %v15235_v61  ;;  %v5184_v36 = vadd.f32 %v15916_v49, %v5114_v21  ;;  %v5115_v30 = vmul.f32 %v15899_v63, %v5045_v8 }
 0x4d0   :  { %v8150_v23 = vrot.slane %v7702_v31, %v15235_v61  ;;  %v5724_v28 = vrot.slane %v5710_v12, %v15186_v52  ;;  %v5725_v60 = vcombine.high %v5717_v59, %v5717_v59  ;;  %v11539_v4 = vrot.slane %v5717_v59, 9  ;;  %v9331_v42 = vld [vmem:[#allocation3 + $0x62] sm:$0xff]  ;;  %v16282_v32 = vpop.permute.xlu1 %3655  ;;  %4759 = vperm.xlu0 %11989, %v4480_v38  }
 0x4d1   :  { %v8158_v53 = vrot.slane %v7704_v10, %v15235_v61  ;;  %v5744_v54 = vcombine.high %v5184_v36, %v5184_v36  ;;  %v5751_v24 = vrot.slane %v5184_v36, %v15186_v52  ;;  %v5185_v56 = vadd.f32 %v15916_v49, %v5115_v30  ;;  %v16279_v46 = vpop.permute.xlu0 %3645  ;;  %v8621_v63 = vld [vmem:[#allocation3 + $0x60] sm:$0xff]  ;;  %9347 = vst.msk [vmem:[#allocation5 + $0x48] sm:$0xff] %vm7781_vm2, %v9331_v42 }
 0x4d2   :  { %v8512_v5 = vsel %vm8463_vm4, %v8150_v23, %v8146_v18  ;;  %v5726_v58 = vcombine.high %v5724_v28, %v5724_v28  ;;  %v11540_v34 = vrot.slane %v5725_v60, 9  ;;  %v11541_v25 = vrot.slane %v5724_v28, 9  ;;  %8637 = vst.msk [vmem:[#allocation5 + $0x60] sm:$0xff] %vm7781_vm2, %v8621_v63  ;;  %4769 = vperm.xlu1 %11990, %v4482_v37   ;;  %v16297_v23 = vld [vmem:[%s18223_s2] ss:$0 sm:$0xff] }
 0x4d3   :  { %v8513_v48 = vsel %vm8465_vm5, %v8154_v29, %v8512_v5  ;;  %v7497_v2 = vmax.f32 %v5717_v59, %v11539_v4  ;;  %v5758_v49 = vrot.slane %v5744_v54, %v15186_v52  ;;  %v5759_v57 = vcombine.high %v5751_v24, %v5751_v24 }
 0x4d4   :  { %v11542_v62 = vrot.slane %v5726_v58, 9  ;;  %v7498_v1 = vmax.f32 %v5725_v60, %v11540_v34  ;;  %v7499_v9 = vmax.f32 %v5724_v28, %v11541_v25  ;;  %v11547_v7 = vrot.slane %v5751_v24, 9  ;;  %v16292_v29 = vpop.permute.xlu1 %3670  ;;  %4774 = vperm.xlu0 %11989, %v4483_v11   ;;  %v3967_v60 = vld [vmem:[#allocation2 + $0x309] sm:$0xff] }
 0x4d5   :  { %v5760_v15 = vcombine.high %v5758_v49, %v5758_v49  ;;  %v11548_v55 = vrot.slane %v5759_v57, 9  ;;  %v11549_v21 = vrot.slane %v5758_v49, 9  ;;  %v8514_v8 = vsel %vm8467_vm6, %v8158_v53, %v8513_v48  ;;  %v16289_v31 = vpop.permute.xlu0 %3660 }
 0x4d6   :  { %v7500_v18 = vmax.f32 %v5726_v58, %v11542_v62  ;;  %v7505_v12 = vmax.f32 %v5751_v24, %v11547_v7  ;;  %v5761_v59 = vcombine.high %v5185_v56, %v5185_v56  ;;  %v5768_v10 = vrot.slane %v5185_v56, %v15186_v52  ;;  %4784 = vperm.xlu1 %11990, %v4485_v50   ;;  %v3969_v24 = vld [vmem:[#allocation2 + $0x321] sm:$0xff] }
 0x4d7   :  { %v11550_v36 = vrot.slane %v5760_v15, 9  ;;  %v7506_v30 = vmax.f32 %v5759_v57, %v11548_v55  ;;  %v7507_v38 = vmax.f32 %v5758_v49, %v11549_v21  ;;  %v4983_v28 = vadd.f32 %v16297_v23, %v16260_v47  ;;  %v3972_v55 = vld [vmem:[#allocation2 + $0x349] sm:$0xff] }
 0x4d8   :  { %v7705_v4 = vmax.f32 %v7497_v2, %v7505_v12  ;;  %v5775_v37 = vrot.slane %v5761_v59, %v15186_v52  ;;  %v5776_v53 = vcombine.high %v5768_v10, %v5768_v10  ;;  %v11551_v54 = vrot.slane %v5768_v10, 9  ;;  %v16305_v47 = vpop.permute.xlu1 %4684  ;;  %4262 = vperm.xlu0 %11989, %v3967_v60   ;;  %v16321_v12 = vld [vmem:[%s18224_s3] ss:$0 sm:$0xff]  ;;  %v16341_v60 = vld [vmem:[%s18222_s1 + $0x7] ss:$0 sm:$0xff] }
 0x4d9   :  { %v7508_v56 = vmax.f32 %v5760_v15, %v11550_v36  ;;  %v7706_v42 = vmax.f32 %v7498_v1, %v7506_v30  ;;  %v7707_v63 = vmax.f32 %v7499_v9, %v7507_v38  ;;  %v5047_v5 = vmax.f32 %v4983_v28, 0.0  ;;  %v16302_v58 = vpop.permute.xlu0 %4674  ;;  %v3970_v1 = vld [vmem:[#allocation2 + $0x331] sm:$0xff] }
 0x4da   :  { %v8162_v34 = vrot.slane %v7705_v4, %v15235_v61  ;;  %v5777_v25 = vcombine.high %v5775_v37, %v5775_v37  ;;  %v11552_v48 = vrot.slane %v5776_v53, 9  ;;  %v11553_v49 = vrot.slane %v5775_v37, 9  ;;  %4272 = vperm.xlu1 %11990, %v3969_v24  }
 0x4db   :  { %v7708_v2 = vmax.f32 %v7500_v18, %v7508_v56  ;;  %v8166_v57 = vrot.slane %v7706_v42, %v15235_v61  ;;  %v8170_v11 = vrot.slane %v7707_v63, %v15235_v61  ;;  %v16309_v62 = vmax.f32 %v5768_v10, %v11551_v54  ;;  %v19217_v54 = vld [vmem:[#allocation64_spill] sm:$0xff] }
 0x4dc   :  { %v8515_v9 = vsel %vm8469_vm7, %v8162_v34, %v8514_v8  ;;  %v11554_v7 = vrot.slane %v5777_v25, 9  ;;  %v16312_v50 = vmax.f32 %v5776_v53, %v11552_v48  ;;  %v16314_v15 = vmax.f32 %v5775_v37, %v11553_v49  ;;  %v16327_v8 = vld [vmem:[%s18222_s1 + $0x6] ss:$0 sm:$0xff]  ;;  %v16345_v37 = vpop.permute.xlu1 %4669  ;;  %4277 = vperm.xlu0 %11989, %v3970_v1   ;;  %v16351_v53 = vld [vmem:[%s18225_s4] ss:$0 sm:$0xff]  ;;  %v3454_v42 = vld [vmem:[#allocation2 + $0x338] sm:$0xff] }
 0x4dd   :  { %v8174_v21 = vrot.slane %v7708_v2, %v15235_v61  ;;  %v8516_v18 = vsel %vm8471_vm8, %v8166_v57, %v8515_v9  ;;  %v5117_v59 = vmul.f32 %v16321_v12, %v5047_v5  ;;  %v3814_v10 = vmul.f32 %v16327_v8, %v16124_v44  ;;  %v16331_v36 = vpop.permute.xlu0 %4659 }
 0x4de   :  { %v8517_v30 = vsel %vm8473_vm9, %v8170_v11, %v8516_v18  ;;  %v16334_v38 = vmax.f32 %v5777_v25, %v11554_v7  ;;  %v3816_v28 = vmul.f32 %v16327_v8, %v16129_v39  ;;  %v4328_v4 = vmul.f32 %v16341_v60, %v16143_v13  ;;  %4287 = vperm.xlu1 %11990, %v3972_v55   ;;  %v3456_v25 = vld [vmem:[#allocation2 + $0x350] sm:$0xff] }
 0x4df   :  { %v8518_v44 = vsel %vm8475_vm10, %v8174_v21, %v8517_v30  ;;  %v5187_v39 = vadd.f32 %v16351_v53, %v5117_v59  ;;  %v3878_v24 = vadd.f32 %v3814_v10, %v19217_v54  ;;  %v4330_v56 = vmul.f32 %v16341_v60, %v16149_v35  ;;  %v19218_v7 = vld [vmem:[#allocation67_spill] sm:$0xff]  ;;  %v4486_v30 = vld [vmem:[#allocation2 + $0x322] sm:$0xff] }
 0x4e0   :  { %8605 = vst.msk [vmem:[#allocation3 + $0x71] sm:$0xff] %vm7781_vm2, %v8518_v44  ;;  %v3880_v13 = vadd.f32 %v3816_v28, %v15330_v26  ;;  %v4392_v63 = vadd.f32 %v4328_v4, %v16184_v14  ;;  %v4331_v5 = vmul.f32 %v16341_v60, %v16167_v40  ;;  %v4333_v34 = vmul.f32 %v16341_v60, %v16175_v51  ;;  %v16377_v51 = vld [vmem:[%s18222_s1 + $0x8] ss:$0 sm:$0xff]  ;;  %v4484_v21 = vld [vmem:[#allocation2 + $0x30a] sm:$0xff] }
 0x4e1   :  { %v5795_v48 = vcombine.high %v5187_v39, %v5187_v39  ;;  %v5802_v49 = vrot.slane %v5187_v39, %v15186_v52  ;;  %v4394_v35 = vadd.f32 %v4330_v56, %v16187_v6  ;;  %v3818_v2 = vmul.f32 %v16327_v8, %v16193_v27  ;;  %v16368_v57 = vpop.permute.xlu0 %4162  ;;  %v16381_v6 = vpop.permute.xlu1 %4172  ;;  %3765 = vperm.xlu0 %11989, %v3454_v42   ;;  %v19220_v42 = vld [vmem:[#allocation65_spill] sm:$0xff] }
 0x4e2   :  { %v4395_v26 = vadd.f32 %v4331_v5, %v3878_v24  ;;  %v16370_v11 = vadd.f32 %v4333_v34, %v3880_v13  ;;  %v3820_v40 = vmul.f32 %v16327_v8, %v16205_v3  ;;  %v4845_v14 = vmul.f32 %v16377_v51, %v16210_v41  ;;  %3775 = vperm.xlu1 %11990, %v3456_v25   ;;  %v19219_v3 = vld [vmem:[#allocation156_spill] sm:$0xff] }
 0x4e3   :  { %v5809_v27 = vrot.slane %v5795_v48, %v15186_v52  ;;  %v5810_v1 = vcombine.high %v5802_v49, %v5802_v49  ;;  %v11559_v9 = vrot.slane %v5802_v49, 9  ;;  %v3882_v55 = vadd.f32 %v3818_v2, %v19218_v7  ;;  %v4487_v48 = vld [vmem:[#allocation2 + $0x332] sm:$0xff] }
 0x4e4   :  { %v16386_v18 = vadd.f32 %v3820_v40, %v19219_v3  ;;  %v4909_v59 = vadd.f32 %v4845_v14, %v4392_v63  ;;  %v4847_v10 = vmul.f32 %v16377_v51, %v16212_v45  ;;  %v3815_v41 = vmul.f32 %v16327_v8, %v16215_v22 }
 0x4e5   :  { %v5811_v28 = vcombine.high %v5809_v27, %v5809_v27  ;;  %v11560_v4 = vrot.slane %v5810_v1, 9  ;;  %v11561_v44 = vrot.slane %v5809_v27, 9  ;;  %v7517_v39 = vmax.f32 %v5802_v49, %v11559_v9  ;;  %v16392_v54 = vpop.permute.xlu0 %4177  ;;  %v16400_v45 = vpop.permute.xlu1 %4187  ;;  %4779 = vperm.xlu0 %11989, %v4484_v21  }
 0x4e6   :  { %v4982_v24 = vadd.f32 %v16297_v23, %v4909_v59  ;;  %v4911_v56 = vadd.f32 %v4847_v10, %v4394_v35  ;;  %v16396_v13 = vadd.f32 %v3815_v41, %v19220_v42  ;;  %v3817_v63 = vmul.f32 %v16327_v8, %v16218_v0  ;;  %4789 = vperm.xlu1 %11990, %v4486_v30   ;;  %v19221_v35 = vld [vmem:[#allocation66_spill] sm:$0xff]  ;;  %v4489_v0 = vld [vmem:[#allocation2 + $0x34a] sm:$0xff] }
 0x4e7   :  { %v11562_v22 = vrot.slane %v5811_v28, 9  ;;  %v7518_v5 = vmax.f32 %v5810_v1, %v11560_v4  ;;  %v7519_v34 = vmax.f32 %v5809_v27, %v11561_v44  ;;  %v7709_v25 = vmax.f32 %v16309_v62, %v7517_v39  ;;  %v9332_v9 = vld [vmem:[#allocation3 + $0x72] sm:$0xff] }
 0x4e8   :  { %v5046_v49 = vmax.f32 %v4982_v24, 0.0  ;;  %v4984_v2 = vadd.f32 %v16297_v23, %v4911_v56  ;;  %v16405_v40 = vadd.f32 %v3817_v63, %v19221_v35  ;;  %v4848_v14 = vmul.f32 %v16377_v51, %v16230_v19  ;;  %v8622_v7 = vld [vmem:[#allocation3 + $0x70] sm:$0xff]  ;;  %9348 = vst.msk [vmem:[#allocation5 + $0x58] sm:$0xff] %vm7781_vm2, %v9332_v9  ;;  %v3971_v44 = vld [vmem:[#allocation2 + $0x339] sm:$0xff] }
 0x4e9   :  { %v7520_v21 = vmax.f32 %v5811_v28, %v11562_v22  ;;  %v7710_v1 = vmax.f32 %v16312_v50, %v7518_v5  ;;  %v7711_v27 = vmax.f32 %v16314_v15, %v7519_v34  ;;  %v8178_v62 = vrot.slane %v7709_v25, %v15235_v61  ;;  %v16412_v3 = vpop.permute.xlu0 %3665  ;;  %8638 = vst.msk [vmem:[#allocation5 + $0x70] sm:$0xff] %vm7781_vm2, %v8622_v7  ;;  %v16419_v30 = vpop.permute.xlu1 %3675  ;;  %v3973_v56 = vld [vmem:[#allocation2 + $0x351] sm:$0xff]  ;;  %v4488_v35 = vld [vmem:[#allocation2 + $0x33a] sm:$0xff] }
 0x4ea   :  { %v5116_v59 = vmul.f32 %v16321_v12, %v5046_v49  ;;  %v5048_v10 = vmax.f32 %v4984_v2, 0.0  ;;  %v4912_v19 = vadd.f32 %v4848_v14, %v4395_v26  ;;  %v4850_v41 = vmul.f32 %v16377_v51, %v16238_v16  ;;  %4794 = vperm.xlu0 %11989, %v4487_v48   ;;  %4804 = vperm.xlu1 %11990, %v4489_v0  }
 0x4eb   :  { %v7712_v50 = vmax.f32 %v16334_v38, %v7520_v21  ;;  %v8182_v15 = vrot.slane %v7710_v1, %v15235_v61  ;;  %v8186_v28 = vrot.slane %v7711_v27, %v15235_v61  ;;  %v4335_v4 = vmul.f32 %v16341_v60, %v16250_v43  ;;  %v4490_v21 = vld [vmem:[#allocation2 + $0x352] sm:$0xff] }
 0x4ec   :  { %v5186_v39 = vadd.f32 %v16351_v53, %v5116_v59  ;;  %v5118_v26 = vmul.f32 %v16321_v12, %v5048_v10  ;;  %v4985_v16 = vadd.f32 %v16297_v23, %v4912_v19  ;;  %v4914_v24 = vadd.f32 %v4850_v41, %v16370_v11 }
 0x4ed   :  { %v8190_v38 = vrot.slane %v7712_v50, %v15235_v61  ;;  %v8519_v42 = vsel %vm8463_vm4, %v8182_v15, %v8178_v62  ;;  %v16432_v63 = vadd.f32 %v4335_v4, %v3882_v55  ;;  %v4337_v43 = vmul.f32 %v16341_v60, %v16255_v33  ;;  %v16436_v22 = vpop.permute.xlu0 %3680  ;;  %v16441_v11 = vpop.permute.xlu1 %3690 }
 0x4ee   :  { %v8520_v5 = vsel %vm8465_vm5, %v8186_v28, %v8519_v42  ;;  %v5778_v34 = vcombine.high %v5186_v39, %v5186_v39  ;;  %v5785_v25 = vrot.slane %v5186_v39, %v15186_v52  ;;  %v5188_v48 = vadd.f32 %v16351_v53, %v5118_v26  ;;  %4282 = vperm.xlu0 %11989, %v3971_v44   ;;  %v8647_v26 = vld [vmem:[#allocation3 + $0x1] sm:$0xff] }
 0x4ef   :  { %v16444_v49 = vsel %vm8467_vm6, %v8190_v38, %v8520_v5  ;;  %v5049_v55 = vmax.f32 %v4985_v16, 0.0  ;;  %v4987_v2 = vadd.f32 %v16297_v23, %v4914_v24  ;;  %v16448_v33 = vadd.f32 %v4337_v43, %v16386_v18  ;;  %4292 = vperm.xlu1 %11990, %v3973_v56   ;;  %v8744_v38 = vld [vmem:[#allocation3 + $0x2] sm:$0xff] }
 0x4f0   :  { %v5792_v14 = vrot.slane %v5778_v34, %v15186_v52  ;;  %v5793_v0 = vcombine.high %v5785_v25, %v5785_v25  ;;  %v11555_v9 = vrot.slane %v5785_v25, 9  ;;  %v5812_v7 = vcombine.high %v5188_v48, %v5188_v48 }
 0x4f1   :  { %v5819_v1 = vrot.slane %v5188_v48, %v15186_v52  ;;  %v5119_v27 = vmul.f32 %v16321_v12, %v5049_v55  ;;  %v5051_v62 = vmax.f32 %v4987_v2, 0.0  ;;  %v16455_v59 = vmul.f32 %v16341_v60, %v16263_v17  ;;  %v16457_v10 = vpop.permute.xlu0 %4679  ;;  %v16459_v15 = vpop.permute.xlu1 %4689 }
 0x4f2   :  { %v5794_v18 = vcombine.high %v5792_v14, %v5792_v14  ;;  %v11556_v19 = vrot.slane %v5793_v0, 9  ;;  %v11557_v41 = vrot.slane %v5792_v14, 9  ;;  %v7513_v50 = vmax.f32 %v5785_v25, %v11555_v9  ;;  %4799 = vperm.xlu0 %11989, %v4488_v35  }
 0x4f3   :  { %v5826_v28 = vrot.slane %v5812_v7, %v15186_v52  ;;  %v5827_v4 = vcombine.high %v5819_v1, %v5819_v1  ;;  %v11563_v44 = vrot.slane %v5819_v1, 9  ;;  %v5189_v39 = vadd.f32 %v16351_v53, %v5119_v27  ;;  %4809 = vperm.xlu1 %11990, %v4490_v21  }
 0x4f4   :  { %v11558_v16 = vrot.slane %v5794_v18, 9  ;;  %v7514_v17 = vmax.f32 %v5793_v0, %v11556_v19  ;;  %v7515_v24 = vmax.f32 %v5792_v14, %v11557_v41  ;;  %v5121_v56 = vmul.f32 %v16321_v12, %v5051_v62 }
 0x4f5   :  { %v5828_v42 = vcombine.high %v5826_v28, %v5826_v28  ;;  %v11564_v43 = vrot.slane %v5827_v4, 9  ;;  %v11565_v5 = vrot.slane %v5826_v28, 9  ;;  %v7521_v34 = vmax.f32 %v5819_v1, %v11563_v44  ;;  %v16464_v25 = vpop.permute.xlu0 %4694  ;;  %v16468_v9 = vpop.permute.xlu1 %4704 }
 0x4f6   :  { %v7516_v48 = vmax.f32 %v5794_v18, %v11558_v16  ;;  %v5829_v55 = vcombine.high %v5189_v39, %v5189_v39  ;;  %v5836_v2 = vrot.slane %v5189_v39, %v15186_v52  ;;  %v5191_v35 = vadd.f32 %v16351_v53, %v5121_v56  ;;  %8679 = vrot.lane.b32.xlu0 %v8647_v26, %s12094_s0  ;;  %v8841_v26 = vld [vmem:[#allocation3 + $0x10] sm:$0xff] }
 0x4f7   :  { %v11566_v14 = vrot.slane %v5828_v42, 9  ;;  %v7522_v0 = vmax.f32 %v5827_v4, %v11564_v43  ;;  %v7523_v7 = vmax.f32 %v5826_v28, %v11565_v5  ;;  %v7713_v21 = vmax.f32 %v7513_v50, %v7521_v34  ;;  %8776 = vrot.lane.b32.xlu1 %v8744_v38, %s12095_s26  ;;  %v8938_v38 = vld [vmem:[#allocation3 + $0x11] sm:$0xff] }
 0x4f8   :  { %v5843_v1 = vrot.slane %v5829_v55, %v15186_v52  ;;  %v5844_v27 = vcombine.high %v5836_v2, %v5836_v2  ;;  %v11567_v62 = vrot.slane %v5836_v2, 9  ;;  %v5863_v18 = vcombine.high %v5191_v35, %v5191_v35 }
 0x4f9   :  { %v7524_v19 = vmax.f32 %v5828_v42, %v11566_v14  ;;  %v7714_v41 = vmax.f32 %v7514_v17, %v7522_v0  ;;  %v7715_v44 = vmax.f32 %v7515_v24, %v7523_v7  ;;  %v8194_v39 = vrot.slane %v7713_v21, %v15235_v61  ;;  %v16474_v16 = vpop.permute.xlu0 %4182  ;;  %v16476_v43 = vpop.permute.xlu1 %4192 }
 0x4fa   :  { %v5845_v56 = vcombine.high %v5843_v1, %v5843_v1  ;;  %v11568_v4 = vrot.slane %v5844_v27, 9  ;;  %v11569_v28 = vrot.slane %v5843_v1, 9  ;;  %v7525_v50 = vmax.f32 %v5836_v2, %v11567_v62  ;;  %8873 = vrot.lane.b32.xlu0 %v8841_v26, %s12096_s27 }
 0x4fb   :  { %v7716_v5 = vmax.f32 %v7516_v48, %v7524_v19  ;;  %v8198_v42 = vrot.slane %v7714_v41, %v15235_v61  ;;  %v8202_v17 = vrot.slane %v7715_v44, %v15235_v61  ;;  %v8522_v24 = vsel %vm8469_vm7, %v8194_v39, %v16444_v49  ;;  %8970 = vrot.lane.b32.xlu1 %v8938_v38, %s12097_s28 }
 0x4fc   :  { %v11570_v34 = vrot.slane %v5845_v56, 9  ;;  %v7526_v55 = vmax.f32 %v5844_v27, %v11568_v4  ;;  %v7527_v2 = vmax.f32 %v5843_v1, %v11569_v28  ;;  %v5870_v14 = vrot.slane %v5191_v35, %v15186_v52  ;;  %v9035_v35 = vld [vmem:[#allocation3 + $0x12] sm:$0xff] }
 0x4fd   :  { %v8206_v0 = vrot.slane %v7716_v5, %v15235_v61  ;;  %v8523_v7 = vsel %vm8471_vm8, %v8198_v42, %v8522_v24  ;;  %v5877_v48 = vrot.slane %v5863_v18, %v15186_v52  ;;  %v4396_v21 = vadd.f32 %v16455_v59, %v16396_v13  ;;  %v16490_v62 = vpop.permute.xlu0 %4197  ;;  %v16493_v27 = vpop.permute.xlu1 %4207 }
 0x4fe   :  { %v8524_v49 = vsel %vm8473_vm9, %v8202_v17, %v8523_v7  ;;  %v7528_v19 = vmax.f32 %v5845_v56, %v11570_v34  ;;  %v5878_v41 = vcombine.high %v5870_v14, %v5870_v14  ;;  %v11575_v44 = vrot.slane %v5870_v14, 9  ;;  %8681 = vrot.lane.b32.xlu0 %v8938_v38, %s12094_s0  ;;  %v19222_v34 = vld [vmem:[#allocation155_spill] sm:$0xff] }
 0x4ff   :  { %v8525_v1 = vsel %vm8475_vm10, %v8206_v0, %v8524_v49  ;;  %v5879_v39 = vcombine.high %v5877_v48, %v5877_v48  ;;  %v11577_v26 = vrot.slane %v5877_v48, 9  ;;  %v4334_v18 = vmul.f32 %v16341_v60, %v16268_v20  ;;  %9067 = vrot.lane.b32.xlu1 %v9035_v35, %s12098_s29 }
 0x500   :  { %8606 = vst.msk [vmem:[#allocation3 + $0x81] sm:$0xff] %vm7781_vm2, %v8525_v1  ;;  %v11576_v13 = vrot.slane %v5878_v41, 9  ;;  %v7533_v59 = vmax.f32 %v5870_v14, %v11575_v44  ;;  %v3819_v56 = vmul.f32 %v16327_v8, %v16279_v46  ;;  %v3821_v4 = vmul.f32 %v16327_v8, %v16282_v32  ;;  %v19223_v14 = vld [vmem:[#allocation157_spill] sm:$0xff]  ;;  %v19224_v44 = vld [vmem:[#allocation68_spill] sm:$0xff] }
 0x501   :  { %v11578_v28 = vrot.slane %v5879_v39, 9  ;;  %v7535_v38 = vmax.f32 %v5877_v48, %v11577_v26  ;;  %v4398_v5 = vadd.f32 %v4334_v18, %v16405_v40  ;;  %v3822_v20 = vmul.f32 %v16327_v8, %v16289_v31  ;;  %v16508_v42 = vpop.permute.xlu0 %3685  ;;  %v16512_v49 = vpop.permute.xlu1 %3695  ;;  %v9133_v46 = vld [vmem:[#allocation3 + $0x20] sm:$0xff] }
 0x502   :  { %v7534_v17 = vmax.f32 %v5878_v41, %v11576_v13  ;;  %v7717_v24 = vmax.f32 %v7525_v50, %v7533_v59  ;;  %v3883_v0 = vadd.f32 %v3819_v56, %v19222_v34  ;;  %v3885_v7 = vadd.f32 %v3821_v4, %v19223_v14  ;;  %8778 = vrot.lane.b32.xlu0 %v9035_v35, %s12095_s26 }
 0x503   :  { %v7536_v32 = vmax.f32 %v5879_v39, %v11578_v28  ;;  %v7719_v48 = vmax.f32 %v7527_v2, %v7535_v38  ;;  %v3886_v40 = vadd.f32 %v3822_v20, %v19224_v44  ;;  %v3824_v31 = vmul.f32 %v16327_v8, %v16292_v29  ;;  %9165 = vrot.lane.b32.xlu1 %v9133_v46, %s12099_s30  ;;  %v19225_v39 = vld [vmem:[#allocation159_spill] sm:$0xff] }
 0x504   :  { %v7718_v50 = vmax.f32 %v7526_v55, %v7534_v17  ;;  %v8210_v41 = vrot.slane %v7717_v24, %v15235_v61  ;;  %v4852_v1 = vmul.f32 %v16377_v51, %v16302_v58  ;;  %v4854_v35 = vmul.f32 %v16377_v51, %v16305_v47 }
 0x505   :  { %v7720_v26 = vmax.f32 %v7528_v19, %v7536_v32  ;;  %v8218_v2 = vrot.slane %v7719_v48, %v15235_v61  ;;  %v3888_v18 = vadd.f32 %v3824_v31, %v19225_v39  ;;  %v4849_v29 = vmul.f32 %v16377_v51, %v16331_v36  ;;  %v16528_v13 = vpop.permute.xlu0 %3700  ;;  %v16535_v47 = vpop.permute.xlu1 %3710  ;;  %v9230_v19 = vld [vmem:[#allocation3 + $0x21] sm:$0xff] }
 0x506   :  { %v8214_v55 = vrot.slane %v7718_v50, %v15235_v61  ;;  %v4916_v59 = vadd.f32 %v4852_v1, %v16432_v63  ;;  %v4918_v56 = vadd.f32 %v4854_v35, %v16448_v33  ;;  %v4851_v58 = vmul.f32 %v16377_v51, %v16345_v37  ;;  %8875 = vrot.lane.b32.xlu0 %v9133_v46, %s12096_s27 }
 0x507   :  { %v8222_v4 = vrot.slane %v7720_v26, %v15235_v61  ;;  %v4913_v28 = vadd.f32 %v4849_v29, %v4396_v21  ;;  %v4336_v36 = vmul.f32 %v16341_v60, %v16368_v57  ;;  %v4338_v38 = vmul.f32 %v16341_v60, %v16381_v6  ;;  %9262 = vrot.lane.b32.xlu1 %v9230_v19, %s12100_s16  ;;  %v16544_v63 = vld [vmem:[#allocation3 + $0x82] sm:$0xff] }
 0x508   :  { %19226 = vst [vmem:[#allocation181_spill] sm:$0xff] %v16544_v63  ;;  %v8526_v37 = vsel %vm8463_vm4, %v8214_v55, %v8210_v41  ;;  %v4989_v33 = vadd.f32 %v16297_v23, %v4916_v59  ;;  %v4991_v20 = vadd.f32 %v16297_v23, %v4918_v56  ;;  %v4915_v17 = vadd.f32 %v4851_v58, %v4398_v5  ;;  %v9036_v29 = vld [vmem:[#allocation3 + $0x22] sm:$0xff]  ;;  %v19230_v58 = vld [vmem:[#allocation160_spill] sm:$0xff] }
 0x509   :  { %9349 = vst.msk [vmem:[#allocation5 + $0x68] sm:$0xff] %vm7781_vm2, %v16544_v63  ;;  %v8527_v57 = vsel %vm8465_vm5, %v8218_v2, %v8526_v37  ;;  %v4986_v21 = vadd.f32 %v16297_v23, %v4913_v28  ;;  %v16553_v6 = vadd.f32 %v4336_v36, %v3883_v0  ;;  %v16555_v24 = vadd.f32 %v4338_v38, %v3885_v7  ;;  %v16557_v34 = vpop.permute.xlu0 %4699  ;;  %v16563_v5 = vpop.permute.xlu1 %4709 }
 0x50a   :  { %v5053_v14 = vmax.f32 %v4989_v33, 0.0  ;;  %v5055_v46 = vmax.f32 %v4991_v20, 0.0  ;;  %v4988_v32 = vadd.f32 %v16297_v23, %v4915_v17  ;;  %v16561_v48 = vsel %vm8467_vm6, %v8222_v4, %v8527_v57  ;;  %19227 = vst [vmem:[#allocation182_spill] sm:$0xff] %v16563_v5  ;;  %8972 = vrot.lane.b32.xlu0 %v9230_v19, %s12097_s28 }
 0x50b   :  { %v5050_v44 = vmax.f32 %v4986_v21, 0.0  ;;  %v4339_v0 = vmul.f32 %v16341_v60, %v16392_v54  ;;  %v4341_v7 = vmul.f32 %v16341_v60, %v16400_v45  ;;  %v3823_v31 = vmul.f32 %v16327_v8, %v16412_v3  ;;  %8683 = vrot.lane.b32.xlu1 %v9230_v19, %s12094_s0  ;;  %v19228_v45 = vld [vmem:[#allocation158_spill] sm:$0xff] }
 0x50c   :  { %v5123_v50 = vmul.f32 %v16321_v12, %v5053_v14  ;;  %v5125_v41 = vmul.f32 %v16321_v12, %v5055_v46  ;;  %v5052_v1 = vmax.f32 %v4988_v32, 0.0  ;;  %v3825_v35 = vmul.f32 %v16327_v8, %v16419_v30 }
 0x50d   :  { %v5120_v26 = vmul.f32 %v16321_v12, %v5050_v44  ;;  %v16578_v2 = vadd.f32 %v4339_v0, %v3886_v40  ;;  %v16580_v54 = vadd.f32 %v4341_v7, %v3888_v18  ;;  %v16583_v39 = vadd.f32 %v3823_v31, %v19228_v45  ;;  %v16585_v3 = vpop.permute.xlu0 %4714  ;;  %v16593_v19 = vpop.permute.xlu1 %4724 }
 0x50e   :  { %19229 = vst [vmem:[#allocation183_spill] sm:$0xff] %v16585_v3  ;;  %v5193_v55 = vadd.f32 %v16351_v53, %v5123_v50  ;;  %v5195_v59 = vadd.f32 %v16351_v53, %v5125_v41  ;;  %v5122_v56 = vmul.f32 %v16321_v12, %v5052_v1  ;;  %v16591_v30 = vadd.f32 %v3825_v35, %v19230_v58 }
 0x50f   :  { %19231 = vst [vmem:[#allocation184_spill] sm:$0xff] %v16593_v19  ;;  %9069 = vrot.lane.b32.xlu0 %v9036_v29, %s12098_s29  ;;  %v5190_v40 = vadd.f32 %v16351_v53, %v5120_v26  ;;  %v3826_v18 = vmul.f32 %v16327_v8, %v16436_v22  ;;  %v16601_v4 = vmul.f32 %v16327_v8, %v16441_v11  ;;  %v19232_v11 = vld [vmem:[#allocation161_spill] sm:$0xff] }
 0x510   :  { %v16605_v28 = vmul.f32 %v16377_v51, %v16457_v10  ;;  %8780 = vrot.lane.b32.xlu1 %v9036_v29, %s12095_s26  ;;  %v5897_v36 = vcombine.high %v5193_v55, %v5193_v55  ;;  %v5904_v38 = vrot.slane %v5193_v55, %v15186_v52  ;;  %v5931_v37 = vcombine.high %v5195_v59, %v5195_v59  ;;  %v9134_v10 = vld [vmem:[#allocation3 + $0x30] sm:$0xff] }
 0x511   :  { %v5938_v33 = vrot.slane %v5195_v59, %v15186_v52  ;;  %v5846_v20 = vcombine.high %v5190_v40, %v5190_v40  ;;  %v5853_v17 = vrot.slane %v5190_v40, %v15186_v52  ;;  %v16612_v22 = vadd.f32 %v16351_v53, %v5122_v56  ;;  %v16617_v21 = vpop.permute.xlu0 %4202  ;;  %v16621_v0 = vpop.permute.xlu1 %4212  ;;  %v9231_v40 = vld [vmem:[#allocation3 + $0x31] sm:$0xff] }
 0x512   :  { %v16615_v57 = vadd.f32 %v3826_v18, %v19232_v11  ;;  %19233 = vst [vmem:[#allocation185_spill] sm:$0xff] %v16617_v21  ;;  %v5911_v14 = vrot.slane %v5897_v36, %v15186_v52  ;;  %v5912_v46 = vcombine.high %v5904_v38, %v5904_v38  ;;  %v11583_v32 = vrot.slane %v5904_v38, 9  ;;  %19234 = vst [vmem:[#allocation186_spill] sm:$0xff] %v16621_v0 }
 0x513   :  { %v5945_v44 = vrot.slane %v5931_v37, %v15186_v52  ;;  %9167 = vrot.lane.b32.xlu0 %v9134_v10, %s12099_s30  ;;  %v5946_v7 = vcombine.high %v5938_v33, %v5938_v33  ;;  %v11591_v31 = vrot.slane %v5938_v33, 9  ;;  %v5860_v50 = vrot.slane %v5846_v20, %v15186_v52 }
 0x514   :  { %v5861_v41 = vcombine.high %v5853_v17, %v5853_v17  ;;  %8877 = vrot.lane.b32.xlu1 %v9134_v10, %s12096_s27  ;;  %v5913_v1 = vcombine.high %v5911_v14, %v5911_v14  ;;  %v11584_v35 = vrot.slane %v5912_v46, 9  ;;  %v11585_v26 = vrot.slane %v5911_v14, 9 }
 0x515   :  { %v7541_v45 = vmax.f32 %v5904_v38, %v11583_v32  ;;  %v5947_v29 = vcombine.high %v5945_v44, %v5945_v44  ;;  %v11592_v55 = vrot.slane %v5946_v7, 9  ;;  %v11593_v59 = vrot.slane %v5945_v44, 9  ;;  %v16626_v58 = vpop.permute.xlu0 %4217  ;;  %v16628_v63 = vpop.permute.xlu1 %4227 }
 0x516   :  { %v7549_v56 = vmax.f32 %v5938_v33, %v11591_v31  ;;  %19235 = vst [vmem:[#allocation276_spill] sm:$0xff] %v16626_v58  ;;  %v11586_v18 = vrot.slane %v5913_v1, 9  ;;  %v7542_v36 = vmax.f32 %v5912_v46, %v11584_v35  ;;  %v7543_v37 = vmax.f32 %v5911_v14, %v11585_v26  ;;  %19236 = vst [vmem:[#allocation277_spill] sm:$0xff] %v16628_v63 }
 0x517   :  { %v5862_v11 = vcombine.high %v5860_v50, %v5860_v50  ;;  %9264 = vrot.lane.b32.xlu0 %v9231_v40, %s12100_s16  ;;  %v11594_v20 = vrot.slane %v5947_v29, 9  ;;  %v7550_v10 = vmax.f32 %v5946_v7, %v11592_v55  ;;  %v7551_v0 = vmax.f32 %v5945_v44, %v11593_v59  ;;  %v9037_v44 = vld [vmem:[#allocation3 + $0x32] sm:$0xff] }
 0x518   :  { %v7725_v21 = vmax.f32 %v7541_v45, %v7549_v56  ;;  %8974 = vrot.lane.b32.xlu1 %v9231_v40, %s12097_s28  ;;  %v7544_v38 = vmax.f32 %v5913_v1, %v11586_v18  ;;  %v11571_v32 = vrot.slane %v5853_v17, 9  ;;  %v11572_v33 = vrot.slane %v5861_v41, 9 }
 0x519   :  { %v11573_v31 = vrot.slane %v5860_v50, 9  ;;  %v7552_v58 = vmax.f32 %v5947_v29, %v11594_v20  ;;  %v7726_v19 = vmax.f32 %v7542_v36, %v7550_v10  ;;  %v7727_v3 = vmax.f32 %v7543_v37, %v7551_v0  ;;  %v16633_v46 = vpop.permute.xlu0 %3705  ;;  %v16635_v7 = vpop.permute.xlu1 %3715 }
 0x51a   :  { %v8242_v14 = vrot.slane %v7725_v21, %v15235_v61  ;;  %v11574_v35 = vrot.slane %v5862_v11, 9  ;;  %v7529_v26 = vmax.f32 %v5853_v17, %v11571_v32  ;;  %v7530_v63 = vmax.f32 %v5861_v41, %v11572_v33 }
 0x51b   :  { %v7531_v5 = vmax.f32 %v5860_v50, %v11573_v31  ;;  %8685 = vrot.lane.b32.xlu0 %v9231_v40, %s12094_s0  ;;  %v7728_v1 = vmax.f32 %v7544_v38, %v7552_v58  ;;  %v8246_v45 = vrot.slane %v7726_v19, %v15235_v61  ;;  %v8250_v29 = vrot.slane %v7727_v3, %v15235_v61  ;;  %v19237_v50 = vld [vmem:[#allocation163_spill] sm:$0xff] }
 0x51c   :  { %v5880_v0 = vcombine.high %v16612_v22, %v16612_v22  ;;  %9071 = vrot.lane.b32.xlu1 %v9037_v44, %s12098_s29  ;;  %v7532_v21 = vmax.f32 %v5862_v11, %v11574_v35  ;;  %v5887_v17 = vrot.slane %v16612_v22, %v15186_v52  ;;  %v16647_v41 = vadd.f32 %v16601_v4, %v19237_v50 }
 0x51d   :  { %v4917_v55 = vadd.f32 %v16605_v28, %v16553_v6  ;;  %v8254_v19 = vrot.slane %v7728_v1, %v15235_v61  ;;  %v8533_v3 = vsel %vm8463_vm4, %v8246_v45, %v8242_v14  ;;  %v4855_v56 = vmul.f32 %v16377_v51, %v16459_v15  ;;  %v16656_v58 = vpop.permute.xlu0 %3720  ;;  %v16660_v36 = vpop.permute.xlu1 %3730  ;;  %v9135_v6 = vld [vmem:[#allocation3 + $0x40] sm:$0xff] }
 0x51e   :  { %v5894_v59 = vrot.slane %v5880_v0, %v15186_v52  ;;  %v8534_v22 = vsel %vm8465_vm5, %v8250_v29, %v8533_v3  ;;  %v5895_v40 = vcombine.high %v5887_v17, %v5887_v17  ;;  %v11579_v18 = vrot.slane %v5887_v17, 9 }
 0x51f   :  { %v4990_v4 = vadd.f32 %v16297_v23, %v4917_v55  ;;  %8782 = vrot.lane.b32.xlu0 %v9037_v44, %s12095_s26  ;;  %v4919_v11 = vadd.f32 %v4855_v56, %v16555_v24  ;;  %v16665_v20 = vsel %vm8467_vm6, %v8254_v19, %v8534_v22  ;;  %v4856_v32 = vmul.f32 %v16377_v51, %v16464_v25  ;;  %v9232_v25 = vld [vmem:[#allocation3 + $0x41] sm:$0xff] }
 0x520   :  { %v5896_v28 = vcombine.high %v5894_v59, %v5894_v59  ;;  %v11581_v37 = vrot.slane %v5894_v59, 9  ;;  %9169 = vrot.lane.b32.xlu1 %v9135_v6, %s12099_s30  ;;  %v11580_v15 = vrot.slane %v5895_v40, 9  ;;  %v7537_v10 = vmax.f32 %v5887_v17, %v11579_v18 }
 0x521   :  { %v5054_v38 = vmax.f32 %v4990_v4, 0.0  ;;  %v4992_v14 = vadd.f32 %v16297_v23, %v4919_v11  ;;  %v4858_v35 = vmul.f32 %v16377_v51, %v16468_v9  ;;  %v16673_v44 = vpop.permute.xlu0 %4719  ;;  %v4920_v29 = vadd.f32 %v4856_v32, %v16578_v2  ;;  %v16677_v0 = vpop.permute.xlu1 %4729 }
 0x522   :  { %v11582_v33 = vrot.slane %v5896_v28, 9  ;;  %v7539_v31 = vmax.f32 %v5894_v59, %v11581_v37  ;;  %v7538_v24 = vmax.f32 %v5895_v40, %v11580_v15  ;;  %v7721_v1 = vmax.f32 %v7529_v26, %v7537_v10 }
 0x523   :  { %v5124_v45 = vmul.f32 %v16321_v12, %v5054_v38  ;;  %8879 = vrot.lane.b32.xlu0 %v9135_v6, %s12096_s27  ;;  %v5056_v55 = vmax.f32 %v4992_v14, 0.0  ;;  %v4922_v19 = vadd.f32 %v4858_v35, %v16580_v54  ;;  %v4993_v59 = vadd.f32 %v16297_v23, %v4920_v29  ;;  %v9038_v35 = vld [vmem:[#allocation3 + $0x42] sm:$0xff] }
 0x524   :  { %v7540_v17 = vmax.f32 %v5896_v28, %v11582_v33  ;;  %v7723_v50 = vmax.f32 %v7531_v5, %v7539_v31  ;;  %9266 = vrot.lane.b32.xlu1 %v9232_v25, %s12100_s16  ;;  %v7722_v9 = vmax.f32 %v7530_v63, %v7538_v24  ;;  %v8226_v3 = vrot.slane %v7721_v1, %v15235_v61 }
 0x525   :  { %v5194_v26 = vadd.f32 %v16351_v53, %v5124_v45  ;;  %v5126_v22 = vmul.f32 %v16321_v12, %v5056_v55  ;;  %v4995_v40 = vadd.f32 %v16297_v23, %v4922_v19  ;;  %v16688_v5 = vpop.permute.xlu0 %4734  ;;  %v16694_v6 = vpop.permute.xlu1 %4744  ;;  %v5057_v37 = vmax.f32 %v4993_v59, 0.0 }
 0x526   :  { %v7724_v2 = vmax.f32 %v7532_v21, %v7540_v17  ;;  %v8234_v56 = vrot.slane %v7723_v50, %v15235_v61  ;;  %v8230_v54 = vrot.slane %v7722_v9, %v15235_v61  ;;  %v8529_v63 = vsel %vm8469_vm7, %v8226_v3, %v16561_v48 }
 0x527   :  { %v5914_v18 = vcombine.high %v5194_v26, %v5194_v26  ;;  %v5921_v4 = vrot.slane %v5194_v26, %v15186_v52  ;;  %8976 = vrot.lane.b32.xlu0 %v9232_v25, %s12097_s28  ;;  %v5196_v28 = vadd.f32 %v16351_v53, %v5126_v22  ;;  %v5059_v23 = vmax.f32 %v4995_v40, 0.0 }
 0x528   :  { %v8238_v21 = vrot.slane %v7724_v2, %v15235_v61  ;;  %8687 = vrot.lane.b32.xlu1 %v9232_v25, %s12094_s0  ;;  %v8530_v11 = vsel %vm8471_vm8, %v8230_v54, %v8529_v63  ;;  %v5127_v31 = vmul.f32 %v16321_v12, %v5057_v37  ;;  %v9136_v63 = vld [vmem:[#allocation3 + $0x50] sm:$0xff] }
 0x529   :  { %v5928_v15 = vrot.slane %v5914_v18, %v15186_v52  ;;  %v5929_v48 = vcombine.high %v5921_v4, %v5921_v4  ;;  %v11587_v10 = vrot.slane %v5921_v4, 9  ;;  %v8531_v38 = vsel %vm8473_vm9, %v8234_v56, %v8530_v11  ;;  %v16705_v14 = vpop.permute.xlu0 %4222  ;;  %v16708_v25 = vpop.permute.xlu1 %4232 }
 0x52a   :  { %v5948_v32 = vcombine.high %v5196_v28, %v5196_v28  ;;  %v5955_v33 = vrot.slane %v5196_v28, %v15186_v52  ;;  %v8532_v24 = vsel %vm8475_vm10, %v8238_v21, %v8531_v38  ;;  %v5197_v59 = vadd.f32 %v16351_v53, %v5127_v31 }
 0x52b   :  { %v5930_v1 = vcombine.high %v5928_v15, %v5928_v15  ;;  %v11588_v45 = vrot.slane %v5929_v48, 9  ;;  %v11589_v29 = vrot.slane %v5928_v15, 9  ;;  %9073 = vrot.lane.b32.xlu0 %v9038_v35, %s12098_s29  ;;  %8607 = vst.msk [vmem:[#allocation3 + $0xb1] sm:$0xff] %vm7781_vm2, %v8532_v24  ;;  %v7545_v17 = vmax.f32 %v5921_v4, %v11587_v10 }
 0x52c   :  { %v5962_v50 = vrot.slane %v5948_v32, %v15186_v52  ;;  %v5963_v55 = vcombine.high %v5955_v33, %v5955_v33  ;;  %v11595_v19 = vrot.slane %v5955_v33, 9  ;;  %8784 = vrot.lane.b32.xlu1 %v9038_v35, %s12095_s26  ;;  %v5965_v4 = vcombine.high %v5197_v59, %v5197_v59 }
 0x52d   :  { %v11590_v9 = vrot.slane %v5930_v1, 9  ;;  %v7546_v3 = vmax.f32 %v5929_v48, %v11588_v45  ;;  %v7547_v26 = vmax.f32 %v5928_v15, %v11589_v29  ;;  %v16715_v54 = vpop.permute.xlu0 %4237  ;;  %v5972_v21 = vrot.slane %v5197_v59, %v15186_v52  ;;  %v16719_v37 = vpop.permute.xlu1 %4247  ;;  %v9233_v45 = vld [vmem:[#allocation3 + $0x51] sm:$0xff] }
 0x52e   :  { %v5964_v2 = vcombine.high %v5962_v50, %v5962_v50  ;;  %v11596_v56 = vrot.slane %v5963_v55, 9  ;;  %v11597_v22 = vrot.slane %v5962_v50, 9  ;;  %v7553_v40 = vmax.f32 %v5955_v33, %v11595_v19 }
 0x52f   :  { %v7548_v18 = vmax.f32 %v5930_v1, %v11590_v9  ;;  %v5129_v28 = vmul.f32 %v16321_v12, %v5059_v23  ;;  %9171 = vrot.lane.b32.xlu0 %v9136_v63, %s12099_s30  ;;  %v5979_v38 = vrot.slane %v5965_v4, %v15186_v52  ;;  %v5980_v32 = vcombine.high %v5972_v21, %v5972_v21 }
 0x530   :  { %v11598_v11 = vrot.slane %v5964_v2, 9  ;;  %v7554_v15 = vmax.f32 %v5963_v55, %v11596_v56  ;;  %v7555_v48 = vmax.f32 %v5962_v50, %v11597_v22  ;;  %v7729_v10 = vmax.f32 %v7545_v17, %v7553_v40  ;;  %8881 = vrot.lane.b32.xlu1 %v9136_v63, %s12096_s27 }
 0x531   :  { %v11599_v33 = vrot.slane %v5972_v21, 9  ;;  %v5199_v31 = vadd.f32 %v16351_v53, %v5129_v28  ;;  %v16726_v23 = vpop.permute.xlu0 %3725  ;;  %v5981_v29 = vcombine.high %v5979_v38, %v5979_v38  ;;  %v11600_v55 = vrot.slane %v5980_v32, 9  ;;  %v16728_v19 = vpop.permute.xlu1 %3735 }
 0x532   :  { %v7556_v35 = vmax.f32 %v5964_v2, %v11598_v11  ;;  %v7730_v24 = vmax.f32 %v7546_v3, %v7554_v15  ;;  %v7731_v1 = vmax.f32 %v7547_v26, %v7555_v48  ;;  %v8258_v12 = vrot.slane %v7729_v10, %v15235_v61  ;;  %v16731_v9 = vld [vmem:[#allocation3 + $0xb0] sm:$0xff] }
 0x533   :  { %v11601_v50 = vrot.slane %v5979_v38, 9  ;;  %v7557_v17 = vmax.f32 %v5972_v21, %v11599_v33  ;;  %9268 = vrot.lane.b32.xlu0 %v9233_v45, %s12100_s16  ;;  %8640 = vst.msk [vmem:[#allocation5 + $0x90] sm:$0xff] %vm7781_vm2, %v16731_v9  ;;  %v11602_v2 = vrot.slane %v5981_v29, 9  ;;  %v7558_v56 = vmax.f32 %v5980_v32, %v11600_v55 }
 0x534   :  { %v7732_v59 = vmax.f32 %v7548_v18, %v7556_v35  ;;  %v8262_v53 = vrot.slane %v7730_v24, %v15235_v61  ;;  %v8266_v3 = vrot.slane %v7731_v1, %v15235_v61  ;;  %v8536_v26 = vsel %vm8469_vm7, %v8258_v12, %v16665_v20  ;;  %8978 = vrot.lane.b32.xlu1 %v9233_v45, %s12097_s28 }
 0x535   :  { %v7559_v22 = vmax.f32 %v5979_v38, %v11601_v50  ;;  %v5999_v40 = vcombine.high %v5199_v31, %v5199_v31  ;;  %v6006_v4 = vrot.slane %v5199_v31, %v15186_v52  ;;  %v4340_v21 = vmul.f32 %v16341_v60, %v16474_v16  ;;  %v16745_v28 = vpop.permute.xlu0 %3740  ;;  %v16751_v10 = vpop.permute.xlu1 %3750  ;;  %v9039_v38 = vld [vmem:[#allocation3 + $0x52] sm:$0xff] }
 0x536   :  { %v8270_v63 = vrot.slane %v7732_v59, %v15235_v61  ;;  %v8537_v18 = vsel %vm8471_vm8, %v8262_v53, %v8536_v26  ;;  %v7560_v11 = vmax.f32 %v5981_v29, %v11602_v2  ;;  %v4342_v48 = vmul.f32 %v16341_v60, %v16476_v43 }
 0x537   :  { %v8538_v20 = vsel %vm8473_vm9, %v8266_v3, %v8537_v18  ;;  %v6013_v15 = vrot.slane %v5999_v40, %v15186_v52  ;;  %8689 = vrot.lane.b32.xlu0 %v9233_v45, %s12094_s0  ;;  %v6014_v33 = vcombine.high %v6006_v4, %v6006_v4  ;;  %v11607_v31 = vrot.slane %v6006_v4, 9  ;;  %v19240_v18 = vld [vmem:[#allocation164_spill] sm:$0xff] }
 0x538   :  { %v8539_v32 = vsel %vm8475_vm10, %v8270_v63, %v8538_v20  ;;  %v4404_v16 = vadd.f32 %v4340_v21, %v16583_v39  ;;  %9075 = vrot.lane.b32.xlu1 %v9039_v38, %s12098_s29  ;;  %v4406_v1 = vadd.f32 %v4342_v48, %v16591_v30  ;;  %v4343_v43 = vmul.f32 %v16341_v60, %v16490_v62  ;;  %v9137_v62 = vld [vmem:[#allocation3 + $0x60] sm:$0xff] }
 0x539   :  { %8608 = vst.msk [vmem:[#allocation3 + $0xc1] sm:$0xff] %vm7781_vm2, %v8539_v32  ;;  %v6015_v35 = vcombine.high %v6013_v15, %v6013_v15  ;;  %v11609_v24 = vrot.slane %v6013_v15, 9  ;;  %v11608_v12 = vrot.slane %v6014_v33, 9  ;;  %v7565_v45 = vmax.f32 %v6006_v4, %v11607_v31  ;;  %v16765_v39 = vpop.permute.xlu0 %4739  ;;  %v16770_v3 = vpop.permute.xlu1 %4749  ;;  %v19242_v48 = vld [vmem:[#allocation165_spill] sm:$0xff]  ;;  %v19243_v32 = vld [vmem:[#allocation182_spill] sm:$0xff]  ;;  %v19245_v31 = vld [vmem:[#allocation167_spill] sm:$0xff] }
 0x53a   :  { %v4345_v29 = vmul.f32 %v16341_v60, %v16493_v27  ;;  %v3827_v55 = vmul.f32 %v16327_v8, %v16508_v42  ;;  %v4407_v53 = vadd.f32 %v4343_v43, %v16615_v57  ;;  %v3829_v30 = vmul.f32 %v16327_v8, %v16512_v49  ;;  %19238 = vst [vmem:[#allocation187_spill] sm:$0xff] %v16770_v3  ;;  %v19239_v27 = vld [vmem:[#allocation162_spill] sm:$0xff] }
 0x53b   :  { %v11610_v50 = vrot.slane %v6015_v35, 9  ;;  %v7567_v59 = vmax.f32 %v6013_v15, %v11609_v24  ;;  %8786 = vrot.lane.b32.xlu0 %v9039_v38, %s12095_s26  ;;  %v7566_v26 = vmax.f32 %v6014_v33, %v11608_v12  ;;  %v7733_v2 = vmax.f32 %v7557_v17, %v7565_v45  ;;  %v16780_v8 = vld [vmem:[%s18222_s1 + $0x6] ss:$0 sm:$0xff]  ;;  %v19246_v24 = vld [vmem:[#allocation183_spill] sm:$0xff] }
 0x53c   :  { %v4409_v60 = vadd.f32 %v4345_v29, %v16647_v41  ;;  %v3891_v42 = vadd.f32 %v3827_v55, %v19239_v27  ;;  %9173 = vrot.lane.b32.xlu1 %v9137_v62, %s12099_s30  ;;  %v3893_v57 = vadd.f32 %v3829_v30, %v19240_v18  ;;  %v3830_v49 = vmul.f32 %v16780_v8, %v16528_v13  ;;  %v16811_v55 = vld [vmem:[%s18222_s1 + $0x8] ss:$0 sm:$0xff] }
 0x53d   :  { %v7568_v40 = vmax.f32 %v6015_v35, %v11610_v50  ;;  %v7735_v63 = vmax.f32 %v7559_v22, %v7567_v59  ;;  %v7734_v4 = vmax.f32 %v7558_v56, %v7566_v26  ;;  %v8274_v17 = vrot.slane %v7733_v2, %v15235_v61  ;;  %v16789_v22 = vpop.permute.xlu0 %4754  ;;  %v16795_v13 = vpop.permute.xlu1 %4764  ;;  %v9234_v56 = vld [vmem:[#allocation3 + $0x61] sm:$0xff]  ;;  %v19248_v50 = vld [vmem:[#allocation184_spill] sm:$0xff] }
 0x53e   :  { %v3832_v41 = vmul.f32 %v16780_v8, %v16535_v47  ;;  %v4857_v21 = vmul.f32 %v16377_v51, %v16557_v34  ;;  %19241 = vst [vmem:[#allocation188_spill] sm:$0xff] %v16789_v22  ;;  %v3894_v38 = vadd.f32 %v3830_v49, %v19242_v48  ;;  %v4859_v33 = vmul.f32 %v16377_v51, %v19243_v32  ;;  %v19249_v59 = vld [vmem:[#allocation185_spill] sm:$0xff]  ;;  %v19250_v27 = vld [vmem:[#allocation186_spill] sm:$0xff] }
 0x53f   :  { %v7736_v20 = vmax.f32 %v7560_v11, %v7568_v40  ;;  %v8282_v15 = vrot.slane %v7735_v63, %v15235_v61  ;;  %19244 = vst [vmem:[#allocation189_spill] sm:$0xff] %v16795_v13  ;;  %8883 = vrot.lane.b32.xlu0 %v9137_v62, %s12096_s27  ;;  %v8278_v47 = vrot.slane %v7734_v4, %v15235_v61  ;;  %v16830_v62 = vld [vmem:[%s18223_s2] ss:$0 sm:$0xff] }
 0x540   :  { %v3896_v35 = vadd.f32 %v3832_v41, %v19245_v31  ;;  %v4921_v34 = vadd.f32 %v4857_v21, %v4404_v16  ;;  %v4860_v11 = vmul.f32 %v16377_v51, %v19246_v24  ;;  %9270 = vrot.lane.b32.xlu1 %v9234_v56, %s12100_s16  ;;  %v16803_v43 = vld [vmem:[#allocation3 + $0xc0] sm:$0xff]  ;;  %v4923_v29 = vadd.f32 %v4859_v33, %v4406_v1 }
 0x541   :  { %v16805_v12 = vld [vmem:[#allocation3 + $0xc2] sm:$0xff]  ;;  %v8286_v45 = vrot.slane %v7736_v20, %v15235_v61  ;;  %v4862_v16 = vmul.f32 %v16811_v55, %v19248_v50  ;;  %8641 = vst.msk [vmem:[#allocation5 + $0xa0] sm:$0xff] %vm7781_vm2, %v16803_v43  ;;  %v8540_v1 = vsel %vm8463_vm4, %v8278_v47, %v8274_v17  ;;  %v16835_v63 = vpop.permute.xlu0 %4242  ;;  %v16841_v17 = vpop.permute.xlu1 %4252  ;;  %v19254_v33 = vld [vmem:[#allocation277_spill] sm:$0xff]  ;;  %v3833_v24 = vmul.f32 %v16780_v8, %v16635_v7 }
 0x542   :  { %19247 = vst [vmem:[#allocation279_spill] sm:$0xff] %v16805_v12  ;;  %v16818_v51 = vld [vmem:[%s18222_s1 + $0x7] ss:$0 sm:$0xff]  ;;  %9351 = vst.msk [vmem:[#allocation5 + $0x88] sm:$0xff] %vm7781_vm2, %v16805_v12  ;;  %v4994_v26 = vadd.f32 %v16830_v62, %v4921_v34  ;;  %v4924_v2 = vadd.f32 %v4860_v11, %v4407_v53  ;;  %v8541_v18 = vsel %vm8465_vm5, %v8282_v15, %v8540_v1  ;;  %v16859_v31 = vld [vmem:[%s18224_s3] ss:$0 sm:$0xff] }
 0x543   :  { %v4344_v30 = vmul.f32 %v16818_v51, %v19249_v59  ;;  %v4346_v40 = vmul.f32 %v16818_v51, %v19250_v27  ;;  %19251 = vst [vmem:[#allocation190_spill] sm:$0xff] %v16835_v63  ;;  %v4996_v49 = vadd.f32 %v16830_v62, %v4923_v29  ;;  %v4926_v4 = vadd.f32 %v4862_v16, %v4409_v60  ;;  %v19253_v60 = vld [vmem:[#allocation276_spill] sm:$0xff] }
 0x544   :  { %19252 = vst [vmem:[#allocation191_spill] sm:$0xff] %v16841_v17  ;;  %8980 = vrot.lane.b32.xlu0 %v9234_v56, %s12097_s28  ;;  %v5058_v21 = vmax.f32 %v4994_v26, 0.0  ;;  %v16845_v20 = vsel %vm8467_vm6, %v8286_v45, %v8541_v18  ;;  %v4997_v53 = vadd.f32 %v16830_v62, %v4924_v2  ;;  %8691 = vrot.lane.b32.xlu1 %v9234_v56, %s12094_s0  ;;  %v9040_v45 = vld [vmem:[#allocation3 + $0x62] sm:$0xff] }
 0x545   :  { %v16839_v41 = vadd.f32 %v4344_v30, %v3891_v42  ;;  %v16848_v48 = vadd.f32 %v4346_v40, %v3893_v57  ;;  %v5060_v15 = vmax.f32 %v4996_v49, 0.0  ;;  %v4999_v32 = vadd.f32 %v16830_v62, %v4926_v4  ;;  %v16866_v11 = vpop.permute.xlu0 %4257  ;;  %v16873_v30 = vpop.permute.xlu1 %4267  ;;  %v19257_v26 = vld [vmem:[#allocation166_spill] sm:$0xff] }
 0x546   :  { %v4347_v42 = vmul.f32 %v16818_v51, %v19253_v60  ;;  %v4349_v47 = vmul.f32 %v16818_v51, %v19254_v33  ;;  %v5128_v34 = vmul.f32 %v16859_v31, %v5058_v21  ;;  %v5061_v57 = vmax.f32 %v4997_v53, 0.0  ;;  %19255 = vst [vmem:[#allocation192_spill] sm:$0xff] %v16866_v11  ;;  %19256 = vst [vmem:[#allocation280_spill] sm:$0xff] %v16873_v30  ;;  %v8615_v4 = vld [vmem:[#allocation3] sm:$0xff] }
 0x547   :  { %v3831_v56 = vmul.f32 %v16780_v8, %v16633_v46  ;;  %v5130_v29 = vmul.f32 %v16859_v31, %v5060_v15  ;;  %v5063_v50 = vmax.f32 %v4999_v32, 0.0  ;;  %v16879_v46 = vld [vmem:[%s18225_s4] ss:$0 sm:$0xff]  ;;  %v3834_v18 = vmul.f32 %v16780_v8, %v16656_v58  ;;  %8631 = vst.msk [vmem:[#allocation5] sm:$0xff] %vm7781_vm2, %v8615_v4  ;;  %v9235_v4 = vld [vmem:[#allocation3 + $0x71] sm:$0xff] }
 0x548   :  { %v16869_v16 = vadd.f32 %v4347_v42, %v3894_v38  ;;  %v16871_v59 = vadd.f32 %v4349_v47, %v3896_v35  ;;  %9077 = vrot.lane.b32.xlu0 %v9040_v45, %s12098_s29  ;;  %v5198_v7 = vadd.f32 %v16879_v46, %v5128_v34  ;;  %v5131_v1 = vmul.f32 %v16859_v31, %v5061_v57  ;;  %v19258_v38 = vld [vmem:[#allocation168_spill] sm:$0xff]  ;;  %v19260_v47 = vld [vmem:[#allocation169_spill] sm:$0xff] }
 0x549   :  { %v16884_v2 = vadd.f32 %v3831_v56, %v19257_v26  ;;  %v16887_v27 = vadd.f32 %v3833_v24, %v19258_v38  ;;  %8788 = vrot.lane.b32.xlu1 %v9040_v45, %s12095_s26  ;;  %v5200_v35 = vadd.f32 %v16879_v46, %v5130_v29  ;;  %v5133_v40 = vmul.f32 %v16859_v31, %v5063_v50  ;;  %v16904_v60 = vpop.permute.xlu0 %3745  ;;  %v9138_v42 = vld [vmem:[#allocation3 + $0x70] sm:$0xff]  ;;  %v16914_v57 = vpop.permute.xlu1 %3755 }
 0x54a   :  { %v16896_v49 = vmul.f32 %v16780_v8, %v16660_v36  ;;  %v5982_v21 = vcombine.high %v5198_v7, %v5198_v7  ;;  %v5989_v53 = vrot.slane %v5198_v7, %v15186_v52  ;;  %v5201_v15 = vadd.f32 %v16879_v46, %v5131_v1  ;;  %19259 = vst [vmem:[#allocation281_spill] sm:$0xff] %v16904_v60 }
 0x54b   :  { %v16902_v32 = vmul.f32 %v16811_v55, %v16673_v44  ;;  %v6016_v58 = vcombine.high %v5200_v35, %v5200_v35  ;;  %v6023_v33 = vrot.slane %v5200_v35, %v15186_v52  ;;  %v16909_v36 = vadd.f32 %v16879_v46, %v5133_v40  ;;  %19261 = vst [vmem:[#allocation193_spill] sm:$0xff] %v16914_v57 }
 0x54c   :  { %v16912_v34 = vadd.f32 %v3834_v18, %v19260_v47  ;;  %9175 = vrot.lane.b32.xlu0 %v9138_v42, %s12099_s30  ;;  %v5996_v44 = vrot.slane %v5982_v21, %v15186_v52  ;;  %v5997_v56 = vcombine.high %v5989_v53, %v5989_v53  ;;  %v11603_v24 = vrot.slane %v5989_v53, 9 }
 0x54d   :  { %v6033_v45 = vcombine.high %v5201_v15, %v5201_v15  ;;  %8885 = vrot.lane.b32.xlu1 %v9138_v42, %s12096_s27  ;;  %v6030_v29 = vrot.slane %v6016_v58, %v15186_v52  ;;  %v6031_v50 = vcombine.high %v6023_v33, %v6023_v33  ;;  %v11611_v7 = vrot.slane %v6023_v33, 9  ;;  %v16921_v18 = vpop.permute.xlu0 %3760  ;;  %v16923_v12 = vpop.permute.xlu1 %3770 }
 0x54e   :  { %v6040_v1 = vrot.slane %v5201_v15, %v15186_v52  ;;  %v5998_v26 = vcombine.high %v5996_v44, %v5996_v44  ;;  %v11604_v38 = vrot.slane %v5997_v56, 9  ;;  %v11605_v35 = vrot.slane %v5996_v44, 9  ;;  %19262 = vst [vmem:[#allocation194_spill] sm:$0xff] %v16921_v18  ;;  %19263 = vst [vmem:[#allocation195_spill] sm:$0xff] %v16923_v12 }
 0x54f   :  { %v7561_v40 = vmax.f32 %v5989_v53, %v11603_v24  ;;  %v6032_v47 = vcombine.high %v6030_v29, %v6030_v29  ;;  %v11612_v21 = vrot.slane %v6031_v50, 9  ;;  %v11613_v57 = vrot.slane %v6030_v29, 9 }
 0x550   :  { %v7569_v60 = vmax.f32 %v6023_v33, %v11611_v7  ;;  %9272 = vrot.lane.b32.xlu0 %v9235_v4, %s12100_s16  ;;  %v11606_v42 = vrot.slane %v5998_v26, 9  ;;  %v7562_v58 = vmax.f32 %v5997_v56, %v11604_v38  ;;  %v7563_v30 = vmax.f32 %v5996_v44, %v11605_v35 }
 0x551   :  { %v6047_v15 = vrot.slane %v6033_v45, %v15186_v52  ;;  %8982 = vrot.lane.b32.xlu1 %v9235_v4, %s12097_s28  ;;  %v11614_v11 = vrot.slane %v6032_v47, 9  ;;  %v7570_v53 = vmax.f32 %v6031_v50, %v11612_v21  ;;  %v7571_v24 = vmax.f32 %v6030_v29, %v11613_v57  ;;  %v16928_v33 = vpop.permute.xlu0 %4759  ;;  %v16931_v44 = vpop.permute.xlu1 %4769  ;;  %v9041_v45 = vld [vmem:[#allocation3 + $0x72] sm:$0xff] }
 0x552   :  { %v7737_v18 = vmax.f32 %v7561_v40, %v7569_v60  ;;  %v7564_v17 = vmax.f32 %v5998_v26, %v11606_v42  ;;  %v6048_v63 = vcombine.high %v6040_v1, %v6040_v1  ;;  %v11615_v22 = vrot.slane %v6040_v1, 9 }
 0x553   :  { %v6049_v13 = vcombine.high %v6047_v15, %v6047_v15  ;;  %v7572_v7 = vmax.f32 %v6032_v47, %v11614_v11  ;;  %v7738_v12 = vmax.f32 %v7562_v58, %v7570_v53  ;;  %v7739_v3 = vmax.f32 %v7563_v30, %v7571_v24 }
 0x554   :  { %v8290_v56 = vrot.slane %v7737_v18, %v15235_v61  ;;  %8693 = vrot.lane.b32.xlu0 %v9235_v4, %s12094_s0  ;;  %v11616_v38 = vrot.slane %v6048_v63, 9  ;;  %v11617_v50 = vrot.slane %v6047_v15, 9  ;;  %v7573_v60 = vmax.f32 %v6040_v1, %v11615_v22 }
 0x555   :  { %v11618_v57 = vrot.slane %v6049_v13, 9  ;;  %9079 = vrot.lane.b32.xlu1 %v9041_v45, %s12098_s29  ;;  %v7740_v29 = vmax.f32 %v7564_v17, %v7572_v7  ;;  %v8294_v26 = vrot.slane %v7738_v12, %v15235_v61  ;;  %v8298_v11 = vrot.slane %v7739_v3, %v15235_v61  ;;  %v16943_v47 = vpop.permute.xlu0 %4774  ;;  %v19264_v3 = vld [vmem:[#allocation171_spill] sm:$0xff] }
 0x556   :  { %v8543_v30 = vsel %vm8469_vm7, %v8290_v56, %v16845_v20  ;;  %v7574_v35 = vmax.f32 %v6048_v63, %v11616_v38  ;;  %v7575_v40 = vmax.f32 %v6047_v15, %v11617_v50  ;;  %v6067_v4 = vcombine.high %v16909_v36, %v16909_v36  ;;  %v16953_v63 = vpop.permute.xlu1 %4784 }
 0x557   :  { %v16939_v18 = vmax.f32 %v6049_v13, %v11618_v57  ;;  %v8302_v22 = vrot.slane %v7740_v29, %v15235_v61  ;;  %v8544_v17 = vsel %vm8471_vm8, %v8294_v26, %v8543_v30  ;;  %v6074_v12 = vrot.slane %v16909_v36, %v15186_v52  ;;  %v9139_v13 = vld [vmem:[#allocation3 + $0x80] sm:$0xff] }
 0x558   :  { %v16951_v1 = vadd.f32 %v16896_v49, %v19264_v3  ;;  %8790 = vrot.lane.b32.xlu0 %v9041_v45, %s12095_s26  ;;  %v8545_v20 = vsel %vm8473_vm9, %v8298_v11, %v8544_v17  ;;  %v6081_v21 = vrot.slane %v6067_v4, %v15186_v52  ;;  %v4925_v42 = vadd.f32 %v16902_v32, %v16839_v41  ;;  %v8655_v17 = vld [vmem:[#allocation3 + $0xa1] sm:$0xff] }
 0x559   :  { %v4863_v58 = vmul.f32 %v16811_v55, %v16677_v0  ;;  %9177 = vrot.lane.b32.xlu1 %v9139_v13, %s12099_s30  ;;  %v8546_v49 = vsel %vm8475_vm10, %v8302_v22, %v8545_v20  ;;  %v6082_v36 = vcombine.high %v6074_v12, %v6074_v12  ;;  %v11623_v15 = vrot.slane %v6074_v12, 9  ;;  %v16969_v32 = vpop.permute.xlu0 %4262 }
 0x55a   :  { %v4864_v53 = vmul.f32 %v16811_v55, %v16688_v5  ;;  %8609 = vst.msk [vmem:[#allocation3 + $0xd1] sm:$0xff] %vm7781_vm2, %v8546_v49  ;;  %v6083_v24 = vcombine.high %v6081_v21, %v6081_v21  ;;  %v11625_v7 = vrot.slane %v6081_v21, 9  ;;  %v4998_v56 = vadd.f32 %v16830_v62, %v4925_v42  ;;  %v16974_v57 = vpop.permute.xlu1 %4272  ;;  %v9236_v5 = vld [vmem:[#allocation3 + $0x81] sm:$0xff] }
 0x55b   :  { %v4927_v41 = vadd.f32 %v4863_v58, %v16848_v48  ;;  %v11624_v0 = vrot.slane %v6082_v36, 9  ;;  %v7581_v45 = vmax.f32 %v6074_v12, %v11623_v15  ;;  %v4866_v50 = vmul.f32 %v16811_v55, %v16694_v6 }
 0x55c   :  { %v4928_v38 = vadd.f32 %v4864_v53, %v16869_v16  ;;  %8887 = vrot.lane.b32.xlu0 %v9139_v13, %s12096_s27  ;;  %v11626_v29 = vrot.slane %v6083_v24, 9  ;;  %v7583_v26 = vmax.f32 %v6081_v21, %v11625_v7  ;;  %v5062_v11 = vmax.f32 %v4998_v56, 0.0  ;;  %v8752_v56 = vld [vmem:[#allocation3 + $0xa2] sm:$0xff] }
 0x55d   :  { %v5000_v30 = vadd.f32 %v16830_v62, %v4927_v41  ;;  %9274 = vrot.lane.b32.xlu1 %v9236_v5, %s12100_s16  ;;  %v7582_v48 = vmax.f32 %v6082_v36, %v11624_v0  ;;  %v7741_v4 = vmax.f32 %v7573_v60, %v7581_v45  ;;  %v4930_v16 = vadd.f32 %v4866_v50, %v16871_v59  ;;  %v16982_v20 = vpop.permute.xlu0 %4277 }
 0x55e   :  { %v5001_v22 = vadd.f32 %v16830_v62, %v4928_v38  ;;  %v7584_v6 = vmax.f32 %v6083_v24, %v11626_v29  ;;  %v7743_v12 = vmax.f32 %v7575_v40, %v7583_v26  ;;  %v5132_v3 = vmul.f32 %v16859_v31, %v5062_v11  ;;  %v16986_v36 = vpop.permute.xlu1 %4287 }
 0x55f   :  { %v5064_v13 = vmax.f32 %v5000_v30, 0.0  ;;  %v7742_v21 = vmax.f32 %v7574_v35, %v7582_v48  ;;  %v8306_v42 = vrot.slane %v7741_v4, %v15235_v61  ;;  %v5003_v49 = vadd.f32 %v16830_v62, %v4930_v16  ;;  %v19267_v48 = vld [vmem:[#allocation181_spill] sm:$0xff] }
 0x560   :  { %v5065_v58 = vmax.f32 %v5001_v22, 0.0  ;;  %8984 = vrot.lane.b32.xlu0 %v9236_v5, %s12097_s28  ;;  %v7744_v59 = vmax.f32 %v16939_v18, %v7584_v6  ;;  %v8314_v60 = vrot.slane %v7743_v12, %v15235_v61  ;;  %v5202_v40 = vadd.f32 %v16879_v46, %v5132_v3  ;;  %v9140_v6 = vld [vmem:[#allocation3 + $0x90] sm:$0xff] }
 0x561   :  { %v5134_v15 = vmul.f32 %v16859_v31, %v5064_v13  ;;  %8695 = vrot.lane.b32.xlu1 %v8655_v17, %s12094_s0  ;;  %v8310_v35 = vrot.slane %v7742_v21, %v15235_v61  ;;  %v5067_v24 = vmax.f32 %v5003_v49, 0.0  ;;  %v4348_v7 = vmul.f32 %v16818_v51, %v16705_v14  ;;  %v16998_v41 = vld [vmem:[#allocation3 + $0xd0] sm:$0xff]  ;;  %v17005_v5 = vpop.permute.xlu0 %3765 }
 0x562   :  { %v5135_v53 = vmul.f32 %v16859_v31, %v5065_v58  ;;  %v17000_v18 = vld [vmem:[#allocation3 + $0xd2] sm:$0xff]  ;;  %v8318_v0 = vrot.slane %v7744_v59, %v15235_v61  ;;  %v6050_v45 = vcombine.high %v5202_v40, %v5202_v40  ;;  %v6057_v38 = vrot.slane %v5202_v40, %v15186_v52  ;;  %19265 = vst [vmem:[#allocation196_spill] sm:$0xff] %v17005_v5  ;;  %v17017_v30 = vpop.permute.xlu1 %3775 }
 0x563   :  { %v5204_v50 = vadd.f32 %v16879_v46, %v5134_v15  ;;  %9352 = vst.msk [vmem:[#allocation5 + $0x98] sm:$0xff] %vm7781_vm2, %v17000_v18  ;;  %8642 = vst.msk [vmem:[#allocation5 + $0xb0] sm:$0xff] %vm7781_vm2, %v16998_v41  ;;  %v8547_v14 = vsel %vm8463_vm4, %v8310_v35, %v8306_v42  ;;  %v5137_v26 = vmul.f32 %v16859_v31, %v5067_v24 }
 0x564   :  { %v5205_v29 = vadd.f32 %v16879_v46, %v5135_v53  ;;  %v17015_v11 = vadd.f32 %v4348_v7, %v16884_v2  ;;  %19266 = vst [vmem:[#allocation197_spill] sm:$0xff] %v17017_v30  ;;  %9081 = vrot.lane.b32.xlu0 %v19267_v48, %s12098_s29  ;;  %v8548_v4 = vsel %vm8465_vm5, %v8314_v60, %v8547_v14  ;;  %v11619_v17 = vrot.slane %v6057_v38, 9 }
 0x565   :  { %v6064_v22 = vrot.slane %v6050_v45, %v15186_v52  ;;  %v6065_v16 = vcombine.high %v6057_v38, %v6057_v38  ;;  %8792 = vrot.lane.b32.xlu1 %v8752_v56, %s12095_s26  ;;  %v6084_v12 = vcombine.high %v5204_v50, %v5204_v50  ;;  %v6091_v3 = vrot.slane %v5204_v50, %v15186_v52  ;;  %v17026_v59 = vpop.permute.xlu0 %4779  ;;  %v9237_v45 = vld [vmem:[#allocation3 + $0x91] sm:$0xff] }
 0x566   :  { %v8549_v2 = vsel %vm8467_vm6, %v8318_v0, %v8548_v4  ;;  %v6101_v13 = vcombine.high %v5205_v29, %v5205_v29  ;;  %v7577_v49 = vmax.f32 %v6057_v38, %v11619_v17  ;;  %19268 = vst [vmem:[#allocation198_spill] sm:$0xff] %v17026_v59  ;;  %v6108_v35 = vrot.slane %v5205_v29, %v15186_v52  ;;  %v17030_v53 = vpop.permute.xlu1 %4789 }
 0x567   :  { %v6066_v21 = vcombine.high %v6064_v22, %v6064_v22  ;;  %v11620_v42 = vrot.slane %v6065_v16, 9  ;;  %v11621_v58 = vrot.slane %v6064_v22, 9  ;;  %v6098_v60 = vrot.slane %v6084_v12, %v15186_v52  ;;  %19269 = vst [vmem:[#allocation76_spill] sm:$0xff] %v17030_v53 }
 0x568   :  { %v6099_v40 = vcombine.high %v6091_v3, %v6091_v3  ;;  %v11627_v15 = vrot.slane %v6091_v3, 9  ;;  %9179 = vrot.lane.b32.xlu0 %v9140_v6, %s12099_s30  ;;  %v6115_v0 = vrot.slane %v6101_v13, %v15186_v52  ;;  %v6116_v17 = vcombine.high %v6108_v35, %v6108_v35 }
 0x569   :  { %v11622_v24 = vrot.slane %v6066_v21, 9  ;;  %v7578_v7 = vmax.f32 %v6065_v16, %v11620_v42  ;;  %v7579_v56 = vmax.f32 %v6064_v22, %v11621_v58  ;;  %8889 = vrot.lane.b32.xlu1 %v16731_v9, %s12096_s27  ;;  %v6100_v38 = vcombine.high %v6098_v60, %v6098_v60  ;;  %v17036_v53 = vpop.permute.xlu0 %4794  ;;  %v8946_v9 = vld [vmem:[#allocation3 + $0xb1] sm:$0xff] }
 0x56a   :  { %v11628_v50 = vrot.slane %v6099_v40, 9  ;;  %v11629_v14 = vrot.slane %v6098_v60, 9  ;;  %v7585_v48 = vmax.f32 %v6091_v3, %v11627_v15  ;;  %v6117_v29 = vcombine.high %v6115_v0, %v6115_v0  ;;  %v17038_v42 = vpop.permute.xlu1 %4804 }
 0x56b   :  { %v7580_v4 = vmax.f32 %v6066_v21, %v11622_v24  ;;  %v11631_v12 = vrot.slane %v6108_v35, 9  ;;  %v11630_v6 = vrot.slane %v6100_v38, 9  ;;  %v11632_v13 = vrot.slane %v6116_v17, 9 }
 0x56c   :  { %v7586_v59 = vmax.f32 %v6099_v40, %v11628_v50  ;;  %v7587_v16 = vmax.f32 %v6098_v60, %v11629_v14  ;;  %v7745_v22 = vmax.f32 %v7577_v49, %v7585_v48  ;;  %9276 = vrot.lane.b32.xlu0 %v9237_v45, %s12100_s16  ;;  %v11633_v58 = vrot.slane %v6115_v0, 9 }
 0x56d   :  { %v11634_v30 = vrot.slane %v6117_v29, 9  ;;  %v17041_v5 = vmax.f32 %v6108_v35, %v11631_v12  ;;  %8986 = vrot.lane.b32.xlu1 %v8946_v9, %s12097_s28  ;;  %v7588_v3 = vmax.f32 %v6100_v38, %v11630_v6  ;;  %v17045_v40 = vmax.f32 %v6116_v17, %v11632_v13  ;;  %v17052_v50 = vpop.permute.xlu0 %4282 }
 0x56e   :  { %v7746_v21 = vmax.f32 %v7578_v7, %v7586_v59  ;;  %v7747_v15 = vmax.f32 %v7579_v56, %v7587_v16  ;;  %v8322_v24 = vrot.slane %v7745_v22, %v15235_v61  ;;  %v17047_v49 = vmax.f32 %v6115_v0, %v11633_v58  ;;  %v17057_v7 = vpop.permute.xlu1 %4292  ;;  %v9043_v56 = vld [vmem:[#allocation3 + $0xb2] sm:$0xff] }
 0x56f   :  { %v17049_v60 = vmax.f32 %v6117_v29, %v11634_v30  ;;  %v5207_v45 = vadd.f32 %v16879_v46, %v5137_v26  ;;  %v7748_v14 = vmax.f32 %v7580_v4, %v7588_v3  ;;  %v4350_v26 = vmul.f32 %v16818_v51, %v16708_v25 }
 0x570   :  { %v8326_v35 = vrot.slane %v7746_v21, %v15235_v61  ;;  %v8330_v48 = vrot.slane %v7747_v15, %v15235_v61  ;;  %v8550_v59 = vsel %vm8469_vm7, %v8322_v24, %v8549_v2  ;;  %8697 = vrot.lane.b32.xlu0 %v8946_v9, %s12094_s0  ;;  %v4351_v38 = vmul.f32 %v16818_v51, %v16715_v54  ;;  %v19272_v24 = vld [vmem:[#allocation170_spill] sm:$0xff] }
 0x571   :  { %v6135_v0 = vcombine.high %v5207_v45, %v5207_v45  ;;  %v6142_v30 = vrot.slane %v5207_v45, %v15186_v52  ;;  %9083 = vrot.lane.b32.xlu1 %v9043_v56, %s12098_s29  ;;  %v8334_v4 = vrot.slane %v7748_v14, %v15235_v61  ;;  %v4353_v17 = vmul.f32 %v16818_v51, %v16719_v37  ;;  %v17074_v22 = vpop.permute.xlu0 %4799 }
 0x572   :  { %v8551_v2 = vsel %vm8471_vm8, %v8326_v35, %v8550_v59  ;;  %v3835_v29 = vmul.f32 %v16780_v8, %v16726_v23  ;;  %19270 = vst [vmem:[#allocation199_spill] sm:$0xff] %v17074_v22  ;;  %v4414_v9 = vadd.f32 %v4350_v26, %v16887_v27  ;;  %v4415_v13 = vadd.f32 %v4351_v38, %v16912_v34  ;;  %v17080_v37 = vpop.permute.xlu1 %4809  ;;  %v19275_v26 = vld [vmem:[#allocation173_spill] sm:$0xff] }
 0x573   :  { %v8552_v12 = vsel %vm8473_vm9, %v8330_v48, %v8551_v2  ;;  %v6149_v6 = vrot.slane %v6135_v0, %v15186_v52  ;;  %v6150_v25 = vcombine.high %v6142_v30, %v6142_v30  ;;  %v11639_v16 = vrot.slane %v6142_v30, 9  ;;  %19271 = vst [vmem:[#allocation200_spill] sm:$0xff] %v17080_v37  ;;  %v19274_v0 = vld [vmem:[#allocation172_spill] sm:$0xff] }
 0x574   :  { %v8553_v54 = vsel %vm8475_vm10, %v8334_v4, %v8552_v12  ;;  %v4417_v58 = vadd.f32 %v4353_v17, %v16951_v1  ;;  %8794 = vrot.lane.b32.xlu0 %v9043_v56, %s12095_s26  ;;  %v3899_v45 = vadd.f32 %v3835_v29, %v19272_v24  ;;  %v3837_v27 = vmul.f32 %v16780_v8, %v16728_v19  ;;  %v19276_v4 = vld [vmem:[#allocation175_spill] sm:$0xff] }
 0x575   :  { %8610 = vst.msk [vmem:[#allocation3 + $0xe1] sm:$0xff] %vm7781_vm2, %v8553_v54  ;;  %v6151_v23 = vcombine.high %v6149_v6, %v6149_v6  ;;  %v11640_v3 = vrot.slane %v6150_v25, 9  ;;  %v11641_v21 = vrot.slane %v6149_v6, 9  ;;  %v7597_v15 = vmax.f32 %v6142_v30, %v11639_v16  ;;  %9181 = vrot.lane.b32.xlu1 %v16803_v43, %s12099_s30  ;;  %v17094_v56 = vpop.permute.xlu0 %8679  ;;  %v19279_v16 = vld [vmem:[#allocation188_spill] sm:$0xff] }
 0x576   :  { %v3838_v34 = vmul.f32 %v16780_v8, %v16745_v28  ;;  %v3840_v1 = vmul.f32 %v16780_v8, %v16751_v10  ;;  %19273 = vst [vmem:[#allocation10_spill] sm:$0xff] %v17094_v56  ;;  %v3901_v30 = vadd.f32 %v3837_v27, %v19274_v0  ;;  %v4865_v19 = vmul.f32 %v16811_v55, %v16765_v39  ;;  %v17101_v28 = vpop.permute.xlu1 %8776  ;;  %v9238_v10 = vld [vmem:[#allocation3 + $0xc1] sm:$0xff] }
 0x577   :  { %v11642_v14 = vrot.slane %v6151_v23, 9  ;;  %v7598_v35 = vmax.f32 %v6150_v25, %v11640_v3  ;;  %v7599_v48 = vmax.f32 %v6149_v6, %v11641_v21  ;;  %v7749_v59 = vmax.f32 %v17041_v5, %v7597_v15  ;;  %19277 = vst [vmem:[#allocation78_spill] sm:$0xff] %v17101_v28  ;;  %v19278_v25 = vld [vmem:[#allocation187_spill] sm:$0xff]  ;;  %v19280_v3 = vld [vmem:[#allocation189_spill] sm:$0xff]  ;;  %v19281_v21 = vld [vmem:[#allocation190_spill] sm:$0xff] }
 0x578   :  { %v3902_v38 = vadd.f32 %v3838_v34, %v19275_v26  ;;  %v3904_v2 = vadd.f32 %v3840_v1, %v19276_v4  ;;  %8891 = vrot.lane.b32.xlu0 %v16803_v43, %s12096_s27  ;;  %v4929_v6 = vadd.f32 %v4865_v19, %v17015_v11  ;;  %v4867_v39 = vmul.f32 %v16811_v55, %v19278_v25  ;;  %v19284_v26 = vld [vmem:[#allocation191_spill] sm:$0xff] }
 0x579   :  { %v7600_v17 = vmax.f32 %v6151_v23, %v11642_v14  ;;  %v7750_v5 = vmax.f32 %v17045_v40, %v7598_v35  ;;  %v7751_v29 = vmax.f32 %v17047_v49, %v7599_v48  ;;  %v8338_v12 = vrot.slane %v7749_v59, %v15235_v61  ;;  %9278 = vrot.lane.b32.xlu1 %v9238_v10, %s12100_s16  ;;  %v17121_v24 = vpop.permute.xlu0 %8873 }
 0x57a   :  { %v4868_v54 = vmul.f32 %v16811_v55, %v19279_v16  ;;  %v4870_v43 = vmul.f32 %v16811_v55, %v19280_v3  ;;  %v4352_v15 = vmul.f32 %v16818_v51, %v19281_v21  ;;  %19282 = vst [vmem:[#allocation201_spill] sm:$0xff] %v17121_v24  ;;  %v5002_v11 = vadd.f32 %v16830_v62, %v4929_v6  ;;  %v17124_v14 = vpop.permute.xlu1 %8970 }
 0x57b   :  { %v7752_v23 = vmax.f32 %v17049_v60, %v7600_v17  ;;  %v8342_v40 = vrot.slane %v7750_v5, %v15235_v61  ;;  %v8346_v49 = vrot.slane %v7751_v29, %v15235_v61  ;;  %v4931_v27 = vadd.f32 %v4867_v39, %v4414_v9  ;;  %19283 = vst [vmem:[#allocation202_spill] sm:$0xff] %v17124_v14  ;;  %v19285_v29 = vld [vmem:[#allocation192_spill] sm:$0xff] }
 0x57c   :  { %v4932_v34 = vadd.f32 %v4868_v54, %v4415_v13  ;;  %v4934_v1 = vadd.f32 %v4870_v43, %v4417_v58  ;;  %8988 = vrot.lane.b32.xlu0 %v9238_v10, %s12097_s28  ;;  %v17127_v35 = vld [vmem:[#allocation3 + $0xe0] sm:$0xff]  ;;  %v17133_v0 = vadd.f32 %v4352_v15, %v3899_v45  ;;  %v4354_v4 = vmul.f32 %v16818_v51, %v19284_v26  ;;  %v19287_v54 = vld [vmem:[#allocation280_spill] sm:$0xff] }
 0x57d   :  { %v17129_v60 = vld [vmem:[#allocation3 + $0xe2] sm:$0xff]  ;;  %v8350_v48 = vrot.slane %v7752_v23, %v15235_v61  ;;  %v8554_v59 = vsel %vm8463_vm4, %v8342_v40, %v8338_v12  ;;  %8699 = vrot.lane.b32.xlu1 %v9238_v10, %s12094_s0  ;;  %8643 = vst.msk [vmem:[#allocation5 + $0xc0] sm:$0xff] %vm7781_vm2, %v17127_v35  ;;  %v5066_v13 = vmax.f32 %v5002_v11, 0.0  ;;  %v5004_v58 = vadd.f32 %v16830_v62, %v4931_v27  ;;  %v17153_v6 = vpop.permute.xlu0 %8681  ;;  %v19289_v23 = vld [vmem:[#allocation279_spill] sm:$0xff]  ;;  %v19291_v15 = vld [vmem:[#allocation193_spill] sm:$0xff] }
 0x57e   :  { %9353 = vst.msk [vmem:[#allocation5 + $0xa8] sm:$0xff] %vm7781_vm2, %v17129_v60  ;;  %v8555_v9 = vsel %vm8465_vm5, %v8346_v49, %v8554_v59  ;;  %v5005_v19 = vadd.f32 %v16830_v62, %v4932_v34  ;;  %v8623_v45 = vld [vmem:[#allocation3 + $0xa0] sm:$0xff]  ;;  %v5007_v5 = vadd.f32 %v16830_v62, %v4934_v1  ;;  %v17149_v10 = vadd.f32 %v4354_v4, %v3901_v30  ;;  %v17159_v43 = vpop.permute.xlu1 %9067  ;;  %v9334_v27 = vld [vmem:[#allocation3 + $0x92] sm:$0xff] }
 0x57f   :  { %v17146_v17 = vsel %vm8467_vm6, %v8350_v48, %v8555_v9  ;;  %v4355_v12 = vmul.f32 %v16818_v51, %v19285_v29  ;;  %19286 = vst [vmem:[#allocation79_spill] sm:$0xff] %v17153_v6  ;;  %8639 = vst.msk [vmem:[#allocation5 + $0x80] sm:$0xff] %vm7781_vm2, %v8623_v45  ;;  %v5136_v25 = vmul.f32 %v16859_v31, %v5066_v13  ;;  %v5068_v39 = vmax.f32 %v5004_v58, 0.0  ;;  %v19290_v49 = vld [vmem:[#allocation281_spill] sm:$0xff]  ;;  %v19292_v26 = vld [vmem:[#allocation174_spill] sm:$0xff] }
 0x580   :  { %v5069_v16 = vmax.f32 %v5005_v19, 0.0  ;;  %v4357_v3 = vmul.f32 %v16818_v51, %v19287_v54  ;;  %19288 = vst [vmem:[#allocation80_spill] sm:$0xff] %v17159_v43  ;;  %9085 = vrot.lane.b32.xlu0 %v19289_v23, %s12098_s29  ;;  %v5071_v30 = vmax.f32 %v5007_v5, 0.0  ;;  %v3839_v21 = vmul.f32 %v16780_v8, %v19290_v49  ;;  %9350 = vst.msk [vmem:[#allocation5 + $0x78] sm:$0xff] %vm7781_vm2, %v9334_v27  ;;  %v19293_v9 = vld [vmem:[#allocation176_spill] sm:$0xff]  ;;  %v19294_v58 = vld [vmem:[#allocation194_spill] sm:$0xff] }
 0x581   :  { %v17163_v40 = vadd.f32 %v4355_v12, %v3902_v38  ;;  %v3841_v11 = vmul.f32 %v16780_v8, %v19291_v15  ;;  %8796 = vrot.lane.b32.xlu1 %v19289_v23, %s12095_s26  ;;  %v5206_v34 = vadd.f32 %v16879_v46, %v5136_v25  ;;  %v5138_v1 = vmul.f32 %v16859_v31, %v5068_v39  ;;  %v17186_v45 = vpop.permute.xlu0 %8778 }
 0x582   :  { %v5139_v48 = vmul.f32 %v16859_v31, %v5069_v16  ;;  %v17174_v59 = vadd.f32 %v4357_v3, %v3904_v2  ;;  %v5141_v38 = vmul.f32 %v16859_v31, %v5071_v30  ;;  %v17179_v4 = vadd.f32 %v3839_v21, %v19292_v26  ;;  %19295 = vst [vmem:[#allocation82_spill] sm:$0xff] %v17186_v45  ;;  %v17191_v25 = vpop.permute.xlu1 %9165  ;;  %v19297_v16 = vld [vmem:[#allocation177_spill] sm:$0xff]  ;;  %v19298_v3 = vld [vmem:[#allocation195_spill] sm:$0xff] }
 0x583   :  { %v17182_v13 = vadd.f32 %v3841_v11, %v19293_v9  ;;  %v3842_v19 = vmul.f32 %v16780_v8, %v19294_v58  ;;  %v6118_v5 = vcombine.high %v5206_v34, %v5206_v34  ;;  %v6125_v29 = vrot.slane %v5206_v34, %v15186_v52  ;;  %19296 = vst [vmem:[#allocation83_spill] sm:$0xff] %v17191_v25 }
 0x584   :  { %v5208_v2 = vadd.f32 %v16879_v46, %v5138_v1  ;;  %v5209_v12 = vadd.f32 %v16879_v46, %v5139_v48  ;;  %9183 = vrot.lane.b32.xlu0 %v16998_v41, %s12099_s30  ;;  %v5211_v39 = vadd.f32 %v16879_v46, %v5141_v38  ;;  %v17201_v23 = vmul.f32 %v16780_v8, %v19298_v3  ;;  %v9239_v38 = vld [vmem:[#allocation3 + $0xd1] sm:$0xff] }
 0x585   :  { %v17197_v54 = vadd.f32 %v3842_v19, %v19297_v16  ;;  %v17205_v30 = vmul.f32 %v16811_v55, %v16928_v33  ;;  %8893 = vrot.lane.b32.xlu1 %v16998_v41, %s12096_s27  ;;  %v6132_v49 = vrot.slane %v6118_v5, %v15186_v52  ;;  %v6133_v21 = vcombine.high %v6125_v29, %v6125_v29  ;;  %v17212_v8 = vpop.permute.xlu0 %8875 }
 0x586   :  { %v11635_v15 = vrot.slane %v6125_v29, 9  ;;  %v6152_v11 = vcombine.high %v5208_v2, %v5208_v2  ;;  %v6159_v27 = vrot.slane %v5208_v2, %v15186_v52  ;;  %v6169_v34 = vcombine.high %v5209_v12, %v5209_v12  ;;  %19299 = vst [vmem:[#allocation84_spill] sm:$0xff] %v17212_v8  ;;  %v17214_v19 = vpop.permute.xlu1 %9262 }
 0x587   :  { %v6176_v1 = vrot.slane %v5209_v12, %v15186_v52  ;;  %v6203_v48 = vcombine.high %v5211_v39, %v5211_v39  ;;  %v6134_v26 = vcombine.high %v6132_v49, %v6132_v49  ;;  %v11636_v33 = vrot.slane %v6133_v21, 9  ;;  %19300 = vst [vmem:[#allocation203_spill] sm:$0xff] %v17214_v19 }
 0x588   :  { %v11637_v9 = vrot.slane %v6132_v49, 9  ;;  %v7593_v58 = vmax.f32 %v6125_v29, %v11635_v15  ;;  %9280 = vrot.lane.b32.xlu0 %v9239_v38, %s12100_s16  ;;  %v6166_v41 = vrot.slane %v6152_v11, %v15186_v52  ;;  %v6167_v5 = vcombine.high %v6159_v27, %v6159_v27 }
 0x589   :  { %v11643_v16 = vrot.slane %v6159_v27, 9  ;;  %v6183_v2 = vrot.slane %v6169_v34, %v15186_v52  ;;  %8990 = vrot.lane.b32.xlu1 %v9239_v38, %s12097_s28  ;;  %v11638_v12 = vrot.slane %v6134_v26, 9  ;;  %v7594_v3 = vmax.f32 %v6133_v21, %v11636_v33  ;;  %v17220_v15 = vpop.permute.xlu0 %8972 }
 0x58a   :  { %v7595_v25 = vmax.f32 %v6132_v49, %v11637_v9  ;;  %v6184_v43 = vcombine.high %v6176_v1, %v6176_v1  ;;  %v6168_v14 = vcombine.high %v6166_v41, %v6166_v41  ;;  %v11644_v8 = vrot.slane %v6167_v5, 9  ;;  %19301 = vst [vmem:[#allocation204_spill] sm:$0xff] %v17220_v15  ;;  %v17222_v6 = vpop.permute.xlu1 %8683 }
 0x58b   :  { %v11645_v24 = vrot.slane %v6166_v41, 9  ;;  %v7601_v29 = vmax.f32 %v6159_v27, %v11643_v16  ;;  %v7596_v19 = vmax.f32 %v6134_v26, %v11638_v12  ;;  %v6185_v45 = vcombine.high %v6183_v2, %v6183_v2  ;;  %19302 = vst [vmem:[#allocation205_spill] sm:$0xff] %v17222_v6 }
 0x58c   :  { %v11647_v28 = vrot.slane %v6176_v1, 9  ;;  %v11648_v11 = vrot.slane %v6184_v43, 9  ;;  %8701 = vrot.lane.b32.xlu0 %v9239_v38, %s12094_s0  ;;  %v11646_v34 = vrot.slane %v6168_v14, 9  ;;  %v7602_v56 = vmax.f32 %v6167_v5, %v11644_v8 }
 0x58d   :  { %v7603_v37 = vmax.f32 %v6166_v41, %v11645_v24  ;;  %v7753_v21 = vmax.f32 %v7593_v58, %v7601_v29  ;;  %9087 = vrot.lane.b32.xlu1 %v17000_v18, %s12098_s29  ;;  %v11649_v49 = vrot.slane %v6183_v2, 9  ;;  %v11650_v33 = vrot.slane %v6185_v45, 9  ;;  %v17228_v22 = vpop.permute.xlu0 %9069 }
 0x58e   :  { %v7605_v27 = vmax.f32 %v6176_v1, %v11647_v28  ;;  %v7606_v9 = vmax.f32 %v6184_v43, %v11648_v11  ;;  %v7604_v16 = vmax.f32 %v6168_v14, %v11646_v34  ;;  %v7754_v26 = vmax.f32 %v7594_v3, %v7602_v56  ;;  %v17232_v58 = vpop.permute.xlu1 %8780  ;;  %v9240_v11 = vld [vmem:[#allocation3 + $0xe1] sm:$0xff] }
 0x58f   :  { %v7755_v12 = vmax.f32 %v7595_v25, %v7603_v37  ;;  %v8354_v15 = vrot.slane %v7753_v21, %v15235_v61  ;;  %v7607_v6 = vmax.f32 %v6183_v2, %v11649_v49  ;;  %v7608_v38 = vmax.f32 %v6185_v45, %v11650_v33 }
 0x590   :  { %v6210_v8 = vrot.slane %v5211_v39, %v15186_v52  ;;  %v6217_v24 = vrot.slane %v6203_v48, %v15186_v52  ;;  %8798 = vrot.lane.b32.xlu0 %v17000_v18, %s12095_s26  ;;  %v7756_v28 = vmax.f32 %v7596_v19, %v7604_v16  ;;  %v8358_v14 = vrot.slane %v7754_v26, %v15235_v61  ;;  %v19303_v18 = vld [vmem:[#allocation179_spill] sm:$0xff] }
 0x591   :  { %v8362_v37 = vrot.slane %v7755_v12, %v15235_v61  ;;  %v8557_v56 = vsel %vm8469_vm7, %v8354_v15, %v17146_v17  ;;  %9185 = vrot.lane.b32.xlu1 %v17127_v35, %s12099_s30  ;;  %v17246_v19 = vadd.f32 %v17201_v23, %v19303_v18  ;;  %v4933_v41 = vadd.f32 %v17205_v30, %v17133_v0  ;;  %v17250_v5 = vpop.permute.xlu0 %9167 }
 0x592   :  { %v6218_v43 = vcombine.high %v6210_v8, %v6210_v8  ;;  %v6219_v45 = vcombine.high %v6217_v24, %v6217_v24  ;;  %v11655_v25 = vrot.slane %v6210_v8, 9  ;;  %v11657_v39 = vrot.slane %v6217_v24, 9  ;;  %v17253_v15 = vpop.permute.xlu1 %8877 }
 0x593   :  { %v8366_v1 = vrot.slane %v7756_v28, %v15235_v61  ;;  %v8558_v48 = vsel %vm8471_vm8, %v8358_v14, %v8557_v56  ;;  %v5006_v21 = vadd.f32 %v16830_v62, %v4933_v41  ;;  %v4871_v0 = vmul.f32 %v16811_v55, %v16931_v44 }
 0x594   :  { %v8559_v17 = vsel %vm8473_vm9, %v8362_v37, %v8558_v48  ;;  %v11656_v2 = vrot.slane %v6218_v43, 9  ;;  %v11658_v3 = vrot.slane %v6219_v45, 9  ;;  %v7613_v29 = vmax.f32 %v6210_v8, %v11655_v25  ;;  %8895 = vrot.lane.b32.xlu0 %v17127_v35, %s12096_s27 }
 0x595   :  { %v8560_v34 = vsel %vm8475_vm10, %v8366_v1, %v8559_v17  ;;  %v7615_v23 = vmax.f32 %v6217_v24, %v11657_v39  ;;  %9282 = vrot.lane.b32.xlu1 %v9240_v11, %s12100_s16  ;;  %v4872_v16 = vmul.f32 %v16811_v55, %v16943_v47  ;;  %v5070_v26 = vmax.f32 %v5006_v21, 0.0  ;;  %v17268_v24 = vpop.permute.xlu0 %9264 }
 0x596   :  { %8611 = vst.msk [vmem:[#allocation3 + $0xf1] sm:$0xff] %vm7781_vm2, %v8560_v34  ;;  %v7614_v30 = vmax.f32 %v6218_v43, %v11656_v2  ;;  %v7616_v49 = vmax.f32 %v6219_v45, %v11658_v3  ;;  %v7757_v33 = vmax.f32 %v7605_v27, %v7613_v29  ;;  %v4935_v12 = vadd.f32 %v4871_v0, %v17149_v10  ;;  %v17272_v56 = vpop.permute.xlu1 %8974 }
 0x597   :  { %v7759_v35 = vmax.f32 %v7607_v6, %v7615_v23  ;;  %v4874_v8 = vmul.f32 %v16811_v55, %v16953_v63  ;;  %v4936_v37 = vadd.f32 %v4872_v16, %v17163_v40  ;;  %v5140_v6 = vmul.f32 %v16859_v31, %v5070_v26 }
 0x598   :  { %v7758_v44 = vmax.f32 %v7606_v9, %v7614_v30  ;;  %v7760_v28 = vmax.f32 %v7608_v38, %v7616_v49  ;;  %v8370_v14 = vrot.slane %v7757_v33, %v15235_v61  ;;  %8992 = vrot.lane.b32.xlu0 %v9240_v11, %s12097_s28  ;;  %v5008_v10 = vadd.f32 %v16830_v62, %v4935_v12 }
 0x599   :  { %v8378_v47 = vrot.slane %v7759_v35, %v15235_v61  ;;  %v4938_v55 = vadd.f32 %v4874_v8, %v17174_v59  ;;  %8703 = vrot.lane.b32.xlu1 %v9240_v11, %s12094_s0  ;;  %v5009_v40 = vadd.f32 %v16830_v62, %v4936_v37  ;;  %v4356_v9 = vmul.f32 %v16818_v51, %v16969_v32  ;;  %v17289_v59 = vpop.permute.xlu0 %8685 }
 0x59a   :  { %v8374_v63 = vrot.slane %v7758_v44, %v15235_v61  ;;  %v8382_v27 = vrot.slane %v7760_v28, %v15235_v61  ;;  %v5210_v38 = vadd.f32 %v16879_v46, %v5140_v6  ;;  %v5072_v43 = vmax.f32 %v5008_v10, 0.0  ;;  %v17297_v32 = vpop.permute.xlu1 %9071  ;;  %8731 = vst.msk [vmem:[#allocation5 + $0x30] sm:$0xff] %vm8727_vm11, %v17289_v59 }
 0x59b   :  { %v5011_v45 = vadd.f32 %v16830_v62, %v4938_v55  ;;  %v4358_v25 = vmul.f32 %v16818_v51, %v16974_v57  ;;  %v5073_v1 = vmax.f32 %v5009_v40, 0.0  ;;  %v17293_v48 = vadd.f32 %v4356_v9, %v17179_v4 }
 0x59c   :  { %v8561_v39 = vsel %vm8463_vm4, %v8374_v63, %v8370_v14  ;;  %v4359_v18 = vmul.f32 %v16818_v51, %v16982_v20  ;;  %9089 = vrot.lane.b32.xlu0 %v17129_v60, %s12098_s29  ;;  %v6186_v41 = vcombine.high %v5210_v38, %v5210_v38  ;;  %v6193_v57 = vrot.slane %v5210_v38, %v15186_v52 }
 0x59d   :  { %v8562_v62 = vsel %vm8465_vm5, %v8378_v47, %v8561_v39  ;;  %v5142_v17 = vmul.f32 %v16859_v31, %v5072_v43  ;;  %8800 = vrot.lane.b32.xlu1 %v17129_v60, %s12095_s26  ;;  %v9144_v4 = vld [vmem:[#allocation3 + $0xf0] sm:$0xff]  ;;  %v5143_v3 = vmul.f32 %v16859_v31, %v5073_v1  ;;  %v5075_v29 = vmax.f32 %v5011_v45, 0.0  ;;  %v17320_v0 = vpop.permute.xlu0 %8782 }
 0x59e   :  { %v17306_v2 = vld [vmem:[#allocation3 + $0xf2] sm:$0xff]  ;;  %v17309_v20 = vsel %vm8467_vm6, %v8382_v27, %v8562_v62  ;;  %v17313_v11 = vadd.f32 %v4358_v25, %v17182_v13  ;;  %8644 = vst.msk [vmem:[#allocation5 + $0xd0] sm:$0xff] %vm7781_vm2, %v9144_v4  ;;  %v6200_v34 = vrot.slane %v6186_v41, %v15186_v52  ;;  %v6201_v60 = vcombine.high %v6193_v57, %v6193_v57  ;;  %v17331_v16 = vpop.permute.xlu1 %9169 }
 0x59f   :  { %9354 = vst.msk [vmem:[#allocation5 + $0xb8] sm:$0xff] %vm7781_vm2, %v17306_v2  ;;  %v11651_v23 = vrot.slane %v6193_v57, 9  ;;  %v5212_v21 = vadd.f32 %v16879_v46, %v5142_v17  ;;  %v5213_v30 = vadd.f32 %v16879_v46, %v5143_v3  ;;  %v5145_v49 = vmul.f32 %v16859_v31, %v5075_v29  ;;  %v9241_v6 = vld [vmem:[#allocation3 + $0xf1] sm:$0xff] }
 0x5a0   :  { %v17325_v13 = vadd.f32 %v4359_v18, %v17197_v54  ;;  %v17329_v33 = vmul.f32 %v16818_v51, %v16986_v36  ;;  %9187 = vrot.lane.b32.xlu0 %v9144_v4, %s12099_s30  ;;  %v6202_v35 = vcombine.high %v6200_v34, %v6200_v34  ;;  %v11652_v26 = vrot.slane %v6201_v60, 9  ;;  %8828 = vst.msk [vmem:[#allocation5 + $0x30] sm:$0xff] %vm8824_vm12, %v17320_v0 }
 0x5a1   :  { %v11653_v12 = vrot.slane %v6200_v34, 9  ;;  %v7609_v8 = vmax.f32 %v6193_v57, %v11651_v23  ;;  %8897 = vrot.lane.b32.xlu1 %v9144_v4, %s12096_s27  ;;  %v6220_v44 = vcombine.high %v5212_v21, %v5212_v21  ;;  %v6227_v31 = vrot.slane %v5212_v21, %v15186_v52  ;;  %v17338_v47 = vpop.permute.xlu0 %8879 }
 0x5a2   :  { %v6237_v28 = vcombine.high %v5213_v30, %v5213_v30  ;;  %v6244_v54 = vrot.slane %v5213_v30, %v15186_v52  ;;  %v11654_v14 = vrot.slane %v6202_v35, 9  ;;  %v7610_v37 = vmax.f32 %v6201_v60, %v11652_v26  ;;  %v17342_v40 = vpop.permute.xlu1 %9266  ;;  %8925 = vst.msk [vmem:[#allocation5 + $0x30] sm:$0xff] %vm8921_vm13, %v17338_v47  ;;  %v19320_v47 = vld [vmem:[#allocation204_spill] sm:$0xff] }
 0x5a3   :  { %v7611_v51 = vmax.f32 %v6200_v34, %v11653_v12  ;;  %v5215_v36 = vadd.f32 %v16879_v46, %v5145_v49  ;;  %v6234_v10 = vrot.slane %v6220_v44, %v15186_v52  ;;  %v6235_v55 = vcombine.high %v6227_v31, %v6227_v31 }
 0x5a4   :  { %v11659_v63 = vrot.slane %v6227_v31, 9  ;;  %v6251_v27 = vrot.slane %v6237_v28, %v15186_v52  ;;  %9284 = vrot.lane.b32.xlu0 %v9241_v6, %s12100_s16  ;;  %v7612_v9 = vmax.f32 %v6202_v35, %v11654_v14  ;;  %v6252_v38 = vcombine.high %v6244_v54, %v6244_v54 }
 0x5a5   :  { %v11663_v43 = vrot.slane %v6244_v54, 9  ;;  %v6271_v45 = vcombine.high %v5215_v36, %v5215_v36  ;;  %8994 = vrot.lane.b32.xlu1 %v9241_v6, %s12097_s28  ;;  %v6236_v46 = vcombine.high %v6234_v10, %v6234_v10  ;;  %v11660_v25 = vrot.slane %v6235_v55, 9  ;;  %v17346_v17 = vpop.permute.xlu0 %8976 }
 0x5a6   :  { %v11661_v39 = vrot.slane %v6234_v10, 9  ;;  %v7617_v1 = vmax.f32 %v6227_v31, %v11659_v63  ;;  %v6253_v18 = vcombine.high %v6251_v27, %v6251_v27  ;;  %v11664_v62 = vrot.slane %v6252_v38, 9  ;;  %v17348_v60 = vpop.permute.xlu1 %8687  ;;  %9022 = vst.msk [vmem:[#allocation5 + $0x30] sm:$0xff] %vm9018_vm14, %v17346_v17 }
 0x5a7   :  { %v11665_v41 = vrot.slane %v6251_v27, 9  ;;  %v7621_v57 = vmax.f32 %v6244_v54, %v11663_v43  ;;  %v11662_v4 = vrot.slane %v6236_v46, 9  ;;  %v7618_v3 = vmax.f32 %v6235_v55, %v11660_v25  ;;  %8732 = vst.msk [vmem:[#allocation5 + $0x40] sm:$0xff] %vm8727_vm11, %v17348_v60 }
 0x5a8   :  { %v7619_v29 = vmax.f32 %v6234_v10, %v11661_v39  ;;  %v7761_v34 = vmax.f32 %v7609_v8, %v7617_v1  ;;  %8705 = vrot.lane.b32.xlu0 %v9241_v6, %s12094_s0  ;;  %v11666_v23 = vrot.slane %v6253_v18, 9  ;;  %v7622_v21 = vmax.f32 %v6252_v38, %v11664_v62 }
 0x5a9   :  { %v7623_v30 = vmax.f32 %v6251_v27, %v11665_v41  ;;  %v6278_v49 = vrot.slane %v5215_v36, %v15186_v52  ;;  %9091 = vrot.lane.b32.xlu1 %v17306_v2, %s12098_s29  ;;  %v7620_v35 = vmax.f32 %v6236_v46, %v11662_v4  ;;  %v7762_v26 = vmax.f32 %v7610_v37, %v7618_v3  ;;  %v17356_v14 = vpop.permute.xlu0 %9073  ;;  %v19304_v46 = vld [vmem:[#allocation196_spill] sm:$0xff]  ;;  %v19305_v3 = vld [vmem:[#allocation178_spill] sm:$0xff] }
 0x5aa   :  { %v7763_v12 = vmax.f32 %v7611_v51, %v7619_v29  ;;  %v8386_v44 = vrot.slane %v7761_v34, %v15235_v61  ;;  %v7624_v31 = vmax.f32 %v6253_v18, %v11666_v23  ;;  %v6285_v8 = vrot.slane %v6271_v45, %v15186_v52  ;;  %v17362_v63 = vpop.permute.xlu1 %8784  ;;  %v19306_v34 = vld [vmem:[#allocation197_spill] sm:$0xff]  ;;  %9119 = vst.msk [vmem:[#allocation5 + $0x30] sm:$0xff] %vm9115_vm15, %v17356_v14 }
 0x5ab   :  { %v6286_v28 = vcombine.high %v6278_v49, %v6278_v49  ;;  %v11671_v54 = vrot.slane %v6278_v49, 9  ;;  %v7764_v6 = vmax.f32 %v7612_v9, %v7620_v35  ;;  %v8390_v10 = vrot.slane %v7762_v26, %v15235_v61  ;;  %v12059_v26 = vld [vmem:[%s18222_s1 + $0x8] ss:$0 sm:$0xff]  ;;  %8829 = vst.msk [vmem:[#allocation5 + $0x40] sm:$0xff] %vm8824_vm12, %v17362_v63 }
 0x5ac   :  { %v8394_v36 = vrot.slane %v7763_v12, %v15235_v61  ;;  %v8564_v55 = vsel %vm8469_vm7, %v8386_v44, %v17309_v20  ;;  %8802 = vrot.lane.b32.xlu0 %v17306_v2, %s12095_s26  ;;  %v6287_v37 = vcombine.high %v6285_v8, %v6285_v8  ;;  %v11673_v27 = vrot.slane %v6285_v8, 9  ;;  %v12058_v20 = vld [vmem:[%s18222_s1 + $0x6] ss:$0 sm:$0xff] }
 0x5ad   :  { %v11672_v51 = vrot.slane %v6286_v28, 9  ;;  %v7629_v38 = vmax.f32 %v6278_v49, %v11671_v54  ;;  %v8398_v43 = vrot.slane %v7764_v6, %v15235_v61  ;;  %v8565_v9 = vsel %vm8471_vm8, %v8390_v10, %v8564_v55  ;;  %v17375_v62 = vpop.permute.xlu0 %9171  ;;  %v19307_v12 = vld [vmem:[#allocation198_spill] sm:$0xff]  ;;  %v19309_v54 = vld [vmem:[#allocation76_spill] sm:$0xff] }
 0x5ae   :  { %v4425_v45 = vadd.f32 %v17329_v33, %v17246_v19  ;;  %v3843_v25 = vmul.f32 %v12058_v20, %v19304_v46  ;;  %v8566_v39 = vsel %vm8473_vm9, %v8394_v36, %v8565_v9  ;;  %v11674_v2 = vrot.slane %v6287_v37, 9  ;;  %v17380_v33 = vpop.permute.xlu1 %8881  ;;  %v9391_v36 = vld [vmem:[%s18226_s5] sm:$0xff]  ;;  %9217 = vst.msk [vmem:[#allocation5 + $0x30] sm:$0xff] %vm9213_vm0, %v17375_v62 }
 0x5af   :  { %v7630_v1 = vmax.f32 %v6286_v28, %v11672_v51  ;;  %v7631_v18 = vmax.f32 %v6285_v8, %v11673_v27  ;;  %v8567_v41 = vsel %vm8475_vm10, %v8398_v43, %v8566_v39  ;;  %v7765_v4 = vmax.f32 %v7621_v57, %v7629_v38  ;;  %v19308_v57 = vld [vmem:[#allocation180_spill] sm:$0xff]  ;;  %v17412_v46 = vld [vmem:[%s18223_s2] ss:$0 sm:$0xff]  ;;  %8926 = vst.msk [vmem:[#allocation5 + $0x40] sm:$0xff] %vm8921_vm13, %v17380_v33 }
 0x5b0   :  { %v3907_v29 = vadd.f32 %v3843_v25, %v19305_v3  ;;  %v3845_v19 = vmul.f32 %v12058_v20, %v19306_v34  ;;  %8612 = vst.msk [vmem:[#allocation3 + $0x101] sm:$0xff] %vm7781_vm2, %v8567_v41  ;;  %v7632_v23 = vmax.f32 %v6287_v37, %v11674_v2  ;;  %v4873_v44 = vmul.f32 %v12059_v26, %v19307_v12  ;;  %v12061_v3 = vld [vmem:[%s18222_s1 + $0x7] ss:$0 sm:$0xff] }
 0x5b1   :  { %v7766_v49 = vmax.f32 %v7622_v21, %v7630_v1  ;;  %v7767_v35 = vmax.f32 %v7623_v30, %v7631_v18  ;;  %v8402_v8 = vrot.slane %v7765_v4, %v15235_v61  ;;  %v4875_v6 = vmul.f32 %v12059_v26, %v19309_v54  ;;  %v9392_v21 = vld [vmem:[%s18226_s5 + $0x8] sm:$0xff]  ;;  %v17400_v27 = vpop.permute.xlu0 %9268  ;;  %v17450_v54 = vld [vmem:[%s18224_s3] ss:$0 sm:$0xff] }
 0x5b2   :  { %v3909_v28 = vadd.f32 %v3845_v19, %v19308_v57  ;;  %v4876_v10 = vmul.f32 %v12059_v26, %v17036_v53  ;;  %v7768_v30 = vmax.f32 %v7624_v31, %v7632_v23  ;;  %v4937_v51 = vadd.f32 %v4873_v44, %v17293_v48  ;;  %v17405_v9 = vpop.permute.xlu1 %8978  ;;  %v17436_v23 = vld [vmem:[%s18226_s5 + $0x20] sm:$0xff]  ;;  %9314 = vst.msk [vmem:[#allocation5 + $0x30] sm:$0xff] %vm9310_vm1, %v17400_v27 }
 0x5b3   :  { %v8406_v55 = vrot.slane %v7766_v49, %v15235_v61  ;;  %v8410_v37 = vrot.slane %v7767_v35, %v15235_v61  ;;  %v4939_v38 = vadd.f32 %v4875_v6, %v17313_v11  ;;  %v4878_v43 = vmul.f32 %v12059_v26, %v17038_v42  ;;  %v9393_v42 = vld [vmem:[%s18226_s5 + $0x10] sm:$0xff]  ;;  %9023 = vst.msk [vmem:[#allocation5 + $0x40] sm:$0xff] %vm9018_vm14, %v17405_v9 }
 0x5b4   :  { %v4940_v53 = vadd.f32 %v4876_v10, %v17325_v13  ;;  %v8414_v20 = vrot.slane %v7768_v30, %v15235_v61  ;;  %v5010_v48 = vadd.f32 %v17412_v46, %v4937_v51  ;;  %v12101_v25 = vmov 0.0|0.0   ;;  %v9394_v13 = vld [vmem:[%s18226_s5 + $0x18] sm:$0xff] }
 0x5b5   :  { %v8568_v31 = vsel %vm8463_vm4, %v8406_v55, %v8402_v8  ;;  %11897 = vmatprep.subr.bf16.mxu0 %v12101_v25  ;;  %v11898_v11 = vpack.c.bf16 %v9392_v21, %v9391_v36  ;;  %v5012_v2 = vadd.f32 %v17412_v46, %v4939_v38  ;;  %v4942_v18 = vadd.f32 %v4878_v43, %v4425_v45  ;;  %v8690_v49 = vpop.permute.xlu0 %8689  ;;  %v9396_v8 = vld [vmem:[%s18226_s5 + $0x28] sm:$0xff]  ;;  %v19311_v38 = vld [vmem:[#allocation200_spill] sm:$0xff] }
 0x5b6   :  { %v8569_v39 = vsel %vm8465_vm5, %v8410_v37, %v8568_v31  ;;  %v5013_v1 = vadd.f32 %v17412_v46, %v4940_v53  ;;  %v5074_v41 = vmax.f32 %v5010_v48, 0.0  ;;  %v4360_v34 = vmul.f32 %v12061_v3, %v17052_v50  ;;  %v17443_v57 = vpop.permute.xlu1 %9075  ;;  %v19310_v21 = vld [vmem:[#allocation199_spill] sm:$0xff]  ;;  %8733 = vst.msk [vmem:[#allocation5 + $0x50] sm:$0xff] %vm8727_vm11, %v8690_v49  ;;  %v19316_v49 = vld [vmem:[#allocation82_spill] sm:$0xff] }
 0x5b7   :  { %v17426_v4 = vsel %vm8467_vm6, %v8414_v20, %v8569_v39  ;;  %11899 = vmatpush1.bf16.msra.mxu0 %v11898_v11  ;;  %v4362_v19 = vmul.f32 %v12061_v3, %v17057_v7  ;;  %v5076_v45 = vmax.f32 %v5012_v2, 0.0  ;;  %v5015_v12 = vadd.f32 %v17412_v46, %v4942_v18  ;;  %v9145_v50 = vld [vmem:[#allocation3 + $0x100] sm:$0xff]  ;;  %v19313_v39 = vld [vmem:[#allocation79_spill] sm:$0xff]  ;;  %9120 = vst.msk [vmem:[#allocation5 + $0x40] sm:$0xff] %vm9115_vm15, %v17443_v57 }
 0x5b8   :  { %v5077_v35 = vmax.f32 %v5013_v1, 0.0  ;;  %11900 = vmatprep.subr.bf16.mxu0 %v12101_v25  ;;  %v11901_v44 = vpack.c.bf16 %v9394_v13, %v9393_v42  ;;  %v17445_v7 = vld [vmem:[#allocation3 + $0x102] sm:$0xff]  ;;  %v5144_v6 = vmul.f32 %v17450_v54, %v5074_v41  ;;  %v4424_v10 = vadd.f32 %v4360_v34, %v3907_v29  ;;  %9189 = vrot.lane.b32.xlu1 %v9145_v50, %s12099_s30  ;;  %v17465_v29 = vld [vmem:[%s18225_s4] ss:$0 sm:$0xff] }
 0x5b9   :  { %v4426_v36 = vadd.f32 %v4362_v19, %v3909_v28  ;;  %v4877_v30 = vmul.f32 %v12059_v26, %v19310_v21  ;;  %9355 = vst.msk [vmem:[#allocation5 + $0xc8] sm:$0xff] %vm7781_vm2, %v17445_v7  ;;  %8645 = vst.msk [vmem:[#allocation5 + $0xe0] sm:$0xff] %vm7781_vm2, %v9145_v50  ;;  %v5146_v55 = vmul.f32 %v17450_v54, %v5076_v45  ;;  %v5079_v51 = vmax.f32 %v5015_v12, 0.0  ;;  %v8787_v31 = vpop.permute.xlu0 %8786  ;;  %v19312_v13 = vld [vmem:[#allocation10_spill] sm:$0xff]  ;;  %v19314_v2 = vld [vmem:[#allocation205_spill] sm:$0xff] }
 0x5ba   :  { %v5147_v37 = vmul.f32 %v17450_v54, %v5077_v35  ;;  %v4879_v53 = vmul.f32 %v12059_v26, %v19311_v38  ;;  %8899 = vrot.lane.b32.xlu0 %v9145_v50, %s12096_s27  ;;  %v5214_v28 = vadd.f32 %v17465_v29, %v5144_v6  ;;  %v11904_v20 = vpack.c.bf16 %v9396_v8, %v17436_v23  ;;  %v9242_v1 = vld [vmem:[#allocation3 + $0x101] sm:$0xff]  ;;  %v17486_v18 = vpop.permute.xlu1 %9173 }
 0x5bb   :  { %11902 = vmatpush1.bf16.msra.mxu0 %v11901_v44  ;;  %v4941_v43 = vadd.f32 %v4877_v30, %v4424_v10  ;;  %v5216_v48 = vadd.f32 %v17465_v29, %v5146_v55  ;;  %v5149_v26 = vmul.f32 %v17450_v54, %v5079_v51  ;;  %8728 = vst.msk [vmem:[#allocation5] sm:$0xff] %vm8727_vm11, %v19312_v13  ;;  %8729 = vst.msk [vmem:[#allocation5 + $0x10] sm:$0xff] %vm8727_vm11, %v19313_v39  ;;  %v19315_v45 = vld [vmem:[#allocation78_spill] sm:$0xff] }
 0x5bc   :  { %v5217_v11 = vadd.f32 %v17465_v29, %v5147_v37  ;;  %v17472_v42 = vadd.f32 %v4879_v53, %v4426_v36  ;;  %11903 = vmatprep.subr.bf16.mxu0 %v12101_v25  ;;  %8730 = vst.msk [vmem:[#allocation5 + $0x20] sm:$0xff] %vm8727_vm11, %v19314_v2  ;;  %v6254_v41 = vcombine.high %v5214_v28, %v5214_v28 }
 0x5bd   :  { %v6261_v3 = vrot.slane %v5214_v28, %v15186_v52  ;;  %v17490_v34 = vadd.f32 %v17412_v46, %v4941_v43  ;;  %9286 = vrot.lane.b32.xlu1 %v9242_v1, %s12100_s16  ;;  %v6288_v19 = vcombine.high %v5216_v48, %v5216_v48  ;;  %v6295_v59 = vrot.slane %v5216_v48, %v15186_v52  ;;  %v17509_v50 = vpop.permute.xlu0 %8883 }
 0x5be   :  { %v6305_v23 = vcombine.high %v5217_v11, %v5217_v11  ;;  %v6312_v60 = vrot.slane %v5217_v11, %v15186_v52  ;;  %8825 = vst.msk [vmem:[#allocation5] sm:$0xff] %vm8824_vm12, %v19315_v45  ;;  %8826 = vst.msk [vmem:[#allocation5 + $0x10] sm:$0xff] %vm8824_vm12, %v19316_v49  ;;  %8996 = vrot.lane.b32.xlu0 %v9242_v1, %s12097_s28  ;;  %v6268_v35 = vrot.slane %v6254_v41, %v15186_v52  ;;  %v17514_v63 = vpop.permute.xlu1 %9270 }
 0x5bf   :  { %8827 = vst.msk [vmem:[#allocation5 + $0x20] sm:$0xff] %vm8824_vm12, %v17232_v58  ;;  %8830 = vst.msk [vmem:[#allocation5 + $0x50] sm:$0xff] %vm8824_vm12, %v8787_v31  ;;  %v6269_v12 = vcombine.high %v6261_v3, %v6261_v3  ;;  %v11667_v44 = vrot.slane %v6261_v3, 9  ;;  %v5219_v8 = vadd.f32 %v17465_v29, %v5149_v26  ;;  %11905 = vmatpush1.bf16.msra.mxu0 %v11904_v20  ;;  %v11675_v0 = vrot.slane %v6295_v59, 9 }
 0x5c0   :  { %v6302_v58 = vrot.slane %v6288_v19, %v15186_v52  ;;  %v6303_v6 = vcombine.high %v6295_v59, %v6295_v59  ;;  %v6319_v10 = vrot.slane %v6305_v23, %v15186_v52  ;;  %11906 = vmatprep.subr.bf16.mxu0 %v12101_v25  ;;  %v6270_v36 = vcombine.high %v6268_v35, %v6268_v35 }
 0x5c1   :  { %v11668_v21 = vrot.slane %v6269_v12, 9  ;;  %v11669_v30 = vrot.slane %v6268_v35, 9  ;;  %v7625_v55 = vmax.f32 %v6261_v3, %v11667_v44  ;;  %8707 = vrot.lane.b32.xlu1 %v9242_v1, %s12094_s0  ;;  %v7633_v53 = vmax.f32 %v6295_v59, %v11675_v0  ;;  %v17519_v48 = vpop.permute.xlu0 %8980  ;;  %8924 = vst.msk [vmem:[#allocation5 + $0x20] sm:$0xff] %vm8921_vm13, %v17253_v15  ;;  %8927 = vst.msk [vmem:[#allocation5 + $0x50] sm:$0xff] %vm8921_vm13, %v17509_v50 }
 0x5c2   :  { %v6304_v37 = vcombine.high %v6302_v58, %v6302_v58  ;;  %v11676_v51 = vrot.slane %v6303_v6, 9  ;;  %v11677_v38 = vrot.slane %v6302_v58, 9  ;;  %9093 = vrot.lane.b32.xlu0 %v17445_v7, %s12098_s29  ;;  %v11670_v28 = vrot.slane %v6270_v36, 9  ;;  %v8692_v2 = vpop.permute.xlu1 %8691  ;;  %9021 = vst.msk [vmem:[#allocation5 + $0x20] sm:$0xff] %vm9018_vm14, %v17272_v56  ;;  %9024 = vst.msk [vmem:[#allocation5 + $0x50] sm:$0xff] %vm9018_vm14, %v17519_v48 }
 0x5c3   :  { %v7626_v43 = vmax.f32 %v6269_v12, %v11668_v21  ;;  %v7627_v20 = vmax.f32 %v6268_v35, %v11669_v30  ;;  %v6320_v31 = vcombine.high %v6312_v60, %v6312_v60  ;;  %v7769_v39 = vmax.f32 %v7625_v55, %v7633_v53  ;;  %8734 = vst.msk [vmem:[#allocation5 + $0x60] sm:$0xff] %vm8727_vm11, %v8692_v2  ;;  %v9398_v53 = vld [vmem:[%s18226_s5 + $0x38] sm:$0xff] }
 0x5c4   :  { %v11678_v11 = vrot.slane %v6304_v37, 9  ;;  %v7634_v26 = vmax.f32 %v6303_v6, %v11676_v51  ;;  %v7635_v13 = vmax.f32 %v6302_v58, %v11677_v38  ;;  %v7628_v41 = vmax.f32 %v6270_v36, %v11670_v28  ;;  %v9397_v38 = vld [vmem:[%s18226_s5 + $0x30] sm:$0xff]  ;;  %9118 = vst.msk [vmem:[#allocation5 + $0x20] sm:$0xff] %vm9115_vm15, %v17297_v32 }
 0x5c5   :  { %v6321_v1 = vcombine.high %v6319_v10, %v6319_v10  ;;  %v11679_v3 = vrot.slane %v6312_v60, 9  ;;  %v11680_v19 = vrot.slane %v6320_v31, 9  ;;  %8804 = vrot.lane.b32.xlu1 %v17445_v7, %s12095_s26  ;;  %v8418_v49 = vrot.slane %v7769_v39, %v15235_v61  ;;  %v17529_v6 = vpop.permute.xlu0 %9077  ;;  %9216 = vst.msk [vmem:[#allocation5 + $0x20] sm:$0xff] %vm9213_vm0, %v17331_v16  ;;  %9218 = vst.msk [vmem:[#allocation5 + $0x40] sm:$0xff] %vm9213_vm0, %v17486_v18 }
 0x5c6   :  { %v7636_v59 = vmax.f32 %v6304_v37, %v11678_v11  ;;  %v7770_v23 = vmax.f32 %v7626_v43, %v7634_v26  ;;  %v7771_v45 = vmax.f32 %v7627_v20, %v7635_v13  ;;  %v11681_v35 = vrot.slane %v6319_v10, 9  ;;  %v8789_v30 = vpop.permute.xlu1 %8788  ;;  %9121 = vst.msk [vmem:[#allocation5 + $0x50] sm:$0xff] %vm9115_vm15, %v17529_v6  ;;  %v9405_v6 = vld [vmem:[%s18226_s5 + $0x70] sm:$0xff] }
 0x5c7   :  { %v11682_v12 = vrot.slane %v6321_v1, 9  ;;  %v17525_v44 = vmax.f32 %v6312_v60, %v11679_v3  ;;  %v17527_v58 = vmax.f32 %v6320_v31, %v11680_v19  ;;  %v8571_v21 = vsel %vm8469_vm7, %v8418_v49, %v17426_v4  ;;  %8831 = vst.msk [vmem:[#allocation5 + $0x60] sm:$0xff] %vm8824_vm12, %v8789_v30  ;;  %v9399_v19 = vld [vmem:[%s18226_s5 + $0x40] sm:$0xff] }
 0x5c8   :  { %v7772_v0 = vmax.f32 %v7628_v41, %v7636_v59  ;;  %v8422_v36 = vrot.slane %v7770_v23, %v15235_v61  ;;  %v8426_v7 = vrot.slane %v7771_v45, %v15235_v61  ;;  %v17535_v55 = vmax.f32 %v6319_v10, %v11681_v35  ;;  %v9400_v59 = vld [vmem:[%s18226_s5 + $0x48] sm:$0xff]  ;;  %9313 = vst.msk [vmem:[#allocation5 + $0x20] sm:$0xff] %vm9310_vm1, %v17342_v40 }
 0x5c9   :  { %v17537_v37 = vmax.f32 %v6321_v1, %v11682_v12  ;;  %v6339_v51 = vcombine.high %v5219_v8, %v5219_v8  ;;  %v6346_v60 = vrot.slane %v5219_v8, %v15186_v52  ;;  %v5078_v28 = vmax.f32 %v17490_v34, 0.0  ;;  %v17554_v26 = vpop.permute.xlu0 %9175  ;;  %9315 = vst.msk [vmem:[#allocation5 + $0x40] sm:$0xff] %vm9310_vm1, %v17514_v63 }
 0x5ca   :  { %v8430_v4 = vrot.slane %v7772_v0, %v15235_v61  ;;  %v8572_v10 = vsel %vm8471_vm8, %v8422_v36, %v8571_v21  ;;  %v5016_v43 = vadd.f32 %v17412_v46, %v17472_v42  ;;  %v11907_v41 = vpack.c.bf16 %v9398_v53, %v9397_v38  ;;  %v8886_v1 = vpop.permute.xlu1 %8885  ;;  %v19317_v36 = vld [vmem:[#allocation201_spill] sm:$0xff]  ;;  %9219 = vst.msk [vmem:[#allocation5 + $0x50] sm:$0xff] %vm9213_vm0, %v17554_v26 }
 0x5cb   :  { %v8573_v8 = vsel %vm8473_vm9, %v8426_v7, %v8572_v10  ;;  %v6353_v20 = vrot.slane %v6339_v51, %v15186_v52  ;;  %v6354_v31 = vcombine.high %v6346_v60, %v6346_v60  ;;  %v11687_v11 = vrot.slane %v6346_v60, 9  ;;  %8922 = vst.msk [vmem:[#allocation5] sm:$0xff] %vm8921_vm13, %v19317_v36  ;;  %v19318_v7 = vld [vmem:[#allocation84_spill] sm:$0xff]  ;;  %8928 = vst.msk [vmem:[#allocation5 + $0x60] sm:$0xff] %vm8921_vm13, %v8886_v1  ;;  %v19319_v51 = vld [vmem:[#allocation202_spill] sm:$0xff] }
 0x5cc   :  { %v8574_v13 = vsel %vm8475_vm10, %v8430_v4, %v8573_v8  ;;  %v5148_v39 = vmul.f32 %v17450_v54, %v5078_v28  ;;  %v5080_v2 = vmax.f32 %v5016_v43, 0.0  ;;  %11908 = vmatpush1.bf16.msra.mxu0 %v11907_v41  ;;  %8923 = vst.msk [vmem:[#allocation5 + $0x10] sm:$0xff] %vm8921_vm13, %v19318_v7  ;;  %v11910_v15 = vpack.c.bf16 %v9400_v59, %v9399_v19  ;;  %v9402_v41 = vld [vmem:[%s18226_s5 + $0x58] sm:$0xff] }
 0x5cd   :  { %8613 = vst.msk [vmem:[#allocation3 + $0x111] sm:$0xff] %vm7781_vm2, %v8574_v13  ;;  %v6355_v34 = vcombine.high %v6353_v20, %v6353_v20  ;;  %v11688_v3 = vrot.slane %v6354_v31, 9  ;;  %v11689_v46 = vrot.slane %v6353_v20, 9  ;;  %v7645_v42 = vmax.f32 %v6346_v60, %v11687_v11  ;;  %11909 = vmatprep.subr.bf16.mxu0 %v12101_v25 }
 0x5ce   :  { %v5218_v23 = vadd.f32 %v17465_v29, %v5148_v39  ;;  %v5150_v45 = vmul.f32 %v17450_v54, %v5080_v2  ;;  %v17582_v54 = vpop.permute.xlu0 %9272  ;;  %9019 = vst.msk [vmem:[#allocation5] sm:$0xff] %vm9018_vm14, %v19319_v51  ;;  %9020 = vst.msk [vmem:[#allocation5 + $0x10] sm:$0xff] %vm9018_vm14, %v19320_v47  ;;  %v8983_v33 = vpop.permute.xlu1 %8982  ;;  %v19321_v47 = vld [vmem:[#allocation80_spill] sm:$0xff] }
 0x5cf   :  { %v11690_v49 = vrot.slane %v6355_v34, 9  ;;  %v7646_v35 = vmax.f32 %v6354_v31, %v11688_v3  ;;  %v7647_v12 = vmax.f32 %v6353_v20, %v11689_v46  ;;  %v7773_v0 = vmax.f32 %v17525_v44, %v7645_v42  ;;  %9025 = vst.msk [vmem:[#allocation5 + $0x60] sm:$0xff] %vm9018_vm14, %v8983_v33 }
 0x5d0   :  { %v6322_v44 = vcombine.high %v5218_v23, %v5218_v23  ;;  %v6329_v21 = vrot.slane %v5218_v23, %v15186_v52  ;;  %v5220_v30 = vadd.f32 %v17465_v29, %v5150_v45  ;;  %11911 = vmatpush1.bf16.msra.mxu0 %v11910_v15  ;;  %v9403_v45 = vld [vmem:[%s18226_s5 + $0x60] sm:$0xff]  ;;  %9116 = vst.msk [vmem:[#allocation5] sm:$0xff] %vm9115_vm15, %v19321_v47  ;;  %9117 = vst.msk [vmem:[#allocation5 + $0x10] sm:$0xff] %vm9115_vm15, %v17228_v22 }
 0x5d1   :  { %v7648_v29 = vmax.f32 %v6355_v34, %v11690_v49  ;;  %v7774_v50 = vmax.f32 %v17527_v58, %v7646_v35  ;;  %v7775_v60 = vmax.f32 %v17535_v55, %v7647_v12  ;;  %v8434_v17 = vrot.slane %v7773_v0, %v15235_v61  ;;  %11912 = vmatprep.subr.bf16.mxu0 %v12101_v25  ;;  %v9404_v49 = vld [vmem:[%s18226_s5 + $0x68] sm:$0xff] }
 0x5d2   :  { %v6336_v38 = vrot.slane %v6322_v44, %v15186_v52  ;;  %v6337_v56 = vcombine.high %v6329_v21, %v6329_v21  ;;  %v11683_v53 = vrot.slane %v6329_v21, 9  ;;  %v6356_v4 = vcombine.high %v5220_v30, %v5220_v30  ;;  %v8694_v10 = vpop.permute.xlu0 %8693  ;;  %v9080_v31 = vpop.permute.xlu1 %9079  ;;  %9215 = vst.msk [vmem:[#allocation5 + $0x10] sm:$0xff] %vm9213_vm0, %v17250_v5 }
 0x5d3   :  { %v8438_v9 = vrot.slane %v7774_v50, %v15235_v61  ;;  %v6363_v48 = vrot.slane %v5220_v30, %v15186_v52  ;;  %v7776_v58 = vmax.f32 %v17537_v37, %v7648_v29  ;;  %8735 = vst.msk [vmem:[#allocation5 + $0x70] sm:$0xff] %vm8727_vm11, %v8694_v10  ;;  %v8442_v11 = vrot.slane %v7775_v60, %v15235_v61  ;;  %v9401_v37 = vld [vmem:[%s18226_s5 + $0x50] sm:$0xff]  ;;  %v9406_v60 = vld [vmem:[%s18226_s5 + $0x78] sm:$0xff] }
 0x5d4   :  { %v6338_v55 = vcombine.high %v6336_v38, %v6336_v38  ;;  %v11684_v28 = vrot.slane %v6337_v56, 9  ;;  %v11685_v43 = vrot.slane %v6336_v38, 9  ;;  %v9146_v8 = vld [vmem:[#allocation3 + $0x110] sm:$0xff]  ;;  %v17611_v13 = vmax.f32 %v6329_v21, %v11683_v53  ;;  %9122 = vst.msk [vmem:[#allocation5 + $0x60] sm:$0xff] %vm9115_vm15, %v9080_v31  ;;  %v9408_v53 = vld [vmem:[%s18226_s5 + $0x88] sm:$0xff]  ;;  %v9362_v31 = vld [vmem:[#allocation5 + $0x18] sm:$0xff] }
 0x5d5   :  { %v17607_v20 = vld [vmem:[#allocation3 + $0x112] sm:$0xff]  ;;  %v6370_v39 = vrot.slane %v6356_v4, %v15186_v52  ;;  %v6371_v2 = vcombine.high %v6363_v48, %v6363_v48  ;;  %9191 = vrot.lane.b32.xlu0 %v9146_v8, %s12099_s30  ;;  %8646 = vst.msk [vmem:[#allocation5 + $0xf0] sm:$0xff] %vm7781_vm2, %v9146_v8  ;;  %v8575_v1 = vsel %vm8463_vm4, %v8438_v9, %v8434_v17  ;;  %v11691_v19 = vrot.slane %v6363_v48, 9  ;;  %v19322_v50 = vld [vmem:[#allocation83_spill] sm:$0xff] }
 0x5d6   :  { %9356 = vst.msk [vmem:[#allocation5 + $0xd8] sm:$0xff] %vm7781_vm2, %v17607_v20  ;;  %v11686_v34 = vrot.slane %v6338_v55, 9  ;;  %v7642_v3 = vmax.f32 %v6337_v56, %v11684_v28  ;;  %v7643_v46 = vmax.f32 %v6336_v38, %v11685_v43  ;;  %8901 = vrot.lane.b32.xlu1 %v9146_v8, %s12096_s27  ;;  %v8791_v35 = vpop.permute.xlu0 %8790  ;;  %v8446_v12 = vrot.slane %v7776_v58, %v15235_v61  ;;  %v9243_v7 = vld [vmem:[#allocation3 + $0x111] sm:$0xff]  ;;  %v9178_v44 = vpop.permute.xlu1 %9177 }
 0x5d7   :  { %v6372_v42 = vcombine.high %v6370_v39, %v6370_v39  ;;  %v11692_v59 = vrot.slane %v6371_v2, 9  ;;  %v11693_v23 = vrot.slane %v6370_v39, 9  ;;  %v11913_v36 = vpack.c.bf16 %v9402_v41, %v9401_v37  ;;  %8832 = vst.msk [vmem:[#allocation5 + $0x70] sm:$0xff] %vm8824_vm12, %v8791_v35  ;;  %v19323_v56 = vld [vmem:[#allocation203_spill] sm:$0xff]  ;;  %v9342_v37 = vld [vmem:[#allocation3 + $0x132] sm:$0xff] }
 0x5d8   :  { %v7644_v0 = vmax.f32 %v6338_v55, %v11686_v34  ;;  %v7649_v30 = vmax.f32 %v6363_v48, %v11691_v19  ;;  %v8576_v33 = vsel %vm8465_vm5, %v8442_v11, %v8575_v1  ;;  %v11916_v22 = vpack.c.bf16 %v9404_v49, %v9403_v45  ;;  %9214 = vst.msk [vmem:[#allocation5] sm:$0xff] %vm9213_vm0, %v19322_v50  ;;  %v9364_v1 = vld [vmem:[#allocation5 + $0x28] sm:$0xff]  ;;  %v9363_v34 = vld [vmem:[#allocation5 + $0x20] sm:$0xff]  ;;  %v9245_v49 = vld [vmem:[#allocation3 + $0x131] sm:$0xff] }
 0x5d9   :  { %v11694_v21 = vrot.slane %v6372_v42, 9  ;;  %v7650_v51 = vmax.f32 %v6371_v2, %v11692_v59  ;;  %v7651_v15 = vmax.f32 %v6370_v39, %v11693_v23  ;;  %9288 = vrot.lane.b32.xlu0 %v9243_v7, %s12100_s16  ;;  %11914 = vmatpush1.bf16.msra.mxu0 %v11913_v36  ;;  %9220 = vst.msk [vmem:[#allocation5 + $0x60] sm:$0xff] %vm9213_vm0, %v9178_v44  ;;  %v9366_v59 = vld [vmem:[#allocation5 + $0x38] sm:$0xff]  ;;  %v9365_v23 = vld [vmem:[#allocation5 + $0x30] sm:$0xff]  ;;  %v9376_v50 = vld [vmem:[#allocation5 + $0x88] sm:$0xff] }
 0x5da   :  { %8998 = vrot.lane.b32.xlu1 %v9243_v7, %s12097_s28  ;;  %v7777_v14 = vmax.f32 %v17611_v13, %v7649_v30  ;;  %11915 = vmatprep.subr.bf16.mxu0 %v12101_v25  ;;  %v8888_v38 = vpop.permute.xlu0 %8887  ;;  %9311 = vst.msk [vmem:[#allocation5] sm:$0xff] %vm9310_vm1, %v19323_v56  ;;  %9312 = vst.msk [vmem:[#allocation5 + $0x10] sm:$0xff] %vm9310_vm1, %v17268_v24  ;;  %v9275_v5 = vpop.permute.xlu1 %9274  ;;  %v8577_v40 = vsel %vm8467_vm6, %v8446_v12, %v8576_v33  ;;  %v9368_v12 = vld [vmem:[#allocation5 + $0x48] sm:$0xff]  ;;  %v9370_v44 = vld [vmem:[#allocation5 + $0x58] sm:$0xff] }
 0x5db   :  { %v7652_v32 = vmax.f32 %v6372_v42, %v11694_v21  ;;  %v7778_v29 = vmax.f32 %v7642_v3, %v7650_v51  ;;  %v7779_v57 = vmax.f32 %v7643_v46, %v7651_v15  ;;  %9316 = vst.msk [vmem:[#allocation5 + $0x50] sm:$0xff] %vm9310_vm1, %v17582_v54  ;;  %9317 = vst.msk [vmem:[#allocation5 + $0x60] sm:$0xff] %vm9310_vm1, %v9275_v5  ;;  %v9407_v54 = vld [vmem:[%s18226_s5 + $0x80] sm:$0xff]  ;;  %v9148_v42 = vld [vmem:[#allocation3 + $0x130] sm:$0xff] }
 0x5dc   :  { %8929 = vst.msk [vmem:[#allocation5 + $0x70] sm:$0xff] %vm8921_vm13, %v8888_v38  ;;  %v8450_v62 = vrot.slane %v7777_v14, %v15235_v61  ;;  %v11919_v27 = vpack.c.bf16 %v9406_v60, %v9405_v6  ;;  %v11922_v58 = vpack.c.bf16 %v9408_v53, %v9407_v54  ;;  %v9372_v15 = vld [vmem:[#allocation5 + $0x68] sm:$0xff]  ;;  %v9374_v33 = vld [vmem:[#allocation5 + $0x78] sm:$0xff] }
 0x5dd   :  { %v7780_v16 = vmax.f32 %v7644_v0, %v7652_v32  ;;  %v8454_v24 = vrot.slane %v7778_v29, %v15235_v61  ;;  %v8458_v18 = vrot.slane %v7779_v57, %v15235_v61  ;;  %8709 = vrot.lane.b32.xlu0 %v9243_v7, %s12094_s0  ;;  %11917 = vmatpush1.bf16.msra.mxu0 %v11916_v22  ;;  %v9367_v0 = vld [vmem:[#allocation5 + $0x40] sm:$0xff]  ;;  %v9378_v56 = vld [vmem:[#allocation5 + $0x98] sm:$0xff] }
 0x5de   :  { %9095 = vrot.lane.b32.xlu1 %v17607_v20, %s12098_s29  ;;  %v8578_v26 = vsel %vm8469_vm7, %v8450_v62, %v8577_v40  ;;  %11918 = vmatprep.subr.bf16.mxu0 %v12101_v25  ;;  %v8985_v4 = vpop.permute.xlu0 %8984  ;;  %v8696_v9 = vpop.permute.xlu1 %8695  ;;  %9358 = vst.msk [vmem:[#allocation5 + $0xf8] sm:$0xff] %vm7781_vm2, %v9342_v37  ;;  %v9380_v40 = vld [vmem:[#allocation5 + $0xa8] sm:$0xff]  ;;  %vm10550_vm7 = vcmask 261120  }
 0x5df   :  { %v8462_v63 = vrot.slane %v7780_v16, %v15235_v61  ;;  %v8579_v17 = vsel %vm8471_vm8, %v8454_v24, %v8578_v26  ;;  %9026 = vst.msk [vmem:[#allocation5 + $0x70] sm:$0xff] %vm9018_vm14, %v8985_v4  ;;  %vm10587_vm8 = vcmask 523520  }
 0x5e0   :  { %v8580_v48 = vsel %vm8473_vm9, %v8458_v18, %v8579_v17  ;;  %8736 = vst.msk [vmem:[#allocation5 + $0x80] sm:$0xff] %vm8727_vm11, %v8696_v9  ;;  %v9382_v9 = vld [vmem:[#allocation5 + $0xb8] sm:$0xff]  ;;  %vm10624_vm9 = vcmask 785920  }
 0x5e1   :  { %8806 = vrot.lane.b32.xlu0 %v17607_v20, %s12095_s26  ;;  %v8581_v10 = vsel %vm8475_vm10, %v8462_v63, %v8580_v48  ;;  %11920 = vmatpush1.bf16.msra.mxu0 %v11919_v27  ;;  %v9359_v43 = vld [vmem:[#allocation5] sm:$0xff]  ;;  %v9361_v11 = vld [vmem:[#allocation5 + $0x10] sm:$0xff]  ;;  %vm10661_vm10 = vcmask 1048320  }
 0x5e2   :  { %8614 = vst.msk [vmem:[#allocation3 + $0x121] sm:$0xff] %vm7781_vm2, %v8581_v10  ;;  %11921 = vmatprep.subr.bf16.mxu0 %v12101_v25  ;;  %v9082_v55 = vpop.permute.xlu0 %9081  ;;  %v8793_v28 = vpop.permute.xlu1 %8792  ;;  %v9369_v21 = vld [vmem:[#allocation5 + $0x50] sm:$0xff]  ;;  %v9371_v47 = vld [vmem:[#allocation5 + $0x60] sm:$0xff] }
 0x5e3   :  { %9123 = vst.msk [vmem:[#allocation5 + $0x70] sm:$0xff] %vm9115_vm15, %v9082_v55 }
 0x5e4   :  { %8833 = vst.msk [vmem:[#allocation5 + $0x80] sm:$0xff] %vm8824_vm12, %v8793_v28 }
 0x5e5   :  { %11923 = vmatpush1.bf16.msra.mxu0 %v11922_v58 }
 0x5e6   :  { %v9180_v8 = vpop.permute.xlu0 %9179  ;;  %v8890_v20 = vpop.permute.xlu1 %8889 }
 0x5e7   :  { %9221 = vst.msk [vmem:[#allocation5 + $0x70] sm:$0xff] %vm9213_vm0, %v9180_v8 }
 0x5e8   :  { %9531 = vmatmul.mubr.f32.vlgmr.msra.gmra.mrb[0].mxu0 %v9359_v43  ;;  %8930 = vst.msk [vmem:[#allocation5 + $0x80] sm:$0xff] %vm8921_vm13, %v8890_v20 }
 0x5e9   :  { %11697 = vmatprep.mubr.msk.f32.mxu0 %vm7781_vm2, %v9362_v31  ;;  %v9147_v13 = vld [vmem:[#allocation3 + $0x120] sm:$0xff] }
 0x5ea   :  { %v9050_v39 = vld [vmem:[#allocation3 + $0x122] sm:$0xff]  ;;  %9193 = vrot.lane.b32.xlu1 %v9147_v13, %s12099_s30  ;;  %8903 = vrot.lane.b32.xlu0 %v9147_v13, %s12096_s27  ;;  %v9277_v2 = vpop.permute.xlu0 %9276  ;;  %v8987_v41 = vpop.permute.xlu1 %8986 }
 0x5eb   :  { %9357 = vst.msk [vmem:[#allocation5 + $0xe8] sm:$0xff] %vm7781_vm2, %v9050_v39  ;;  %v9244_v3 = vld [vmem:[#allocation3 + $0x121] sm:$0xff] }
 0x5ec   :  { %9318 = vst.msk [vmem:[#allocation5 + $0x70] sm:$0xff] %vm9310_vm1, %v9277_v2  ;;  %9536 = vmatmul.mubr.f32.gmra.mrb[2].mxu0 %v9361_v11  ;;  %v9384_v11 = vld [vmem:[#allocation5 + $0xc8] sm:$0xff] }
 0x5ed   :  { %9027 = vst.msk [vmem:[#allocation5 + $0x80] sm:$0xff] %vm9018_vm14, %v8987_v41  ;;  %11698 = vmatprep.mubr.msk.f32.mxu0 %vm7781_vm2, %v9364_v1 }
 0x5ee   :  { %9290 = vrot.lane.b32.xlu1 %v9244_v3, %s12100_s16  ;;  %9000 = vrot.lane.b32.xlu0 %v9244_v3, %s12097_s28  ;;  %v8698_v46 = vpop.permute.xlu0 %8697  ;;  %v9084_v19 = vpop.permute.xlu1 %9083  ;;  %v9386_v3 = vld [vmem:[#allocation5 + $0xd8] sm:$0xff] }
 0x5ef   :  { %8737 = vst.msk [vmem:[#allocation5 + $0x90] sm:$0xff] %vm8727_vm11, %v8698_v46 }
 0x5f0   :  { %9541 = vmatmul.mubr.f32.gmra.mrb[4].mxu0 %v9363_v34  ;;  %9124 = vst.msk [vmem:[#allocation5 + $0x80] sm:$0xff] %vm9115_vm15, %v9084_v19 }
 0x5f1   :  { %11699 = vmatprep.mubr.msk.f32.mxu0 %vm7781_vm2, %v9366_v59 }
 0x5f2   :  { %9097 = vrot.lane.b32.xlu1 %v9050_v39, %s12098_s29  ;;  %9195 = vrot.lane.b32.xlu0 %v9148_v42, %s12099_s30  ;;  %v8795_v45 = vpop.permute.xlu0 %8794  ;;  %v9182_v35 = vpop.permute.xlu1 %9181 }
 0x5f3   :  { %8834 = vst.msk [vmem:[#allocation5 + $0x90] sm:$0xff] %vm8824_vm12, %v8795_v45  ;;  %v9373_v14 = vld [vmem:[#allocation5 + $0x70] sm:$0xff] }
 0x5f4   :  { %9546 = vmatmul.mubr.f32.gmra.mrb[6].mxu0 %v9365_v23  ;;  %9222 = vst.msk [vmem:[#allocation5 + $0x80] sm:$0xff] %vm9213_vm0, %v9182_v35 }
 0x5f5   :  { %11700 = vmatprep.mubr.msk.f32.mxu0 %vm7781_vm2, %v9368_v12  ;;  %v9388_v12 = vld [vmem:[#allocation5 + $0xe8] sm:$0xff] }
 0x5f6   :  { %9292 = vrot.lane.b32.xlu1 %v9245_v49, %s12100_s16  ;;  %v8892_v36 = vpop.permute.xlu0 %8891  ;;  %v9279_v7 = vpop.permute.xlu1 %9278 }
 0x5f7   :  { %8931 = vst.msk [vmem:[#allocation5 + $0x90] sm:$0xff] %vm8921_vm13, %v8892_v36 }
 0x5f8   :  { %9551 = vmatmul.mubr.f32.gmra.mrb[8].mxu0 %v9367_v0  ;;  %9319 = vst.msk [vmem:[#allocation5 + $0x80] sm:$0xff] %vm9310_vm1, %v9279_v7  ;;  %v19324_v0 = vmov 0.0  }
 0x5f9   :  { %11701 = vmatprep.mubr.msk.f32.mxu0 %vm7781_vm2, %v9370_v44  ;;  %10313 = vst.msk [vmem:[#allocation4 + $0x8] sm:$0x3f] %vm10311_vm3, %v19324_v0  ;;  %10312 = vst.msk [vmem:[#allocation4] sm:$0x3f] %vm10311_vm3, %v19324_v0 }
 0x5fa   :  { %v8989_v30 = vpop.permute.xlu0 %8988  ;;  %v8700_v51 = vpop.permute.xlu1 %8699  ;;  %10314 = vst.msk [vmem:[#allocation4 + $0x10] sm:$0x3f] %vm10311_vm3, %v19324_v0  ;;  %10315 = vst.msk [vmem:[#allocation4 + $0x18] sm:$0x3f] %vm10311_vm3, %v19324_v0 }
 0x5fb   :  { %9028 = vst.msk [vmem:[#allocation5 + $0x90] sm:$0xff] %vm9018_vm14, %v8989_v30 }
 0x5fc   :  { %9556 = vmatmul.mubr.f32.gmra.mrb[10].mxu0 %v9369_v21  ;;  %8738 = vst.msk [vmem:[#allocation5 + $0xa0] sm:$0xff] %vm8727_vm11, %v8700_v51 }
 0x5fd   :  { %11702 = vmatprep.mubr.msk.f32.mxu0 %vm7781_vm2, %v9372_v15  ;;  %10316 = vst.msk [vmem:[#allocation4 + $0x20] sm:$0x3f] %vm10311_vm3, %v19324_v0  ;;  %10317 = vst.msk [vmem:[#allocation4 + $0x28] sm:$0x3f] %vm10311_vm3, %v19324_v0  ;;  %v9390_v15 = vld [vmem:[#allocation5 + $0xf8] sm:$0xff] }
 0x5fe   :  { %v9086_v22 = vpop.permute.xlu0 %9085  ;;  %v8797_v32 = vpop.permute.xlu1 %8796  ;;  %10318 = vst.msk [vmem:[#allocation4 + $0x30] sm:$0x3f] %vm10311_vm3, %v19324_v0  ;;  %10319 = vst.msk [vmem:[#allocation4 + $0x38] sm:$0x3f] %vm10311_vm3, %v19324_v0 }
 0x5ff   :  { %9125 = vst.msk [vmem:[#allocation5 + $0x90] sm:$0xff] %vm9115_vm15, %v9086_v22  ;;  %v9375_v6 = vld [vmem:[#allocation5 + $0x80] sm:$0xff] }
 0x600   :  { %9561 = vmatmul.mubr.f32.gmra.mrb[12].mxu0 %v9371_v47  ;;  %8835 = vst.msk [vmem:[#allocation5 + $0xa0] sm:$0xff] %vm8824_vm12, %v8797_v32  ;;  %v17807_v32 = vld [vmem:[%s18227_s6] ss:$0 sm:$0xff] }
 0x601   :  { %11703 = vmatprep.mubr.msk.f32.mxu0 %vm7781_vm2, %v9374_v33  ;;  %10320 = vst.msk [vmem:[#allocation4 + $0x40] sm:$0x3f] %vm10311_vm3, %v19324_v0  ;;  %10321 = vst.msk [vmem:[#allocation4 + $0x48] sm:$0x3f] %vm10311_vm3, %v19324_v0 }
 0x602   :  { %v9184_v29 = vpop.permute.xlu0 %9183  ;;  %v8894_v57 = vpop.permute.xlu1 %8893  ;;  %10322 = vst.msk [vmem:[#allocation4 + $0x50] sm:$0x3f] %vm10311_vm3, %v19324_v0  ;;  %10323 = vst.msk [vmem:[#allocation4 + $0x58] sm:$0x3f] %vm10311_vm3, %v19324_v0 }
 0x603   :  { %9223 = vst.msk [vmem:[#allocation5 + $0x90] sm:$0xff] %vm9213_vm0, %v9184_v29 }
 0x604   :  { %9566 = vmatmul.mubr.f32.gmra.mrb[14].mxu0 %v9373_v14  ;;  %8932 = vst.msk [vmem:[#allocation5 + $0xa0] sm:$0xff] %vm8921_vm13, %v8894_v57 }
 0x605   :  { %11704 = vmatprep.mubr.msk.f32.mxu0 %vm7781_vm2, %v9376_v50  ;;  %v17813_v50 = vld [vmem:[%s18228_s7] ss:$0 sm:$0xff] }
 0x606   :  { %v9281_v60 = vpop.permute.xlu0 %9280  ;;  %v8991_v38 = vpop.permute.xlu1 %8990 }
 0x607   :  { %9320 = vst.msk [vmem:[#allocation5 + $0x90] sm:$0xff] %vm9310_vm1, %v9281_v60  ;;  %v17818_v60 = vld [vmem:[%s18229_s8] ss:$0 sm:$0xff] }
 0x608   :  { %9571 = vmatmul.mubr.f32.gmra.mrb[16].mxu0 %v9375_v6  ;;  %9029 = vst.msk [vmem:[#allocation5 + $0xa0] sm:$0xff] %vm9018_vm14, %v8991_v38 }
 0x609   :  { %11705 = vmatprep.mubr.msk.f32.mxu0 %vm7781_vm2, %v9378_v56 }
 0x60a   :  { %v8702_v5 = vpop.permute.xlu0 %8701  ;;  %v9088_v16 = vpop.permute.xlu1 %9087 }
 0x60b   :  { %8739 = vst.msk [vmem:[#allocation5 + $0xb0] sm:$0xff] %vm8727_vm11, %v8702_v5 }
 0x60c   :  { %9126 = vst.msk [vmem:[#allocation5 + $0xa0] sm:$0xff] %vm9115_vm15, %v9088_v16 }
 0x60e   :  { %v8799_v62 = vpop.permute.xlu0 %8798  ;;  %v9377_v24 = vld [vmem:[#allocation5 + $0x90] sm:$0xff]  ;;  %v9186_v18 = vpop.permute.xlu1 %9185 }
 0x60f   :  { %8836 = vst.msk [vmem:[#allocation5 + $0xb0] sm:$0xff] %vm8824_vm12, %v8799_v62  ;;  %9576 = vmatmul.mubr.f32.gmra.mrb[18].mxu0 %v9377_v24 }
 0x610   :  { %9224 = vst.msk [vmem:[#allocation5 + $0xa0] sm:$0xff] %vm9213_vm0, %v9186_v18  ;;  %11706 = vmatprep.mubr.msk.f32.mxu0 %vm7781_vm2, %v9380_v40 }
 0x612   :  { %v8896_v27 = vpop.permute.xlu0 %8895  ;;  %v9283_v63 = vpop.permute.xlu1 %9282 }
 0x613   :  { %8933 = vst.msk [vmem:[#allocation5 + $0xb0] sm:$0xff] %vm8921_vm13, %v8896_v27 }
 0x614   :  { %9321 = vst.msk [vmem:[#allocation5 + $0xa0] sm:$0xff] %vm9310_vm1, %v9283_v63 }
 0x616   :  { %v8993_v26 = vpop.permute.xlu0 %8992  ;;  %v8704_v54 = vpop.permute.xlu1 %8703 }
 0x617   :  { %9030 = vst.msk [vmem:[#allocation5 + $0xb0] sm:$0xff] %vm9018_vm14, %v8993_v26 }
 0x618   :  { %8740 = vst.msk [vmem:[#allocation5 + $0xc0] sm:$0xff] %vm8727_vm11, %v8704_v54 }
 0x61a   :  { %v9090_v53 = vpop.permute.xlu0 %9089  ;;  %v8801_v4 = vpop.permute.xlu1 %8800 }
 0x61b   :  { %9127 = vst.msk [vmem:[#allocation5 + $0xb0] sm:$0xff] %vm9115_vm15, %v9090_v53  ;;  %v9379_v17 = vld [vmem:[#allocation5 + $0xa0] sm:$0xff] }
 0x61c   :  { %8837 = vst.msk [vmem:[#allocation5 + $0xc0] sm:$0xff] %vm8824_vm12, %v8801_v4  ;;  %9581 = vmatmul.mubr.f32.gmra.mrb[20].mxu0 %v9379_v17 }
 0x61d   :  { %11707 = vmatprep.mubr.msk.f32.mxu0 %vm7781_vm2, %v9382_v9 }
 0x61e   :  { %v9188_v48 = vpop.permute.xlu0 %9187  ;;  %v8898_v10 = vpop.permute.xlu1 %8897 }
 0x61f   :  { %9225 = vst.msk [vmem:[#allocation5 + $0xb0] sm:$0xff] %vm9213_vm0, %v9188_v48 }
 0x620   :  { %8934 = vst.msk [vmem:[#allocation5 + $0xc0] sm:$0xff] %vm8921_vm13, %v8898_v10 }
 0x622   :  { %v9285_v58 = vpop.permute.xlu0 %9284  ;;  %v8995_v55 = vpop.permute.xlu1 %8994 }
 0x623   :  { %9322 = vst.msk [vmem:[#allocation5 + $0xb0] sm:$0xff] %vm9310_vm1, %v9285_v58 }
 0x624   :  { %9031 = vst.msk [vmem:[#allocation5 + $0xc0] sm:$0xff] %vm9018_vm14, %v8995_v55 }
 0x626   :  { %v8706_v28 = vpop.permute.xlu0 %8705  ;;  %v9092_v43 = vpop.permute.xlu1 %9091 }
 0x627   :  { %8741 = vst.msk [vmem:[#allocation5 + $0xd0] sm:$0xff] %vm8727_vm11, %v8706_v28 }
 0x628   :  { %9128 = vst.msk [vmem:[#allocation5 + $0xc0] sm:$0xff] %vm9115_vm15, %v9092_v43 }
 0x62a   :  { %v8803_v8 = vpop.permute.xlu0 %8802  ;;  %v9381_v20 = vld [vmem:[#allocation5 + $0xb0] sm:$0xff]  ;;  %v9190_v31 = vpop.permute.xlu1 %9189 }
 0x62b   :  { %8838 = vst.msk [vmem:[#allocation5 + $0xd0] sm:$0xff] %vm8824_vm12, %v8803_v8  ;;  %9586 = vmatmul.mubr.f32.gmra.mrb[22].mxu0 %v9381_v20 }
 0x62c   :  { %9226 = vst.msk [vmem:[#allocation5 + $0xc0] sm:$0xff] %vm9213_vm0, %v9190_v31  ;;  %11708 = vmatprep.mubr.msk.f32.mxu0 %vm7781_vm2, %v9384_v11 }
 0x62e   :  { %v8900_v13 = vpop.permute.xlu0 %8899 }
 0x62f   :  { %8935 = vst.msk [vmem:[#allocation5 + $0xd0] sm:$0xff] %vm8921_vm13, %v8900_v13  ;;  %v9287_v39 = vpop.permute.xlu1 %9286 }
 0x630   :  { %9323 = vst.msk [vmem:[#allocation5 + $0xc0] sm:$0xff] %vm9310_vm1, %v9287_v39 }
 0x632   :  { %v8997_v2 = vpop.permute.xlu0 %8996 }
 0x633   :  { %9032 = vst.msk [vmem:[#allocation5 + $0xd0] sm:$0xff] %vm9018_vm14, %v8997_v2  ;;  %v8708_v37 = vpop.permute.xlu1 %8707 }
 0x634   :  { %8742 = vst.msk [vmem:[#allocation5 + $0xe0] sm:$0xff] %vm8727_vm11, %v8708_v37 }
 0x636   :  { %v9094_v41 = vpop.permute.xlu0 %9093 }
 0x637   :  { %9129 = vst.msk [vmem:[#allocation5 + $0xd0] sm:$0xff] %vm9115_vm15, %v9094_v41  ;;  %v8805_v1 = vpop.permute.xlu1 %8804  ;;  %v9383_v34 = vld [vmem:[#allocation5 + $0xc0] sm:$0xff] }
 0x638   :  { %8839 = vst.msk [vmem:[#allocation5 + $0xe0] sm:$0xff] %vm8824_vm12, %v8805_v1  ;;  %9591 = vmatmul.mubr.f32.gmra.mrb[24].mxu0 %v9383_v34 }
 0x639   :  { %11709 = vmatprep.mubr.msk.f32.mxu0 %vm7781_vm2, %v9386_v3 }
 0x647   :  { %v9192_v46 = vpop.permute.xlu0 %9191 }
 0x648   :  { %9227 = vst.msk [vmem:[#allocation5 + $0xd0] sm:$0xff] %vm9213_vm0, %v9192_v46  ;;  %v8902_v42 = vpop.permute.xlu1 %8901 }
 0x649   :  { %8936 = vst.msk [vmem:[#allocation5 + $0xe0] sm:$0xff] %vm8921_vm13, %v8902_v42 }
 0x64b   :  { %v9289_v19 = vpop.permute.xlu0 %9288 }
 0x64c   :  { %9324 = vst.msk [vmem:[#allocation5 + $0xd0] sm:$0xff] %vm9310_vm1, %v9289_v19  ;;  %v8999_v59 = vpop.permute.xlu1 %8998 }
 0x64d   :  { %9033 = vst.msk [vmem:[#allocation5 + $0xe0] sm:$0xff] %vm9018_vm14, %v8999_v59 }
 0x64f   :  { %v8710_v23 = vpop.permute.xlu0 %8709 }
 0x650   :  { %8743 = vst.msk [vmem:[#allocation5 + $0xf0] sm:$0xff] %vm8727_vm11, %v8710_v23  ;;  %v9096_v45 = vpop.permute.xlu1 %9095  ;;  %vm12102_vm11 = vmmov 0  }
 0x651   :  { %9130 = vst.msk [vmem:[#allocation5 + $0xe0] sm:$0xff] %vm9115_vm15, %v9096_v45 }
 0x653   :  { %v8807_v49 = vpop.permute.xlu0 %8806  ;;  %v9385_v35 = vld [vmem:[#allocation5 + $0xd0] sm:$0xff] }
 0x654   :  { %8840 = vst.msk [vmem:[#allocation5 + $0xf0] sm:$0xff] %vm8824_vm12, %v8807_v49  ;;  %9596 = vmatmul.mubr.f32.gmra.mrb[26].mxu0 %v9385_v35  ;;  %vm11302_vm12 = vcmask 519168  }
 0x655   :  { %11710 = vmatprep.mubr.msk.f32.mxu0 %vm7781_vm2, %v9388_v12 }
 0x65c   :  { %v9194_v36 = vpop.permute.xlu1 %9193  ;;  %v8904_v7 = vpop.permute.xlu0 %8903 }
 0x65d   :  { %9228 = vst.msk [vmem:[#allocation5 + $0xe0] sm:$0xff] %vm9213_vm0, %v9194_v36 }
 0x65e   :  { %8937 = vst.msk [vmem:[#allocation5 + $0xf0] sm:$0xff] %vm8921_vm13, %v8904_v7  ;;  %vm11338_vm13 = vcmask 523264  }
 0x660   :  { %v9291_v44 = vpop.permute.xlu1 %9290  ;;  %v9001_v21 = vpop.permute.xlu0 %9000 }
 0x661   :  { %9325 = vst.msk [vmem:[#allocation5 + $0xe0] sm:$0xff] %vm9310_vm1, %v9291_v44 }
 0x662   :  { %9034 = vst.msk [vmem:[#allocation5 + $0xf0] sm:$0xff] %vm9018_vm14, %v9001_v21 }
 0x664   :  { %v9098_v30 = vpop.permute.xlu1 %9097  ;;  %v9196_v51 = vpop.permute.xlu0 %9195 }
 0x665   :  { %9131 = vst.msk [vmem:[#allocation5 + $0xf0] sm:$0xff] %vm9115_vm15, %v9098_v30 }
 0x666   :  { %9229 = vst.msk [vmem:[#allocation5 + $0xf0] sm:$0xff] %vm9213_vm0, %v9196_v51 }
 0x668   :  { %v9293_v47 = vpop.permute.xlu1 %9292  ;;  %v9387_v33 = vld [vmem:[#allocation5 + $0xe0] sm:$0xff] }
 0x669   :  { %9326 = vst.msk [vmem:[#allocation5 + $0xf0] sm:$0xff] %vm9310_vm1, %v9293_v47  ;;  %9601 = vmatmul.mubr.f32.gmra.mrb[28].mxu0 %v9387_v33 }
 0x66a   :  { %11711 = vmatprep.mubr.msk.f32.mxu0 %vm7781_vm2, %v9390_v15  ;;  %vm10517_vm2 = vcmask 257024  }
 0x670   :  { %v9389_v22 = vld [vmem:[#allocation5 + $0xf0] sm:$0xff] }
 0x671   :  { %9606 = vmatmul.mubr.f32.gmra.mrb[30].mxu0 %v9389_v22 }
 0x6bb   :  { %v9532_v14 = vpop.f32.mrb[0].mxu0 }
 0x6bc   :  { %v9533_v29 = vadd.f32 %v17807_v32, %v9532_v14  ;;  %v9534_v57 = vpop.f32.mrb[1].mxu0 }
 0x6be   :  { %v9611_v6 = vmax.f32 %v9533_v29, 0.0 }
 0x6bf   :  { %v9537_v38 = vpop.f32.mrb[2].mxu0 }
 0x6c0   :  { %v9633_v56 = vmul.f32 %v17813_v50, %v9611_v6  ;;  %v9538_v5 = vadd.f32 %v17807_v32, %v9537_v38  ;;  %v9539_v16 = vpop.f32.mrb[3].mxu0 }
 0x6c2   :  { %v9655_v62 = vadd.f32 %v17818_v60, %v9633_v56  ;;  %v9612_v24 = vmax.f32 %v9538_v5, 0.0 }
 0x6c3   :  { %v9542_v18 = vpop.f32.mrb[4].mxu0 }
 0x6c4   :  { %v9687_v40 = vcombine.high %v9655_v62, %v9655_v62  ;;  %v9694_v27 = vrot.slane %v9655_v62, %v15186_v52  ;;  %v9634_v63 = vmul.f32 %v17813_v50, %v9612_v24  ;;  %v9543_v26 = vadd.f32 %v17807_v32, %v9542_v18  ;;  %v9544_v54 = vpop.f32.mrb[5].mxu0 }
 0x6c6   :  { %v9701_v53 = vrot.slane %v9687_v40, %v15186_v52  ;;  %v9702_v4 = vcombine.high %v9694_v27, %v9694_v27  ;;  %v11714_v17 = vrot.slane %v9694_v27, 9  ;;  %v9656_v9 = vadd.f32 %v17818_v60, %v9634_v63 }
 0x6c7   :  { %v9613_v48 = vmax.f32 %v9543_v26, 0.0  ;;  %v9547_v10 = vpop.f32.mrb[6].mxu0 }
 0x6c8   :  { %v9703_v58 = vcombine.high %v9701_v53, %v9701_v53  ;;  %v11715_v55 = vrot.slane %v9702_v4, 9  ;;  %v11716_v28 = vrot.slane %v9701_v53, 9  ;;  %v9549_v43 = vpop.f32.mrb[7].mxu0  ;;  %v9704_v8 = vcombine.high %v9656_v9, %v9656_v9 }
 0x6c9   :  { %v9711_v20 = vrot.slane %v9656_v9, %v15186_v52  ;;  %v9635_v31 = vmul.f32 %v17813_v50, %v9613_v48  ;;  %v9548_v11 = vadd.f32 %v17807_v32, %v9547_v10  ;;  %v10215_v39 = vmax.f32 %v9694_v27, %v11714_v17 }
 0x6ca   :  { %v11717_v13 = vrot.slane %v9703_v58, 9  ;;  %v10216_v2 = vmax.f32 %v9702_v4, %v11715_v55  ;;  %v9718_v37 = vrot.slane %v9704_v8, %v15186_v52  ;;  %v10217_v46 = vmax.f32 %v9701_v53, %v11716_v28 }
 0x6cb   :  { %v9719_v41 = vcombine.high %v9711_v20, %v9711_v20  ;;  %v11718_v1 = vrot.slane %v9711_v20, 9  ;;  %v9657_v34 = vadd.f32 %v17818_v60, %v9635_v31  ;;  %v9552_v3 = vpop.f32.mrb[8].mxu0  ;;  %v9614_v19 = vmax.f32 %v9548_v11, 0.0 }
 0x6cc   :  { %v10218_v42 = vmax.f32 %v9703_v58, %v11717_v13  ;;  %v9553_v59 = vadd.f32 %v17807_v32, %v9552_v3  ;;  %v9554_v23 = vpop.f32.mrb[9].mxu0  ;;  %v9720_v45 = vcombine.high %v9718_v37, %v9718_v37  ;;  %v11720_v35 = vrot.slane %v9718_v37, 9 }
 0x6cd   :  { %v11719_v49 = vrot.slane %v9719_v41, 9  ;;  %v10219_v12 = vmax.f32 %v9711_v20, %v11718_v1  ;;  %v9721_v36 = vcombine.high %v9657_v34, %v9657_v34  ;;  %v9728_v7 = vrot.slane %v9657_v34, %v15186_v52 }
 0x6ce   :  { %v9636_v44 = vmul.f32 %v17813_v50, %v9614_v19  ;;  %v9615_v21 = vmax.f32 %v9553_v59, 0.0  ;;  %v11721_v30 = vrot.slane %v9720_v45, 9  ;;  %v10221_v15 = vmax.f32 %v9718_v37, %v11720_v35 }
 0x6cf   :  { %v10220_v51 = vmax.f32 %v9719_v41, %v11719_v49  ;;  %v10279_v47 = vmax.f32 %v10215_v39, %v10219_v12  ;;  %v9557_v33 = vpop.f32.mrb[10].mxu0  ;;  %v9735_v22 = vrot.slane %v9721_v36, %v15186_v52  ;;  %v9736_v14 = vcombine.high %v9728_v7, %v9728_v7 }
 0x6d0   :  { %v11722_v29 = vrot.slane %v9728_v7, 9  ;;  %v9658_v57 = vadd.f32 %v17818_v60, %v9636_v44  ;;  %v9559_v6 = vpop.f32.mrb[11].mxu0  ;;  %v10222_v38 = vmax.f32 %v9720_v45, %v11721_v30  ;;  %v10281_v5 = vmax.f32 %v10217_v46, %v10221_v15 }
 0x6d1   :  { %v10280_v56 = vmax.f32 %v10216_v2, %v10220_v51  ;;  %v10359_v16 = vrot.slane %v10279_v47, %v15235_v61  ;;  %v9737_v62 = vcombine.high %v9735_v22, %v9735_v22  ;;  %v11723_v24 = vrot.slane %v9736_v14, 9 }
 0x6d2   :  { %v11724_v18 = vrot.slane %v9735_v22, 9  ;;  %v10223_v40 = vmax.f32 %v9728_v7, %v11722_v29  ;;  %v10282_v27 = vmax.f32 %v10218_v42, %v10222_v38  ;;  %v10367_v26 = vrot.slane %v10281_v5, %v15235_v61 }
 0x6d3   :  { %v10363_v63 = vrot.slane %v10280_v56, %v15235_v61  ;;  %v9738_v54 = vcombine.high %v9658_v57, %v9658_v57  ;;  %v9562_v53 = vpop.f32.mrb[12].mxu0  ;;  %v11725_v4 = vrot.slane %v9737_v62, 9  ;;  %v10224_v17 = vmax.f32 %v9736_v14, %v11723_v24 }
 0x6d4   :  { %v10225_v9 = vmax.f32 %v9735_v22, %v11724_v18  ;;  %v9745_v48 = vrot.slane %v9658_v57, %v15186_v52  ;;  %v9564_v10 = vpop.f32.mrb[13].mxu0  ;;  %v10371_v58 = vrot.slane %v10282_v27, %v15235_v61  ;;  %v9637_v43 = vmul.f32 %v17813_v50, %v9615_v21 }
 0x6d5   :  { %v10484_v55 = vsel %vm8463_vm4, %v10363_v63, %v10359_v16  ;;  %v9752_v28 = vrot.slane %v9738_v54, %v15186_v52  ;;  %v10226_v20 = vmax.f32 %v9737_v62, %v11725_v4  ;;  %v9558_v3 = vadd.f32 %v17807_v32, %v9557_v33 }
 0x6d6   :  { %v10485_v8 = vsel %vm8465_vm5, %v10367_v26, %v10484_v55  ;;  %v9753_v31 = vcombine.high %v9745_v48, %v9745_v48  ;;  %v11726_v11 = vrot.slane %v9745_v48, 9  ;;  %v9659_v37 = vadd.f32 %v17818_v60, %v9637_v43 }
 0x6d7   :  { %v10486_v13 = vsel %vm8467_vm6, %v10371_v58, %v10485_v8  ;;  %v9754_v39 = vcombine.high %v9752_v28, %v9752_v28  ;;  %v11728_v2 = vrot.slane %v9752_v28, 9  ;;  %v9567_v41 = vpop.f32.mrb[14].mxu0  ;;  %v9563_v46 = vadd.f32 %v17807_v32, %v9562_v53 }
 0x6d8   :  { %10518 = vst.msk [vmem:[#allocation4 + $0x9] sm:$0xf] %vm10517_vm2, %v10486_v13  ;;  %v11727_v1 = vrot.slane %v9753_v31, 9  ;;  %v10227_v34 = vmax.f32 %v9745_v48, %v11726_v11  ;;  %v9569_v42 = vpop.f32.mrb[15].mxu0  ;;  %v9755_v23 = vcombine.high %v9659_v37, %v9659_v37  ;;  %v9762_v45 = vrot.slane %v9659_v37, %v15186_v52 }
 0x6d9   :  { %v11729_v19 = vrot.slane %v9754_v39, 9  ;;  %v10229_v59 = vmax.f32 %v9752_v28, %v11728_v2  ;;  %v9616_v12 = vmax.f32 %v9558_v3, 0.0  ;;  %v9617_v36 = vmax.f32 %v9563_v46, 0.0 }
 0x6da   :  { %v10228_v49 = vmax.f32 %v9753_v31, %v11727_v1  ;;  %v10283_v35 = vmax.f32 %v10223_v40, %v10227_v34  ;;  %v9769_v21 = vrot.slane %v9755_v23, %v15186_v52  ;;  %v9770_v30 = vcombine.high %v9762_v45, %v9762_v45 }
 0x6db   :  { %v10230_v7 = vmax.f32 %v9754_v39, %v11729_v19  ;;  %v10285_v44 = vmax.f32 %v10225_v9, %v10229_v59  ;;  %v9572_v51 = vpop.f32.mrb[16].mxu0  ;;  %v11730_v47 = vrot.slane %v9762_v45, 9  ;;  %v9638_v33 = vmul.f32 %v17813_v50, %v9616_v12 }
 0x6dc   :  { %v10284_v15 = vmax.f32 %v10224_v17, %v10228_v49  ;;  %v9574_v22 = vpop.f32.mrb[17].mxu0  ;;  %v9771_v57 = vcombine.high %v9769_v21, %v9769_v21  ;;  %v11731_v6 = vrot.slane %v9770_v30, 9  ;;  %v10375_v38 = vrot.slane %v10283_v35, %v15235_v61 }
 0x6dd   :  { %v10286_v14 = vmax.f32 %v10226_v20, %v10230_v7  ;;  %v10383_v29 = vrot.slane %v10285_v44, %v15235_v61  ;;  %v11732_v5 = vrot.slane %v9769_v21, 9  ;;  %v9660_v16 = vadd.f32 %v17818_v60, %v9638_v33 }
 0x6de   :  { %v10379_v56 = vrot.slane %v10284_v15, %v15235_v61  ;;  %v10231_v18 = vmax.f32 %v9762_v45, %v11730_v47  ;;  %v9639_v40 = vmul.f32 %v17813_v50, %v9617_v36  ;;  %v9568_v27 = vadd.f32 %v17807_v32, %v9567_v41 }
 0x6df   :  { %v10387_v62 = vrot.slane %v10286_v14, %v15235_v61  ;;  %v11991_v24 = vld [vmem:[#allocation4 + $0x1] ss:$8 sps:$4 sm:$0xff]   ;;  %v11733_v26 = vrot.slane %v9771_v57, 9  ;;  %v10232_v54 = vmax.f32 %v9770_v30, %v11731_v6  ;;  %v9772_v53 = vcombine.high %v9660_v16, %v9660_v16 }
 0x6e0   :  { %v10487_v63 = vsel %vm8463_vm4, %v10379_v56, %v10375_v38  ;;  %10575 = vrot.lane.b32.xlu1 %v11991_v24, %s12095_s26  ;;  %v9779_v17 = vrot.slane %v9660_v16, %v15186_v52  ;;  %v9661_v9 = vadd.f32 %v17818_v60, %v9639_v40  ;;  %v9618_v48 = vmax.f32 %v9568_v27, 0.0  ;;  %v12004_v8 = vld [vmem:[#allocation4] ss:$8 sps:$4 sm:$0xff]  }
 0x6e1   :  { %v10488_v4 = vsel %vm8465_vm5, %v10383_v29, %v10487_v63  ;;  %v10233_v58 = vmax.f32 %v9769_v21, %v11732_v5  ;;  %v9786_v55 = vrot.slane %v9772_v53, %v15186_v52  ;;  %v9573_v28 = vadd.f32 %v17807_v32, %v9572_v51  ;;  %v11992_v20 = vld [vmem:[#allocation4 + $0x2] ss:$8 sps:$4 sm:$0xff]   ;;  %10551 = vst.msk [vmem:[#allocation6] sm:$0xff] %vm10550_vm7, %v12004_v8 }
 0x6e2   :  { %v10489_v10 = vsel %vm8467_vm6, %v10387_v62, %v10488_v4  ;;  %v9577_v43 = vpop.f32.mrb[18].mxu0  ;;  %v9787_v31 = vcombine.high %v9779_v17, %v9779_v17  ;;  %v11734_v11 = vrot.slane %v9779_v17, 9  ;;  %v9789_v13 = vcombine.high %v9661_v9, %v9661_v9 }
 0x6e3   :  { %10519 = vst.msk [vmem:[#allocation4 + $0x11] sm:$0xf] %vm10517_vm2, %v10489_v10  ;;  %v9796_v39 = vrot.slane %v9661_v9, %v15186_v52  ;;  %v9579_v2 = vpop.f32.mrb[19].mxu0  ;;  %v9788_v37 = vcombine.high %v9786_v55, %v9786_v55  ;;  %v11736_v41 = vrot.slane %v9786_v55, 9  ;;  %v9640_v1 = vmul.f32 %v17813_v50, %v9618_v48 }
 0x6e4   :  { %v9619_v34 = vmax.f32 %v9573_v28, 0.0  ;;  %10612 = vrot.lane.b32.xlu1 %v11992_v20, %s12097_s28  ;;  %v11735_v3 = vrot.slane %v9787_v31, 9  ;;  %v10235_v46 = vmax.f32 %v9779_v17, %v11734_v11  ;;  %v9803_v42 = vrot.slane %v9789_v13, %v15186_v52 }
 0x6e5   :  { %v9804_v19 = vcombine.high %v9796_v39, %v9796_v39  ;;  %v11737_v59 = vrot.slane %v9788_v37, 9  ;;  %v10237_v23 = vmax.f32 %v9786_v55, %v11736_v41  ;;  %v11738_v45 = vrot.slane %v9796_v39, 9 }
 0x6e6   :  { %v9662_v49 = vadd.f32 %v17818_v60, %v9640_v1  ;;  %v10236_v35 = vmax.f32 %v9787_v31, %v11735_v3  ;;  %v10287_v12 = vmax.f32 %v10231_v18, %v10235_v46  ;;  %v9805_v36 = vcombine.high %v9803_v42, %v9803_v42 }
 0x6e7   :  { %v11739_v7 = vrot.slane %v9804_v19, 9  ;;  %v10234_v44 = vmax.f32 %v9771_v57, %v11733_v26  ;;  %v10238_v21 = vmax.f32 %v9788_v37, %v11737_v59  ;;  %v10289_v30 = vmax.f32 %v10233_v58, %v10237_v23 }
 0x6e8   :  { %v11740_v51 = vrot.slane %v9803_v42, 9  ;;  %v10288_v15 = vmax.f32 %v10232_v54, %v10236_v35  ;;  %v11741_v47 = vrot.slane %v9805_v36, 9  ;;  %v10239_v33 = vmax.f32 %v9796_v39, %v11738_v45  ;;  %v10859_v35 = vld [vmem:[%s18230_s9 + $0x80] sm:$0xff] }
 0x6e9   :  { %v10290_v22 = vmax.f32 %v10234_v44, %v10238_v21  ;;  %v10391_v14 = vrot.slane %v10287_v12, %v15235_v61  ;;  %v10399_v29 = vrot.slane %v10289_v30, %v15235_v61  ;;  %v9806_v38 = vcombine.high %v9662_v49, %v9662_v49  ;;  %v10860_v12 = vld [vmem:[%s18230_s9 + $0x88] sm:$0xff]  ;;  %v10843_v30 = vld [vmem:[%s18230_s9] sm:$0xff] }
 0x6ea   :  { %v11993_v6 = vld [vmem:[#allocation4 + $0xa] ss:$8 sps:$4 sm:$0xff]   ;;  %v10395_v56 = vrot.slane %v10288_v15, %v15235_v61  ;;  %v10240_v16 = vmax.f32 %v9804_v19, %v11739_v7  ;;  %v9813_v62 = vrot.slane %v9662_v49, %v15186_v52  ;;  %v9641_v57 = vmul.f32 %v17813_v50, %v9619_v34 }
 0x6eb   :  { %v11994_v5 = vld [vmem:[#allocation4 + $0x8] ss:$8 sps:$4 sm:$0xff]   ;;  %v10403_v24 = vrot.slane %v10290_v22, %v15235_v61  ;;  %10714 = vrot.lane.b32.xlu0 %v11993_v6, %s12095_s26  ;;  %v10241_v18 = vmax.f32 %v9803_v42, %v11740_v51  ;;  %v9820_v40 = vrot.slane %v9806_v38, %v15186_v52  ;;  %v9578_v27 = vadd.f32 %v17807_v32, %v9577_v43  ;;  %v10846_v38 = vld [vmem:[%s18230_s9 + $0x18] sm:$0xff] }
 0x6ec   :  { %v10490_v63 = vsel %vm8463_vm4, %v10395_v56, %v10391_v14  ;;  %10649 = vrot.lane.b32.xlu1 %v11994_v5, %s12099_s30  ;;  %v9821_v26 = vcombine.high %v9813_v62, %v9813_v62  ;;  %v11742_v54 = vrot.slane %v9813_v62, 9  ;;  %v9663_v53 = vadd.f32 %v17818_v60, %v9641_v57  ;;  %v12008_v4 = vld [vmem:[#allocation4 + $0x9] ss:$8 sps:$4 sm:$0xff]  }
 0x6ed   :  { %v10491_v17 = vsel %vm8465_vm5, %v10399_v29, %v10490_v63  ;;  %v9822_v9 = vcombine.high %v9820_v40, %v9820_v40  ;;  %v11744_v48 = vrot.slane %v9820_v40, 9  ;;  %v9620_v10 = vmax.f32 %v9578_v27, 0.0  ;;  %10690 = vst.msk [vmem:[#allocation6 + $0x8] sm:$0xff] %vm10550_vm7, %v12008_v4  ;;  %v10844_v51 = vld [vmem:[%s18230_s9 + $0x8] sm:$0xff]  ;;  %v10861_v15 = vld [vmem:[%s18230_s9 + $0x90] sm:$0xff]  ;;  %v10862_v29 = vld [vmem:[%s18230_s9 + $0x98] sm:$0xff] }
 0x6ee   :  { %v10492_v58 = vsel %vm8467_vm6, %v10403_v24, %v10491_v17  ;;  %v11743_v55 = vrot.slane %v9821_v26, 9  ;;  %v10243_v28 = vmax.f32 %v9813_v62, %v11742_v54  ;;  %v9823_v8 = vcombine.high %v9663_v53, %v9663_v53  ;;  %v10845_v6 = vld [vmem:[%s18230_s9 + $0x10] sm:$0xff]  ;;  %v10863_v63 = vld [vmem:[%s18230_s9 + $0xa0] sm:$0xff] }
 0x6ef   :  { %v9582_v43 = vpop.f32.mrb[20].mxu0  ;;  %10520 = vst.msk [vmem:[#allocation4 + $0x19] sm:$0xf] %vm10517_vm2, %v10492_v58  ;;  %v10242_v20 = vmax.f32 %v9805_v36, %v11741_v47  ;;  %v11745_v31 = vrot.slane %v9822_v9, 9  ;;  %v10245_v11 = vmax.f32 %v9820_v40, %v11744_v48  ;;  %v9830_v13 = vrot.slane %v9663_v53, %v15186_v52 }
 0x6f0   :  { %v9584_v39 = vpop.f32.mrb[21].mxu0  ;;  %v10244_v2 = vmax.f32 %v9821_v26, %v11743_v55  ;;  %v10291_v37 = vmax.f32 %v10239_v33, %v10243_v28  ;;  %v9837_v41 = vrot.slane %v9823_v8, %v15186_v52  ;;  %v9642_v1 = vmul.f32 %v17813_v50, %v9620_v10  ;;  %v10847_v55 = vld [vmem:[%s18230_s9 + $0x20] sm:$0xff]  ;;  %v10848_v28 = vld [vmem:[%s18230_s9 + $0x28] sm:$0xff] }
 0x6f1   :  { %v10246_v34 = vmax.f32 %v9822_v9, %v11745_v31  ;;  %v10293_v3 = vmax.f32 %v10241_v18, %v10245_v11  ;;  %v9838_v46 = vcombine.high %v9830_v13, %v9830_v13  ;;  %v9583_v42 = vadd.f32 %v17807_v32, %v9582_v43  ;;  %v10864_v9 = vld [vmem:[%s18230_s9 + $0xa8] sm:$0xff] }
 0x6f2   :  { %v10292_v19 = vmax.f32 %v10240_v16, %v10244_v2  ;;  %v17897_v59 = vcombine.high %v9837_v41, %v9837_v41  ;;  %v11746_v49 = vrot.slane %v9830_v13, 9  ;;  %v10407_v36 = vrot.slane %v10291_v37, %v15235_v61 }
 0x6f3   :  { %v10294_v23 = vmax.f32 %v10242_v20, %v10246_v34  ;;  %v10415_v45 = vrot.slane %v10293_v3, %v15235_v61  ;;  %v11748_v44 = vrot.slane %v9837_v41, 9  ;;  %v9664_v21 = vadd.f32 %v17818_v60, %v9642_v1 }
 0x6f4   :  { %v10411_v7 = vrot.slane %v10292_v19, %v15235_v61  ;;  %v11747_v33 = vrot.slane %v9838_v46, 9  ;;  %v11749_v22 = vrot.slane %v17897_v59, 9  ;;  %v9621_v14 = vmax.f32 %v9583_v42, 0.0 }
 0x6f5   :  { %v10419_v47 = vrot.slane %v10294_v23, %v15235_v61  ;;  %v9840_v16 = vcombine.high %v9664_v21, %v9664_v21  ;;  %v9847_v62 = vrot.slane %v9664_v21, %v15186_v52  ;;  %v11924_v40 = vpack.c.bf16 %v10860_v12, %v10859_v35  ;;  %v10849_v21 = vld [vmem:[%s18230_s9 + $0x30] sm:$0xff] }
 0x6f6   :  { %v10493_v56 = vsel %vm8463_vm4, %v10411_v7, %v10407_v36  ;;  %v11995_v5 = vld [vmem:[#allocation4 + $0x10] ss:$8 sps:$4 sm:$0xff]   ;;  %v9643_v18 = vmul.f32 %v17813_v50, %v9621_v14  ;;  %v11926_v27 = vpack.c.bf16 %v10844_v51, %v10843_v30  ;;  %v10247_v48 = vmax.f32 %v9830_v13, %v11746_v49 }
 0x6f7   :  { %v10494_v57 = vsel %vm8465_vm5, %v10415_v45, %v10493_v56  ;;  %v11996_v24 = vld [vmem:[#allocation4 + $0x11] ss:$8 sps:$4 sm:$0xff]   ;;  %10751 = vrot.lane.b32.xlu0 %v11995_v5, %s12097_s28  ;;  %v9854_v53 = vrot.slane %v9840_v16, %v15186_v52  ;;  %v9855_v4 = vcombine.high %v9847_v62, %v9847_v62  ;;  %v11750_v17 = vrot.slane %v9847_v62, 9  ;;  %11925 = vmatprep.subr.bf16.mxu1 %v11924_v40  ;;  %v10851_v16 = vld [vmem:[%s18230_s9 + $0x40] sm:$0xff]  ;;  %v10852_v40 = vld [vmem:[%s18230_s9 + $0x48] sm:$0xff] }
 0x6f8   :  { %v10495_v26 = vsel %vm8467_vm6, %v10419_v47, %v10494_v57  ;;  %v11997_v54 = vld [vmem:[#allocation4 + $0x11] ss:$8 sps:$4 sm:$0xff]   ;;  %10577 = vrot.lane.b32.xlu1 %v11996_v24, %s12095_s26  ;;  %v11928_v10 = vpack.c.bf16 %v10862_v29, %v10861_v15  ;;  %v11930_v58 = vpack.c.bf16 %v10846_v38, %v10845_v6  ;;  %11927 = vmatpush3.bf16.msra.mxu1 %v11926_v27  ;;  %v10867_v47 = vld [vmem:[%s18230_s9 + $0xc0] sm:$0xff] }
 0x6f9   :  { %10521 = vst.msk [vmem:[#allocation4 + $0x21] sm:$0xf] %vm10517_vm2, %v10495_v26  ;;  %v9856_v8 = vcombine.high %v9854_v53, %v9854_v53  ;;  %v11751_v43 = vrot.slane %v9855_v4, 9  ;;  %v11752_v20 = vrot.slane %v9854_v53, 9  ;;  %v10251_v31 = vmax.f32 %v9847_v62, %v11750_v17  ;;  %v12011_v11 = vld [vmem:[#allocation4 + $0x10] ss:$8 sps:$4 sm:$0xff]  }
 0x6fa   :  { %v11998_v39 = vld [vmem:[#allocation4 + $0x12] ss:$8 sps:$4 sm:$0xff]   ;;  %v10248_v2 = vmax.f32 %v9838_v46, %v11747_v33  ;;  %v10249_v13 = vmax.f32 %v9837_v41, %v11748_v44  ;;  %v9665_v37 = vadd.f32 %v17818_v60, %v9643_v18  ;;  %11929 = vmatprep.subr.bf16.mxu1 %v11928_v10  ;;  %v11932_v1 = vpack.c.bf16 %v10864_v9, %v10863_v63  ;;  %v10868_v33 = vld [vmem:[%s18230_s9 + $0xc8] sm:$0xff] }
 0x6fb   :  { %v12023_v34 = vld [vmem:[#allocation4 + $0x12] ss:$8 sps:$4 sm:$0xff]   ;;  %10787 = vrot.lane.b32.xlu0 %v11997_v54, %s12099_s30  ;;  %v11753_v3 = vrot.slane %v9856_v8, 9  ;;  %v10252_v42 = vmax.f32 %v9855_v4, %v11751_v43  ;;  %v10253_v19 = vmax.f32 %v9854_v53, %v11752_v20  ;;  %v10295_v23 = vmax.f32 %v10247_v48, %v10251_v31  ;;  %10552 = vst.msk [vmem:[#allocation6 + $0x18] sm:$0xff] %vm10550_vm7, %v12011_v11 }
 0x6fc   :  { %v10865_v45 = vld [vmem:[%s18230_s9 + $0xb0] sm:$0xff]  ;;  %v10866_v46 = vld [vmem:[%s18230_s9 + $0xb8] sm:$0xff]  ;;  %10614 = vrot.lane.b32.xlu1 %v11998_v39, %s12097_s28  ;;  %v10250_v41 = vmax.f32 %v17897_v59, %v11749_v22  ;;  %10827 = vst.msk [vmem:[#allocation6 + $0x10] sm:$0xff] %vm10550_vm7, %v12023_v34  ;;  %11931 = vmatpush3.bf16.msra.mxu1 %v11930_v58  ;;  %v11934_v44 = vpack.c.bf16 %v10848_v28, %v10847_v55 }
 0x6fd   :  { %v10254_v35 = vmax.f32 %v9856_v8, %v11753_v3  ;;  %v10296_v12 = vmax.f32 %v10248_v2, %v10252_v42  ;;  %v10297_v36 = vmax.f32 %v10249_v13, %v10253_v19  ;;  %v10423_v30 = vrot.slane %v10295_v23, %v15235_v61  ;;  %11933 = vmatprep.subr.bf16.mxu1 %v11932_v1  ;;  %v10850_v59 = vld [vmem:[%s18230_s9 + $0x38] sm:$0xff]  ;;  %v10869_v27 = vld [vmem:[%s18230_s9 + $0xd0] sm:$0xff]  ;;  %v10872_v1 = vld [vmem:[%s18230_s9 + $0xe8] sm:$0xff] }
 0x6fe   :  { %v9587_v49 = vpop.f32.mrb[22].mxu0  ;;  %v9857_v51 = vcombine.high %v9665_v37, %v9665_v37  ;;  %v11936_v15 = vpack.c.bf16 %v10866_v46, %v10865_v45  ;;  %v9864_v5 = vrot.slane %v9665_v37, %v15186_v52  ;;  %v11938_v18 = vpack.c.bf16 %v10850_v59, %v10849_v21  ;;  %v10870_v48 = vld [vmem:[%s18230_s9 + $0xd8] sm:$0xff]  ;;  %v10853_v31 = vld [vmem:[%s18230_s9 + $0x50] sm:$0xff]  ;;  %v10871_v37 = vld [vmem:[%s18230_s9 + $0xe0] sm:$0xff] }
 0x6ff   :  { %v9589_v7 = vpop.f32.mrb[23].mxu0  ;;  %v10298_v22 = vmax.f32 %v10250_v41, %v10254_v35  ;;  %v10427_v14 = vrot.slane %v10296_v12, %v15235_v61  ;;  %v10431_v29 = vrot.slane %v10297_v36, %v15235_v61  ;;  %v9588_v38 = vadd.f32 %v17807_v32, %v9587_v49  ;;  %v10854_v11 = vld [vmem:[%s18230_s9 + $0x58] sm:$0xff]  ;;  %v10855_v41 = vld [vmem:[%s18230_s9 + $0x60] sm:$0xff]  ;;  %v10856_v49 = vld [vmem:[%s18230_s9 + $0x68] sm:$0xff] }
 0x700   :  { %v11999_v6 = vld [vmem:[#allocation4 + $0x1a] ss:$8 sps:$4 sm:$0xff]   ;;  %11935 = vmatpush3.bf16.msra.mxu1 %v11934_v44  ;;  %v9871_v26 = vrot.slane %v9857_v51, %v15186_v52  ;;  %v11940_v54 = vpack.c.bf16 %v10868_v33, %v10867_v47  ;;  %v9872_v58 = vcombine.high %v9864_v5, %v9864_v5  ;;  %v11942_v28 = vpack.c.bf16 %v10852_v40, %v10851_v16  ;;  %v10873_v44 = vld [vmem:[%s18230_s9 + $0xf0] sm:$0xff] }
 0x701   :  { %v12000_v56 = vld [vmem:[#allocation4 + $0x18] ss:$8 sps:$4 sm:$0xff]   ;;  %v10435_v62 = vrot.slane %v10298_v22, %v15235_v61  ;;  %v10496_v57 = vsel %vm8463_vm4, %v10427_v14, %v10423_v30  ;;  %10716 = vrot.lane.b32.xlu0 %v11999_v6, %s12095_s26  ;;  %v9622_v24 = vmax.f32 %v9588_v38, 0.0  ;;  %11937 = vmatprep.subr.bf16.mxu1 %v11936_v15  ;;  %v11754_v43 = vrot.slane %v9864_v5, 9 }
 0x702   :  { %v10497_v63 = vsel %vm8465_vm5, %v10431_v29, %v10496_v57  ;;  %10651 = vrot.lane.b32.xlu1 %v12000_v56, %s12099_s30  ;;  %v12018_v53 = vld [vmem:[#allocation4 + $0x19] ss:$8 sps:$4 sm:$0xff]   ;;  %v9873_v8 = vcombine.high %v9871_v26, %v9871_v26  ;;  %v11944_v20 = vpack.c.bf16 %v10870_v48, %v10869_v27  ;;  %v11755_v34 = vrot.slane %v9872_v58, 9  ;;  %v10857_v29 = vld [vmem:[%s18230_s9 + $0x70] sm:$0xff] }
 0x703   :  { %v10498_v4 = vsel %vm8467_vm6, %v10435_v62, %v10497_v63  ;;  %v12001_v17 = vld [vmem:[#allocation4 + $0x20] ss:$8 sps:$4 sm:$0xff]   ;;  %v9644_v9 = vmul.f32 %v17813_v50, %v9622_v24  ;;  %10691 = vst.msk [vmem:[#allocation6 + $0x20] sm:$0xff] %vm10550_vm7, %v12018_v53  ;;  %v11756_v3 = vrot.slane %v9871_v26, 9  ;;  %v11946_v46 = vpack.c.bf16 %v10854_v11, %v10853_v31  ;;  %v10874_v21 = vld [vmem:[%s18230_s9 + $0xf8] sm:$0xff] }
 0x704   :  { %v12024_v10 = vld [vmem:[#allocation4 + $0x22] ss:$8 sps:$4 sm:$0xff]   ;;  %10522 = vst.msk [vmem:[#allocation4 + $0x39] sm:$0xf] %vm10517_vm2, %v10498_v4  ;;  %11939 = vmatpush3.bf16.msra.mxu1 %v11938_v18  ;;  %v11757_v35 = vrot.slane %v9873_v8, 9  ;;  %v10255_v12 = vmax.f32 %v9864_v5, %v11754_v43  ;;  %v11948_v7 = vpack.c.bf16 %v10872_v1, %v10871_v37  ;;  %v10256_v33 = vmax.f32 %v9872_v58, %v11755_v34  ;;  %v10858_v16 = vld [vmem:[%s18230_s9 + $0x78] sm:$0xff] }
 0x705   :  { %10753 = vrot.lane.b32.xlu0 %v12001_v17, %s12097_s28  ;;  %v9666_v55 = vadd.f32 %v17818_v60, %v9644_v9  ;;  %10828 = vst.msk [vmem:[#allocation6 + $0x28] sm:$0xff] %vm10550_vm7, %v12024_v10  ;;  %11941 = vmatprep.subr.bf16.mxu1 %v11940_v54  ;;  %v12002_v39 = vld [vmem:[#allocation4 + $0x21] ss:$8 sps:$4 sm:$0xff]   ;;  %v10257_v22 = vmax.f32 %v9871_v26, %v11756_v3 }
 0x706   :  { %v11950_v14 = vpack.c.bf16 %v10856_v49, %v10855_v41  ;;  %v11952_v62 = vpack.c.bf16 %v10874_v21, %v10873_v44  ;;  %v10258_v24 = vmax.f32 %v9873_v8, %v11757_v35  ;;  %v11954_v54 = vpack.c.bf16 %v10858_v16, %v10857_v29 }
 0x707   :  { %v9874_v2 = vcombine.high %v9666_v55, %v9666_v55  ;;  %v9881_v13 = vrot.slane %v9666_v55, %v15186_v52 }
 0x708   :  { %11943 = vmatpush3.bf16.msra.mxu1 %v11942_v28 }
 0x709   :  { %10789 = vrot.lane.b32.xlu0 %v12002_v39, %s12099_s30  ;;  %v9888_v42 = vrot.slane %v9874_v2, %v15186_v52  ;;  %v9889_v19 = vcombine.high %v9881_v13, %v9881_v13  ;;  %v11758_v23 = vrot.slane %v9881_v13, 9  ;;  %11945 = vmatprep.subr.bf16.mxu1 %v11944_v20 }
 0x70b   :  { %v9592_v45 = vpop.f32.mrb[24].mxu0  ;;  %v9890_v30 = vcombine.high %v9888_v42, %v9888_v42  ;;  %v11759_v51 = vrot.slane %v9889_v19, 9  ;;  %v11760_v15 = vrot.slane %v9888_v42, 9  ;;  %v10259_v59 = vmax.f32 %v9881_v13, %v11758_v23  ;;  %v12003_v47 = vld [vmem:[#allocation4 + $0x31] ss:$8 sps:$4 sm:$0xff]  }
 0x70c   :  { %v9594_v36 = vpop.f32.mrb[25].mxu0  ;;  %10579 = vrot.lane.b32.xlu1 %v12003_v47, %s12095_s26  ;;  %11947 = vmatpush3.bf16.msra.mxu1 %v11946_v46  ;;  %v12019_v57 = vld [vmem:[#allocation4 + $0x30] ss:$8 sps:$4 sm:$0xff]   ;;  %v9593_v58 = vadd.f32 %v17807_v32, %v9592_v45 }
 0x70d   :  { %v11761_v6 = vrot.slane %v9890_v30, 9  ;;  %v10260_v38 = vmax.f32 %v9889_v19, %v11759_v51  ;;  %v10261_v56 = vmax.f32 %v9888_v42, %v11760_v15  ;;  %v10299_v5 = vmax.f32 %v10255_v12, %v10259_v59  ;;  %11949 = vmatprep.subr.bf16.mxu1 %v11948_v7  ;;  %v12005_v63 = vld [vmem:[#allocation4 + $0x32] ss:$8 sps:$4 sm:$0xff]   ;;  %10553 = vst.msk [vmem:[#allocation6 + $0x30] sm:$0xff] %vm10550_vm7, %v12019_v57 }
 0x70e   :  { %v9623_v28 = vmax.f32 %v9593_v58, 0.0 }
 0x70f   :  { %v10262_v18 = vmax.f32 %v9890_v30, %v11761_v6  ;;  %v10300_v40 = vmax.f32 %v10256_v33, %v10260_v38  ;;  %v10301_v27 = vmax.f32 %v10257_v22, %v10261_v56  ;;  %v10439_v26 = vrot.slane %v10299_v5, %v15235_v61 }
 0x710   :  { %10616 = vrot.lane.b32.xlu1 %v12005_v63, %s12097_s28  ;;  %11951 = vmatpush3.bf16.msra.mxu1 %v11950_v14  ;;  %v9645_v8 = vmul.f32 %v17813_v50, %v9623_v28 }
 0x711   :  { %v10302_v53 = vmax.f32 %v10258_v24, %v10262_v18  ;;  %v10443_v4 = vrot.slane %v10300_v40, %v15235_v61  ;;  %v10447_v17 = vrot.slane %v10301_v27, %v15235_v61  ;;  %11953 = vmatprep.subr.bf16.mxu1 %v11952_v62 }
 0x712   :  { %v9667_v31 = vadd.f32 %v17818_v60, %v9645_v8 }
 0x713   :  { %v10451_v9 = vrot.slane %v10302_v53, %v15235_v61  ;;  %v10499_v48 = vsel %vm8463_vm4, %v10443_v4, %v10439_v26 }
 0x714   :  { %v10500_v10 = vsel %vm8465_vm5, %v10447_v17, %v10499_v48  ;;  %11955 = vmatpush3.bf16.msra.mxu1 %v11954_v54  ;;  %v9891_v39 = vcombine.high %v9667_v31, %v9667_v31  ;;  %v9898_v1 = vrot.slane %v9667_v31, %v15186_v52  ;;  %v12064_v54 = vld [vmem:[%s18227_s6] ss:$0 sm:$0xff] }
 0x715   :  { %v10501_v55 = vsel %vm8467_vm6, %v10451_v9, %v10500_v10  ;;  %v12065_v9 = vld [vmem:[%s18228_s7] ss:$0 sm:$0xff] }
 0x716   :  { %10523 = vst.msk [vmem:[#allocation4 + $0x41] sm:$0xf] %vm10517_vm2, %v10501_v55  ;;  %v9905_v3 = vrot.slane %v9891_v39, %v15186_v52  ;;  %v9906_v19 = vcombine.high %v9898_v1, %v9898_v1  ;;  %v11762_v46 = vrot.slane %v9898_v1, 9 }
 0x718   :  { %v9907_v45 = vcombine.high %v9905_v3, %v9905_v3  ;;  %v11763_v35 = vrot.slane %v9906_v19, 9  ;;  %v11764_v12 = vrot.slane %v9905_v3, 9  ;;  %v10263_v21 = vmax.f32 %v9898_v1, %v11762_v46 }
 0x71a   :  { %v11765_v44 = vrot.slane %v9907_v45, 9  ;;  %v10264_v59 = vmax.f32 %v9906_v19, %v11763_v35  ;;  %v10265_v47 = vmax.f32 %v9905_v3, %v11764_v12  ;;  %v12066_v3 = vld [vmem:[%s18229_s8] ss:$0 sm:$0xff] }
 0x71c   :  { %v10266_v6 = vmax.f32 %v9907_v45, %v11765_v44 }
 0x71d   :  { %v12006_v43 = vld [vmem:[#allocation4 + $0x3a] ss:$8 sps:$4 sm:$0xff]  }
 0x71e   :  { %v12007_v20 = vld [vmem:[#allocation4 + $0x38] ss:$8 sps:$4 sm:$0xff]   ;;  %10718 = vrot.lane.b32.xlu0 %v12006_v43, %s12095_s26 }
 0x71f   :  { %10653 = vrot.lane.b32.xlu1 %v12007_v20, %s12099_s30  ;;  %v12020_v11 = vld [vmem:[#allocation4 + $0x39] ss:$8 sps:$4 sm:$0xff]  }
 0x720   :  { %10692 = vst.msk [vmem:[#allocation6 + $0x38] sm:$0xff] %vm10550_vm7, %v12020_v11 }
 0x727   :  { %v9597_v2 = vpop.f32.mrb[26].mxu0 }
 0x728   :  { %v9598_v13 = vadd.f32 %v17807_v32, %v9597_v2  ;;  %v9599_v37 = vpop.f32.mrb[27].mxu0 }
 0x72a   :  { %v9624_v34 = vmax.f32 %v9598_v13, 0.0 }
 0x72c   :  { %v9646_v42 = vmul.f32 %v17813_v50, %v9624_v34 }
 0x72e   :  { %v9668_v23 = vadd.f32 %v17818_v60, %v9646_v42 }
 0x730   :  { %v9908_v41 = vcombine.high %v9668_v23, %v9668_v23  ;;  %v9915_v49 = vrot.slane %v9668_v23, %v15186_v52 }
 0x732   :  { %v9922_v32 = vrot.slane %v9908_v41, %v15186_v52  ;;  %v9923_v36 = vcombine.high %v9915_v49, %v9915_v49  ;;  %v11766_v7 = vrot.slane %v9915_v49, 9 }
 0x734   :  { %v9924_v30 = vcombine.high %v9922_v32, %v9922_v32  ;;  %v11767_v51 = vrot.slane %v9923_v36, 9  ;;  %v11768_v15 = vrot.slane %v9922_v32, 9  ;;  %v10267_v50 = vmax.f32 %v9915_v49, %v11766_v7 }
 0x736   :  { %v11769_v33 = vrot.slane %v9924_v30, 9  ;;  %v10268_v22 = vmax.f32 %v9923_v36, %v11767_v51  ;;  %v10269_v14 = vmax.f32 %v9922_v32, %v11768_v15  ;;  %v10303_v29 = vmax.f32 %v10263_v21, %v10267_v50 }
 0x738   :  { %v10270_v38 = vmax.f32 %v9924_v30, %v11769_v33  ;;  %v10304_v56 = vmax.f32 %v10264_v59, %v10268_v22  ;;  %v10305_v5 = vmax.f32 %v10265_v47, %v10269_v14  ;;  %v10455_v62 = vrot.slane %v10303_v29, %v15235_v61 }
 0x73a   :  { %v10306_v16 = vmax.f32 %v10266_v6, %v10270_v38  ;;  %v10459_v57 = vrot.slane %v10304_v56, %v15235_v61  ;;  %v10463_v24 = vrot.slane %v10305_v5, %v15235_v61 }
 0x73c   :  { %v10467_v18 = vrot.slane %v10306_v16, %v15235_v61  ;;  %v10502_v40 = vsel %vm8463_vm4, %v10459_v57, %v10455_v62  ;;  %v9602_v63 = vpop.f32.mrb[28].mxu0 }
 0x73d   :  { %v10503_v27 = vsel %vm8465_vm5, %v10463_v24, %v10502_v40  ;;  %v9603_v53 = vadd.f32 %v12064_v54, %v9602_v63  ;;  %v9604_v4 = vpop.f32.mrb[29].mxu0 }
 0x73e   :  { %v10504_v26 = vsel %vm8467_vm6, %v10467_v18, %v10503_v27 }
 0x73f   :  { %10524 = vst.msk [vmem:[#allocation4 + $0x49] sm:$0xf] %vm10517_vm2, %v10504_v26  ;;  %v9625_v17 = vmax.f32 %v9603_v53, 0.0  ;;  %v10875_v26 = vld [vmem:[%s18230_s9 + $0x100] sm:$0xff] }
 0x741   :  { %v9647_v48 = vmul.f32 %v12065_v9, %v9625_v17 }
 0x743   :  { %v9669_v10 = vadd.f32 %v17818_v60, %v9647_v48 }
 0x744   :  { %v9607_v58 = vpop.f32.mrb[30].mxu0 }
 0x745   :  { %v9925_v55 = vcombine.high %v9669_v10, %v9669_v10  ;;  %v9608_v28 = vadd.f32 %v12064_v54, %v9607_v58  ;;  %v9609_v8 = vpop.f32.mrb[31].mxu0  ;;  %v9932_v31 = vrot.slane %v9669_v10, %v15186_v52  ;;  %v10876_v54 = vld [vmem:[%s18230_s9 + $0x108] sm:$0xff] }
 0x746   :  { %v12009_v43 = vld [vmem:[#allocation4 + $0x40] ss:$8 sps:$4 sm:$0xff]   ;;  %v11956_v4 = vpack.c.bf16 %v10876_v54, %v10875_v26  ;;  %v11326_v54 = vld [vmem:[%s18234_s13 + $0x38] sm:$0xff] }
 0x747   :  { %v12010_v20 = vld [vmem:[#allocation4 + $0x41] ss:$8 sps:$4 sm:$0xff]   ;;  %v9626_v11 = vmax.f32 %v9608_v28, 0.0  ;;  %10755 = vrot.lane.b32.xlu0 %v12009_v43, %s12097_s28  ;;  %v9939_v2 = vrot.slane %v9925_v55, %v15186_v52  ;;  %v9940_v34 = vcombine.high %v9932_v31, %v9932_v31  ;;  %v11770_v23 = vrot.slane %v9932_v31, 9 }
 0x748   :  { %10581 = vrot.lane.b32.xlu1 %v12010_v20, %s12095_s26  ;;  %v12012_v39 = vld [vmem:[#allocation4 + $0x41] ss:$8 sps:$4 sm:$0xff]   ;;  %11957 = vmatprep.subr.bf16.mxu1 %v11956_v4 }
 0x749   :  { %v12013_v13 = vld [vmem:[#allocation4 + $0x42] ss:$8 sps:$4 sm:$0xff]   ;;  %v9648_v1 = vmul.f32 %v12065_v9, %v9626_v11  ;;  %v9941_v19 = vcombine.high %v9939_v2, %v9939_v2  ;;  %v11771_v41 = vrot.slane %v9940_v34, 9  ;;  %v11772_v49 = vrot.slane %v9939_v2, 9  ;;  %v10877_v11 = vld [vmem:[%s18230_s9 + $0x110] sm:$0xff] }
 0x74a   :  { %v12021_v37 = vld [vmem:[#allocation4 + $0x40] ss:$8 sps:$4 sm:$0xff]   ;;  %v10271_v7 = vmax.f32 %v9932_v31, %v11770_v23 }
 0x74b   :  { %v12025_v60 = vld [vmem:[#allocation4 + $0x42] ss:$8 sps:$4 sm:$0xff]   ;;  %10791 = vrot.lane.b32.xlu0 %v12012_v39, %s12099_s30  ;;  %10554 = vst.msk [vmem:[#allocation6 + $0x48] sm:$0xff] %vm10550_vm7, %v12021_v37  ;;  %v9670_v42 = vadd.f32 %v12066_v3, %v9648_v1  ;;  %v11773_v36 = vrot.slane %v9941_v19, 9  ;;  %v10272_v50 = vmax.f32 %v9940_v34, %v11771_v41  ;;  %v10273_v59 = vmax.f32 %v9939_v2, %v11772_v49  ;;  %v10878_v39 = vld [vmem:[%s18230_s9 + $0x118] sm:$0xff] }
 0x74c   :  { %10618 = vrot.lane.b32.xlu1 %v12013_v13, %s12097_s28  ;;  %10829 = vst.msk [vmem:[#allocation6 + $0x40] sm:$0xff] %vm10550_vm7, %v12025_v60  ;;  %v11960_v1 = vpack.c.bf16 %v10878_v39, %v10877_v11 }
 0x74d   :  { %v9942_v45 = vcombine.high %v9670_v42, %v9670_v42  ;;  %v9949_v46 = vrot.slane %v9670_v42, %v15186_v52  ;;  %v10274_v29 = vmax.f32 %v9941_v19, %v11773_v36 }
 0x74f   :  { %v9956_v35 = vrot.slane %v9942_v45, %v15186_v52  ;;  %v9957_v12 = vcombine.high %v9949_v46, %v9949_v46  ;;  %v11774_v32 = vrot.slane %v9949_v46, 9 }
 0x751   :  { %v9958_v44 = vcombine.high %v9956_v35, %v9956_v35  ;;  %v11775_v21 = vrot.slane %v9957_v12, 9  ;;  %v11776_v30 = vrot.slane %v9956_v35, 9  ;;  %v10275_v51 = vmax.f32 %v9949_v46, %v11774_v32 }
 0x752   :  { %v10576_v15 = vpop.permute.xlu1 %10575 }
 0x753   :  { %10588 = vst.msk [vmem:[#allocation6] sm:$0xff] %vm10587_vm8, %v10576_v15  ;;  %v11777_v47 = vrot.slane %v9958_v44, 9  ;;  %v10276_v33 = vmax.f32 %v9957_v12, %v11775_v21  ;;  %v10277_v22 = vmax.f32 %v9956_v35, %v11776_v30  ;;  %v10307_v14 = vmax.f32 %v10271_v7, %v10275_v51 }
 0x755   :  { %v10278_v6 = vmax.f32 %v9958_v44, %v11777_v47  ;;  %v10308_v38 = vmax.f32 %v10272_v50, %v10276_v33  ;;  %v10309_v56 = vmax.f32 %v10273_v59, %v10277_v22  ;;  %v10471_v62 = vrot.slane %v10307_v14, %v15235_v61  ;;  %v10833_v59 = vld [vmem:[#allocation6 + $0x10] sm:$0xff]  ;;  %v10836_v47 = vld [vmem:[#allocation6 + $0x28] sm:$0xff]  ;;  %v10839_v33 = vld [vmem:[#allocation6 + $0x40] sm:$0xff] }
 0x756   :  { %v10613_v5 = vpop.permute.xlu1 %10612 }
 0x757   :  { %10625 = vst.msk [vmem:[#allocation6] sm:$0xff] %vm10624_vm9, %v10613_v5  ;;  %v10310_v16 = vmax.f32 %v10274_v29, %v10278_v6  ;;  %v10475_v57 = vrot.slane %v10308_v38, %v15235_v61  ;;  %v10479_v24 = vrot.slane %v10309_v56, %v15235_v61 }
 0x759   :  { %v10483_v18 = vrot.slane %v10310_v16, %v15235_v61  ;;  %v10505_v40 = vsel %vm8463_vm4, %v10475_v57, %v10471_v62  ;;  %v11319_v16 = vld [vmem:[%s18234_s13] sm:$0xff]  ;;  %v11320_v62 = vld [vmem:[%s18234_s13 + $0x8] sm:$0xff]  ;;  %v11321_v57 = vld [vmem:[%s18234_s13 + $0x10] sm:$0xff] }
 0x75a   :  { %v10506_v27 = vsel %vm8465_vm5, %v10479_v24, %v10505_v40  ;;  %v11965_v24 = vpack.c.bf16 %v11320_v62, %v11319_v16 }
 0x75b   :  { %v10507_v63 = vsel %vm8467_vm6, %v10483_v18, %v10506_v27  ;;  %v11322_v18 = vld [vmem:[%s18234_s13 + $0x18] sm:$0xff]  ;;  %v11323_v27 = vld [vmem:[%s18234_s13 + $0x20] sm:$0xff] }
 0x75c   :  { %10525 = vst.msk [vmem:[#allocation4 + $0x51] sm:$0xf] %vm10517_vm2, %v10507_v63  ;;  %v11968_v40 = vpack.c.bf16 %v11322_v18, %v11321_v57  ;;  %v11324_v63 = vld [vmem:[%s18234_s13 + $0x28] sm:$0xff] }
 0x75d   :  { %v10715_v53 = vpop.permute.xlu0 %10714  ;;  %v11971_v26 = vpack.c.bf16 %v11324_v63, %v11323_v27 }
 0x75e   :  { %v10650_v17 = vpop.permute.xlu1 %10649  ;;  %10726 = vst.msk [vmem:[#allocation6 + $0x8] sm:$0xff] %vm10587_vm8, %v10715_v53 }
 0x75f   :  { %10662 = vst.msk [vmem:[#allocation6] sm:$0xff] %vm10661_vm10, %v10650_v17 }
 0x763   :  { %v12014_v9 = vld [vmem:[#allocation4 + $0x4a] ss:$8 sps:$4 sm:$0xff]  }
 0x764   :  { %v12015_v48 = vld [vmem:[#allocation4 + $0x48] ss:$8 sps:$4 sm:$0xff]   ;;  %10720 = vrot.lane.b32.xlu0 %v12014_v9, %s12095_s26 }
 0x765   :  { %10655 = vrot.lane.b32.xlu1 %v12015_v48, %s12099_s30  ;;  %v12022_v10 = vld [vmem:[#allocation4 + $0x49] ss:$8 sps:$4 sm:$0xff]  }
 0x766   :  { %v12016_v58 = vld [vmem:[#allocation4 + $0x50] ss:$8 sps:$4 sm:$0xff]   ;;  %10693 = vst.msk [vmem:[#allocation6 + $0x50] sm:$0xff] %vm10550_vm7, %v12022_v10  ;;  %v10831_v60 = vld [vmem:[#allocation6] sm:$0xff] }
 0x767   :  { %v12026_v55 = vld [vmem:[#allocation4 + $0x52] ss:$8 sps:$4 sm:$0xff]  }
 0x768   :  { %10757 = vrot.lane.b32.xlu0 %v12016_v58, %s12097_s28  ;;  %10830 = vst.msk [vmem:[#allocation6 + $0x58] sm:$0xff] %vm10550_vm7, %v12026_v55  ;;  %v12017_v43 = vld [vmem:[#allocation4 + $0x51] ss:$8 sps:$4 sm:$0xff]   ;;  %v11778_v58 = vld [vmem:[%s18231_s10] ss:$0 sm:$0xff] }
 0x769   :  { %v10752_v28 = vpop.permute.xlu0 %10751 }
 0x76a   :  { %v10578_v8 = vpop.permute.xlu1 %10577  ;;  %10763 = vst.msk [vmem:[#allocation6 + $0x8] sm:$0xff] %vm10624_vm9, %v10752_v28 }
 0x76b   :  { %10589 = vst.msk [vmem:[#allocation6 + $0x18] sm:$0xff] %vm10587_vm8, %v10578_v8 }
 0x76c   :  { %10793 = vrot.lane.b32.xlu0 %v12017_v43, %s12099_s30 }
 0x76d   :  { %v10788_v20 = vpop.permute.xlu0 %10787 }
 0x76e   :  { %v10615_v31 = vpop.permute.xlu1 %10614  ;;  %10799 = vst.msk [vmem:[#allocation6 + $0x8] sm:$0xff] %vm10661_vm10, %v10788_v20 }
 0x76f   :  { %10626 = vst.msk [vmem:[#allocation6 + $0x18] sm:$0xff] %vm10624_vm9, %v10615_v31  ;;  %v10842_v22 = vld [vmem:[#allocation6 + $0x58] sm:$0xff] }
 0x773   :  { %v10717_v2 = vpop.permute.xlu0 %10716 }
 0x774   :  { %v10652_v13 = vpop.permute.xlu1 %10651  ;;  %10727 = vst.msk [vmem:[#allocation6 + $0x20] sm:$0xff] %vm10587_vm8, %v10717_v2 }
 0x775   :  { %v10832_v37 = vld [vmem:[#allocation6 + $0x8] sm:$0xff]  ;;  %10663 = vst.msk [vmem:[#allocation6 + $0x18] sm:$0xff] %vm10661_vm10, %v10652_v13  ;;  %v11784_v13 = vld [vmem:[%s18233_s12] ss:$0 sm:$0xff]  ;;  %s12103_s12 = smov [#allocation7]  }
 0x776   :  { %10964 = vmatprep.mubr.f32.mxu1 %v10832_v37  ;;  %s11419_s26 = sshll.u32 %s12103_s12, 4  ;;  %s11420_s26 = int_to_ptr.vmem [resolvable:$true] %s11419_s26 }
 0x777   :  { %10965 = vmatmul.mubr.f32.vlgmr.msra.gmra.mrb[0].mxu1 %v10831_v60  ;;  %v10754_v34 = vpop.permute.xlu0 %10753  ;;  %s12067_s3 = scalar_lea.vmem %s11420_s26, 32  ;;  %p12072_p1 = scmp.lt.s32.totalorder %s11420_s26, %s11420_s26 }
 0x778   :  { %10764 = vst.msk [vmem:[#allocation6 + $0x20] sm:$0xff] %vm10624_vm9, %v10754_v34  ;;  %11959 = vmatpush3.bf16.msra.mxu1 %v11956_v4  ;;  %p12068_p0 = scmp.ne.s32.totalorder %s11420_s26, %s12067_s3  ;;  %p12073_p2 = scmp.lt.s32.totalorder %s12067_s3, %s12067_s3 }
 0x779   :  { %11961 = vmatprep.subr.bf16.mxu1 %v11960_v1 }
 0x77a   :  { %p12074_p3 = por %p12073_p2, %p12072_p1 }
 0x77b   :  { %v10790_v3 = vpop.permute.xlu0 %10789 }
 0x77c   :  { %10800 = vst.msk [vmem:[#allocation6 + $0x20] sm:$0xff] %vm10661_vm10, %v10790_v3  ;;  %11963 = vmatpush3.bf16.msra.mxu1 %v11960_v1  ;;  %v10834_v45 = vld [vmem:[#allocation6 + $0x18] sm:$0xff]  ;;  %p12075_p4 = pnand %p12074_p3, %p12068_p0 }
 0x77d   :  { %11964 = vmatprep.subr.bf16.mxu1 %v12101_v25 }
 0x77e   :  { %v10580_v42 = vpop.permute.xlu1 %10579 }
 0x77f   :  { %10590 = vst.msk [vmem:[#allocation6 + $0x30] sm:$0xff] %vm10587_vm8, %v10580_v42 }
 0x782   :  { %v10617_v23 = vpop.permute.xlu1 %10616 }
 0x783   :  { %v10835_v19 = vld [vmem:[#allocation6 + $0x20] sm:$0xff]  ;;  %10627 = vst.msk [vmem:[#allocation6 + $0x30] sm:$0xff] %vm10624_vm9, %v10617_v23 }
 0x784   :  { %10969 = vmatprep.mubr.f32.mxu1 %v10835_v19 }
 0x785   :  { %10970 = vmatmul.mubr.f32.gmra.mrb[2].mxu1 %v10834_v45 }
 0x790   :  { %v10719_v46 = vpop.permute.xlu0 %10718 }
 0x791   :  { %v10654_v41 = vpop.permute.xlu1 %10653  ;;  %10728 = vst.msk [vmem:[#allocation6 + $0x38] sm:$0xff] %vm10587_vm8, %v10719_v46 }
 0x792   :  { %10664 = vst.msk [vmem:[#allocation6 + $0x30] sm:$0xff] %vm10661_vm10, %v10654_v41 }
 0x799   :  { %v10837_v7 = vld [vmem:[#allocation6 + $0x30] sm:$0xff] }
 0x7b9   :  { %v10756_v49 = vpop.permute.xlu0 %10755 }
 0x7ba   :  { %v10582_v35 = vpop.permute.xlu1 %10581  ;;  %10765 = vst.msk [vmem:[#allocation6 + $0x38] sm:$0xff] %vm10624_vm9, %v10756_v49 }
 0x7bb   :  { %10591 = vst.msk [vmem:[#allocation6 + $0x48] sm:$0xff] %vm10587_vm8, %v10582_v35 }
 0x7bd   :  { %v10792_v12 = vpop.permute.xlu0 %10791 }
 0x7be   :  { %v10619_v32 = vpop.permute.xlu1 %10618  ;;  %10801 = vst.msk [vmem:[#allocation6 + $0x38] sm:$0xff] %vm10661_vm10, %v10792_v12 }
 0x7bf   :  { %10628 = vst.msk [vmem:[#allocation6 + $0x48] sm:$0xff] %vm10624_vm9, %v10619_v32 }
 0x7c5   :  { %v10838_v36 = vld [vmem:[#allocation6 + $0x38] sm:$0xff] }
 0x7c6   :  { %10974 = vmatprep.mubr.f32.mxu1 %v10838_v36 }
 0x7c7   :  { %10975 = vmatmul.mubr.f32.gmra.mrb[4].mxu1 %v10837_v7 }
 0x7d6   :  { %v10721_v44 = vpop.permute.xlu0 %10720 }
 0x7d7   :  { %v10656_v21 = vpop.permute.xlu1 %10655  ;;  %10729 = vst.msk [vmem:[#allocation6 + $0x50] sm:$0xff] %vm10587_vm8, %v10721_v44 }
 0x7d8   :  { %10665 = vst.msk [vmem:[#allocation6 + $0x48] sm:$0xff] %vm10661_vm10, %v10656_v21 }
 0x7da   :  { %v10758_v30 = vpop.permute.xlu0 %10757 }
 0x7db   :  { %10766 = vst.msk [vmem:[#allocation6 + $0x50] sm:$0xff] %vm10624_vm9, %v10758_v30 }
 0x7de   :  { %v10794_v51 = vpop.permute.xlu0 %10793 }
 0x7df   :  { %10802 = vst.msk [vmem:[#allocation6 + $0x50] sm:$0xff] %vm10661_vm10, %v10794_v51  ;;  %v10840_v50 = vld [vmem:[#allocation6 + $0x48] sm:$0xff] }
 0x7e6   :  { %v10841_v15 = vld [vmem:[#allocation6 + $0x50] sm:$0xff] }
 0x7e7   :  { %10979 = vmatprep.mubr.f32.mxu1 %v10841_v15 }
 0x7e8   :  { %10980 = vmatmul.mubr.f32.gmra.mrb[6].mxu1 %v10840_v50 }
 0x7e9   :  { %11872 = vmatprep.mubr.msk.f32.mxu1 %vm10550_vm7, %v10833_v59 }
 0x7ec   :  { %11873 = vmatmul.mubr.msk.f32.vlgmr.msra.gmra.mrb[8].mxu1 %vm10550_vm7, %v10836_v47 }
 0x7ed   :  { %11875 = vmatprep.mubr.msk.f32.mxu1 %vm10550_vm7, %v10839_v33  ;;  %11966 = vmatpush3.bf16.msra.mxu1 %v11965_v24 }
 0x7ee   :  { %11967 = vmatprep.subr.bf16.mxu1 %v12101_v25 }
 0x7f0   :  { %11876 = vmatmul.mubr.msk.f32.gmra.mrb[10].mxu1 %vm10550_vm7, %v10842_v22 }
 0x7f1   :  { %11894 = vmatprep.mubr.msk.f32.mxu1 %vm12102_vm11, %v19324_v0  ;;  %11969 = vmatpush3.bf16.msra.mxu1 %v11968_v40  ;;  %v11325_v0 = vld [vmem:[%s18234_s13 + $0x30] sm:$0xff] }
 0x7f2   :  { %11970 = vmatprep.subr.bf16.mxu1 %v12101_v25  ;;  %v11974_v53 = vpack.c.bf16 %v11326_v54, %v11325_v0 }
 0x7f5   :  { %11972 = vmatpush3.bf16.msra.mxu1 %v11971_v26 }
 0x7f6   :  { %11973 = vmatprep.subr.bf16.mxu1 %v12101_v25  ;;  %v11783_v25 = vld [vmem:[%s18232_s11] ss:$0 sm:$0xff] }
 0x7f9   :  { %11975 = vmatpush3.bf16.msra.mxu1 %v11974_v53 }
 0x84a   :  { %v11835_v14 = vpop.f32.mrb[0].mxu1 }
 0x84b   :  { %v11836_v29 = vpop.f32.mrb[1].mxu1 }
 0x84c   :  { %v11837_v6 = vadd.f32 %v11836_v29, %v11835_v14 }
 0x84e   :  { %v10967_v43 = vadd.f32 %v11837_v6, %v11778_v58 }
 0x858   :  { %v11838_v38 = vpop.f32.mrb[2].mxu1 }
 0x859   :  { %v11839_v56 = vpop.f32.mrb[3].mxu1 }
 0x85a   :  { %v11840_v5 = vadd.f32 %v11839_v56, %v11838_v38 }
 0x85c   :  { %v10972_v28 = vadd.f32 %v11840_v5, %v11778_v58 }
 0x89a   :  { %v11841_v4 = vpop.f32.mrb[4].mxu1 }
 0x89b   :  { %v11842_v17 = vpop.f32.mrb[5].mxu1 }
 0x89c   :  { %v11843_v9 = vadd.f32 %v11842_v17, %v11841_v4 }
 0x89e   :  { %v10977_v60 = vadd.f32 %v11843_v9, %v11778_v58 }
 0x8bb   :  { %v11844_v48 = vpop.f32.mrb[6].mxu1 }
 0x8bc   :  { %v11845_v10 = vpop.f32.mrb[7].mxu1 }
 0x8bd   :  { %v11846_v55 = vadd.f32 %v11845_v10, %v11844_v48 }
 0x8bf   :  { %v11874_v8 = vpop.f32.mrb[8].mxu1  ;;  %v10982_v2 = vadd.f32 %v11846_v55, %v11778_v58 }
 0x8c0   :  { %v11057_v20 = vadd.f32 %v11874_v8, %v10972_v28  ;;  %v11051_v31 = vpop.f32.mrb[9].mxu1 }
 0x8c1   :  { %v11052_v11 = vadd.f32 %v11051_v31, %v10967_v43 }
 0x8c2   :  { %v11071_v39 = vmax.f32 %v11057_v20, 0.0 }
 0x8c3   :  { %v11070_v37 = vmax.f32 %v11052_v11, 0.0  ;;  %v11877_v1 = vpop.f32.mrb[10].mxu1 }
 0x8c4   :  { %v11081_v34 = vmul.f32 %v11783_v25, %v11071_v39  ;;  %v11067_v3 = vadd.f32 %v11877_v1, %v10982_v2  ;;  %v11061_v42 = vpop.f32.mrb[11].mxu1 }
 0x8c5   :  { %v11080_v19 = vmul.f32 %v11783_v25, %v11070_v37  ;;  %v11062_v23 = vadd.f32 %v11061_v42, %v10977_v60 }
 0x8c6   :  { %v11091_v45 = vadd.f32 %v11784_v13, %v11081_v34  ;;  %v11073_v46 = vmax.f32 %v11067_v3, 0.0 }
 0x8c7   :  { %v11090_v41 = vadd.f32 %v11784_v13, %v11080_v19  ;;  %v11072_v49 = vmax.f32 %v11062_v23, 0.0 }
 0x8c8   :  { %v11115_v35 = vcombine.high %v11091_v45, %v11091_v45  ;;  %v11122_v12 = vrot.slane %v11091_v45, %v15186_v52  ;;  %v11083_v32 = vmul.f32 %v11783_v25, %v11073_v46 }
 0x8c9   :  { %v11098_v36 = vcombine.high %v11090_v41, %v11090_v41  ;;  %v11105_v7 = vrot.slane %v11090_v41, %v15186_v52  ;;  %v11082_v44 = vmul.f32 %v11783_v25, %v11072_v49 }
 0x8ca   :  { %v11129_v21 = vrot.slane %v11115_v35, %v15186_v52  ;;  %v11130_v30 = vcombine.high %v11122_v12, %v11122_v12  ;;  %v11093_v51 = vadd.f32 %v11784_v13, %v11083_v32  ;;  %v11789_v33 = vrot.slane %v11122_v12, 9 }
 0x8cb   :  { %v11112_v15 = vrot.slane %v11098_v36, %v15186_v52  ;;  %v11113_v50 = vcombine.high %v11105_v7, %v11105_v7  ;;  %v11785_v59 = vrot.slane %v11105_v7, 9  ;;  %v11092_v38 = vadd.f32 %v11784_v13, %v11082_v44 }
 0x8cc   :  { %v11131_v47 = vcombine.high %v11129_v21, %v11129_v21  ;;  %v11791_v22 = vrot.slane %v11129_v21, 9  ;;  %v11790_v56 = vrot.slane %v11130_v30, 9  ;;  %v11149_v62 = vcombine.high %v11093_v51, %v11093_v51 }
 0x8cd   :  { %v11114_v14 = vcombine.high %v11112_v15, %v11112_v15  ;;  %v11786_v29 = vrot.slane %v11113_v50, 9  ;;  %v11787_v6 = vrot.slane %v11112_v15, 9  ;;  %v11230_v16 = vmax.f32 %v11105_v7, %v11785_v59 }
 0x8ce   :  { %v11792_v5 = vrot.slane %v11131_v47, 9  ;;  %v11236_v57 = vmax.f32 %v11129_v21, %v11791_v22  ;;  %v11156_v40 = vrot.slane %v11093_v51, %v15186_v52  ;;  %v11234_v27 = vmax.f32 %v11122_v12, %v11789_v33 }
 0x8cf   :  { %v11788_v24 = vrot.slane %v11114_v14, 9  ;;  %v11232_v18 = vmax.f32 %v11112_v15, %v11787_v6  ;;  %v11163_v26 = vrot.slane %v11149_v62, %v15186_v52  ;;  %v11231_v0 = vmax.f32 %v11113_v50, %v11786_v29 }
 0x8d0   :  { %v11237_v63 = vmax.f32 %v11131_v47, %v11792_v5  ;;  %v11132_v4 = vcombine.high %v11092_v38, %v11092_v38  ;;  %v11235_v17 = vmax.f32 %v11130_v30, %v11790_v56  ;;  %v11164_v9 = vcombine.high %v11156_v40, %v11156_v40 }
 0x8d1   :  { %v11233_v54 = vmax.f32 %v11114_v14, %v11788_v24  ;;  %v11246_v53 = vmax.f32 %v11230_v16, %v11232_v18  ;;  %v11165_v48 = vcombine.high %v11163_v26, %v11163_v26  ;;  %v11248_v10 = vmax.f32 %v11234_v27, %v11236_v57 }
 0x8d2   :  { %v11249_v55 = vmax.f32 %v11235_v17, %v11237_v63  ;;  %v11799_v28 = vrot.slane %v11163_v26, 9  ;;  %v11139_v43 = vrot.slane %v11092_v38, %v15186_v52  ;;  %v11146_v25 = vrot.slane %v11132_v4, %v15186_v52 }
 0x8d3   :  { %v11247_v58 = vmax.f32 %v11231_v0, %v11233_v54  ;;  %v11800_v8 = vrot.slane %v11165_v48, 9  ;;  %v11265_v20 = vrot.slane %v11246_v53, %v15235_v61  ;;  %v11797_v11 = vrot.slane %v11156_v40, 9  ;;  %v11801_v53 = vld [vmem:[%s18235_s14] ss:$0 sm:$0xff] }
 0x8d4   :  { %v11798_v39 = vrot.slane %v11164_v9, 9  ;;  %v11147_v2 = vcombine.high %v11139_v43, %v11139_v43  ;;  %v11793_v13 = vrot.slane %v11139_v43, 9  ;;  %v11273_v37 = vrot.slane %v11248_v10, %v15235_v61 }
 0x8d5   :  { %v11269_v31 = vrot.slane %v11247_v58, %v15235_v61  ;;  %v11148_v60 = vcombine.high %v11146_v25, %v11146_v25  ;;  %v11795_v34 = vrot.slane %v11146_v25, 9  ;;  %v11277_v3 = vrot.slane %v11249_v55, %v15235_v61 }
 0x8d6   :  { %v11244_v42 = vmax.f32 %v11163_v26, %v11799_v28  ;;  %v11245_v19 = vmax.f32 %v11165_v48, %v11800_v8  ;;  %v11794_v23 = vrot.slane %v11147_v2, 9  ;;  %v11238_v46 = vmax.f32 %v11139_v43, %v11793_v13 }
 0x8d7   :  { %v11294_v1 = vsel %vm8463_vm4, %v11269_v31, %v11265_v20  ;;  %v11796_v45 = vrot.slane %v11148_v60, 9  ;;  %v11240_v41 = vmax.f32 %v11146_v25, %v11795_v34  ;;  %v11242_v49 = vmax.f32 %v11156_v40, %v11797_v11 }
 0x8d8   :  { %v11295_v52 = vsel %vm8465_vm5, %v11273_v37, %v11294_v1  ;;  %v11243_v35 = vmax.f32 %v11164_v9, %v11798_v39  ;;  %v11239_v32 = vmax.f32 %v11147_v2, %v11794_v23 }
 0x8d9   :  { %v11296_v12 = vsel %vm8467_vm6, %v11277_v3, %v11295_v52  ;;  %v11241_v36 = vmax.f32 %v11148_v60, %v11796_v45  ;;  %v11250_v7 = vmax.f32 %v11238_v46, %v11240_v41  ;;  %v11252_v21 = vmax.f32 %v11242_v49, %v11244_v42 }
 0x8da   :  { %v11303_v44 = vsel %vm11302_vm12, %v11296_v12, 0.0  ;;  %v11253_v51 = vmax.f32 %v11243_v35, %v11245_v19 }
 0x8db   :  { %v11304_v30 = vrot.slane %v11303_v44, 4  ;;  %v11251_v15 = vmax.f32 %v11239_v32, %v11241_v36  ;;  %v11281_v50 = vrot.slane %v11250_v7, %v15235_v61  ;;  %v11289_v33 = vrot.slane %v11252_v21, %v15235_v61 }
 0x8dc   :  { %v11293_v22 = vrot.slane %v11253_v51, %v15235_v61 }
 0x8dd   :  { %v11285_v59 = vrot.slane %v11251_v15, %v15235_v61  ;;  %v11305_v47 = vadd.f32 %v11304_v30, %v11303_v44 }
 0x8df   :  { %v11297_v14 = vsel %vm8463_vm4, %v11285_v59, %v11281_v50  ;;  %v11306_v38 = vrot.slane %v11305_v47, 2 }
 0x8e0   :  { %v11298_v29 = vsel %vm8465_vm5, %v11289_v33, %v11297_v14  ;;  %vm11411_vm5 = vcmask 17408  }
 0x8e1   :  { %v11299_v6 = vsel %vm8467_vm6, %v11293_v22, %v11298_v29  ;;  %v11307_v16 = vadd.f32 %v11306_v38, %v11305_v47 }
 0x8e2   :  { %v11310_v56 = vsel %vm11302_vm12, %v11299_v6, 0.0 }
 0x8e3   :  { %v11311_v5 = vrot.slane %v11310_v56, 4  ;;  %v11308_v24 = vrot.slane %v11307_v16, 1 }
 0x8e5   :  { %v11312_v62 = vadd.f32 %v11311_v5, %v11310_v56  ;;  %v11309_v27 = vadd.f32 %v11308_v24, %v11307_v16 }
 0x8e7   :  { %v11313_v57 = vrot.slane %v11312_v62, 2  ;;  %v11317_v61 = vmul.f32 0.25, %v11309_v27 }
 0x8e9   :  { %v11314_v18 = vadd.f32 %v11313_v57, %v11312_v62 }
 0x8eb   :  { %v11315_v40 = vrot.slane %v11314_v18, 1 }
 0x8ed   :  { %v11316_v63 = vadd.f32 %v11315_v40, %v11314_v18 }
 0x8ef   :  { %v11318_v26 = vmul.f32 0.25, %v11316_v63 }
 0x8f1   :  { %v11336_v0 = vrot.slane %v11318_v26, 7 }
 0x8f3   :  { %v11337_v54 = vsel %vm8463_vm4, %v11336_v0, %v11317_v61 }
 0x8f4   :  { %11895 = vmatmul.mubr.msk.f32.vlgmr.msra.gmra.mrb[12].mxu1 %vm11338_vm13, %v11337_v54 }
 0x9c7   :  { %v11407_v4 = vpop.f32.mrb[12].mxu1 }
 0x9c8   :  { %v11408_v17 = vadd.f32 %v11801_v53, %v11407_v4  ;;  %v11896_v9 = vpop.f32.mrb[13].mxu1 }
 0x9ca   :  { %11412 = vst.msk [vmem:[#allocation7] sm:$0x3] %vm11411_vm5, %v11408_v17 }
 0x9cb   :  { %12078 = shalt.err (!%p12075_p4)
}
 0x9cc   :  { %s12079_s9 = scalar_lea.hbm %s18236_s15, 32 }
 0x9cd   :  { %p12080_p5 = scmp.ne.s32.totalorder %s18236_s15, %s12079_s9  ;;  %p12083_p6 = scmp.lt.u32.totalorder %s12079_s9, %s18236_s15 }
 0x9cf   :  { %p12085_p7 = pnand %p12083_p6, %p12080_p5 }
 0x9d1   :  { %12088 = shalt.err (!%p12085_p7)
}
 0x9d2   :  { %11422 = dma.vmem_to_hbm [thread:$0]  %s11420_s26, 32, %s18236_s15, [#allocation8]  }
 0x9d3   :  { %12089 = dma.done.wait [#allocation8], 32  }
 0x9d4   :  { %12090 = vsyncadd [#allocation8], 4294967264 }
 0x9d5   :  { %11426 = vsyncpa [#allocation8], 1 }

</bundles_post_ra>
